<compile_context>
chip_gen: v7x
topology: tpu7x:2x2x1
jax: 0.10.0
libtpu: 0.0.40
codegen_flags: <defaults>
</compile_context>

<pallas_src>
import math
from functools import partial

import jax
import jax.numpy as jnp
from jax.experimental import pallas as pl
from jax.experimental.pallas import tpu as pltpu


# ----------------------------------------------------------------------------
# Per-chip VMEM budget: raise v5e/v6e scoped default, stay under v7x's 64 MiB.
# ----------------------------------------------------------------------------
_VMEM_LIMIT_CACHE = None


def _vmem_limit_bytes():
    global _VMEM_LIMIT_CACHE
    if _VMEM_LIMIT_CACHE is None:
        try:
            cap = int(pltpu.get_tpu_info().vmem_capacity_bytes)
            _VMEM_LIMIT_CACHE = int(min(96 << 20, (cap * 3) // 4))
        except Exception:
            _VMEM_LIMIT_CACHE = 48 << 20      # safe on every generation
    return _VMEM_LIMIT_CACHE


def _cparams(dims):
    return pltpu.CompilerParams(dimension_semantics=dims,
                                vmem_limit_bytes=_vmem_limit_bytes())


# ----------------------------------------------------------------------------
# In-kernel math helpers
# ----------------------------------------------------------------------------
_SQRT_2_OVER_PI = 0.7978845608028654


def _gelu_tanh(x):
    # tanh-approximate GELU: ~8 VPU ops + 1 EUP tanh (vs ~25 ops erf poly).
    return 0.5 * x * (1.0 + jnp.tanh(_SQRT_2_OVER_PI * (x + 0.044715 * x * x * x)))


def _layernorm(x, g, b, eps):
    mean = jnp.mean(x, axis=-1, keepdims=True)
    xc = x - mean
    var = jnp.mean(xc * xc, axis=-1, keepdims=True)
    return (xc * jax.lax.rsqrt(var + eps)) * g + b


# ----------------------------------------------------------------------------
# Fused (LayerNorm ->) matmul (+bias) kernel  (patch embed / qkv / head)
# ----------------------------------------------------------------------------
def _fused_linear_kernel(*refs, fuse_ln, eps):
    idx = 0
    x_ref = refs[idx]; idx += 1
    if fuse_ln:
        g_ref, be_ref = refs[idx], refs[idx + 1]; idx += 2
    w_ref, b_ref, o_ref = refs[idx], refs[idx + 1], refs[idx + 2]

    x = x_ref[...].astype(jnp.float32)
    if fuse_ln:
        x = _layernorm(x, g_ref[...], be_ref[...], eps)
    acc = jnp.dot(x.astype(jnp.bfloat16), w_ref[...],
                  preferred_element_type=jnp.float32)
    acc = acc + b_ref[...]
    o_ref[...] = acc.astype(o_ref.dtype)


def _pick_tm(M):
    # Largest lane/sublane-friendly row tile; fewer grid steps on 1-TC chips.
    return M if M <= 256 else 256


def fused_linear(x, w, b, *, ln=None, eps=1e-6, out_dtype=jnp.float32):
    """y = LN?(x) @ w + b.  x:(M,K) f32, w:(K,N) -> bf16 operand, b:(N,)."""
    M, K = x.shape
    N = w.shape[1]
    tm = _pick_tm(M)
    grid = (pl.cdiv(M, tm),)

    args = [x.astype(jnp.float32)]
    in_specs = [pl.BlockSpec((tm, K), lambda i: (i, 0))]
    if ln is not None:
        g, beta = ln
        args += [g.reshape(1, K).astype(jnp.float32),
                 beta.reshape(1, K).astype(jnp.float32)]
        in_specs += [pl.BlockSpec((1, K), lambda i: (0, 0)),
                     pl.BlockSpec((1, K), lambda i: (0, 0))]
    args += [w.astype(jnp.bfloat16), b.reshape(1, N).astype(jnp.float32)]
    in_specs += [pl.BlockSpec((K, N), lambda i: (0, 0)),
                 pl.BlockSpec((1, N), lambda i: (0, 0))]

    return pl.pallas_call(
        partial(_fused_linear_kernel, fuse_ln=ln is not None, eps=eps),
        out_shape=jax.ShapeDtypeStruct((M, N), out_dtype),
        grid=grid,
        in_specs=in_specs,
        out_specs=pl.BlockSpec((tm, N), lambda i: (i, 0)),
        compiler_params=_cparams(("parallel",)),
    )(*args)


# ----------------------------------------------------------------------------
# Fused MLP block: x + fc2(gelu(fc1(LN2(x)))) -- hidden tensor stays in VMEM
# ----------------------------------------------------------------------------
def _mlp_kernel(x_ref, g_ref, be_ref, w1_ref, b1_ref, w2_ref, b2_ref, o_ref,
                xn_ref, acc_ref, *, eps):
    j = pl.program_id(1)

    @pl.when(j == 0)
    def _():
        x = x_ref[...].astype(jnp.float32)
        xn = _layernorm(x, g_ref[...], be_ref[...], eps)
        xn_ref[...] = xn.astype(jnp.bfloat16)
        acc_ref[...] = jnp.zeros_like(acc_ref)

    h = jnp.dot(xn_ref[...], w1_ref[...], preferred_element_type=jnp.float32)
    h = _gelu_tanh(h + b1_ref[...])
    acc_ref[...] += jnp.dot(h.astype(jnp.bfloat16), w2_ref[...],
                            preferred_element_type=jnp.float32)

    @pl.when(j == pl.num_programs(1) - 1)
    def _():
        out = acc_ref[...] + b2_ref[...] + x_ref[...].astype(jnp.float32)
        o_ref[...] = out.astype(o_ref.dtype)


def _pick_th(hd):
    if hd <= 1024:
        return hd
    for th in range(1024, 127, -128):
        if hd % th == 0:
            return th
    return hd


def mlp_block(x, ln, w1, b1, w2, b2, *, eps=1e-6):
    M, E = x.shape
    Hd = w1.shape[1]
    tm = _pick_tm(M)
    th = _pick_th(Hd)
    g, beta = ln
    grid = (pl.cdiv(M, tm), Hd // th)

    return pl.pallas_call(
        partial(_mlp_kernel, eps=eps),
        out_shape=jax.ShapeDtypeStruct((M, E), jnp.float32),
        grid=grid,
        in_specs=[
            pl.BlockSpec((tm, E), lambda i, j: (i, 0)),   # x (resident over j)
            pl.BlockSpec((1, E), lambda i, j: (0, 0)),    # ln gamma
            pl.BlockSpec((1, E), lambda i, j: (0, 0)),    # ln beta
            pl.BlockSpec((E, th), lambda i, j: (0, j)),   # fc1 weight slab
            pl.BlockSpec((1, th), lambda i, j: (0, j)),   # fc1 bias slab
            pl.BlockSpec((th, E), lambda i, j: (j, 0)),   # fc2 weight slab
            pl.BlockSpec((1, E), lambda i, j: (0, 0)),    # fc2 bias
        ],
        out_specs=pl.BlockSpec((tm, E), lambda i, j: (i, 0)),
        scratch_shapes=[pltpu.VMEM((tm, E), jnp.bfloat16),   # LN2(x)
                        pltpu.VMEM((tm, E), jnp.float32)],   # fc2 accumulator
        compiler_params=_cparams(("parallel", "arbitrary")),
    )(x.astype(jnp.float32),
      g.reshape(1, E).astype(jnp.float32),
      beta.reshape(1, E).astype(jnp.float32),
      w1.astype(jnp.bfloat16),
      b1.reshape(1, Hd).astype(jnp.float32),
      w2.astype(jnp.bfloat16),
      b2.reshape(1, E).astype(jnp.float32))


# ----------------------------------------------------------------------------
# Multi-head self-attention + output projection + residual, fused.
# grid = (B, Npad // 128); K/V block index constant over the q-tile axis.
# 1/sqrt(dh) is pre-folded into the Q weights, so no per-element scale here.
# ----------------------------------------------------------------------------
def _attn_proj_kernel(qkv_ref, bias_ref, res_ref, pw_ref, pb_ref, o_ref,
                      ctx_ref, *, heads, dh, tq):
    E = heads * dh
    start = pl.multiple_of(pl.program_id(1) * tq, tq)
    q_blk = qkv_ref[0, pl.ds(start, tq), :]          # (tq, 3E) bf16
    bias = bias_ref[...]                              # (1, Npad) f32 key bias

    for h in range(heads):                            # static unroll over heads
        q = q_blk[:, h * dh:(h + 1) * dh]
        k = qkv_ref[0, :, E + h * dh:E + (h + 1) * dh]
        v = qkv_ref[0, :, 2 * E + h * dh:2 * E + (h + 1) * dh]
        s = jax.lax.dot_general(q, k, (((1,), (1,)), ((), ())),
                                preferred_element_type=jnp.float32)
        s = s + bias                                   # mask padded keys
        m = jnp.max(s, axis=-1, keepdims=True)
        p = jnp.exp(s - m)
        denom = jnp.sum(p, axis=-1, keepdims=True)
        p = p * pl.reciprocal(denom, approx=True)
        pv = jnp.dot(p.astype(jnp.bfloat16), v,
                     preferred_element_type=jnp.float32)
        ctx_ref[:, h * dh:(h + 1) * dh] = pv.astype(jnp.bfloat16)

    out = jnp.dot(ctx_ref[...], pw_ref[...], preferred_element_type=jnp.float32)
    out = out + pb_ref[...] + res_ref[0].astype(jnp.float32)
    o_ref[0] = out.astype(o_ref.dtype)


def attention_proj(qkv, key_bias, res, proj_w, proj_b, heads):
    B, Npad, threeE = qkv.shape
    E = threeE // 3
    dh = E // heads
    tq = 128
    grid = (B, Npad // tq)
    return pl.pallas_call(
        partial(_attn_proj_kernel, heads=heads, dh=dh, tq=tq),
        out_shape=jax.ShapeDtypeStruct((B, Npad, E), jnp.float32),
        grid=grid,
        in_specs=[
            pl.BlockSpec((1, Npad, threeE), lambda b, q: (b, 0, 0)),  # qkv (all keys)
            pl.BlockSpec((1, Npad), lambda b, q: (0, 0)),             # key bias
            pl.BlockSpec((1, tq, E), lambda b, q: (b, q, 0)),         # residual
            pl.BlockSpec((E, E), lambda b, q: (0, 0)),                # proj w
            pl.BlockSpec((1, E), lambda b, q: (0, 0)),                # proj b
        ],
        out_specs=pl.BlockSpec((1, tq, E), lambda b, q: (b, q, 0)),
        scratch_shapes=[pltpu.VMEM((tq, E), jnp.bfloat16)],           # attn ctx
        compiler_params=_cparams(("parallel", "parallel")),
    )(qkv.astype(jnp.bfloat16), key_bias.astype(jnp.float32),
      res.astype(jnp.float32), proj_w.astype(jnp.bfloat16),
      proj_b.reshape(1, E).astype(jnp.float32))


# ----------------------------------------------------------------------------
# Bilinear x2 upsample (align_corners=True) as one spatial matmul per batch
# ----------------------------------------------------------------------------
def _upsample_kernel(m_ref, z_ref, o_ref):
    o_ref[0] = jnp.dot(m_ref[...], z_ref[0], preferred_element_type=jnp.float32)


def spatial_upsample(z, m_up):
    """z: (B, S, C) channels-last tokens (bf16), m_up: (S2, S) -> (B, S2, C)."""
    B, S, C = z.shape
    S2 = m_up.shape[0]
    return pl.pallas_call(
        _upsample_kernel,
        out_shape=jax.ShapeDtypeStruct((B, S2, C), jnp.float32),
        grid=(B,),
        in_specs=[pl.BlockSpec((S2, S), lambda b: (0, 0)),
                  pl.BlockSpec((1, S, C), lambda b: (b, 0, 0))],
        out_specs=pl.BlockSpec((1, S2, C), lambda b: (b, 0, 0)),
        compiler_params=_cparams(("parallel",)),
    )(m_up.astype(jnp.bfloat16), z.astype(jnp.bfloat16))


def bilinear_matrix(n_in, n_out):
    out = jnp.arange(n_out, dtype=jnp.float32)
    if n_out == 1:
        src = jnp.zeros((n_out,), jnp.float32)
    else:
        src = out * (n_in - 1) / (n_out - 1)            # align_corners=True
    i0 = jnp.clip(jnp.floor(src).astype(jnp.int32), 0, n_in - 1)
    i1 = jnp.clip(i0 + 1, 0, n_in - 1)
    w1 = src - i0.astype(jnp.float32)
    w0 = 1.0 - w1
    m = jnp.zeros((n_out, n_in), jnp.float32)
    m = m.at[jnp.arange(n_out), i0].add(w0)
    m = m.at[jnp.arange(n_out), i1].add(w1)
    return m


# ----------------------------------------------------------------------------
# Parameters (synthetic init; PyTorch Linear/Conv weights stored transposed,
# i.e. (in, out); matmul weights in bf16, bias/LN/pos/cls in f32).  The
# 1/sqrt(dh) attention scale is folded into the Q columns of qkv_w/qkv_b
# (exact, one-time).  For pretrained weights apply the same transform at load.
# ----------------------------------------------------------------------------
def init_params(key, cfg):
    E, P = cfg["embed_dim"], cfg["patch"]
    G = cfg["img_size"] // P
    N = G * G + 1
    hidden = cfg["mlp_ratio"] * E
    q_scale = 1.0 / math.sqrt(E // cfg["heads"])
    keys = iter(jax.random.split(key, 8 + 8 * cfg["depth"]))
    bf = jnp.bfloat16

    def nrm(shape, scale=0.02):
        return (scale * jax.random.normal(next(keys), shape)).astype(jnp.float32)

    params = {
        "pe_w": nrm((3 * P * P, E)).astype(bf),
        "pe_b": jnp.zeros((E,), jnp.float32),
        "cls": nrm((1, 1, E)),
        "pos": nrm((1, N, E)),
        "blocks": [],
        "norm_g": jnp.ones((E,), jnp.float32),
        "norm_b": jnp.zeros((E,), jnp.float32),
        # conv head kept in f32 so the c1∘c2 composition is done at full precision
        "c1_w": nrm((E, E)), "c1_b": jnp.zeros((E,), jnp.float32),
        "c2_w": nrm((E, cfg["out_ch"])),   # final 1x1 conv: bias=False in the ref
    }
    for _ in range(cfg["depth"]):
        qkv_w = nrm((E, 3 * E)).at[:, :E].multiply(q_scale)
        qkv_b = jnp.zeros((3 * E,), jnp.float32).at[:E].multiply(q_scale)
        params["blocks"].append({
            "ln1_g": jnp.ones((E,), jnp.float32), "ln1_b": jnp.zeros((E,), jnp.float32),
            "qkv_w": qkv_w.astype(bf), "qkv_b": qkv_b,
            "proj_w": nrm((E, E)).astype(bf), "proj_b": jnp.zeros((E,), jnp.float32),
            "ln2_g": jnp.ones((E,), jnp.float32), "ln2_b": jnp.zeros((E,), jnp.float32),
            "fc1_w": nrm((E, hidden)).astype(bf), "fc1_b": jnp.zeros((hidden,), jnp.float32),
            "fc2_w": nrm((hidden, E)).astype(bf), "fc2_b": jnp.zeros((E,), jnp.float32),
        })
    return params


# ----------------------------------------------------------------------------
# Forward pass (mirrors ViTBasePatch16Encoder.forward, eval mode: dropout = id)
# ----------------------------------------------------------------------------
def vit_encoder_forward(x, params, cfg):
    B, C, Himg, Wimg = x.shape
    P, E, H = cfg["patch"], cfg["embed_dim"], cfg["heads"]
    Gh, Gw = Himg // P, Wimg // P
    N = Gh * Gw + 1
    Npad = ((N + 127) // 128) * 128          # lane-dense sequence length

    # --- patch embed: NCHW conv(k=16, s=16) as im2col + fused matmul ----------
    patches = x.reshape(B, C, Gh, P, Gw, P).transpose(0, 2, 4, 1, 3, 5)
    patches = patches.reshape(B * Gh * Gw, C * P * P)
    tok = fused_linear(patches, params["pe_w"], params["pe_b"]).reshape(B, Gh * Gw, E)

    # --- cls token + pos embed, then pad the sequence to Npad -----------------
    cls = jnp.broadcast_to(params["cls"].astype(jnp.float32), (B, 1, E))
    seq = jnp.concatenate([cls, tok], axis=1) + params["pos"].astype(jnp.float32)
    seq = jnp.pad(seq, ((0, 0), (0, Npad - N), (0, 0)))
    seq2d = seq.reshape(B * Npad, E)

    # additive key bias: 0 for real tokens, -1e30 for padded keys
    key_bias = jnp.where(jnp.arange(Npad) < N, 0.0, -1e30).reshape(1, Npad)

    # --- transformer blocks: fused LN1->qkv (bf16 out), fused attn+proj+res,
    #     fused LN2->fc1->GELU->fc2+res (hidden never leaves VMEM) -------------
    for blk in params["blocks"]:
        qkv = fused_linear(seq2d, blk["qkv_w"], blk["qkv_b"],
                           ln=(blk["ln1_g"], blk["ln1_b"]),
                           out_dtype=jnp.bfloat16)
        seq3d = attention_proj(qkv.reshape(B, Npad, 3 * E), key_bias,
                               seq2d.reshape(B, Npad, E),
                               blk["proj_w"], blk["proj_b"], H)
        seq2d = mlp_block(seq3d.reshape(B * Npad, E),
                          (blk["ln2_g"], blk["ln2_b"]),
                          blk["fc1_w"], blk["fc1_b"],
                          blk["fc2_w"], blk["fc2_b"])

    # --- drop cls + padding; tokens stay channels-last (lane-dense) -----------
    tok = seq2d.reshape(B, Npad, E)[:, 1:1 + Gh * Gw, :].reshape(B * Gh * Gw, E)

    # --- conv head: compose c1 (1x1 conv + bias) with c2 (1x1 conv, no bias);
    #     both commute with the per-channel bilinear upsample ------------------
    head_w = params["c1_w"] @ params["c2_w"]          # (E, out_ch)
    head_b = params["c1_b"] @ params["c2_w"]          # (out_ch,)
    z = fused_linear(tok, head_w, head_b,
                     ln=(params["norm_g"], params["norm_b"]),
                     out_dtype=jnp.bfloat16)           # final norm fused
    z = z.reshape(B, Gh * Gw, cfg["out_ch"])

    # --- bilinear x2 (align_corners=True) as one spatial matmul ---------------
    Wy = bilinear_matrix(Gh, 2 * Gh)
    Wx = bilinear_matrix(Gw, 2 * Gw)
    m_up = jnp.kron(Wy, Wx)                            # (4*Gh*Gw, Gh*Gw)
    up = spatial_upsample(z, m_up)                     # (B, 4*Gh*Gw, out_ch)

    out = up.reshape(B, 2 * Gh, 2 * Gw, cfg["out_ch"]).transpose(0, 3, 1, 2)
    return out


# ----------------------------------------------------------------------------
if __name__ == "__main__":
    cfg = dict(img_size=64, patch=16, embed_dim=128, depth=2, heads=4,
               mlp_ratio=4, out_ch=64)

    key = jax.random.PRNGKey(0)
    kp, kx = jax.random.split(key)
    params = init_params(kp, cfg)
    x = jax.random.normal(kx, (2, 3, cfg["img_size"], cfg["img_size"]), jnp.float32)

    fwd = jax.jit(lambda xx, pp: vit_encoder_forward(xx, pp, cfg))
    out = jax.block_until_ready(fwd(x, params))

    Gh = cfg["img_size"] // cfg["patch"]
    assert out.shape == (2, cfg["out_ch"], 2 * Gh, 2 * Gh), out.shape
    assert bool(jnp.all(jnp.isfinite(out)))
    print("KERNEL_OK")
</pallas_src>

<mosaic_0001>
module attributes {stable_mosaic.version = 11 : i64} {
  func.func @_fused_linear_kernel(%arg0: i32, %arg1: memref<32x768xf32, #tpu.memory_space<vmem>>, %arg2: memref<768x128xbf16, #tpu.memory_space<vmem>>, %arg3: memref<1x128xf32, #tpu.memory_space<vmem>>, %arg4: memref<32x128xf32, #tpu.memory_space<vmem>>) attributes {dimension_semantics = [#tpu.dimension_semantics<parallel>], iteration_bounds = array<i64: 1>, scalar_prefetch = 0 : i64, scratch_operands = 0 : i64, tpu.core_type = #tpu.core_type<tc>, window_params = [{transform_indices = @transform_0, window_bounds = array<i64: 32, 768>}, {pipeline_mode = #tpu.pipeline_mode<synchronous>, transform_indices = @transform_1, window_bounds = array<i64: 768, 128>}, {pipeline_mode = #tpu.pipeline_mode<synchronous>, transform_indices = @transform_2, window_bounds = array<i64: 1, 128>}, {transform_indices = @transform_3, window_bounds = array<i64: 32, 128>}]} {
    %c0 = arith.constant 0 : index
    %c0_0 = arith.constant 0 : index
    %0 = vector.load %arg1[%c0, %c0_0] : memref<32x768xf32, #tpu.memory_space<vmem>>, vector<32x768xf32>
    %1 = arith.truncf %0 : vector<32x768xf32> to vector<32x768xbf16>
    %c0_1 = arith.constant 0 : index
    %c0_2 = arith.constant 0 : index
    %2 = vector.load %arg2[%c0_1, %c0_2] : memref<768x128xbf16, #tpu.memory_space<vmem>>, vector<768x128xbf16>
    %cst = arith.constant dense<0.000000e+00> : vector<32x128xf32>
    %3 = tpu.matmul %1, %2, %cst {dimension_numbers = #tpu.dot_dimension_numbers<[1], [0], [0], [1], [0, 0, 1, 1], [], []>} : vector<32x768xbf16>, vector<768x128xbf16>, vector<32x128xf32> -> vector<32x128xf32>
    %c0_3 = arith.constant 0 : index
    %c0_4 = arith.constant 0 : index
    %4 = vector.load %arg3[%c0_3, %c0_4] : memref<1x128xf32, #tpu.memory_space<vmem>>, vector<1x128xf32>
    %5 = vector.broadcast %4 : vector<1x128xf32> to vector<32x128xf32>
    %6 = arith.addf %3, %5 : vector<32x128xf32>
    %c0_5 = arith.constant 0 : index
    %c0_6 = arith.constant 0 : index
    %7 = vector.load %arg4[%c0_5, %c0_6] : memref<32x128xf32, #tpu.memory_space<vmem>>, vector<32x128xf32>
    tpu.vector_store %arg4[%c0_5, %c0_6], %6 {strides = array<i32>} : memref<32x128xf32, #tpu.memory_space<vmem>>, vector<32x128xf32>,
    return
  }
  func.func @transform_0(%arg0: i32) -> (i32, i32) {
    %c0_i32 = arith.constant 0 : i32
    %c0_i32_0 = arith.constant 0 : i32
    return %arg0, %c0_i32 : i32, i32
  }
  func.func @transform_1(%arg0: i32) -> (i32, i32) {
    %c0_i32 = arith.constant 0 : i32
    %c0_i32_0 = arith.constant 0 : i32
    %c0_i32_1 = arith.constant 0 : i32
    return %c0_i32, %c0_i32_0 : i32, i32
  }
  func.func @transform_2(%arg0: i32) -> (i32, i32) {
    %c0_i32 = arith.constant 0 : i32
    %c0_i32_0 = arith.constant 0 : i32
    %c0_i32_1 = arith.constant 0 : i32
    return %c0_i32, %c0_i32_0 : i32, i32
  }
  func.func @transform_3(%arg0: i32) -> (i32, i32) {
    %c0_i32 = arith.constant 0 : i32
    %c0_i32_0 = arith.constant 0 : i32
    return %arg0, %c0_i32 : i32, i32
  }
}

module attributes {stable_mosaic.version = 11 : i64} {
  func.func @_fused_linear_kernel(%arg0: i32, %arg1: memref<256x128xf32, #tpu.memory_space<vmem>>, %arg2: memref<1x128xf32, #tpu.memory_space<vmem>>, %arg3: memref<1x128xf32, #tpu.memory_space<vmem>>, %arg4: memref<128x384xbf16, #tpu.memory_space<vmem>>, %arg5: memref<1x384xf32, #tpu.memory_space<vmem>>, %arg6: memref<256x384xbf16, #tpu.memory_space<vmem>>) attributes {dimension_semantics = [#tpu.dimension_semantics<parallel>], iteration_bounds = array<i64: 1>, scalar_prefetch = 0 : i64, scratch_operands = 0 : i64, tpu.core_type = #tpu.core_type<tc>, window_params = [{transform_indices = @transform_0, window_bounds = array<i64: 256, 128>}, {pipeline_mode = #tpu.pipeline_mode<synchronous>, transform_indices = @transform_1, window_bounds = array<i64: 1, 128>}, {pipeline_mode = #tpu.pipeline_mode<synchronous>, transform_indices = @transform_2, window_bounds = array<i64: 1, 128>}, {pipeline_mode = #tpu.pipeline_mode<synchronous>, transform_indices = @transform_3, window_bounds = array<i64: 128, 384>}, {pipeline_mode = #tpu.pipeline_mode<synchronous>, transform_indices = @transform_4, window_bounds = array<i64: 1, 384>}, {transform_indices = @transform_5, window_bounds = array<i64: 256, 384>}]} {
    %c0 = arith.constant 0 : index
    %c0_0 = arith.constant 0 : index
    %0 = vector.load %arg1[%c0, %c0_0] : memref<256x128xf32, #tpu.memory_space<vmem>>, vector<256x128xf32>
    %c0_1 = arith.constant 0 : index
    %c0_2 = arith.constant 0 : index
    %1 = vector.load %arg2[%c0_1, %c0_2] : memref<1x128xf32, #tpu.memory_space<vmem>>, vector<1x128xf32>
    %c0_3 = arith.constant 0 : index
    %c0_4 = arith.constant 0 : index
    %2 = vector.load %arg3[%c0_3, %c0_4] : memref<1x128xf32, #tpu.memory_space<vmem>>, vector<1x128xf32>
    %cst = arith.constant dense<0.000000e+00> : vector<256xf32>
    %3 = vector.multi_reduction <add>, %0, %cst [1] : vector<256x128xf32> to vector<256xf32>
    %4 = vector.shape_cast %3 : vector<256xf32> to vector<256x1xf32>
    %cst_5 = arith.constant 1.280000e+02 : f32
    %5 = vector.broadcast %cst_5 : f32 to vector<256x1xf32>
    %6 = arith.divf %4, %5 : vector<256x1xf32>
    %7 = vector.broadcast %6 : vector<256x1xf32> to vector<256x128xf32>
    %8 = arith.subf %0, %7 : vector<256x128xf32>
    %9 = arith.mulf %8, %8 : vector<256x128xf32>
    %cst_6 = arith.constant dense<0.000000e+00> : vector<256xf32>
    %10 = vector.multi_reduction <add>, %9, %cst_6 [1] : vector<256x128xf32> to vector<256xf32>
    %11 = vector.shape_cast %10 : vector<256xf32> to vector<256x1xf32>
    %cst_7 = arith.constant 1.280000e+02 : f32
    %12 = vector.broadcast %cst_7 : f32 to vector<256x1xf32>
    %13 = arith.divf %11, %12 : vector<256x1xf32>
    %cst_8 = arith.constant 9.99999997E-7 : f32
    %14 = vector.broadcast %cst_8 : f32 to vector<256x1xf32>
    %15 = arith.addf %13, %14 : vector<256x1xf32>
    %16 = math.rsqrt %15 : vector<256x1xf32>
    %17 = vector.broadcast %16 : vector<256x1xf32> to vector<256x128xf32>
    %18 = arith.mulf %8, %17 : vector<256x128xf32>
    %19 = vector.broadcast %1 : vector<1x128xf32> to vector<256x128xf32>
    %20 = arith.mulf %18, %19 : vector<256x128xf32>
    %21 = vector.broadcast %2 : vector<1x128xf32> to vector<256x128xf32>
    %22 = arith.addf %20, %21 : vector<256x128xf32>
    %23 = arith.truncf %22 : vector<256x128xf32> to vector<256x128xbf16>
    %c0_9 = arith.constant 0 : index
    %c0_10 = arith.constant 0 : index
    %24 = vector.load %arg4[%c0_9, %c0_10] : memref<128x384xbf16, #tpu.memory_space<vmem>>, vector<128x384xbf16>
    %cst_11 = arith.constant dense<0.000000e+00> : vector<256x384xf32>
    %25 = tpu.matmul %23, %24, %cst_11 {dimension_numbers = #tpu.dot_dimension_numbers<[1], [0], [0], [1], [0, 0, 1, 1], [], []>} : vector<256x128xbf16>, vector<128x384xbf16>, vector<256x384xf32> -> vector<256x384xf32>
    %c0_12 = arith.constant 0 : index
    %c0_13 = arith.constant 0 : index
    %26 = vector.load %arg5[%c0_12, %c0_13] : memref<1x384xf32, #tpu.memory_space<vmem>>, vector<1x384xf32>
    %27 = vector.broadcast %26 : vector<1x384xf32> to vector<256x384xf32>
    %28 = arith.addf %25, %27 : vector<256x384xf32>
    %29 = arith.truncf %28 : vector<256x384xf32> to vector<256x384xbf16>
    %c0_14 = arith.constant 0 : index
    %c0_15 = arith.constant 0 : index
    %30 = vector.load %arg6[%c0_14, %c0_15] : memref<256x384xbf16, #tpu.memory_space<vmem>>, vector<256x384xbf16>
    tpu.vector_store %arg6[%c0_14, %c0_15], %29 {strides = array<i32>} : memref<256x384xbf16, #tpu.memory_space<vmem>>, vector<256x384xbf16>,
    return
  }
  func.func @transform_0(%arg0: i32) -> (i32, i32) {
    %c0_i32 = arith.constant 0 : i32
    %c0_i32_0 = arith.constant 0 : i32
    return %arg0, %c0_i32 : i32, i32
  }
  func.func @transform_1(%arg0: i32) -> (i32, i32) {
    %c0_i32 = arith.constant 0 : i32
    %c0_i32_0 = arith.constant 0 : i32
    %c0_i32_1 = arith.constant 0 : i32
    return %c0_i32, %c0_i32_0 : i32, i32
  }
  func.func @transform_2(%arg0: i32) -> (i32, i32) {
    %c0_i32 = arith.constant 0 : i32
    %c0_i32_0 = arith.constant 0 : i32
    %c0_i32_1 = arith.constant 0 : i32
    return %c0_i32, %c0_i32_0 : i32, i32
  }
  func.func @transform_3(%arg0: i32) -> (i32, i32) {
    %c0_i32 = arith.constant 0 : i32
    %c0_i32_0 = arith.constant 0 : i32
    %c0_i32_1 = arith.constant 0 : i32
    return %c0_i32, %c0_i32_0 : i32, i32
  }
  func.func @transform_4(%arg0: i32) -> (i32, i32) {
    %c0_i32 = arith.constant 0 : i32
    %c0_i32_0 = arith.constant 0 : i32
    %c0_i32_1 = arith.constant 0 : i32
    return %c0_i32, %c0_i32_0 : i32, i32
  }
  func.func @transform_5(%arg0: i32) -> (i32, i32) {
    %c0_i32 = arith.constant 0 : i32
    %c0_i32_0 = arith.constant 0 : i32
    return %arg0, %c0_i32 : i32, i32
  }
}

module attributes {stable_mosaic.version = 11 : i64} {
  func.func @_attn_proj_kernel(%arg0: i32, %arg1: i32, %arg2: memref<1x128x384xbf16, #tpu.memory_space<vmem>>, %arg3: memref<1x128xf32, #tpu.memory_space<vmem>>, %arg4: memref<1x128x128xf32, #tpu.memory_space<vmem>>, %arg5: memref<128x128xbf16, #tpu.memory_space<vmem>>, %arg6: memref<1x128xf32, #tpu.memory_space<vmem>>, %arg7: memref<1x128x128xf32, #tpu.memory_space<vmem>>, %arg8: memref<128x128xbf16, #tpu.memory_space<vmem>>) attributes {dimension_semantics = [#tpu.dimension_semantics<parallel>, #tpu.dimension_semantics<parallel>], iteration_bounds = array<i64: 2, 1>, scalar_prefetch = 0 : i64, scratch_operands = 1 : i64, tpu.core_type = #tpu.core_type<tc>, window_params = [{transform_indices = @transform_0, window_bounds = array<i64: 1, 128, 384>}, {pipeline_mode = #tpu.pipeline_mode<synchronous>, transform_indices = @transform_1, window_bounds = array<i64: 1, 128>}, {transform_indices = @transform_2, window_bounds = array<i64: 1, 128, 128>}, {pipeline_mode = #tpu.pipeline_mode<synchronous>, transform_indices = @transform_3, window_bounds = array<i64: 128, 128>}, {pipeline_mode = #tpu.pipeline_mode<synchronous>, transform_indices = @transform_4, window_bounds = array<i64: 1, 128>}, {transform_indices = @transform_5, window_bounds = array<i64: 1, 128, 128>}]} {
    %c128_i32 = arith.constant 128 : i32
    %0 = arith.muli %arg1, %c128_i32 : i32
    %1 = tpu.assume_multiple %0, 128 : i32
    %c0 = arith.constant 0 : index
    %2 = arith.index_cast %1 : i32 to index
    %c0_0 = arith.constant 0 : index
    %3 = vector.load %arg2[%c0, %2, %c0_0] : memref<1x128x384xbf16, #tpu.memory_space<vmem>>, vector<1x128x384xbf16>
    %4 = vector.shape_cast %3 : vector<1x128x384xbf16> to vector<128x384xbf16>
    %c0_1 = arith.constant 0 : index
    %c0_2 = arith.constant 0 : index
    %5 = vector.load %arg3[%c0_1, %c0_2] : memref<1x128xf32, #tpu.memory_space<vmem>>, vector<1x128xf32>
    %6 = vector.extract_strided_slice %4 {offsets = [0, 0], sizes = [128, 32], strides = [1, 1]} : vector<128x384xbf16> to vector<128x32xbf16>
    %c0_3 = arith.constant 0 : index
    %c0_4 = arith.constant 0 : index
    %c128 = arith.constant 128 : index
    %7 = vector.load %arg2[%c0_3, %c0_4, %c128] : memref<1x128x384xbf16, #tpu.memory_space<vmem>>, vector<1x128x32xbf16>
    %8 = vector.shape_cast %7 : vector<1x128x32xbf16> to vector<128x32xbf16>
    %c0_5 = arith.constant 0 : index
    %c0_6 = arith.constant 0 : index
    %c256 = arith.constant 256 : index
    %9 = vector.load %arg2[%c0_5, %c0_6, %c256] : memref<1x128x384xbf16, #tpu.memory_space<vmem>>, vector<1x128x32xbf16>
    %10 = vector.shape_cast %9 : vector<1x128x32xbf16> to vector<128x32xbf16>
    %cst = arith.constant dense<0.000000e+00> : vector<128x128xf32>
    %11 = tpu.matmul %6, %8, %cst {dimension_numbers = #tpu.dot_dimension_numbers<[1], [1], [0], [0], [0, 0, 1, 0], [], []>} : vector<128x32xbf16>, vector<128x32xbf16>, vector<128x128xf32> -> vector<128x128xf32>
    %12 = vector.broadcast %5 : vector<1x128xf32> to vector<128x128xf32>
    %13 = arith.addf %11, %12 : vector<128x128xf32>
    %cst_7 = arith.constant dense<0xFF800000> : vector<128xf32>
    %14 = vector.multi_reduction <maximumf>, %13, %cst_7 [1] : vector<128x128xf32> to vector<128xf32>
    %15 = vector.shape_cast %14 : vector<128xf32> to vector<128x1xf32>
    %16 = vector.broadcast %15 : vector<128x1xf32> to vector<128x128xf32>
    %17 = arith.subf %13, %16 : vector<128x128xf32>
    %18 = math.exp %17 : vector<128x128xf32>
    %cst_8 = arith.constant dense<0.000000e+00> : vector<128xf32>
    %19 = vector.multi_reduction <add>, %18, %cst_8 [1] : vector<128x128xf32> to vector<128xf32>
    %20 = vector.shape_cast %19 : vector<128xf32> to vector<128x1xf32>
    %21 = tpu.reciprocal %20 {approx = true} : vector<128x1xf32> -> vector<128x1xf32>
    %22 = vector.broadcast %21 : vector<128x1xf32> to vector<128x128xf32>
    %23 = arith.mulf %18, %22 : vector<128x128xf32>
    %24 = arith.truncf %23 : vector<128x128xf32> to vector<128x128xbf16>
    %cst_9 = arith.constant dense<0.000000e+00> : vector<128x32xf32>
    %25 = tpu.matmul %24, %10, %cst_9 {dimension_numbers = #tpu.dot_dimension_numbers<[1], [0], [0], [1], [0, 0, 1, 1], [], []>} : vector<128x128xbf16>, vector<128x32xbf16>, vector<128x32xf32> -> vector<128x32xf32>
    %26 = arith.truncf %25 : vector<128x32xf32> to vector<128x32xbf16>
    %c0_10 = arith.constant 0 : index
    %c0_11 = arith.constant 0 : index
    %27 = vector.load %arg8[%c0_10, %c0_11] : memref<128x128xbf16, #tpu.memory_space<vmem>>, vector<128x32xbf16>
    tpu.vector_store %arg8[%c0_10, %c0_11], %26 {strides = array<i32>} : memref<128x128xbf16, #tpu.memory_space<vmem>>, vector<128x32xbf16>,
    %28 = vector.extract_strided_slice %4 {offsets = [0, 32], sizes = [128, 32], strides = [1, 1]} : vector<128x384xbf16> to vector<128x32xbf16>
    %c0_12 = arith.constant 0 : index
    %c0_13 = arith.constant 0 : index
    %c160 = arith.constant 160 : index
    %29 = vector.load %arg2[%c0_12, %c0_13, %c160] : memref<1x128x384xbf16, #tpu.memory_space<vmem>>, vector<1x128x32xbf16>
    %30 = vector.shape_cast %29 : vector<1x128x32xbf16> to vector<128x32xbf16>
    %c0_14 = arith.constant 0 : index
    %c0_15 = arith.constant 0 : index
    %c288 = arith.constant 288 : index
    %31 = vector.load %arg2[%c0_14, %c0_15, %c288] : memref<1x128x384xbf16, #tpu.memory_space<vmem>>, vector<1x128x32xbf16>
    %32 = vector.shape_cast %31 : vector<1x128x32xbf16> to vector<128x32xbf16>
    %cst_16 = arith.constant dense<0.000000e+00> : vector<128x128xf32>
    %33 = tpu.matmul %28, %30, %cst_16 {dimension_numbers = #tpu.dot_dimension_numbers<[1], [1], [0], [0], [0, 0, 1, 0], [], []>} : vector<128x32xbf16>, vector<128x32xbf16>, vector<128x128xf32> -> vector<128x128xf32>
    %34 = vector.broadcast %5 : vector<1x128xf32> to vector<128x128xf32>
    %35 = arith.addf %33, %34 : vector<128x128xf32>
    %cst_17 = arith.constant dense<0xFF800000> : vector<128xf32>
    %36 = vector.multi_reduction <maximumf>, %35, %cst_17 [1] : vector<128x128xf32> to vector<128xf32>
    %37 = vector.shape_cast %36 : vector<128xf32> to vector<128x1xf32>
    %38 = vector.broadcast %37 : vector<128x1xf32> to vector<128x128xf32>
    %39 = arith.subf %35, %38 : vector<128x128xf32>
    %40 = math.exp %39 : vector<128x128xf32>
    %cst_18 = arith.constant dense<0.000000e+00> : vector<128xf32>
    %41 = vector.multi_reduction <add>, %40, %cst_18 [1] : vector<128x128xf32> to vector<128xf32>
    %42 = vector.shape_cast %41 : vector<128xf32> to vector<128x1xf32>
    %43 = tpu.reciprocal %42 {approx = true} : vector<128x1xf32> -> vector<128x1xf32>
    %44 = vector.broadcast %43 : vector<128x1xf32> to vector<128x128xf32>
    %45 = arith.mulf %40, %44 : vector<128x128xf32>
    %46 = arith.truncf %45 : vector<128x128xf32> to vector<128x128xbf16>
    %cst_19 = arith.constant dense<0.000000e+00> : vector<128x32xf32>
    %47 = tpu.matmul %46, %32, %cst_19 {dimension_numbers = #tpu.dot_dimension_numbers<[1], [0], [0], [1], [0, 0, 1, 1], [], []>} : vector<128x128xbf16>, vector<128x32xbf16>, vector<128x32xf32> -> vector<128x32xf32>
    %48 = arith.truncf %47 : vector<128x32xf32> to vector<128x32xbf16>
    %c0_20 = arith.constant 0 : index
    %c32 = arith.constant 32 : index
    %49 = vector.load %arg8[%c0_20, %c32] : memref<128x128xbf16, #tpu.memory_space<vmem>>, vector<128x32xbf16>
    tpu.vector_store %arg8[%c0_20, %c32], %48 {strides = array<i32>} : memref<128x128xbf16, #tpu.memory_space<vmem>>, vector<128x32xbf16>,
    %50 = vector.extract_strided_slice %4 {offsets = [0, 64], sizes = [128, 32], strides = [1, 1]} : vector<128x384xbf16> to vector<128x32xbf16>
    %c0_21 = arith.constant 0 : index
    %c0_22 = arith.constant 0 : index
    %c192 = arith.constant 192 : index
    %51 = vector.load %arg2[%c0_21, %c0_22, %c192] : memref<1x128x384xbf16, #tpu.memory_space<vmem>>, vector<1x128x32xbf16>
    %52 = vector.shape_cast %51 : vector<1x128x32xbf16> to vector<128x32xbf16>
    %c0_23 = arith.constant 0 : index
    %c0_24 = arith.constant 0 : index
    %c320 = arith.constant 320 : index
    %53 = vector.load %arg2[%c0_23, %c0_24, %c320] : memref<1x128x384xbf16, #tpu.memory_space<vmem>>, vector<1x128x32xbf16>
    %54 = vector.shape_cast %53 : vector<1x128x32xbf16> to vector<128x32xbf16>
    %cst_25 = arith.constant dense<0.000000e+00> : vector<128x128xf32>
    %55 = tpu.matmul %50, %52, %cst_25 {dimension_numbers = #tpu.dot_dimension_numbers<[1], [1], [0], [0], [0, 0, 1, 0], [], []>} : vector<128x32xbf16>, vector<128x32xbf16>, vector<128x128xf32> -> vector<128x128xf32>
    %56 = vector.broadcast %5 : vector<1x128xf32> to vector<128x128xf32>
    %57 = arith.addf %55, %56 : vector<128x128xf32>
    %cst_26 = arith.constant dense<0xFF800000> : vector<128xf32>
    %58 = vector.multi_reduction <maximumf>, %57, %cst_26 [1] : vector<128x128xf32> to vector<128xf32>
    %59 = vector.shape_cast %58 : vector<128xf32> to vector<128x1xf32>
    %60 = vector.broadcast %59 : vector<128x1xf32> to vector<128x128xf32>
    %61 = arith.subf %57, %60 : vector<128x128xf32>
    %62 = math.exp %61 : vector<128x128xf32>
    %cst_27 = arith.constant dense<0.000000e+00> : vector<128xf32>
    %63 = vector.multi_reduction <add>, %62, %cst_27 [1] : vector<128x128xf32> to vector<128xf32>
    %64 = vector.shape_cast %63 : vector<128xf32> to vector<128x1xf32>
    %65 = tpu.reciprocal %64 {approx = true} : vector<128x1xf32> -> vector<128x1xf32>
    %66 = vector.broadcast %65 : vector<128x1xf32> to vector<128x128xf32>
    %67 = arith.mulf %62, %66 : vector<128x128xf32>
    %68 = arith.truncf %67 : vector<128x128xf32> to vector<128x128xbf16>
    %cst_28 = arith.constant dense<0.000000e+00> : vector<128x32xf32>
    %69 = tpu.matmul %68, %54, %cst_28 {dimension_numbers = #tpu.dot_dimension_numbers<[1], [0], [0], [1], [0, 0, 1, 1], [], []>} : vector<128x128xbf16>, vector<128x32xbf16>, vector<128x32xf32> -> vector<128x32xf32>
    %70 = arith.truncf %69 : vector<128x32xf32> to vector<128x32xbf16>
    %c0_29 = arith.constant 0 : index
    %c64 = arith.constant 64 : index
    %71 = vector.load %arg8[%c0_29, %c64] : memref<128x128xbf16, #tpu.memory_space<vmem>>, vector<128x32xbf16>
    tpu.vector_store %arg8[%c0_29, %c64], %70 {strides = array<i32>} : memref<128x128xbf16, #tpu.memory_space<vmem>>, vector<128x32xbf16>,
    %72 = vector.extract_strided_slice %4 {offsets = [0, 96], sizes = [128, 32], strides = [1, 1]} : vector<128x384xbf16> to vector<128x32xbf16>
    %c0_30 = arith.constant 0 : index
    %c0_31 = arith.constant 0 : index
    %c224 = arith.constant 224 : index
    %73 = vector.load %arg2[%c0_30, %c0_31, %c224] : memref<1x128x384xbf16, #tpu.memory_space<vmem>>, vector<1x128x32xbf16>
    %74 = vector.shape_cast %73 : vector<1x128x32xbf16> to vector<128x32xbf16>
    %c0_32 = arith.constant 0 : index
    %c0_33 = arith.constant 0 : index
    %c352 = arith.constant 352 : index
    %75 = vector.load %arg2[%c0_32, %c0_33, %c352] : memref<1x128x384xbf16, #tpu.memory_space<vmem>>, vector<1x128x32xbf16>
    %76 = vector.shape_cast %75 : vector<1x128x32xbf16> to vector<128x32xbf16>
    %cst_34 = arith.constant dense<0.000000e+00> : vector<128x128xf32>
    %77 = tpu.matmul %72, %74, %cst_34 {dimension_numbers = #tpu.dot_dimension_numbers<[1], [1], [0], [0], [0, 0, 1, 0], [], []>} : vector<128x32xbf16>, vector<128x32xbf16>, vector<128x128xf32> -> vector<128x128xf32>
    %78 = vector.broadcast %5 : vector<1x128xf32> to vector<128x128xf32>
    %79 = arith.addf %77, %78 : vector<128x128xf32>
    %cst_35 = arith.constant dense<0xFF800000> : vector<128xf32>
    %80 = vector.multi_reduction <maximumf>, %79, %cst_35 [1] : vector<128x128xf32> to vector<128xf32>
    %81 = vector.shape_cast %80 : vector<128xf32> to vector<128x1xf32>
    %82 = vector.broadcast %81 : vector<128x1xf32> to vector<128x128xf32>
    %83 = arith.subf %79, %82 : vector<128x128xf32>
    %84 = math.exp %83 : vector<128x128xf32>
    %cst_36 = arith.constant dense<0.000000e+00> : vector<128xf32>
    %85 = vector.multi_reduction <add>, %84, %cst_36 [1] : vector<128x128xf32> to vector<128xf32>
    %86 = vector.shape_cast %85 : vector<128xf32> to vector<128x1xf32>
    %87 = tpu.reciprocal %86 {approx = true} : vector<128x1xf32> -> vector<128x1xf32>
    %88 = vector.broadcast %87 : vector<128x1xf32> to vector<128x128xf32>
    %89 = arith.mulf %84, %88 : vector<128x128xf32>
    %90 = arith.truncf %89 : vector<128x128xf32> to vector<128x128xbf16>
    %cst_37 = arith.constant dense<0.000000e+00> : vector<128x32xf32>
    %91 = tpu.matmul %90, %76, %cst_37 {dimension_numbers = #tpu.dot_dimension_numbers<[1], [0], [0], [1], [0, 0, 1, 1], [], []>} : vector<128x128xbf16>, vector<128x32xbf16>, vector<128x32xf32> -> vector<128x32xf32>
    %92 = arith.truncf %91 : vector<128x32xf32> to vector<128x32xbf16>
    %c0_38 = arith.constant 0 : index
    %c96 = arith.constant 96 : index
    %93 = vector.load %arg8[%c0_38, %c96] : memref<128x128xbf16, #tpu.memory_space<vmem>>, vector<128x32xbf16>
    tpu.vector_store %arg8[%c0_38, %c96], %92 {strides = array<i32>} : memref<128x128xbf16, #tpu.memory_space<vmem>>, vector<128x32xbf16>,
    %c0_39 = arith.constant 0 : index
    %c0_40 = arith.constant 0 : index
    %94 = vector.load %arg8[%c0_39, %c0_40] : memref<128x128xbf16, #tpu.memory_space<vmem>>, vector<128x128xbf16>
    %c0_41 = arith.constant 0 : index
    %c0_42 = arith.constant 0 : index
    %95 = vector.load %arg5[%c0_41, %c0_42] : memref<128x128xbf16, #tpu.memory_space<vmem>>, vector<128x128xbf16>
    %cst_43 = arith.constant dense<0.000000e+00> : vector<128x128xf32>
    %96 = tpu.matmul %94, %95, %cst_43 {dimension_numbers = #tpu.dot_dimension_numbers<[1], [0], [0], [1], [0, 0, 1, 1], [], []>} : vector<128x128xbf16>, vector<128x128xbf16>, vector<128x128xf32> -> vector<128x128xf32>
    %c0_44 = arith.constant 0 : index
    %c0_45 = arith.constant 0 : index
    %97 = vector.load %arg6[%c0_44, %c0_45] : memref<1x128xf32, #tpu.memory_space<vmem>>, vector<1x128xf32>
    %98 = vector.broadcast %97 : vector<1x128xf32> to vector<128x128xf32>
    %99 = arith.addf %96, %98 : vector<128x128xf32>
    %c0_46 = arith.constant 0 : index
    %c0_47 = arith.constant 0 : index
    %c0_48 = arith.constant 0 : index
    %100 = vector.load %arg4[%c0_46, %c0_47, %c0_48] : memref<1x128x128xf32, #tpu.memory_space<vmem>>, vector<1x128x128xf32>
    %101 = vector.shape_cast %100 : vector<1x128x128xf32> to vector<128x128xf32>
    %102 = arith.addf %99, %101 : vector<128x128xf32>
    %c0_49 = arith.constant 0 : index
    %c0_50 = arith.constant 0 : index
    %c0_51 = arith.constant 0 : index
    %103 = vector.load %arg7[%c0_49, %c0_50, %c0_51] : memref<1x128x128xf32, #tpu.memory_space<vmem>>, vector<1x128x128xf32>
    %104 = vector.shape_cast %103 : vector<1x128x128xf32> to vector<128x128xf32>
    %105 = vector.shape_cast %102 : vector<128x128xf32> to vector<1x128x128xf32>
    tpu.vector_store %arg7[%c0_49, %c0_50, %c0_51], %105 {strides = array<i32>} : memref<1x128x128xf32, #tpu.memory_space<vmem>>, vector<1x128x128xf32>,
    return
  }
  func.func @transform_0(%arg0: i32, %arg1: i32) -> (i32, i32, i32) {
    %c0_i32 = arith.constant 0 : i32
    %c0_i32_0 = arith.constant 0 : i32
    %c0_i32_1 = arith.constant 0 : i32
    return %arg0, %c0_i32, %c0_i32_0 : i32, i32, i32
  }
  func.func @transform_1(%arg0: i32, %arg1: i32) -> (i32, i32) {
    %c0_i32 = arith.constant 0 : i32
    %c0_i32_0 = arith.constant 0 : i32
    %c0_i32_1 = arith.constant 0 : i32
    return %c0_i32, %c0_i32_0 : i32, i32
  }
  func.func @transform_2(%arg0: i32, %arg1: i32) -> (i32, i32, i32) {
    %c0_i32 = arith.constant 0 : i32
    %c0_i32_0 = arith.constant 0 : i32
    return %arg0, %arg1, %c0_i32 : i32, i32, i32
  }
  func.func @transform_3(%arg0: i32, %arg1: i32) -> (i32, i32) {
    %c0_i32 = arith.constant 0 : i32
    %c0_i32_0 = arith.constant 0 : i32
    %c0_i32_1 = arith.constant 0 : i32
    return %c0_i32, %c0_i32_0 : i32, i32
  }
  func.func @transform_4(%arg0: i32, %arg1: i32) -> (i32, i32) {
    %c0_i32 = arith.constant 0 : i32
    %c0_i32_0 = arith.constant 0 : i32
    %c0_i32_1 = arith.constant 0 : i32
    return %c0_i32, %c0_i32_0 : i32, i32
  }
  func.func @transform_5(%arg0: i32, %arg1: i32) -> (i32, i32, i32) {
    %c0_i32 = arith.constant 0 : i32
    %c0_i32_0 = arith.constant 0 : i32
    return %arg0, %arg1, %c0_i32 : i32, i32, i32
  }
}

module attributes {stable_mosaic.version = 11 : i64} {
  func.func @_mlp_kernel(%arg0: i32, %arg1: i32, %arg2: memref<256x128xf32, #tpu.memory_space<vmem>>, %arg3: memref<1x128xf32, #tpu.memory_space<vmem>>, %arg4: memref<1x128xf32, #tpu.memory_space<vmem>>, %arg5: memref<128x512xbf16, #tpu.memory_space<vmem>>, %arg6: memref<1x512xf32, #tpu.memory_space<vmem>>, %arg7: memref<512x128xbf16, #tpu.memory_space<vmem>>, %arg8: memref<1x128xf32, #tpu.memory_space<vmem>>, %arg9: memref<256x128xf32, #tpu.memory_space<vmem>>, %arg10: memref<256x128xbf16, #tpu.memory_space<vmem>>, %arg11: memref<256x128xf32, #tpu.memory_space<vmem>>) attributes {dimension_semantics = [#tpu.dimension_semantics<parallel>, #tpu.dimension_semantics<arbitrary>], iteration_bounds = array<i64: 1, 1>, scalar_prefetch = 0 : i64, scratch_operands = 2 : i64, tpu.core_type = #tpu.core_type<tc>, window_params = [{transform_indices = @transform_0, window_bounds = array<i64: 256, 128>}, {pipeline_mode = #tpu.pipeline_mode<synchronous>, transform_indices = @transform_1, window_bounds = array<i64: 1, 128>}, {pipeline_mode = #tpu.pipeline_mode<synchronous>, transform_indices = @transform_2, window_bounds = array<i64: 1, 128>}, {transform_indices = @transform_3, window_bounds = array<i64: 128, 512>}, {transform_indices = @transform_4, window_bounds = array<i64: 1, 512>}, {transform_indices = @transform_5, window_bounds = array<i64: 512, 128>}, {pipeline_mode = #tpu.pipeline_mode<synchronous>, transform_indices = @transform_6, window_bounds = array<i64: 1, 128>}, {transform_indices = @transform_7, window_bounds = array<i64: 256, 128>}]} {
    %c0_i32 = arith.constant 0 : i32
    %0 = arith.cmpi eq, %arg1, %c0_i32 : i32
    %1 = arith.extui %0 : i1 to i32
    %c0_i32_0 = arith.constant 0 : i32
    %2 = arith.cmpi ne, %1, %c0_i32_0 : i32
    scf.if %2 {
      %c0_19 = arith.constant 0 : index
      %c0_20 = arith.constant 0 : index
      %31 = vector.load %arg2[%c0_19, %c0_20] : memref<256x128xf32, #tpu.memory_space<vmem>>, vector<256x128xf32>
      %c0_21 = arith.constant 0 : index
      %c0_22 = arith.constant 0 : index
      %32 = vector.load %arg3[%c0_21, %c0_22] : memref<1x128xf32, #tpu.memory_space<vmem>>, vector<1x128xf32>
      %c0_23 = arith.constant 0 : index
      %c0_24 = arith.constant 0 : index
      %33 = vector.load %arg4[%c0_23, %c0_24] : memref<1x128xf32, #tpu.memory_space<vmem>>, vector<1x128xf32>
      %cst_25 = arith.constant dense<0.000000e+00> : vector<256xf32>
      %34 = vector.multi_reduction <add>, %31, %cst_25 [1] : vector<256x128xf32> to vector<256xf32>
      %35 = vector.shape_cast %34 : vector<256xf32> to vector<256x1xf32>
      %cst_26 = arith.constant 1.280000e+02 : f32
      %36 = vector.broadcast %cst_26 : f32 to vector<256x1xf32>
      %37 = arith.divf %35, %36 : vector<256x1xf32>
      %38 = vector.broadcast %37 : vector<256x1xf32> to vector<256x128xf32>
      %39 = arith.subf %31, %38 : vector<256x128xf32>
      %40 = arith.mulf %39, %39 : vector<256x128xf32>
      %cst_27 = arith.constant dense<0.000000e+00> : vector<256xf32>
      %41 = vector.multi_reduction <add>, %40, %cst_27 [1] : vector<256x128xf32> to vector<256xf32>
      %42 = vector.shape_cast %41 : vector<256xf32> to vector<256x1xf32>
      %cst_28 = arith.constant 1.280000e+02 : f32
      %43 = vector.broadcast %cst_28 : f32 to vector<256x1xf32>
      %44 = arith.divf %42, %43 : vector<256x1xf32>
      %cst_29 = arith.constant 9.99999997E-7 : f32
      %45 = vector.broadcast %cst_29 : f32 to vector<256x1xf32>
      %46 = arith.addf %44, %45 : vector<256x1xf32>
      %47 = math.rsqrt %46 : vector<256x1xf32>
      %48 = vector.broadcast %47 : vector<256x1xf32> to vector<256x128xf32>
      %49 = arith.mulf %39, %48 : vector<256x128xf32>
      %50 = vector.broadcast %32 : vector<1x128xf32> to vector<256x128xf32>
      %51 = arith.mulf %49, %50 : vector<256x128xf32>
      %52 = vector.broadcast %33 : vector<1x128xf32> to vector<256x128xf32>
      %53 = arith.addf %51, %52 : vector<256x128xf32>
      %54 = arith.truncf %53 : vector<256x128xf32> to vector<256x128xbf16>
      %c0_30 = arith.constant 0 : index
      %c0_31 = arith.constant 0 : index
      %55 = vector.load %arg10[%c0_30, %c0_31] : memref<256x128xbf16, #tpu.memory_space<vmem>>, vector<256x128xbf16>
      tpu.vector_store %arg10[%c0_30, %c0_31], %54 {strides = array<i32>} : memref<256x128xbf16, #tpu.memory_space<vmem>>, vector<256x128xbf16>,
      %cst_32 = arith.constant 0.000000e+00 : f32
      %56 = vector.broadcast %cst_32 : f32 to vector<256x128xf32>
      %c0_33 = arith.constant 0 : index
      %c0_34 = arith.constant 0 : index
      %57 = vector.load %arg11[%c0_33, %c0_34] : memref<256x128xf32, #tpu.memory_space<vmem>>, vector<256x128xf32>
      tpu.vector_store %arg11[%c0_33, %c0_34], %56 {strides = array<i32>} : memref<256x128xf32, #tpu.memory_space<vmem>>, vector<256x128xf32>,
    } else {
    }
    %c0 = arith.constant 0 : index
    %c0_1 = arith.constant 0 : index
    %3 = vector.load %arg10[%c0, %c0_1] : memref<256x128xbf16, #tpu.memory_space<vmem>>, vector<256x128xbf16>
    %c0_2 = arith.constant 0 : index
    %c0_3 = arith.constant 0 : index
    %4 = vector.load %arg5[%c0_2, %c0_3] : memref<128x512xbf16, #tpu.memory_space<vmem>>, vector<128x512xbf16>
    %cst = arith.constant dense<0.000000e+00> : vector<256x512xf32>
    %5 = tpu.matmul %3, %4, %cst {dimension_numbers = #tpu.dot_dimension_numbers<[1], [0], [0], [1], [0, 0, 1, 1], [], []>} : vector<256x128xbf16>, vector<128x512xbf16>, vector<256x512xf32> -> vector<256x512xf32>
    %c0_4 = arith.constant 0 : index
    %c0_5 = arith.constant 0 : index
    %6 = vector.load %arg6[%c0_4, %c0_5] : memref<1x512xf32, #tpu.memory_space<vmem>>, vector<1x512xf32>
    %7 = vector.broadcast %6 : vector<1x512xf32> to vector<256x512xf32>
    %8 = arith.addf %5, %7 : vector<256x512xf32>
    %cst_6 = arith.constant 5.000000e-01 : f32
    %9 = vector.broadcast %cst_6 : f32 to vector<256x512xf32>
    %10 = arith.mulf %9, %8 : vector<256x512xf32>
    %cst_7 = arith.constant 4.471500e-02 : f32
    %11 = vector.broadcast %cst_7 : f32 to vector<256x512xf32>
    %12 = arith.mulf %11, %8 : vector<256x512xf32>
    %13 = arith.mulf %12, %8 : vector<256x512xf32>
    %14 = arith.mulf %13, %8 : vector<256x512xf32>
    %15 = arith.addf %8, %14 : vector<256x512xf32>
    %cst_8 = arith.constant 0.797884583 : f32
    %16 = vector.broadcast %cst_8 : f32 to vector<256x512xf32>
    %17 = arith.mulf %16, %15 : vector<256x512xf32>
    %18 = math.tanh %17 : vector<256x512xf32>
    %cst_9 = arith.constant 1.000000e+00 : f32
    %19 = vector.broadcast %cst_9 : f32 to vector<256x512xf32>
    %20 = arith.addf %19, %18 : vector<256x512xf32>
    %21 = arith.mulf %10, %20 : vector<256x512xf32>
    %c0_10 = arith.constant 0 : index
    %c0_11 = arith.constant 0 : index
    %22 = vector.load %arg11[%c0_10, %c0_11] : memref<256x128xf32, #tpu.memory_space<vmem>>, vector<256x128xf32>
    %23 = arith.truncf %21 : vector<256x512xf32> to vector<256x512xbf16>
    %c0_12 = arith.constant 0 : index
    %c0_13 = arith.constant 0 : index
    %24 = vector.load %arg7[%c0_12, %c0_13] : memref<512x128xbf16, #tpu.memory_space<vmem>>, vector<512x128xbf16>
    %cst_14 = arith.constant dense<0.000000e+00> : vector<256x128xf32>
    %25 = tpu.matmul %23, %24, %cst_14 {dimension_numbers = #tpu.dot_dimension_numbers<[1], [0], [0], [1], [0, 0, 1, 1], [], []>} : vector<256x512xbf16>, vector<512x128xbf16>, vector<256x128xf32> -> vector<256x128xf32>
    %26 = arith.addf %22, %25 : vector<256x128xf32>
    %c0_15 = arith.constant 0 : index
    %c0_16 = arith.constant 0 : index
    %27 = vector.load %arg11[%c0_15, %c0_16] : memref<256x128xf32, #tpu.memory_space<vmem>>, vector<256x128xf32>
    tpu.vector_store %arg11[%c0_15, %c0_16], %26 {strides = array<i32>} : memref<256x128xf32, #tpu.memory_space<vmem>>, vector<256x128xf32>,
    %c0_i32_17 = arith.constant 0 : i32
    %28 = arith.cmpi eq, %arg1, %c0_i32_17 : i32
    %29 = arith.extui %28 : i1 to i32
    %c0_i32_18 = arith.constant 0 : i32
    %30 = arith.cmpi ne, %29, %c0_i32_18 : i32
    scf.if %30 {
      %c0_19 = arith.constant 0 : index
      %c0_20 = arith.constant 0 : index
      %31 = vector.load %arg11[%c0_19, %c0_20] : memref<256x128xf32, #tpu.memory_space<vmem>>, vector<256x128xf32>
      %c0_21 = arith.constant 0 : index
      %c0_22 = arith.constant 0 : index
      %32 = vector.load %arg8[%c0_21, %c0_22] : memref<1x128xf32, #tpu.memory_space<vmem>>, vector<1x128xf32>
      %33 = vector.broadcast %32 : vector<1x128xf32> to vector<256x128xf32>
      %34 = arith.addf %31, %33 : vector<256x128xf32>
      %c0_23 = arith.constant 0 : index
      %c0_24 = arith.constant 0 : index
      %35 = vector.load %arg2[%c0_23, %c0_24] : memref<256x128xf32, #tpu.memory_space<vmem>>, vector<256x128xf32>
      %36 = arith.addf %34, %35 : vector<256x128xf32>
      %c0_25 = arith.constant 0 : index
      %c0_26 = arith.constant 0 : index
      %37 = vector.load %arg9[%c0_25, %c0_26] : memref<256x128xf32, #tpu.memory_space<vmem>>, vector<256x128xf32>
      tpu.vector_store %arg9[%c0_25, %c0_26], %36 {strides = array<i32>} : memref<256x128xf32, #tpu.memory_space<vmem>>, vector<256x128xf32>,
    } else {
    }
    return
  }
  func.func @transform_0(%arg0: i32, %arg1: i32) -> (i32, i32) {
    %c0_i32 = arith.constant 0 : i32
    %c0_i32_0 = arith.constant 0 : i32
    return %arg0, %c0_i32 : i32, i32
  }
  func.func @transform_1(%arg0: i32, %arg1: i32) -> (i32, i32) {
    %c0_i32 = arith.constant 0 : i32
    %c0_i32_0 = arith.constant 0 : i32
    %c0_i32_1 = arith.constant 0 : i32
    return %c0_i32, %c0_i32_0 : i32, i32
  }
  func.func @transform_2(%arg0: i32, %arg1: i32) -> (i32, i32) {
    %c0_i32 = arith.constant 0 : i32
    %c0_i32_0 = arith.constant 0 : i32
    %c0_i32_1 = arith.constant 0 : i32
    return %c0_i32, %c0_i32_0 : i32, i32
  }
  func.func @transform_3(%arg0: i32, %arg1: i32) -> (i32, i32) {
    %c0_i32 = arith.constant 0 : i32
    %c0_i32_0 = arith.constant 0 : i32
    return %c0_i32, %arg1 : i32, i32
  }
  func.func @transform_4(%arg0: i32, %arg1: i32) -> (i32, i32) {
    %c0_i32 = arith.constant 0 : i32
    %c0_i32_0 = arith.constant 0 : i32
    return %c0_i32, %arg1 : i32, i32
  }
  func.func @transform_5(%arg0: i32, %arg1: i32) -> (i32, i32) {
    %c0_i32 = arith.constant 0 : i32
    %c0_i32_0 = arith.constant 0 : i32
    return %arg1, %c0_i32 : i32, i32
  }
  func.func @transform_6(%arg0: i32, %arg1: i32) -> (i32, i32) {
    %c0_i32 = arith.constant 0 : i32
    %c0_i32_0 = arith.constant 0 : i32
    %c0_i32_1 = arith.constant 0 : i32
    return %c0_i32, %c0_i32_0 : i32, i32
  }
  func.func @transform_7(%arg0: i32, %arg1: i32) -> (i32, i32) {
    %c0_i32 = arith.constant 0 : i32
    %c0_i32_0 = arith.constant 0 : i32
    return %arg0, %c0_i32 : i32, i32
  }
}

module attributes {stable_mosaic.version = 11 : i64} {
  func.func @_fused_linear_kernel(%arg0: i32, %arg1: memref<32x128xf32, #tpu.memory_space<vmem>>, %arg2: memref<1x128xf32, #tpu.memory_space<vmem>>, %arg3: memref<1x128xf32, #tpu.memory_space<vmem>>, %arg4: memref<128x64xbf16, #tpu.memory_space<vmem>>, %arg5: memref<1x64xf32, #tpu.memory_space<vmem>>, %arg6: memref<32x64xbf16, #tpu.memory_space<vmem>>) attributes {dimension_semantics = [#tpu.dimension_semantics<parallel>], iteration_bounds = array<i64: 1>, scalar_prefetch = 0 : i64, scratch_operands = 0 : i64, tpu.core_type = #tpu.core_type<tc>, window_params = [{transform_indices = @transform_0, window_bounds = array<i64: 32, 128>}, {pipeline_mode = #tpu.pipeline_mode<synchronous>, transform_indices = @transform_1, window_bounds = array<i64: 1, 128>}, {pipeline_mode = #tpu.pipeline_mode<synchronous>, transform_indices = @transform_2, window_bounds = array<i64: 1, 128>}, {pipeline_mode = #tpu.pipeline_mode<synchronous>, transform_indices = @transform_3, window_bounds = array<i64: 128, 64>}, {pipeline_mode = #tpu.pipeline_mode<synchronous>, transform_indices = @transform_4, window_bounds = array<i64: 1, 64>}, {transform_indices = @transform_5, window_bounds = array<i64: 32, 64>}]} {
    %c0 = arith.constant 0 : index
    %c0_0 = arith.constant 0 : index
    %0 = vector.load %arg1[%c0, %c0_0] : memref<32x128xf32, #tpu.memory_space<vmem>>, vector<32x128xf32>
    %c0_1 = arith.constant 0 : index
    %c0_2 = arith.constant 0 : index
    %1 = vector.load %arg2[%c0_1, %c0_2] : memref<1x128xf32, #tpu.memory_space<vmem>>, vector<1x128xf32>
    %c0_3 = arith.constant 0 : index
    %c0_4 = arith.constant 0 : index
    %2 = vector.load %arg3[%c0_3, %c0_4] : memref<1x128xf32, #tpu.memory_space<vmem>>, vector<1x128xf32>
    %cst = arith.constant dense<0.000000e+00> : vector<32xf32>
    %3 = vector.multi_reduction <add>, %0, %cst [1] : vector<32x128xf32> to vector<32xf32>
    %4 = vector.shape_cast %3 : vector<32xf32> to vector<32x1xf32>
    %cst_5 = arith.constant 1.280000e+02 : f32
    %5 = vector.broadcast %cst_5 : f32 to vector<32x1xf32>
    %6 = arith.divf %4, %5 : vector<32x1xf32>
    %7 = vector.broadcast %6 : vector<32x1xf32> to vector<32x128xf32>
    %8 = arith.subf %0, %7 : vector<32x128xf32>
    %9 = arith.mulf %8, %8 : vector<32x128xf32>
    %cst_6 = arith.constant dense<0.000000e+00> : vector<32xf32>
    %10 = vector.multi_reduction <add>, %9, %cst_6 [1] : vector<32x128xf32> to vector<32xf32>
    %11 = vector.shape_cast %10 : vector<32xf32> to vector<32x1xf32>
    %cst_7 = arith.constant 1.280000e+02 : f32
    %12 = vector.broadcast %cst_7 : f32 to vector<32x1xf32>
    %13 = arith.divf %11, %12 : vector<32x1xf32>
    %cst_8 = arith.constant 9.99999997E-7 : f32
    %14 = vector.broadcast %cst_8 : f32 to vector<32x1xf32>
    %15 = arith.addf %13, %14 : vector<32x1xf32>
    %16 = math.rsqrt %15 : vector<32x1xf32>
    %17 = vector.broadcast %16 : vector<32x1xf32> to vector<32x128xf32>
    %18 = arith.mulf %8, %17 : vector<32x128xf32>
    %19 = vector.broadcast %1 : vector<1x128xf32> to vector<32x128xf32>
    %20 = arith.mulf %18, %19 : vector<32x128xf32>
    %21 = vector.broadcast %2 : vector<1x128xf32> to vector<32x128xf32>
    %22 = arith.addf %20, %21 : vector<32x128xf32>
    %23 = arith.truncf %22 : vector<32x128xf32> to vector<32x128xbf16>
    %c0_9 = arith.constant 0 : index
    %c0_10 = arith.constant 0 : index
    %24 = vector.load %arg4[%c0_9, %c0_10] : memref<128x64xbf16, #tpu.memory_space<vmem>>, vector<128x64xbf16>
    %cst_11 = arith.constant dense<0.000000e+00> : vector<32x64xf32>
    %25 = tpu.matmul %23, %24, %cst_11 {dimension_numbers = #tpu.dot_dimension_numbers<[1], [0], [0], [1], [0, 0, 1, 1], [], []>} : vector<32x128xbf16>, vector<128x64xbf16>, vector<32x64xf32> -> vector<32x64xf32>
    %c0_12 = arith.constant 0 : index
    %c0_13 = arith.constant 0 : index
    %26 = vector.load %arg5[%c0_12, %c0_13] : memref<1x64xf32, #tpu.memory_space<vmem>>, vector<1x64xf32>
    %27 = vector.broadcast %26 : vector<1x64xf32> to vector<32x64xf32>
    %28 = arith.addf %25, %27 : vector<32x64xf32>
    %29 = arith.truncf %28 : vector<32x64xf32> to vector<32x64xbf16>
    %c0_14 = arith.constant 0 : index
    %c0_15 = arith.constant 0 : index
    %30 = vector.load %arg6[%c0_14, %c0_15] : memref<32x64xbf16, #tpu.memory_space<vmem>>, vector<32x64xbf16>
    tpu.vector_store %arg6[%c0_14, %c0_15], %29 {strides = array<i32>} : memref<32x64xbf16, #tpu.memory_space<vmem>>, vector<32x64xbf16>,
    return
  }
  func.func @transform_0(%arg0: i32) -> (i32, i32) {
    %c0_i32 = arith.constant 0 : i32
    %c0_i32_0 = arith.constant 0 : i32
    return %arg0, %c0_i32 : i32, i32
  }
  func.func @transform_1(%arg0: i32) -> (i32, i32) {
    %c0_i32 = arith.constant 0 : i32
    %c0_i32_0 = arith.constant 0 : i32
    %c0_i32_1 = arith.constant 0 : i32
    return %c0_i32, %c0_i32_0 : i32, i32
  }
  func.func @transform_2(%arg0: i32) -> (i32, i32) {
    %c0_i32 = arith.constant 0 : i32
    %c0_i32_0 = arith.constant 0 : i32
    %c0_i32_1 = arith.constant 0 : i32
    return %c0_i32, %c0_i32_0 : i32, i32
  }
  func.func @transform_3(%arg0: i32) -> (i32, i32) {
    %c0_i32 = arith.constant 0 : i32
    %c0_i32_0 = arith.constant 0 : i32
    %c0_i32_1 = arith.constant 0 : i32
    return %c0_i32, %c0_i32_0 : i32, i32
  }
  func.func @transform_4(%arg0: i32) -> (i32, i32) {
    %c0_i32 = arith.constant 0 : i32
    %c0_i32_0 = arith.constant 0 : i32
    %c0_i32_1 = arith.constant 0 : i32
    return %c0_i32, %c0_i32_0 : i32, i32
  }
  func.func @transform_5(%arg0: i32) -> (i32, i32) {
    %c0_i32 = arith.constant 0 : i32
    %c0_i32_0 = arith.constant 0 : i32
    return %arg0, %c0_i32 : i32, i32
  }
}

module attributes {stable_mosaic.version = 11 : i64} {
  func.func @_upsample_kernel(%arg0: i32, %arg1: memref<64x16xbf16, #tpu.memory_space<vmem>>, %arg2: memref<1x16x64xbf16, #tpu.memory_space<vmem>>, %arg3: memref<1x64x64xf32, #tpu.memory_space<vmem>>) attributes {dimension_semantics = [#tpu.dimension_semantics<parallel>], iteration_bounds = array<i64: 2>, scalar_prefetch = 0 : i64, scratch_operands = 0 : i64, tpu.core_type = #tpu.core_type<tc>, window_params = [{pipeline_mode = #tpu.pipeline_mode<synchronous>, transform_indices = @transform_0, window_bounds = array<i64: 64, 16>}, {transform_indices = @transform_1, window_bounds = array<i64: 1, 16, 64>}, {transform_indices = @transform_2, window_bounds = array<i64: 1, 64, 64>}]} {
    %c0 = arith.constant 0 : index
    %c0_0 = arith.constant 0 : index
    %0 = vector.load %arg1[%c0, %c0_0] : memref<64x16xbf16, #tpu.memory_space<vmem>>, vector<64x16xbf16>
    %c0_1 = arith.constant 0 : index
    %c0_2 = arith.constant 0 : index
    %c0_3 = arith.constant 0 : index
    %1 = vector.load %arg2[%c0_1, %c0_2, %c0_3] : memref<1x16x64xbf16, #tpu.memory_space<vmem>>, vector<1x16x64xbf16>
    %2 = vector.shape_cast %1 : vector<1x16x64xbf16> to vector<16x64xbf16>
    %cst = arith.constant dense<0.000000e+00> : vector<64x64xf32>
    %3 = tpu.matmul %0, %2, %cst {dimension_numbers = #tpu.dot_dimension_numbers<[1], [0], [0], [1], [0, 0, 1, 1], [], []>} : vector<64x16xbf16>, vector<16x64xbf16>, vector<64x64xf32> -> vector<64x64xf32>
    %c0_4 = arith.constant 0 : index
    %c0_5 = arith.constant 0 : index
    %c0_6 = arith.constant 0 : index
    %4 = vector.load %arg3[%c0_4, %c0_5, %c0_6] : memref<1x64x64xf32, #tpu.memory_space<vmem>>, vector<1x64x64xf32>
    %5 = vector.shape_cast %4 : vector<1x64x64xf32> to vector<64x64xf32>
    %6 = vector.shape_cast %3 : vector<64x64xf32> to vector<1x64x64xf32>
    tpu.vector_store %arg3[%c0_4, %c0_5, %c0_6], %6 {strides = array<i32>} : memref<1x64x64xf32, #tpu.memory_space<vmem>>, vector<1x64x64xf32>,
    return
  }
  func.func @transform_0(%arg0: i32) -> (i32, i32) {
    %c0_i32 = arith.constant 0 : i32
    %c0_i32_0 = arith.constant 0 : i32
    %c0_i32_1 = arith.constant 0 : i32
    return %c0_i32, %c0_i32_0 : i32, i32
  }
  func.func @transform_1(%arg0: i32) -> (i32, i32, i32) {
    %c0_i32 = arith.constant 0 : i32
    %c0_i32_0 = arith.constant 0 : i32
    %c0_i32_1 = arith.constant 0 : i32
    return %arg0, %c0_i32, %c0_i32_0 : i32, i32, i32
  }
  func.func @transform_2(%arg0: i32) -> (i32, i32, i32) {
    %c0_i32 = arith.constant 0 : i32
    %c0_i32_0 = arith.constant 0 : i32
    %c0_i32_1 = arith.constant 0 : i32
    return %arg0, %c0_i32, %c0_i32_0 : i32, i32, i32
  }
}

</mosaic_0001>

<bundles_post_ra>
// kernel: _lambda_.9
= control target key start
LH: loop header
LB: loop body
LE: loop exit
PB: predicated region body
PF: predicated region fallthrough
CT: control target
= control target key end

     0   :  { %s1045_s1 = inlined_call_operand.vmem [shape: bf16[768,128], index: 1, kind: input, shape index: {}]   ;;  %s1046_s0 = inlined_call_operand.vmem [shape: f32[32,768], index: 0, kind: input, shape index: {}]   ;;  %s1047_s2 = inlined_call_operand.vmem [shape: f32[1,128], index: 2, kind: input, shape index: {}]   ;;  %s1048_s3 = inlined_call_operand.vmem [shape: f32[32,128], index: 3, kind: output, shape index: {}]  }
   0x1   :  { %v746_v0 = vld [vmem:[%s1045_s1 + $0x40] sm:$0xff]   ;;  %v750_v4 = vld [vmem:[%s1045_s1 + $0x48] sm:$0xff]   ;;  %v754_v8 = vld [vmem:[%s1045_s1 + $0x50] sm:$0xff]  }
   0x2   :  { %v747_v1 = vld [vmem:[%s1045_s1 + $0xc0] sm:$0xff]   ;;  %646 = vmatprep.subr.bf16.mxu0 %v746_v0  ;;  %v751_v5 = vld [vmem:[%s1045_s1 + $0xc8] sm:$0xff]   ;;  %v755_v9 = vld [vmem:[%s1045_s1 + $0xd0] sm:$0xff]  }
   0x3   :  { %v748_v2 = vld [vmem:[%s1045_s1] sm:$0xff]   ;;  %674 = vmatprep.subr.bf16.mxu1 %v747_v1  ;;  %v752_v6 = vld [vmem:[%s1045_s1 + $0x8] sm:$0xff]   ;;  %v756_v10 = vld [vmem:[%s1045_s1 + $0x10] sm:$0xff]  }
   0x4   :  { %v749_v3 = vld [vmem:[%s1045_s1 + $0x80] sm:$0xff]   ;;  %647 = vmatpush3.bf16.msra.mxu0 %v748_v2  ;;  %v753_v7 = vld [vmem:[%s1045_s1 + $0x88] sm:$0xff]   ;;  %v757_v11 = vld [vmem:[%s1045_s1 + $0x90] sm:$0xff]  }
   0x5   :  { %675 = vmatpush3.bf16.msra.mxu1 %v749_v3  ;;  %648 = vmatprep.subr.bf16.mxu0 %v750_v4  ;;  %v758_v12 = vld [vmem:[%s1045_s1 + $0x58] sm:$0xff]   ;;  %v762_v16 = vld [vmem:[%s1045_s1 + $0x60] sm:$0xff]   ;;  %v766_v20 = vld [vmem:[%s1045_s1 + $0x68] sm:$0xff]  }
   0x6   :  { %676 = vmatprep.subr.bf16.mxu1 %v751_v5  ;;  %v759_v13 = vld [vmem:[%s1045_s1 + $0xd8] sm:$0xff]   ;;  %v763_v17 = vld [vmem:[%s1045_s1 + $0xe0] sm:$0xff]   ;;  %v767_v21 = vld [vmem:[%s1045_s1 + $0xe8] sm:$0xff]  }
   0x7   :  { %v760_v14 = vld [vmem:[%s1045_s1 + $0x18] sm:$0xff]   ;;  %v764_v18 = vld [vmem:[%s1045_s1 + $0x20] sm:$0xff]   ;;  %v768_v22 = vld [vmem:[%s1045_s1 + $0x28] sm:$0xff]  }
   0x8   :  { %649 = vmatpush3.bf16.msra.mxu0 %v752_v6  ;;  %v761_v15 = vld [vmem:[%s1045_s1 + $0x98] sm:$0xff]   ;;  %v765_v19 = vld [vmem:[%s1045_s1 + $0xa0] sm:$0xff]   ;;  %v769_v23 = vld [vmem:[%s1045_s1 + $0xa8] sm:$0xff]  }
   0x9   :  { %677 = vmatpush3.bf16.msra.mxu1 %v753_v7  ;;  %650 = vmatprep.subr.bf16.mxu0 %v754_v8  ;;  %v770_v24 = vld [vmem:[%s1045_s1 + $0x70] sm:$0xff]   ;;  %v774_v28 = vld [vmem:[%s1045_s1 + $0x78] sm:$0xff]   ;;  %v16_v32 = vld [vmem:[%s1046_s0 + $0x8] sm:$0xff] }
   0xa   :  { %678 = vmatprep.subr.bf16.mxu1 %v755_v9  ;;  %v771_v25 = vld [vmem:[%s1045_s1 + $0xf0] sm:$0xff]   ;;  %v775_v29 = vld [vmem:[%s1045_s1 + $0xf8] sm:$0xff]   ;;  %v24_v36 = vld [vmem:[%s1046_s0 + $0x48] sm:$0xff] }
   0xb   :  { %v772_v26 = vld [vmem:[%s1045_s1 + $0x30] sm:$0xff]   ;;  %v776_v30 = vld [vmem:[%s1045_s1 + $0x38] sm:$0xff]   ;;  %v15_v37 = vld [vmem:[%s1046_s0] sm:$0xff] }
   0xc   :  { %651 = vmatpush3.bf16.msra.mxu0 %v756_v10  ;;  %v773_v27 = vld [vmem:[%s1045_s1 + $0xb0] sm:$0xff]   ;;  %v777_v31 = vld [vmem:[%s1045_s1 + $0xb8] sm:$0xff]   ;;  %v23_v42 = vld [vmem:[%s1046_s0 + $0x40] sm:$0xff] }
   0xd   :  { %679 = vmatpush3.bf16.msra.mxu1 %v757_v11  ;;  %652 = vmatprep.subr.bf16.mxu0 %v758_v12  ;;  %v22_v33 = vld [vmem:[%s1046_s0 + $0x38] sm:$0xff]  ;;  %v21_v38 = vld [vmem:[%s1046_s0 + $0x30] sm:$0xff]  ;;  %v778_v44 = vld [vmem:[%s1045_s1 + $0x140] sm:$0xff]  }
   0xe   :  { %680 = vmatprep.subr.bf16.mxu1 %v759_v13  ;;  %v18_v34 = vld [vmem:[%s1046_s0 + $0x18] sm:$0xff]  ;;  %v40_v35 = vpack.c.bf16 %v22_v33, %v16_v32  ;;  %v39_v40 = vpack.c.bf16 %v21_v38, %v15_v37  ;;  %v17_v41 = vld [vmem:[%s1046_s0 + $0x10] sm:$0xff]  ;;  %v779_v45 = vld [vmem:[%s1045_s1 + $0x100] sm:$0xff]  }
   0xf   :  { %v42_v39 = vpack.c.bf16 %v24_v36, %v18_v34  ;;  %v41_v43 = vpack.c.bf16 %v23_v42, %v17_v41  ;;  %v780_v46 = vld [vmem:[%s1045_s1 + $0x148] sm:$0xff]   ;;  %v782_v48 = vld [vmem:[%s1045_s1 + $0x150] sm:$0xff]   ;;  %v784_v50 = vld [vmem:[%s1045_s1 + $0x158] sm:$0xff]  }
  0x10   :  { %653 = vmatpush3.bf16.msra.mxu0 %v760_v14  ;;  %474 = vmatprep.mubr.bf16.mxu0 %v40_v35  ;;  %v781_v47 = vld [vmem:[%s1045_s1 + $0x108] sm:$0xff]   ;;  %v783_v49 = vld [vmem:[%s1045_s1 + $0x110] sm:$0xff]   ;;  %v785_v51 = vld [vmem:[%s1045_s1 + $0x118] sm:$0xff]  }
  0x11   :  { %681 = vmatpush3.bf16.msra.mxu1 %v761_v15  ;;  %654 = vmatprep.subr.bf16.mxu0 %v762_v16  ;;  %v28_v52 = vld [vmem:[%s1046_s0 + $0x68] sm:$0xff]  ;;  %v34_v53 = vld [vmem:[%s1046_s0 + $0x98] sm:$0xff]  ;;  %v27_v54 = vld [vmem:[%s1046_s0 + $0x60] sm:$0xff] }
  0x12   :  { %682 = vmatprep.subr.bf16.mxu1 %v763_v17  ;;  %523 = vmatprep.mubr.bf16.mxu1 %v42_v39  ;;  %v33_v55 = vld [vmem:[%s1046_s0 + $0x90] sm:$0xff]  ;;  %v46_v56 = vpack.c.bf16 %v34_v53, %v28_v52  ;;  %v30_v58 = vld [vmem:[%s1046_s0 + $0x78] sm:$0xff]  ;;  %v36_v59 = vld [vmem:[%s1046_s0 + $0xa8] sm:$0xff] }
  0x13   :  { %v45_v57 = vpack.c.bf16 %v33_v55, %v27_v54  ;;  %v786_v60 = vld [vmem:[%s1045_s1 + $0x160] sm:$0xff]   ;;  %v48_v61 = vpack.c.bf16 %v36_v59, %v30_v58  ;;  %v29_v62 = vld [vmem:[%s1046_s0 + $0x70] sm:$0xff]  ;;  %v788_v2 = vld [vmem:[%s1045_s1 + $0x168] sm:$0xff]  }
  0x14   :  { %655 = vmatpush3.bf16.msra.mxu0 %v764_v18  ;;  %v35_v63 = vld [vmem:[%s1046_s0 + $0xa0] sm:$0xff]  ;;  %v20_v3 = vld [vmem:[%s1046_s0 + $0x28] sm:$0xff]  ;;  %v26_v4 = vld [vmem:[%s1046_s0 + $0x58] sm:$0xff] }
  0x15   :  { %683 = vmatpush3.bf16.msra.mxu1 %v765_v19  ;;  %656 = vmatprep.subr.bf16.mxu0 %v766_v20  ;;  %v47_v0 = vpack.c.bf16 %v35_v63, %v29_v62  ;;  %v787_v1 = vld [vmem:[%s1045_s1 + $0x120] sm:$0xff]   ;;  %v789_v5 = vld [vmem:[%s1045_s1 + $0x128] sm:$0xff]   ;;  %v44_v6 = vpack.c.bf16 %v26_v4, %v20_v3  ;;  %v38_v8 = vld [vmem:[%s1046_s0 + $0xb8] sm:$0xff] }
  0x16   :  { %684 = vmatprep.subr.bf16.mxu1 %v767_v21  ;;  %v32_v7 = vld [vmem:[%s1046_s0 + $0x88] sm:$0xff]  ;;  %v790_v9 = vld [vmem:[%s1045_s1 + $0x170] sm:$0xff]   ;;  %v792_v12 = vld [vmem:[%s1045_s1 + $0x178] sm:$0xff]  }
  0x17   :  { %v50_v10 = vpack.c.bf16 %v38_v8, %v32_v7  ;;  %v791_v11 = vld [vmem:[%s1045_s1 + $0x130] sm:$0xff]   ;;  %v793_v13 = vld [vmem:[%s1045_s1 + $0x138] sm:$0xff]   ;;  %v19_v14 = vld [vmem:[%s1046_s0 + $0x20] sm:$0xff] }
  0x18   :  { %657 = vmatpush3.bf16.msra.mxu0 %v768_v22  ;;  %v25_v15 = vld [vmem:[%s1046_s0 + $0x50] sm:$0xff]  ;;  %v31_v16 = vld [vmem:[%s1046_s0 + $0x80] sm:$0xff] }
  0x19   :  { %685 = vmatpush3.bf16.msra.mxu1 %v769_v23  ;;  %658 = vmatprep.subr.bf16.mxu0 %v770_v24  ;;  %v37_v17 = vld [vmem:[%s1046_s0 + $0xb0] sm:$0xff]  ;;  %v43_v18 = vpack.c.bf16 %v25_v15, %v19_v14  ;;  %v597_v22 = vld [vmem:[%s1047_s2] ss:$0 sm:$0xff] }
  0x1a   :  { %686 = vmatprep.subr.bf16.mxu1 %v771_v25  ;;  %v49_v19 = vpack.c.bf16 %v37_v17, %v31_v16 }
  0x1c   :  { %659 = vmatpush3.bf16.msra.mxu0 %v772_v26 }
  0x1d   :  { %687 = vmatpush3.bf16.msra.mxu1 %v773_v27  ;;  %660 = vmatprep.subr.bf16.mxu0 %v774_v28 }
  0x1e   :  { %688 = vmatprep.subr.bf16.mxu1 %v775_v29 }
  0x20   :  { %661 = vmatpush3.bf16.msra.mxu0 %v776_v30 }
  0x21   :  { %689 = vmatpush3.bf16.msra.mxu1 %v777_v31  ;;  %702 = vmatprep.subr.bf16.mxu0 %v778_v44 }
  0x22   :  { %730 = vmatprep.subr.bf16.mxu1 %v778_v44 }
  0x23   :  { %475 = vmatmul.mubr.bf16.vlgmr.msra.gmra.mrb[0].mxu0 %v39_v40 }
  0x24   :  { %524 = vmatmul.mubr.bf16.vlgmr.msra.gmra.mrb[0].mxu1 %v41_v43  ;;  %703 = vmatpush3.bf16.msra.mxu0 %v779_v45 }
  0x25   :  { %738 = vmatpush3.bf16.msra.mxu1 %v779_v45  ;;  %704 = vmatprep.subr.bf16.mxu0 %v780_v46 }
  0x26   :  { %731 = vmatprep.subr.bf16.mxu1 %v780_v46  ;;  %482 = vmatprep.mubr.bf16.mxu0 %v46_v56 }
  0x27   :  { %531 = vmatprep.mubr.bf16.mxu1 %v48_v61 }
  0x28   :  { %705 = vmatpush3.bf16.msra.mxu0 %v781_v47 }
  0x29   :  { %739 = vmatpush3.bf16.msra.mxu1 %v781_v47  ;;  %706 = vmatprep.subr.bf16.mxu0 %v782_v48 }
  0x2a   :  { %732 = vmatprep.subr.bf16.mxu1 %v782_v48 }
  0x2b   :  { %483 = vmatmul.mubr.bf16.gmra.mrb[4].mxu0 %v45_v57 }
  0x2c   :  { %707 = vmatpush3.bf16.msra.mxu0 %v783_v49  ;;  %532 = vmatmul.mubr.bf16.gmra.mrb[4].mxu1 %v47_v0 }
  0x2d   :  { %740 = vmatpush3.bf16.msra.mxu1 %v783_v49  ;;  %708 = vmatprep.subr.bf16.mxu0 %v784_v50 }
  0x2e   :  { %733 = vmatprep.subr.bf16.mxu1 %v784_v50  ;;  %572 = vmatprep.mubr.bf16.mxu0 %v44_v6 }
  0x2f   :  { %580 = vmatprep.mubr.bf16.mxu1 %v50_v10 }
  0x30   :  { %709 = vmatpush3.bf16.msra.mxu0 %v785_v51 }
  0x31   :  { %741 = vmatpush3.bf16.msra.mxu1 %v785_v51  ;;  %710 = vmatprep.subr.bf16.mxu0 %v786_v60 }
  0x32   :  { %734 = vmatprep.subr.bf16.mxu1 %v786_v60 }
  0x34   :  { %711 = vmatpush3.bf16.msra.mxu0 %v787_v1 }
  0x35   :  { %742 = vmatpush3.bf16.msra.mxu1 %v787_v1  ;;  %712 = vmatprep.subr.bf16.mxu0 %v788_v2 }
  0x36   :  { %735 = vmatprep.subr.bf16.mxu1 %v788_v2 }
  0x38   :  { %713 = vmatpush3.bf16.msra.mxu0 %v789_v5 }
  0x39   :  { %743 = vmatpush3.bf16.msra.mxu1 %v789_v5  ;;  %714 = vmatprep.subr.bf16.mxu0 %v790_v9 }
  0x3a   :  { %736 = vmatprep.subr.bf16.mxu1 %v790_v9 }
  0x3c   :  { %715 = vmatpush3.bf16.msra.mxu0 %v791_v11 }
  0x3d   :  { %744 = vmatpush3.bf16.msra.mxu1 %v791_v11  ;;  %716 = vmatprep.subr.bf16.mxu0 %v792_v12 }
  0x3e   :  { %737 = vmatprep.subr.bf16.mxu1 %v792_v12 }
  0x40   :  { %717 = vmatpush3.bf16.msra.mxu0 %v793_v13 }
  0x41   :  { %745 = vmatpush3.bf16.msra.mxu1 %v793_v13 }
  0x43   :  { %573 = vmatmul.mubr.bf16.vlgmr.msra.gmra.mrb[8].mxu0 %v43_v18 }
  0x44   :  { %581 = vmatmul.mubr.bf16.vlgmr.msra.gmra.mrb[8].mxu1 %v49_v19 }
  0xf6   :  { %v662_v20 = vpop.f32.mrb[0].mxu0 }
  0xf7   :  { %v690_v21 = vpop.f32.mrb[0].mxu1  ;;  %v663_v23 = vpop.f32.mrb[1].mxu0 }
  0xf8   :  { %v664_v24 = vadd.f32 %v663_v23, %v662_v20  ;;  %v691_v25 = vpop.f32.mrb[1].mxu1  ;;  %v665_v26 = vpop.f32.mrb[2].mxu0 }
  0xf9   :  { %v692_v27 = vadd.f32 %v691_v25, %v690_v21  ;;  %v693_v28 = vpop.f32.mrb[2].mxu1  ;;  %v666_v29 = vpop.f32.mrb[3].mxu0 }
  0xfa   :  { %v477_v30 = vadd.f32 %v664_v24, %v597_v22  ;;  %v667_v31 = vadd.f32 %v666_v29, %v665_v26  ;;  %v694_v32 = vpop.f32.mrb[3].mxu1 }
  0xfb   :  { %v695_v33 = vadd.f32 %v694_v32, %v693_v28 }
  0xfc   :  { %v526_v34 = vadd.f32 %v692_v27, %v477_v30  ;;  %v480_v35 = vadd.f32 %v667_v31, %v597_v22 }
  0xfe   :  { %v529_v36 = vadd.f32 %v695_v33, %v480_v35  ;;  %v668_v37 = vpop.f32.mrb[4].mxu0 }
  0xff   :  { %v669_v38 = vpop.f32.mrb[5].mxu0  ;;  %v696_v41 = vpop.f32.mrb[4].mxu1 }
 0x100   :  { %v670_v39 = vadd.f32 %v669_v38, %v668_v37  ;;  %v671_v40 = vpop.f32.mrb[6].mxu0  ;;  %v697_v45 = vpop.f32.mrb[5].mxu1 }
 0x101   :  { %v672_v42 = vpop.f32.mrb[7].mxu0  ;;  %v698_v46 = vadd.f32 %v697_v45, %v696_v41  ;;  %v699_v47 = vpop.f32.mrb[6].mxu1 }
 0x102   :  { %v485_v43 = vadd.f32 %v670_v39, %v597_v22  ;;  %v673_v44 = vadd.f32 %v672_v42, %v671_v40  ;;  %v700_v49 = vpop.f32.mrb[7].mxu1 }
 0x103   :  { %v701_v51 = vadd.f32 %v700_v49, %v699_v47 }
 0x104   :  { %v488_v48 = vadd.f32 %v673_v44, %v597_v22  ;;  %v534_v50 = vadd.f32 %v698_v46, %v485_v43 }
 0x106   :  { %v537_v52 = vadd.f32 %v701_v51, %v488_v48 }
 0x116   :  { %v718_v53 = vpop.f32.mrb[8].mxu0 }
 0x117   :  { %v724_v54 = vpop.f32.mrb[8].mxu1  ;;  %v719_v55 = vpop.f32.mrb[9].mxu0 }
 0x118   :  { %v720_v56 = vadd.f32 %v719_v55, %v718_v53  ;;  %v725_v57 = vpop.f32.mrb[9].mxu1  ;;  %v721_v58 = vpop.f32.mrb[10].mxu0 }
 0x119   :  { %v726_v59 = vadd.f32 %v725_v57, %v724_v54  ;;  %v727_v60 = vpop.f32.mrb[10].mxu1  ;;  %v722_v61 = vpop.f32.mrb[11].mxu0 }
 0x11a   :  { %v575_v62 = vadd.f32 %v720_v56, %v526_v34  ;;  %v723_v63 = vadd.f32 %v722_v61, %v721_v58  ;;  %v728_v0 = vpop.f32.mrb[11].mxu1 }
 0x11b   :  { %v583_v1 = vadd.f32 %v726_v59, %v534_v50  ;;  %v729_v2 = vadd.f32 %v728_v0, %v727_v60 }
 0x11c   :  { %589 = vst [vmem:[%s1048_s3] sm:$0xff] %v575_v62  ;;  %v578_v3 = vadd.f32 %v723_v63, %v529_v36 }
 0x11d   :  { %591 = vst [vmem:[%s1048_s3 + $0x10] sm:$0xff] %v583_v1  ;;  %v586_v4 = vadd.f32 %v729_v2, %v537_v52 }
 0x11e   :  { %590 = vst [vmem:[%s1048_s3 + $0x8] sm:$0xff] %v578_v3 }
 0x11f   :  { %592 = vst [vmem:[%s1048_s3 + $0x18] sm:$0xff] %v586_v4 }

// kernel: _lambda_.10
= control target key start
LH: loop header
LB: loop body
LE: loop exit
PB: predicated region body
PF: predicated region fallthrough
CT: control target
= control target key end

     0   :  { %s2678_s0 = inlined_call_operand.vmem [shape: f32[256,128], index: 0, kind: input, shape index: {}]   ;;  %s2679_s3 = inlined_call_operand.vmem [shape: bf16[128,384], index: 3, kind: input, shape index: {}]   ;;  %s2680_s1 = inlined_call_operand.vmem [shape: f32[1,128], index: 1, kind: input, shape index: {}]   ;;  %s2681_s2 = inlined_call_operand.vmem [shape: f32[1,128], index: 2, kind: input, shape index: {}]   ;;  %s2682_s4 = inlined_call_operand.vmem [shape: f32[1,384], index: 4, kind: input, shape index: {}]   ;;  %s2683_s5 = inlined_call_operand.vmem [shape: bf16[256,384], index: 5, kind: output, shape index: {}]  }
   0x1   :  { %v1792_v0 = vld [vmem:[%s2678_s0] sm:$0xff]  ;;  %v1804_v2 = vld [vmem:[%s2678_s0 + $0x8] sm:$0xff]  ;;  %v1816_v4 = vld [vmem:[%s2678_s0 + $0x10] sm:$0xff] }
   0x2   :  { %v1797_v1 = vld [vmem:[%s2678_s0 + $0xc0] sm:$0xff]  ;;  %55 = vadd.xlane.f32.xlu0 %v1792_v0  ;;  %v1809_v3 = vld [vmem:[%s2678_s0 + $0xc8] sm:$0xff]  ;;  %v1821_v5 = vld [vmem:[%s2678_s0 + $0x18] sm:$0xff] }
   0x3   :  { %103 = vadd.xlane.f32.xlu1 %v1797_v1  ;;  %v1828_v6 = vld [vmem:[%s2678_s0 + $0xd0] sm:$0xff]  ;;  %v1833_v7 = vld [vmem:[%s2678_s0 + $0xd8] sm:$0xff]  ;;  %v1840_v8 = vld [vmem:[%s2678_s0 + $0x20] sm:$0xff] }
   0x4   :  { %v1845_v9 = vld [vmem:[%s2678_s0 + $0x28] sm:$0xff]  ;;  %v1852_v10 = vld [vmem:[%s2678_s0 + $0xe0] sm:$0xff]  ;;  %v1864_v12 = vld [vmem:[%s2678_s0 + $0x30] sm:$0xff] }
   0x5   :  { %v1857_v11 = vld [vmem:[%s2678_s0 + $0xe8] sm:$0xff]  ;;  %v1869_v13 = vld [vmem:[%s2678_s0 + $0x38] sm:$0xff]  ;;  %v1876_v14 = vld [vmem:[%s2678_s0 + $0xf0] sm:$0xff] }
   0x6   :  { %57 = vadd.xlane.f32.xlu0 %v1804_v2  ;;  %v1881_v15 = vld [vmem:[%s2678_s0 + $0xf8] sm:$0xff]  ;;  %v1888_v16 = vld [vmem:[%s2678_s0 + $0x40] sm:$0xff]  ;;  %v1893_v17 = vld [vmem:[%s2678_s0 + $0x48] sm:$0xff] }
   0x7   :  { %105 = vadd.xlane.f32.xlu1 %v1809_v3  ;;  %v1900_v18 = vld [vmem:[%s2678_s0 + $0x50] sm:$0xff]  ;;  %v1905_v19 = vld [vmem:[%s2678_s0 + $0x58] sm:$0xff]  ;;  %v1912_v20 = vld [vmem:[%s2678_s0 + $0x60] sm:$0xff] }
   0x8   :  { %v1917_v21 = vld [vmem:[%s2678_s0 + $0x68] sm:$0xff]  ;;  %v1924_v22 = vld [vmem:[%s2678_s0 + $0x70] sm:$0xff]  ;;  %v1929_v23 = vld [vmem:[%s2678_s0 + $0x78] sm:$0xff] }
   0x9   :  { %v1936_v24 = vld [vmem:[%s2678_s0 + $0x80] sm:$0xff]  ;;  %v1941_v25 = vld [vmem:[%s2678_s0 + $0x88] sm:$0xff]  ;;  %v1948_v26 = vld [vmem:[%s2678_s0 + $0x90] sm:$0xff] }
   0xa   :  { %59 = vadd.xlane.f32.xlu0 %v1816_v4  ;;  %v1953_v27 = vld [vmem:[%s2678_s0 + $0x98] sm:$0xff]  ;;  %v1960_v28 = vld [vmem:[%s2678_s0 + $0xa0] sm:$0xff]  ;;  %v1965_v29 = vld [vmem:[%s2678_s0 + $0xa8] sm:$0xff] }
   0xb   :  { %61 = vadd.xlane.f32.xlu1 %v1821_v5  ;;  %v1972_v30 = vld [vmem:[%s2678_s0 + $0xb0] sm:$0xff]  ;;  %v1977_v31 = vld [vmem:[%s2678_s0 + $0xb8] sm:$0xff]  ;;  %v1664_v33 = vld [vmem:[%s2679_s3] ss:$12 sps:$4 sm:$0xff]  }
   0xc   :  { %v1662_v32 = vld [vmem:[%s2679_s3 + $0x4] ss:$12 sps:$4 sm:$0xff]   ;;  %v1665_v34 = vld [vmem:[%s2679_s3 + $0x1c] ss:$12 sps:$4 sm:$0xff]  }
   0xd   :  { %677 = vmatprep.subr.bf16.mxu0 %v1662_v32  ;;  %1645 = vmatprep.subr.bf16.mxu1 %v1662_v32 }
   0xe   :  { %107 = vadd.xlane.f32.xlu0 %v1828_v6  ;;  %678 = vmatpush1.bf16.msra.mxu0 %v1664_v33 }
   0xf   :  { %109 = vadd.xlane.f32.xlu1 %v1833_v7  ;;  %1653 = vmatpush1.bf16.msra.mxu1 %v1664_v33  ;;  %v1667_v33 = vld [vmem:[%s2679_s3 + $0x18] ss:$12 sps:$4 sm:$0xff]  }
  0x10   :  { %679 = vmatprep.subr.bf16.mxu0 %v1665_v34  ;;  %1646 = vmatprep.subr.bf16.mxu1 %v1665_v34 }
  0x12   :  { %63 = vadd.xlane.f32.xlu0 %v1840_v8  ;;  %680 = vmatpush1.bf16.msra.mxu0 %v1667_v33 }
  0x13   :  { %65 = vadd.xlane.f32.xlu1 %v1845_v9  ;;  %1654 = vmatpush1.bf16.msra.mxu1 %v1667_v33 }
  0x16   :  { %111 = vadd.xlane.f32.xlu0 %v1852_v10 }
  0x17   :  { %113 = vadd.xlane.f32.xlu1 %v1857_v11 }
  0x1a   :  { %67 = vadd.xlane.f32.xlu0 %v1864_v12 }
  0x1b   :  { %69 = vadd.xlane.f32.xlu1 %v1869_v13 }
  0x1e   :  { %115 = vadd.xlane.f32.xlu0 %v1876_v14 }
  0x1f   :  { %117 = vadd.xlane.f32.xlu1 %v1881_v15 }
  0x22   :  { %71 = vadd.xlane.f32.xlu0 %v1888_v16 }
  0x23   :  { %73 = vadd.xlane.f32.xlu1 %v1893_v17 }
  0x26   :  { %75 = vadd.xlane.f32.xlu0 %v1900_v18 }
  0x27   :  { %77 = vadd.xlane.f32.xlu1 %v1905_v19 }
  0x2a   :  { %79 = vadd.xlane.f32.xlu0 %v1912_v20 }
  0x2b   :  { %81 = vadd.xlane.f32.xlu1 %v1917_v21 }
  0x2e   :  { %83 = vadd.xlane.f32.xlu0 %v1924_v22 }
  0x2f   :  { %85 = vadd.xlane.f32.xlu1 %v1929_v23 }
  0x32   :  { %87 = vadd.xlane.f32.xlu0 %v1936_v24 }
  0x33   :  { %89 = vadd.xlane.f32.xlu1 %v1941_v25 }
  0x36   :  { %91 = vadd.xlane.f32.xlu0 %v1948_v26 }
  0x37   :  { %93 = vadd.xlane.f32.xlu1 %v1953_v27 }
  0x3a   :  { %95 = vadd.xlane.f32.xlu0 %v1960_v28 }
  0x3b   :  { %97 = vadd.xlane.f32.xlu1 %v1965_v29 }
  0x3e   :  { %99 = vadd.xlane.f32.xlu0 %v1972_v30 }
  0x3f   :  { %101 = vadd.xlane.f32.xlu1 %v1977_v31 }
  0x8f   :  { %v56_v35 = vpop.xlane.xlu0 %55 }
  0x90   :  { %v104_v36 = vpop.xlane.xlu1 %103  ;;  %v120_v37 = vmul.f32 0.0078125, %v56_v35 }
  0x91   :  { %v144_v38 = vmul.f32 0.0078125, %v104_v36 }
  0x92   :  { %v1991_v39 = vsub.f32 %v1792_v0, %v120_v37 }
  0x93   :  { %v1994_v40 = vsub.f32 %v1797_v1, %v144_v38  ;;  %v58_v41 = vpop.xlane.xlu0 %57 }
  0x94   :  { %v106_v42 = vpop.xlane.xlu1 %105  ;;  %v121_v43 = vmul.f32 0.0078125, %v58_v41  ;;  %v184_v44 = vmul.f32 %v1991_v39, %v1991_v39 }
  0x95   :  { %v145_v45 = vmul.f32 0.0078125, %v106_v42  ;;  %v208_v48 = vmul.f32 %v1994_v40, %v1994_v40 }
  0x96   :  { %v1999_v46 = vsub.f32 %v1804_v2, %v121_v43  ;;  %216 = vadd.xlane.f32.xlu0 %v184_v44 }
  0x97   :  { %v2002_v47 = vsub.f32 %v1809_v3, %v145_v45  ;;  %v60_v49 = vpop.xlane.xlu0 %59  ;;  %v1670_v45 = vld [vmem:[%s2679_s3 + $0x30] ss:$12 sps:$4 sm:$0xff]  }
  0x98   :  { %v62_v50 = vpop.xlane.xlu1 %61  ;;  %v122_v51 = vmul.f32 0.0078125, %v60_v49  ;;  %v185_v52 = vmul.f32 %v1999_v46, %v1999_v46 }
  0x99   :  { %v123_v53 = vmul.f32 0.0078125, %v62_v50  ;;  %v209_v56 = vmul.f32 %v2002_v47, %v2002_v47 }
  0x9a   :  { %v2009_v54 = vsub.f32 %v1816_v4, %v122_v51  ;;  %264 = vadd.xlane.f32.xlu0 %v208_v48  ;;  %218 = vadd.xlane.f32.xlu1 %v185_v52  ;;  %v1671_v52 = vld [vmem:[%s2679_s3 + $0x4c] ss:$12 sps:$4 sm:$0xff]  }
  0x9b   :  { %v2012_v55 = vsub.f32 %v1821_v5, %v123_v53  ;;  %v108_v57 = vpop.xlane.xlu0 %107 }
  0x9c   :  { %v110_v58 = vpop.xlane.xlu1 %109  ;;  %v146_v59 = vmul.f32 0.0078125, %v108_v57  ;;  %v186_v60 = vmul.f32 %v2009_v54, %v2009_v54  ;;  %v1673_v57 = vld [vmem:[%s2679_s3 + $0x48] ss:$12 sps:$4 sm:$0xff]  }
  0x9d   :  { %v147_v61 = vmul.f32 0.0078125, %v110_v58  ;;  %v187_v0 = vmul.f32 %v2012_v55, %v2012_v55 }
  0x9e   :  { %v2019_v62 = vsub.f32 %v1828_v6, %v146_v59  ;;  %266 = vadd.xlane.f32.xlu1 %v209_v56  ;;  %220 = vadd.xlane.f32.xlu0 %v186_v60 }
  0x9f   :  { %v2022_v63 = vsub.f32 %v1833_v7, %v147_v61  ;;  %v64_v1 = vpop.xlane.xlu0 %63 }
  0xa0   :  { %v66_v2 = vpop.xlane.xlu1 %65  ;;  %v124_v3 = vmul.f32 0.0078125, %v64_v1  ;;  %v210_v4 = vmul.f32 %v2019_v62, %v2019_v62 }
  0xa1   :  { %v125_v5 = vmul.f32 0.0078125, %v66_v2  ;;  %v211_v7 = vmul.f32 %v2022_v63, %v2022_v63 }
  0xa2   :  { %v2029_v32 = vsub.f32 %v1840_v8, %v124_v3  ;;  %222 = vadd.xlane.f32.xlu1 %v187_v0  ;;  %268 = vadd.xlane.f32.xlu0 %v210_v4  ;;  %v1674_v0 = vld [vmem:[%s2679_s3 + $0x64] ss:$12 sps:$4 sm:$0xff]   ;;  %v1676_v3 = vld [vmem:[%s2679_s3 + $0x60] ss:$12 sps:$4 sm:$0xff]  }
  0xa3   :  { %v2032_v6 = vsub.f32 %v1845_v9, %v125_v5  ;;  %v112_v34 = vpop.xlane.xlu0 %111  ;;  %v1668_v9 = vld [vmem:[%s2679_s3 + $0x34] ss:$12 sps:$4 sm:$0xff]  }
  0xa4   :  { %v114_v35 = vpop.xlane.xlu1 %113  ;;  %v148_v36 = vmul.f32 0.0078125, %v112_v34  ;;  %v188_v37 = vmul.f32 %v2029_v32, %v2029_v32  ;;  %681 = vmatprep.subr.bf16.mxu0 %v1668_v9  ;;  %1647 = vmatprep.subr.bf16.mxu1 %v1668_v9  ;;  %v1677_v34 = vld [vmem:[%s2679_s3 + $0x7c] ss:$12 sps:$4 sm:$0xff]  }
  0xa5   :  { %v149_v8 = vmul.f32 0.0078125, %v114_v35  ;;  %v189_v42 = vmul.f32 %v2032_v6, %v2032_v6  ;;  %682 = vmatpush1.bf16.msra.mxu0 %v1670_v45  ;;  %1655 = vmatpush1.bf16.msra.mxu1 %v1670_v45 }
  0xa6   :  { %v2045_v38 = vsub.f32 %v1852_v10, %v148_v36  ;;  %270 = vadd.xlane.f32.xlu1 %v211_v7  ;;  %224 = vadd.xlane.f32.xlu0 %v188_v37  ;;  %v1679_v37 = vld [vmem:[%s2679_s3 + $0x78] ss:$12 sps:$4 sm:$0xff]  }
  0xa7   :  { %v2048_v41 = vsub.f32 %v1857_v11, %v149_v8  ;;  %v68_v43 = vpop.xlane.xlu0 %67  ;;  %683 = vmatprep.subr.bf16.mxu0 %v1671_v52  ;;  %1648 = vmatprep.subr.bf16.mxu1 %v1671_v52 }
  0xa8   :  { %v70_v44 = vpop.xlane.xlu1 %69  ;;  %v126_v48 = vmul.f32 0.0078125, %v68_v43  ;;  %v212_v10 = vmul.f32 %v2045_v38, %v2045_v38 }
  0xa9   :  { %v127_v49 = vmul.f32 0.0078125, %v70_v44  ;;  %v213_v51 = vmul.f32 %v2048_v41, %v2048_v41  ;;  %684 = vmatpush1.bf16.msra.mxu0 %v1673_v57  ;;  %1656 = vmatpush1.bf16.msra.mxu1 %v1673_v57  ;;  %v1680_v44 = vld [vmem:[%s2679_s3 + $0x94] ss:$12 sps:$4 sm:$0xff]  }
  0xaa   :  { %v2058_v11 = vsub.f32 %v1864_v12, %v126_v48  ;;  %226 = vadd.xlane.f32.xlu1 %v189_v42  ;;  %272 = vadd.xlane.f32.xlu0 %v212_v10  ;;  %v1682_v10 = vld [vmem:[%s2679_s3 + $0x90] ss:$12 sps:$4 sm:$0xff]  }
  0xab   :  { %v2061_v50 = vsub.f32 %v1869_v13, %v127_v49  ;;  %v116_v53 = vpop.xlane.xlu0 %115  ;;  %685 = vmatprep.subr.bf16.mxu0 %v1674_v0  ;;  %1649 = vmatprep.subr.bf16.mxu1 %v1674_v0 }
  0xac   :  { %v118_v56 = vpop.xlane.xlu1 %117  ;;  %v150_v12 = vmul.f32 0.0078125, %v116_v53  ;;  %v190_v58 = vmul.f32 %v2058_v11, %v2058_v11 }
  0xad   :  { %v151_v59 = vmul.f32 0.0078125, %v118_v56  ;;  %v191_v61 = vmul.f32 %v2061_v50, %v2061_v50  ;;  %686 = vmatpush1.bf16.msra.mxu0 %v1676_v3  ;;  %1657 = vmatpush1.bf16.msra.mxu1 %v1676_v3  ;;  %v1683_v56 = vld [vmem:[%s2679_s3 + $0xac] ss:$12 sps:$4 sm:$0xff]  }
  0xae   :  { %v2074_v13 = vsub.f32 %v1876_v14, %v150_v12  ;;  %274 = vadd.xlane.f32.xlu1 %v213_v51  ;;  %228 = vadd.xlane.f32.xlu0 %v190_v58  ;;  %v1685_v58 = vld [vmem:[%s2679_s3 + $0xa8] ss:$12 sps:$4 sm:$0xff]  }
  0xaf   :  { %v2077_v60 = vsub.f32 %v1881_v15, %v151_v59  ;;  %v72_v1 = vpop.xlane.xlu0 %71  ;;  %687 = vmatprep.subr.bf16.mxu0 %v1677_v34  ;;  %1650 = vmatprep.subr.bf16.mxu1 %v1677_v34 }
  0xb0   :  { %v74_v2 = vpop.xlane.xlu1 %73  ;;  %v128_v14 = vmul.f32 0.0078125, %v72_v1  ;;  %v214_v4 = vmul.f32 %v2074_v13, %v2074_v13 }
  0xb1   :  { %v129_v5 = vmul.f32 0.0078125, %v74_v2  ;;  %v215_v33 = vmul.f32 %v2077_v60, %v2077_v60  ;;  %688 = vmatpush1.bf16.msra.mxu0 %v1679_v37  ;;  %1658 = vmatpush1.bf16.msra.mxu1 %v1679_v37 }
  0xb2   :  { %v2090_v15 = vsub.f32 %v1888_v16, %v128_v14  ;;  %230 = vadd.xlane.f32.xlu1 %v191_v61  ;;  %276 = vadd.xlane.f32.xlu0 %v214_v4  ;;  %v1758_v14 = vmov 0  }
  0xb3   :  { %v2093_v7 = vsub.f32 %v1893_v17, %v129_v5  ;;  %v76_v35 = vpop.xlane.xlu0 %75  ;;  %689 = vmatprep.subr.bf16.mxu0 %v1680_v44  ;;  %1651 = vmatprep.subr.bf16.mxu1 %v1680_v44 }
  0xb4   :  { %v78_v36 = vpop.xlane.xlu1 %77  ;;  %v130_v16 = vmul.f32 0.0078125, %v76_v35  ;;  %v192_v8 = vmul.f32 %v2090_v15, %v2090_v15  ;;  %709 = vmatprep.mubr.bf16.mxu0 %v1758_v14  ;;  %829 = vmatprep.mubr.bf16.mxu1 %v1758_v14  ;;  %v2160_v35 = vld [vmem:[%s2679_s3 + $0x8] ss:$12 sps:$4 sm:$0xff]  }
  0xb5   :  { %v131_v9 = vmul.f32 0.0078125, %v78_v36  ;;  %v193_v43 = vmul.f32 %v2093_v7, %v2093_v7  ;;  %690 = vmatpush1.bf16.msra.mxu0 %v1682_v10  ;;  %1659 = vmatpush1.bf16.msra.mxu1 %v1682_v10 }
  0xb6   :  { %v2106_v17 = vsub.f32 %v1900_v18, %v130_v16  ;;  %278 = vadd.xlane.f32.xlu1 %v215_v33  ;;  %232 = vadd.xlane.f32.xlu0 %v192_v8 }
  0xb7   :  { %v2109_v42 = vsub.f32 %v1905_v19, %v131_v9  ;;  %v80_v45 = vpop.xlane.xlu0 %79  ;;  %691 = vmatprep.subr.bf16.mxu0 %v1683_v56  ;;  %1652 = vmatprep.subr.bf16.mxu1 %v1683_v56 }
  0xb8   :  { %v82_v48 = vpop.xlane.xlu1 %81  ;;  %v132_v18 = vmul.f32 0.0078125, %v80_v45  ;;  %v194_v49 = vmul.f32 %v2106_v17, %v2106_v17 }
  0xb9   :  { %v133_v51 = vmul.f32 0.0078125, %v82_v48  ;;  %v195_v53 = vmul.f32 %v2109_v42, %v2109_v42  ;;  %692 = vmatpush1.bf16.msra.mxu0 %v1685_v58  ;;  %1660 = vmatpush1.bf16.msra.mxu1 %v1685_v58 }
  0xba   :  { %v2122_v19 = vsub.f32 %v1912_v20, %v132_v18  ;;  %234 = vadd.xlane.f32.xlu1 %v193_v43  ;;  %236 = vadd.xlane.f32.xlu0 %v194_v49 }
  0xbb   :  { %v2125_v52 = vsub.f32 %v1917_v21, %v133_v51  ;;  %v84_v57 = vpop.xlane.xlu0 %83  ;;  %1597 = vmatprep.subr.bf16.mxu1 %v2160_v35 }
  0xbc   :  { %v86_v12 = vpop.xlane.xlu1 %85  ;;  %v134_v20 = vmul.f32 0.0078125, %v84_v57  ;;  %v196_v59 = vmul.f32 %v2122_v19, %v2122_v19 }
  0xbd   :  { %v135_v61 = vmul.f32 0.0078125, %v86_v12  ;;  %v197_v1 = vmul.f32 %v2125_v52, %v2125_v52 }
  0xbe   :  { %v2138_v21 = vsub.f32 %v1924_v22, %v134_v20  ;;  %238 = vadd.xlane.f32.xlu1 %v195_v53  ;;  %240 = vadd.xlane.f32.xlu0 %v196_v59 }
  0xbf   :  { %v2141_v0 = vsub.f32 %v1929_v23, %v135_v61  ;;  %v88_v2 = vpop.xlane.xlu0 %87 }
  0xc0   :  { %v90_v3 = vpop.xlane.xlu1 %89  ;;  %v136_v4 = vmul.f32 0.0078125, %v88_v2  ;;  %v198_v22 = vmul.f32 %v2138_v21, %v2138_v21 }
  0xc1   :  { %v137_v5 = vmul.f32 0.0078125, %v90_v3  ;;  %v199_v34 = vmul.f32 %v2141_v0, %v2141_v0 }
  0xc2   :  { %v2150_v33 = vsub.f32 %v1936_v24, %v136_v4  ;;  %242 = vadd.xlane.f32.xlu1 %v197_v1  ;;  %244 = vadd.xlane.f32.xlu0 %v198_v22 }
  0xc3   :  { %v2153_v23 = vsub.f32 %v1941_v25, %v137_v5  ;;  %v92_v36 = vpop.xlane.xlu0 %91 }
  0xc4   :  { %v94_v37 = vpop.xlane.xlu1 %93  ;;  %v138_v16 = vmul.f32 0.0078125, %v92_v36  ;;  %v200_v24 = vmul.f32 %v2150_v33, %v2150_v33 }
  0xc5   :  { %v139_v8 = vmul.f32 0.0078125, %v94_v37  ;;  %v201_v43 = vmul.f32 %v2153_v23, %v2153_v23 }
  0xc6   :  { %v2166_v25 = vsub.f32 %v1948_v26, %v138_v16  ;;  %246 = vadd.xlane.f32.xlu1 %v199_v34  ;;  %248 = vadd.xlane.f32.xlu0 %v200_v24 }
  0xc7   :  { %v2169_v9 = vsub.f32 %v1953_v27, %v139_v8  ;;  %v96_v44 = vpop.xlane.xlu0 %95 }
  0xc8   :  { %v98_v45 = vpop.xlane.xlu1 %97  ;;  %v140_v48 = vmul.f32 0.0078125, %v96_v44  ;;  %v202_v10 = vmul.f32 %v2166_v25, %v2166_v25 }
  0xc9   :  { %v141_v18 = vmul.f32 0.0078125, %v98_v45  ;;  %v203_v27 = vmul.f32 %v2169_v9, %v2169_v9 }
  0xca   :  { %v2176_v49 = vsub.f32 %v1960_v28, %v140_v48  ;;  %250 = vadd.xlane.f32.xlu1 %v201_v43  ;;  %252 = vadd.xlane.f32.xlu0 %v202_v10 }
  0xcb   :  { %v2179_v26 = vsub.f32 %v1965_v29, %v141_v18  ;;  %v100_v51 = vpop.xlane.xlu0 %99 }
  0xcc   :  { %v102_v53 = vpop.xlane.xlu1 %101  ;;  %v142_v56 = vmul.f32 0.0078125, %v100_v51  ;;  %v204_v57 = vmul.f32 %v2176_v49, %v2176_v49 }
  0xcd   :  { %v143_v12 = vmul.f32 0.0078125, %v102_v53  ;;  %v205_v29 = vmul.f32 %v2179_v26, %v2179_v26 }
  0xce   :  { %v2186_v58 = vsub.f32 %v1972_v30, %v142_v56  ;;  %254 = vadd.xlane.f32.xlu1 %v203_v27  ;;  %256 = vadd.xlane.f32.xlu0 %v204_v57 }
  0xcf   :  { %v2189_v28 = vsub.f32 %v1977_v31, %v143_v12 }
  0xd0   :  { %v206_v20 = vmul.f32 %v2186_v58, %v2186_v58 }
  0xd1   :  { %v207_v59 = vmul.f32 %v2189_v28, %v2189_v28 }
  0xd2   :  { %258 = vadd.xlane.f32.xlu1 %v205_v29  ;;  %260 = vadd.xlane.f32.xlu0 %v206_v20  ;;  %v2201_v29 = vld [vmem:[%s2680_s1] ss:$0 sm:$0xff] }
  0xd6   :  { %262 = vadd.xlane.f32.xlu1 %v207_v59 }
 0x123   :  { %v217_v61 = vpop.xlane.xlu0 %216 }
 0x124   :  { %v280_v30 = vmul.f32 0.0078125, %v217_v61 }
 0x126   :  { %v312_v1 = vadd.f32 1e-06, %v280_v30 }
 0x127   :  { %v219_v2 = vpop.xlane.xlu1 %218  ;;  %v265_v3 = vpop.xlane.xlu0 %264 }
 0x128   :  { %1694 = vrsqrt.f32 %v312_v1  ;;  %v281_v31 = vmul.f32 0.0078125, %v219_v2  ;;  %v304_v4 = vmul.f32 0.0078125, %v265_v3 }
 0x12a   :  { %v313_v22 = vadd.f32 1e-06, %v281_v31  ;;  %v336_v5 = vadd.f32 1e-06, %v304_v4 }
 0x12b   :  { %v267_v34 = vpop.xlane.xlu1 %266  ;;  %v221_v36 = vpop.xlane.xlu0 %220 }
 0x12c   :  { %1696 = vrsqrt.f32 %v313_v22  ;;  %v305_v37 = vmul.f32 0.0078125, %v267_v34  ;;  %v282_v16 = vmul.f32 0.0078125, %v221_v36  ;;  %v2208_v22 = vld [vmem:[%s2681_s2] ss:$0 sm:$0xff] }
 0x12d   :  { %1698 = vrsqrt.f32 %v336_v5 }
 0x12e   :  { %v337_v24 = vadd.f32 1e-06, %v305_v37  ;;  %v314_v8 = vadd.f32 1e-06, %v282_v16 }
 0x12f   :  { %v223_v43 = vpop.xlane.xlu1 %222  ;;  %v269_v44 = vpop.xlane.xlu0 %268 }
 0x130   :  { %1700 = vrsqrt.f32 %v337_v24  ;;  %v283_v45 = vmul.f32 0.0078125, %v223_v43  ;;  %v306_v48 = vmul.f32 0.0078125, %v269_v44 }
 0x131   :  { %1702 = vrsqrt.f32 %v314_v8 }
 0x132   :  { %v1695_v10 = vpop.eup %1694  ;;  %v315_v18 = vadd.f32 1e-06, %v283_v45  ;;  %v338_v27 = vadd.f32 1e-06, %v306_v48 }
 0x133   :  { %v271_v51 = vpop.xlane.xlu1 %270  ;;  %v225_v53 = vpop.xlane.xlu0 %224  ;;  %v376_v56 = vmul.f32 %v1695_v10, %v1991_v39 }
 0x134   :  { %1704 = vrsqrt.f32 %v315_v18  ;;  %v307_v57 = vmul.f32 0.0078125, %v271_v51  ;;  %v284_v12 = vmul.f32 0.0078125, %v225_v53 }
 0x135   :  { %1706 = vrsqrt.f32 %v338_v27  ;;  %v414_v31 = vmul.f32 %v2201_v29, %v376_v56 }
 0x136   :  { %v1697_v20 = vpop.eup %1696  ;;  %v339_v59 = vadd.f32 1e-06, %v307_v57  ;;  %v316_v61 = vadd.f32 1e-06, %v284_v12 }
 0x137   :  { %v1699_v30 = vpop.eup %1698  ;;  %v227_v1 = vpop.xlane.xlu1 %226  ;;  %v377_v3 = vmul.f32 %v1697_v20, %v1999_v46  ;;  %v452_v43 = vadd.f32 %v2208_v22, %v414_v31 }
 0x138   :  { %v273_v2 = vpop.xlane.xlu0 %272  ;;  %1708 = vrsqrt.f32 %v339_v59  ;;  %v285_v39 = vmul.f32 0.0078125, %v227_v1  ;;  %v400_v5 = vmul.f32 %v1699_v30, %v1994_v40 }
 0x139   :  { %v308_v4 = vmul.f32 0.0078125, %v273_v2  ;;  %1710 = vrsqrt.f32 %v316_v61  ;;  %v415_v34 = vmul.f32 %v2201_v29, %v377_v3 }
 0x13a   :  { %v1701_v36 = vpop.eup %1700  ;;  %v317_v37 = vadd.f32 1e-06, %v285_v39  ;;  %v438_v48 = vmul.f32 %v2201_v29, %v400_v5  ;;  %v1687_v39 = vld [vmem:[%s2679_s3 + $0x20] ss:$12 sps:$4 sm:$0xff]  }
 0x13b   :  { %v340_v16 = vadd.f32 1e-06, %v308_v4  ;;  %v1703_v24 = vpop.eup %1702  ;;  %v275_v46 = vpop.xlane.xlu1 %274  ;;  %v453_v44 = vadd.f32 %v2208_v22, %v415_v34  ;;  %v401_v45 = vmul.f32 %v1701_v36, %v2002_v47 }
 0x13c   :  { %v229_v8 = vpop.xlane.xlu0 %228  ;;  %1712 = vrsqrt.f32 %v317_v37  ;;  %v309_v10 = vmul.f32 0.0078125, %v275_v46  ;;  %v378_v51 = vmul.f32 %v1703_v24, %v2009_v54  ;;  %v476_v59 = vadd.f32 %v2208_v22, %v438_v48  ;;  %v1688_v48 = vld [vmem:[%s2679_s3 + $0x38] ss:$12 sps:$4 sm:$0xff]  }
 0x13d   :  { %v286_v40 = vmul.f32 0.0078125, %v229_v8  ;;  %1714 = vrsqrt.f32 %v340_v16  ;;  %v2216_v18 = vpack.c.bf16 %v453_v44, %v452_v43  ;;  %v439_v27 = vmul.f32 %v2201_v29, %v401_v45 }
 0x13e   :  { %v1705_v53 = vpop.eup %1704  ;;  %v341_v56 = vadd.f32 1e-06, %v309_v10  ;;  %v416_v1 = vmul.f32 %v2201_v29, %v378_v51 }
 0x13f   :  { %v318_v57 = vadd.f32 1e-06, %v286_v40  ;;  %v1707_v12 = vpop.eup %1706  ;;  %v231_v20 = vpop.xlane.xlu1 %230  ;;  %710 = vmatmul.mubr.bf16.vlgmr.msra.gmra.mrb[0].mxu0 %v2216_v18  ;;  %v477_v61 = vadd.f32 %v2208_v22, %v439_v27  ;;  %v379_v30 = vmul.f32 %v1705_v53, %v2012_v55 }
 0x140   :  { %v277_v47 = vpop.xlane.xlu0 %276  ;;  %1716 = vrsqrt.f32 %v341_v56  ;;  %v287_v2 = vmul.f32 0.0078125, %v231_v20  ;;  %719 = vmatprep.mubr.bf16.mxu0 %v1758_v14  ;;  %v402_v54 = vmul.f32 %v1707_v12, %v2019_v62  ;;  %v454_v24 = vadd.f32 %v2208_v22, %v416_v1  ;;  %v1689_v1 = vld [vmem:[%s2679_s3 + $0x50] ss:$12 sps:$4 sm:$0xff]  }
 0x141   :  { %v310_v3 = vmul.f32 0.0078125, %v277_v47  ;;  %1718 = vrsqrt.f32 %v318_v57  ;;  %v2227_v31 = vpack.c.bf16 %v477_v61, %v476_v59  ;;  %v417_v4 = vmul.f32 %v2201_v29, %v379_v30 }
 0x142   :  { %v1709_v5 = vpop.eup %1708  ;;  %v319_v55 = vadd.f32 1e-06, %v287_v2  ;;  %v440_v8 = vmul.f32 %v2201_v29, %v402_v54 }
 0x143   :  { %v342_v34 = vadd.f32 1e-06, %v310_v3  ;;  %v1711_v36 = vpop.eup %1710  ;;  %v279_v37 = vpop.xlane.xlu1 %278  ;;  %830 = vmatmul.mubr.bf16.vlgmr.msra.gmra.mrb[0].mxu1 %v2227_v31  ;;  %v455_v62 = vadd.f32 %v2208_v22, %v417_v4  ;;  %v403_v46 = vmul.f32 %v1709_v5, %v2022_v63 }
 0x144   :  { %v233_v16 = vpop.xlane.xlu0 %232  ;;  %1720 = vrsqrt.f32 %v319_v55  ;;  %v311_v43 = vmul.f32 0.0078125, %v279_v37  ;;  %1598 = vmatpush3.bf16.msra.mxu1 %v2160_v35  ;;  %839 = vmatprep.mubr.bf16.mxu1 %v1758_v14  ;;  %v380_v63 = vmul.f32 %v1711_v36, %v2029_v32  ;;  %v478_v57 = vadd.f32 %v2208_v22, %v440_v8 }
 0x145   :  { %v288_v44 = vmul.f32 0.0078125, %v233_v16  ;;  %1722 = vrsqrt.f32 %v342_v34  ;;  %1599 = vmatprep.subr.bf16.mxu1 %v1687_v39  ;;  %v2240_v45 = vpack.c.bf16 %v455_v62, %v454_v24  ;;  %v441_v10 = vmul.f32 %v2201_v29, %v403_v46  ;;  %v1690_v24 = vld [vmem:[%s2679_s3 + $0x68] ss:$12 sps:$4 sm:$0xff]  }
 0x146   :  { %v1713_v40 = vpop.eup %1712  ;;  %v343_v27 = vadd.f32 1e-06, %v311_v43  ;;  %v418_v47 = vmul.f32 %v2201_v29, %v380_v63 }
 0x147   :  { %v320_v51 = vadd.f32 1e-06, %v288_v44  ;;  %v1715_v53 = vpop.eup %1714  ;;  %v235_v35 = vpop.xlane.xlu1 %234  ;;  %720 = vmatmul.mubr.bf16.gmra.mrb[4].mxu0 %v2240_v45  ;;  %v479_v12 = vadd.f32 %v2208_v22, %v441_v10  ;;  %v381_v20 = vmul.f32 %v1713_v40, %v2032_v6 }
 0x148   :  { %v237_v56 = vpop.xlane.xlu0 %236  ;;  %1724 = vrsqrt.f32 %v343_v27  ;;  %v289_v59 = vmul.f32 0.0078125, %v235_v35  ;;  %1600 = vmatpush3.bf16.msra.mxu1 %v1687_v39  ;;  %729 = vmatprep.mubr.bf16.mxu0 %v1758_v14  ;;  %v404_v61 = vmul.f32 %v1715_v53, %v2045_v38  ;;  %v456_v38 = vadd.f32 %v2208_v22, %v418_v47 }
 0x149   :  { %v290_v32 = vmul.f32 0.0078125, %v237_v56  ;;  %1726 = vrsqrt.f32 %v320_v51  ;;  %1601 = vmatprep.subr.bf16.mxu1 %v1688_v48  ;;  %v2254_v30 = vpack.c.bf16 %v479_v12, %v478_v57  ;;  %v419_v6 = vmul.f32 %v2201_v29, %v381_v20  ;;  %v1691_v56 = vld [vmem:[%s2679_s3 + $0x80] ss:$12 sps:$4 sm:$0xff]  }
 0x14a   :  { %v1717_v2 = vpop.eup %1716  ;;  %v321_v3 = vadd.f32 1e-06, %v289_v59  ;;  %v442_v36 = vmul.f32 %v2201_v29, %v404_v61 }
 0x14b   :  { %v322_v54 = vadd.f32 1e-06, %v290_v32  ;;  %v1719_v4 = vpop.eup %1718  ;;  %v239_v39 = vpop.xlane.xlu1 %238  ;;  %840 = vmatmul.mubr.bf16.gmra.mrb[4].mxu1 %v2254_v30  ;;  %v457_v55 = vadd.f32 %v2208_v22, %v419_v6  ;;  %v405_v34 = vmul.f32 %v1717_v2, %v2048_v41 }
 0x14c   :  { %v241_v5 = vpop.xlane.xlu0 %240  ;;  %1728 = vrsqrt.f32 %v321_v3  ;;  %v291_v37 = vmul.f32 0.0078125, %v239_v39  ;;  %1602 = vmatpush3.bf16.msra.mxu1 %v1688_v48  ;;  %849 = vmatprep.mubr.bf16.mxu1 %v1758_v14  ;;  %v382_v46 = vmul.f32 %v1719_v4, %v2058_v11  ;;  %v480_v63 = vadd.f32 %v2208_v22, %v442_v36 }
 0x14d   :  { %1730 = vrsqrt.f32 %v322_v54  ;;  %1603 = vmatprep.subr.bf16.mxu1 %v1689_v1  ;;  %v2266_v16 = vpack.c.bf16 %v457_v55, %v456_v38  ;;  %v443_v62 = vmul.f32 %v2201_v29, %v405_v34  ;;  %v292_v43 = vmul.f32 0.0078125, %v241_v5  ;;  %v1692_v54 = vld [vmem:[%s2679_s3 + $0x98] ss:$12 sps:$4 sm:$0xff]  }
 0x14e   :  { %v1721_v41 = vpop.eup %1720  ;;  %v323_v8 = vadd.f32 1e-06, %v291_v37  ;;  %v420_v51 = vmul.f32 %v2201_v29, %v382_v46 }
 0x14f   :  { %v1723_v44 = vpop.eup %1722  ;;  %v243_v10 = vpop.xlane.xlu1 %242  ;;  %730 = vmatmul.mubr.bf16.gmra.mrb[8].mxu0 %v2266_v16  ;;  %v481_v40 = vadd.f32 %v2208_v22, %v443_v62  ;;  %v383_v27 = vmul.f32 %v1721_v41, %v2061_v50  ;;  %v324_v50 = vadd.f32 1e-06, %v292_v43  ;;  %v1693_v43 = vld [vmem:[%s2679_s3 + $0xb0] ss:$12 sps:$4 sm:$0xff]  }
 0x150   :  { %v245_v48 = vpop.xlane.xlu0 %244  ;;  %1732 = vrsqrt.f32 %v323_v8  ;;  %v293_v53 = vmul.f32 0.0078125, %v243_v10  ;;  %1604 = vmatpush3.bf16.msra.mxu1 %v1689_v1  ;;  %739 = vmatprep.mubr.bf16.mxu0 %v1758_v14  ;;  %v406_v11 = vmul.f32 %v1723_v44, %v2074_v13  ;;  %v458_v61 = vadd.f32 %v2208_v22, %v420_v51 }
 0x151   :  { %1605 = vmatprep.subr.bf16.mxu1 %v1690_v24  ;;  %v2280_v35 = vpack.c.bf16 %v481_v40, %v480_v63  ;;  %v421_v57 = vmul.f32 %v2201_v29, %v383_v27 }
 0x152   :  { %v1725_v12 = vpop.eup %1724  ;;  %v325_v20 = vadd.f32 1e-06, %v293_v53  ;;  %v444_v6 = vmul.f32 %v2201_v29, %v406_v11 }
 0x153   :  { %v1727_v47 = vpop.eup %1726  ;;  %v247_v59 = vpop.xlane.xlu1 %246  ;;  %850 = vmatmul.mubr.bf16.gmra.mrb[8].mxu1 %v2280_v35  ;;  %v459_v13 = vadd.f32 %v2208_v22, %v421_v57  ;;  %v407_v1 = vmul.f32 %v1725_v12, %v2077_v60  ;;  %v294_v60 = vmul.f32 0.0078125, %v245_v48 }
 0x154   :  { %v249_v32 = vpop.xlane.xlu0 %248  ;;  %1734 = vrsqrt.f32 %v325_v20  ;;  %v295_v2 = vmul.f32 0.0078125, %v247_v59  ;;  %1606 = vmatpush3.bf16.msra.mxu1 %v1690_v24  ;;  %859 = vmatprep.mubr.bf16.mxu1 %v1758_v14  ;;  %v384_v39 = vmul.f32 %v1727_v47, %v2090_v15  ;;  %v482_v36 = vadd.f32 %v2208_v22, %v444_v6 }
 0x155   :  { %1607 = vmatprep.subr.bf16.mxu1 %v1691_v56  ;;  %v2292_v3 = vpack.c.bf16 %v459_v13, %v458_v61  ;;  %v445_v4 = vmul.f32 %v2201_v29, %v407_v1  ;;  %1736 = vrsqrt.f32 %v324_v50  ;;  %v326_v48 = vadd.f32 1e-06, %v294_v60 }
 0x156   :  { %v1729_v5 = vpop.eup %1728  ;;  %v422_v62 = vmul.f32 %v2201_v29, %v384_v39  ;;  %v327_v46 = vadd.f32 1e-06, %v295_v2 }
 0x157   :  { %v1731_v38 = vpop.eup %1730  ;;  %v251_v55 = vpop.xlane.xlu1 %250  ;;  %740 = vmatmul.mubr.bf16.gmra.mrb[12].mxu0 %v2292_v3  ;;  %v483_v37 = vadd.f32 %v2208_v22, %v445_v4  ;;  %v385_v24 = vmul.f32 %v1729_v5, %v2093_v7  ;;  %v296_v7 = vmul.f32 0.0078125, %v249_v32 }
 0x158   :  { %v253_v34 = vpop.xlane.xlu0 %252  ;;  %v297_v41 = vmul.f32 0.0078125, %v251_v55  ;;  %1608 = vmatpush3.bf16.msra.mxu1 %v1691_v56  ;;  %749 = vmatprep.mubr.bf16.mxu0 %v1758_v14  ;;  %v386_v40 = vmul.f32 %v1731_v38, %v2106_v17  ;;  %v460_v11 = vadd.f32 %v2208_v22, %v422_v62  ;;  %1738 = vrsqrt.f32 %v327_v46 }
 0x159   :  { %v298_v15 = vmul.f32 0.0078125, %v253_v34  ;;  %1609 = vmatprep.subr.bf16.mxu1 %v1692_v54  ;;  %v2305_v8 = vpack.c.bf16 %v483_v37, %v482_v36  ;;  %v423_v44 = vmul.f32 %v2201_v29, %v385_v24  ;;  %v328_v61 = vadd.f32 1e-06, %v296_v7 }
 0x15a   :  { %v1733_v10 = vpop.eup %1732  ;;  %v329_v27 = vadd.f32 1e-06, %v297_v41  ;;  %v424_v1 = vmul.f32 %v2201_v29, %v386_v40 }
 0x15b   :  { %v330_v63 = vadd.f32 1e-06, %v298_v15  ;;  %v255_v51 = vpop.xlane.xlu1 %254  ;;  %860 = vmatmul.mubr.bf16.gmra.mrb[12].mxu1 %v2305_v8  ;;  %v461_v56 = vadd.f32 %v2208_v22, %v423_v44  ;;  %v387_v57 = vmul.f32 %v1733_v10, %v2109_v42 }
 0x15c   :  { %v257_v53 = vpop.xlane.xlu0 %256  ;;  %v299_v12 = vmul.f32 0.0078125, %v255_v51  ;;  %1610 = vmatpush3.bf16.msra.mxu1 %v1692_v54  ;;  %1613 = vmatprep.mubr.bf16.mxu1 %v2216_v18  ;;  %v462_v38 = vadd.f32 %v2208_v22, %v424_v1 }
 0x15d   :  { %v300_v50 = vmul.f32 0.0078125, %v257_v53  ;;  %1740 = vrsqrt.f32 %v330_v63  ;;  %1611 = vmatprep.subr.bf16.mxu1 %v1693_v43  ;;  %v488_v17 = vpack.c.bf16 %v461_v56, %v460_v11  ;;  %v425_v20 = vmul.f32 %v2201_v29, %v387_v57 }
 0x15e   :  { %v1735_v47 = vpop.eup %1734  ;;  %1742 = vrsqrt.f32 %v326_v48  ;;  %v331_v59 = vadd.f32 1e-06, %v299_v12 }
 0x15f   :  { %v332_v32 = vadd.f32 1e-06, %v300_v50  ;;  %1744 = vrsqrt.f32 %v329_v27  ;;  %v259_v13 = vpop.xlane.xlu1 %258  ;;  %750 = vmatmul.mubr.bf16.gmra.mrb[16].mxu0 %v488_v17  ;;  %v1737_v6 = vpop.eup %1736  ;;  %v463_v54 = vadd.f32 %v2208_v22, %v425_v20  ;;  %v389_v4 = vmul.f32 %v1735_v47, %v2125_v52 }
 0x160   :  { %v261_v42 = vpop.xlane.xlu0 %260  ;;  %1746 = vrsqrt.f32 %v331_v59  ;;  %v301_v2 = vmul.f32 0.0078125, %v259_v13  ;;  %1612 = vmatpush3.bf16.msra.mxu1 %v1693_v43  ;;  %759 = vmatprep.mubr.bf16.mxu0 %v1758_v14  ;;  %v388_v55 = vmul.f32 %v1737_v6, %v2122_v19 }
 0x161   :  { %v302_v18 = vmul.f32 0.0078125, %v261_v42  ;;  %1748 = vrsqrt.f32 %v332_v32  ;;  %v489_v36 = vpack.c.bf16 %v463_v54, %v462_v38  ;;  %v427_v37 = vmul.f32 %v2201_v29, %v389_v4 }
 0x162   :  { %v333_v39 = vadd.f32 1e-06, %v301_v2  ;;  %1750 = vrsqrt.f32 %v328_v61  ;;  %v1739_v24 = vpop.eup %1738  ;;  %v426_v46 = vmul.f32 %v2201_v29, %v388_v55 }
 0x163   :  { %v334_v5 = vadd.f32 1e-06, %v302_v18  ;;  %v263_v60 = vpop.xlane.xlu1 %262  ;;  %1614 = vmatmul.mubr.bf16.vlgmr.msra.gmra.mrb[16].mxu1 %v2240_v45  ;;  %v465_v15 = vadd.f32 %v2208_v22, %v427_v37 }
 0x164   :  { %1752 = vrsqrt.f32 %v333_v39  ;;  %v303_v34 = vmul.f32 0.0078125, %v263_v60  ;;  %1617 = vmatprep.mubr.bf16.mxu1 %v2266_v16  ;;  %v391_v16 = vmul.f32 %v1739_v24, %v2141_v0  ;;  %v464_v48 = vadd.f32 %v2208_v22, %v426_v46  ;;  %v2377_v60 = vld [vmem:[%s2682_s4] sm:$0x7] }
 0x165   :  { %1754 = vrsqrt.f32 %v334_v5 }
 0x166   :  { %v335_v52 = vadd.f32 1e-06, %v303_v34  ;;  %v490_v51 = vpack.c.bf16 %v465_v15, %v464_v48  ;;  %v429_v0 = vmul.f32 %v2201_v29, %v391_v16 }
 0x167   :  { %v1741_v62 = vpop.eup %1740  ;;  %760 = vmatmul.mubr.bf16.gmra.mrb[20].mxu0 %v489_v36 }
 0x168   :  { %v1743_v41 = vpop.eup %1742  ;;  %1756 = vrsqrt.f32 %v335_v52  ;;  %769 = vmatprep.mubr.bf16.mxu0 %v1758_v14  ;;  %v394_v19 = vmul.f32 %v1741_v62, %v2166_v25 }
 0x169   :  { %v1745_v45 = vpop.eup %1744  ;;  %v390_v7 = vmul.f32 %v1743_v41, %v2138_v21 }
 0x16a   :  { %v1747_v43 = vpop.eup %1746  ;;  %v432_v44 = vmul.f32 %v2201_v29, %v394_v19 }
 0x16b   :  { %v1749_v10 = vpop.eup %1748  ;;  %1618 = vmatmul.mubr.bf16.gmra.mrb[20].mxu1 %v2292_v3  ;;  %v395_v63 = vmul.f32 %v1747_v43, %v2169_v9  ;;  %v393_v3 = vmul.f32 %v1745_v45, %v2153_v23  ;;  %v428_v21 = vmul.f32 %v2201_v29, %v390_v7  ;;  %v467_v23 = vadd.f32 %v2208_v22, %v429_v0 }
 0x16c   :  { %1621 = vmatprep.mubr.bf16.mxu1 %v488_v17  ;;  %v470_v25 = vadd.f32 %v2208_v22, %v432_v44  ;;  %v396_v40 = vmul.f32 %v1749_v10, %v2176_v49  ;;  %v1751_v27 = vpop.eup %1750 }
 0x16d   :  { %v433_v53 = vmul.f32 %v2201_v29, %v395_v63  ;;  %v392_v49 = vmul.f32 %v1751_v27, %v2150_v33  ;;  %v431_v32 = vmul.f32 %v2201_v29, %v393_v3 }
 0x16e   :  { %v1753_v11 = vpop.eup %1752  ;;  %v434_v56 = vmul.f32 %v2201_v29, %v396_v40 }
 0x16f   :  { %v1755_v57 = vpop.eup %1754  ;;  %770 = vmatmul.mubr.bf16.gmra.mrb[24].mxu0 %v490_v51  ;;  %v471_v9 = vadd.f32 %v2208_v22, %v433_v53  ;;  %v397_v12 = vmul.f32 %v1753_v11, %v2179_v26  ;;  %v466_v26 = vadd.f32 %v2208_v22, %v428_v21  ;;  %v469_v18 = vadd.f32 %v2208_v22, %v431_v32 }
 0x170   :  { %779 = vmatprep.mubr.bf16.mxu0 %v1758_v14  ;;  %v472_v50 = vadd.f32 %v2208_v22, %v434_v56  ;;  %v398_v17 = vmul.f32 %v1755_v57, %v2186_v58  ;;  %v430_v58 = vmul.f32 %v2201_v29, %v392_v49 }
 0x171   :  { %v493_v20 = vpack.c.bf16 %v471_v9, %v470_v25  ;;  %v435_v47 = vmul.f32 %v2201_v29, %v397_v12  ;;  %v491_v1 = vpack.c.bf16 %v467_v23, %v466_v26 }
 0x172   :  { %v1757_v59 = vpop.eup %1756  ;;  %v436_v61 = vmul.f32 %v2201_v29, %v398_v17  ;;  %v468_v4 = vadd.f32 %v2208_v22, %v430_v58 }
 0x173   :  { %1622 = vmatmul.mubr.bf16.gmra.mrb[24].mxu1 %v489_v36  ;;  %v473_v13 = vadd.f32 %v2208_v22, %v435_v47  ;;  %v399_v33 = vmul.f32 %v1757_v59, %v2189_v28 }
 0x174   :  { %1625 = vmatprep.mubr.bf16.mxu1 %v490_v51  ;;  %v474_v42 = vadd.f32 %v2208_v22, %v436_v61  ;;  %v492_v28 = vpack.c.bf16 %v469_v18, %v468_v4 }
 0x175   :  { %v494_v6 = vpack.c.bf16 %v473_v13, %v472_v50  ;;  %v437_v2 = vmul.f32 %v2201_v29, %v399_v33  ;;  %v534_v29 = vlaneseq }
 0x177   :  { %780 = vmatmul.mubr.bf16.gmra.mrb[28].mxu0 %v491_v1  ;;  %v475_v54 = vadd.f32 %v2208_v22, %v437_v2  ;;  %v2371_v22 = vshrl.u32 %v534_v29, 7 }
 0x178   :  { %789 = vmatprep.mubr.bf16.mxu0 %v1758_v14 }
 0x179   :  { %v495_v39 = vpack.c.bf16 %v475_v54, %v474_v42  ;;  %v536_v5 = vsub.s32 0, %v2371_v22 }
 0x17b   :  { %1626 = vmatmul.mubr.bf16.gmra.mrb[28].mxu1 %v491_v1 }
 0x17c   :  { %1629 = vmatprep.mubr.bf16.mxu1 %v492_v28 }
 0x17f   :  { %790 = vmatmul.mubr.bf16.gmra.mrb[32].mxu0 %v492_v28 }
 0x180   :  { %799 = vmatprep.mubr.bf16.mxu0 %v1758_v14 }
 0x183   :  { %1630 = vmatmul.mubr.bf16.gmra.mrb[32].mxu1 %v493_v20 }
 0x184   :  { %1633 = vmatprep.mubr.bf16.mxu1 %v494_v6 }
 0x187   :  { %800 = vmatmul.mubr.bf16.gmra.mrb[36].mxu0 %v493_v20 }
 0x188   :  { %809 = vmatprep.mubr.bf16.mxu0 %v1758_v14 }
 0x18b   :  { %1634 = vmatmul.mubr.bf16.gmra.mrb[36].mxu1 %v495_v39 }
 0x18c   :  { %1637 = vmatprep.mubr.bf16.mxu1 %v2227_v31  ;;  %v540_v31 = vsub.s32 1, %v2371_v22 }
 0x18f   :  { %810 = vmatmul.mubr.bf16.gmra.mrb[40].mxu0 %v494_v6 }
 0x190   :  { %819 = vmatprep.mubr.bf16.mxu0 %v1758_v14  ;;  %v2381_v14 = vrot.slane %v2377_v60, %v536_v5 }
 0x193   :  { %1638 = vmatmul.mubr.bf16.gmra.mrb[40].mxu1 %v2254_v30  ;;  %v2384_v30 = vrot.slane %v2377_v60, %v540_v31 }
 0x194   :  { %1641 = vmatprep.mubr.bf16.mxu1 %v2280_v35 }
 0x197   :  { %820 = vmatmul.mubr.bf16.gmra.mrb[44].mxu0 %v495_v39 }
 0x19b   :  { %1642 = vmatmul.mubr.bf16.gmra.mrb[44].mxu1 %v2305_v8 }
 0x212   :  { %v711_v35 = vpop.f32.mrb[0].mxu0 }
 0x213   :  { %v712_v8 = vadd.f32 %v711_v35, %v2381_v14  ;;  %v713_v38 = vpop.f32.mrb[1].mxu0 }
 0x214   :  { %v714_v55 = vadd.f32 %v713_v38, %v2384_v30  ;;  %v715_v34 = vpop.f32.mrb[2].mxu0 }
 0x215   :  { %v716_v36 = vadd.f32 %v715_v34, %v2381_v14  ;;  %v717_v37 = vpop.f32.mrb[3].mxu0 }
 0x216   :  { %v1509_v24 = vpack.c.bf16 %v714_v55, %v712_v8  ;;  %v718_v52 = vadd.f32 %v717_v37, %v2384_v30  ;;  %v831_v62 = vpop.f32.mrb[0].mxu1 }
 0x217   :  { %v832_v46 = vadd.f32 %v831_v62, %v2381_v14  ;;  %v833_v41 = vpop.f32.mrb[1].mxu1 }
 0x218   :  { %1351 = vst [vmem:[%s2683_s5] sm:$0xff] %v1509_v24  ;;  %v1511_v19 = vpack.c.bf16 %v718_v52, %v716_v36  ;;  %v834_v45 = vadd.f32 %v833_v41, %v2384_v30  ;;  %v835_v15 = vpop.f32.mrb[2].mxu1 }
 0x219   :  { %v836_v16 = vadd.f32 %v835_v15, %v2381_v14  ;;  %v837_v43 = vpop.f32.mrb[3].mxu1 }
 0x21a   :  { %1353 = vst [vmem:[%s2683_s5 + $0xc] sm:$0xff] %v1511_v19  ;;  %v1557_v44 = vpack.c.bf16 %v834_v45, %v832_v46  ;;  %v838_v10 = vadd.f32 %v837_v43, %v2384_v30  ;;  %v721_v48 = vpop.f32.mrb[4].mxu0  ;;  %v544_v19 = vsub.s32 2, %v2371_v22 }
 0x21b   :  { %v722_v7 = vadd.f32 %v721_v48, %v2381_v14  ;;  %v723_v63 = vpop.f32.mrb[5].mxu0 }
 0x21c   :  { %1399 = vst [vmem:[%s2683_s5 + $0x120] sm:$0xff] %v1557_v44  ;;  %v1559_v25 = vpack.c.bf16 %v838_v10, %v836_v16  ;;  %v724_v40 = vadd.f32 %v723_v63, %v2384_v30  ;;  %v725_v27 = vpop.f32.mrb[6].mxu0 }
 0x21d   :  { %v726_v51 = vadd.f32 %v725_v27, %v2381_v14  ;;  %v727_v0 = vpop.f32.mrb[7].mxu0 }
 0x21e   :  { %1401 = vst [vmem:[%s2683_s5 + $0x12c] sm:$0xff] %v1559_v25  ;;  %v1513_v53 = vpack.c.bf16 %v724_v40, %v722_v7  ;;  %v728_v11 = vadd.f32 %v727_v0, %v2384_v30  ;;  %v841_v3 = vpop.f32.mrb[4].mxu1  ;;  %v2463_v25 = vrot.slane %v2377_v60, %v544_v19 }
 0x21f   :  { %v842_v56 = vadd.f32 %v841_v3, %v2381_v14  ;;  %v843_v57 = vpop.f32.mrb[5].mxu1 }
 0x220   :  { %1355 = vst [vmem:[%s2683_s5 + $0x18] sm:$0xff] %v1513_v53  ;;  %v1515_v21 = vpack.c.bf16 %v728_v11, %v726_v51  ;;  %v844_v9 = vadd.f32 %v843_v57, %v2384_v30  ;;  %v845_v12 = vpop.f32.mrb[6].mxu1 }
 0x221   :  { %v846_v49 = vadd.f32 %v845_v12, %v2381_v14  ;;  %v847_v50 = vpop.f32.mrb[7].mxu1 }
 0x222   :  { %1357 = vst [vmem:[%s2683_s5 + $0x24] sm:$0xff] %v1515_v21  ;;  %v1561_v17 = vpack.c.bf16 %v844_v9, %v842_v56  ;;  %v848_v23 = vadd.f32 %v847_v50, %v2384_v30  ;;  %v731_v20 = vpop.f32.mrb[8].mxu0 }
 0x223   :  { %v732_v47 = vadd.f32 %v731_v20, %v2381_v14  ;;  %v733_v59 = vpop.f32.mrb[9].mxu0 }
 0x224   :  { %1403 = vst [vmem:[%s2683_s5 + $0x138] sm:$0xff] %v1561_v17  ;;  %v1563_v32 = vpack.c.bf16 %v848_v23, %v846_v49  ;;  %v734_v61 = vadd.f32 %v733_v59, %v2384_v30  ;;  %v735_v26 = vpop.f32.mrb[10].mxu0 }
 0x225   :  { %v736_v13 = vadd.f32 %v735_v26, %v2381_v14  ;;  %v737_v33 = vpop.f32.mrb[11].mxu0 }
 0x226   :  { %1405 = vst [vmem:[%s2683_s5 + $0x144] sm:$0xff] %v1563_v32  ;;  %v1517_v58 = vpack.c.bf16 %v734_v61, %v732_v47  ;;  %v738_v42 = vadd.f32 %v737_v33, %v2384_v30  ;;  %v851_v1 = vpop.f32.mrb[8].mxu1 }
 0x227   :  { %v852_v6 = vadd.f32 %v851_v1, %v2381_v14  ;;  %v853_v2 = vpop.f32.mrb[9].mxu1 }
 0x228   :  { %1359 = vst [vmem:[%s2683_s5 + $0x30] sm:$0xff] %v1517_v58  ;;  %v1519_v18 = vpack.c.bf16 %v738_v42, %v736_v13  ;;  %v854_v54 = vadd.f32 %v853_v2, %v2384_v30  ;;  %v855_v4 = vpop.f32.mrb[10].mxu1 }
 0x229   :  { %v856_v39 = vadd.f32 %v855_v4, %v2381_v14  ;;  %v857_v28 = vpop.f32.mrb[11].mxu1 }
 0x22a   :  { %1361 = vst [vmem:[%s2683_s5 + $0x3c] sm:$0xff] %v1519_v18  ;;  %v1565_v29 = vpack.c.bf16 %v854_v54, %v852_v6  ;;  %v858_v5 = vadd.f32 %v857_v28, %v2384_v30  ;;  %v741_v31 = vpop.f32.mrb[12].mxu0 }
 0x22b   :  { %v742_v35 = vadd.f32 %v741_v31, %v2381_v14  ;;  %v743_v8 = vpop.f32.mrb[13].mxu0 }
 0x22c   :  { %1407 = vst [vmem:[%s2683_s5 + $0x150] sm:$0xff] %v1565_v29  ;;  %v1567_v38 = vpack.c.bf16 %v858_v5, %v856_v39  ;;  %v744_v55 = vadd.f32 %v743_v8, %v2384_v30  ;;  %v745_v34 = vpop.f32.mrb[14].mxu0 }
 0x22d   :  { %v746_v36 = vadd.f32 %v745_v34, %v2381_v14  ;;  %v747_v37 = vpop.f32.mrb[15].mxu0 }
 0x22e   :  { %1409 = vst [vmem:[%s2683_s5 + $0x15c] sm:$0xff] %v1567_v38  ;;  %v1521_v24 = vpack.c.bf16 %v744_v55, %v742_v35  ;;  %v748_v52 = vadd.f32 %v747_v37, %v2384_v30  ;;  %v861_v62 = vpop.f32.mrb[12].mxu1 }
 0x22f   :  { %v862_v46 = vadd.f32 %v861_v62, %v2381_v14  ;;  %v863_v41 = vpop.f32.mrb[13].mxu1 }
 0x230   :  { %1363 = vst [vmem:[%s2683_s5 + $0x48] sm:$0xff] %v1521_v24  ;;  %v1523_v45 = vpack.c.bf16 %v748_v52, %v746_v36  ;;  %v864_v15 = vadd.f32 %v863_v41, %v2384_v30  ;;  %v865_v16 = vpop.f32.mrb[14].mxu1 }
 0x231   :  { %v866_v43 = vadd.f32 %v865_v16, %v2381_v14  ;;  %v867_v44 = vpop.f32.mrb[15].mxu1 }
 0x232   :  { %1365 = vst [vmem:[%s2683_s5 + $0x54] sm:$0xff] %v1523_v45  ;;  %v1569_v10 = vpack.c.bf16 %v864_v15, %v862_v46  ;;  %v868_v48 = vadd.f32 %v867_v44, %v2384_v30  ;;  %v751_v7 = vpop.f32.mrb[16].mxu0 }
 0x233   :  { %v752_v22 = vadd.f32 %v751_v7, %v2381_v14  ;;  %v753_v63 = vpop.f32.mrb[17].mxu0 }
 0x234   :  { %1411 = vst [vmem:[%s2683_s5 + $0x168] sm:$0xff] %v1569_v10  ;;  %v1571_v40 = vpack.c.bf16 %v868_v48, %v866_v43  ;;  %v754_v27 = vadd.f32 %v753_v63, %v2384_v30  ;;  %v755_v51 = vpop.f32.mrb[18].mxu0 }
 0x235   :  { %v756_v0 = vadd.f32 %v755_v51, %v2381_v14  ;;  %v757_v53 = vpop.f32.mrb[19].mxu0 }
 0x236   :  { %1413 = vst [vmem:[%s2683_s5 + $0x174] sm:$0xff] %v1571_v40  ;;  %v1525_v11 = vpack.c.bf16 %v754_v27, %v752_v22  ;;  %v758_v3 = vadd.f32 %v757_v53, %v2384_v30  ;;  %v1615_v60 = vpop.f32.mrb[16].mxu1 }
 0x237   :  { %v913_v56 = vadd.f32 %v1615_v60, %v2463_v25  ;;  %v904_v57 = vpop.f32.mrb[17].mxu1 }
 0x238   :  { %1367 = vst [vmem:[%s2683_s5 + $0x60] sm:$0xff] %v1525_v11  ;;  %v1527_v21 = vpack.c.bf16 %v758_v3, %v756_v0  ;;  %v905_v9 = vadd.f32 %v904_v57, %v2463_v25  ;;  %v1616_v12 = vpop.f32.mrb[18].mxu1 }
 0x239   :  { %v1514_v49 = vpack.c.bf16 %v913_v56, %v913_v56  ;;  %v916_v50 = vadd.f32 %v1616_v12, %v2463_v25  ;;  %v907_v17 = vpop.f32.mrb[19].mxu1 }
 0x23a   :  { %1369 = vst [vmem:[%s2683_s5 + $0x6c] sm:$0xff] %v1527_v21  ;;  %v1510_v23 = vpack.c.bf16 %v905_v9, %v905_v9  ;;  %v908_v20 = vadd.f32 %v907_v17, %v2463_v25  ;;  %v761_v47 = vpop.f32.mrb[20].mxu0 }
 0x23b   :  { %1356 = vst [vmem:[%s2683_s5 + $0x20] sm:$0xf] %v1514_v49  ;;  %v1516_v59 = vpack.c.bf16 %v916_v50, %v916_v50  ;;  %v762_v32 = vadd.f32 %v761_v47, %v2381_v14  ;;  %v763_v61 = vpop.f32.mrb[21].mxu0 }
 0x23c   :  { %1352 = vst [vmem:[%s2683_s5 + $0x8] sm:$0xf] %v1510_v23  ;;  %v1512_v26 = vpack.c.bf16 %v908_v20, %v908_v20  ;;  %v764_v13 = vadd.f32 %v763_v61, %v2384_v30  ;;  %v765_v33 = vpop.f32.mrb[22].mxu0 }
 0x23d   :  { %1358 = vst [vmem:[%s2683_s5 + $0x2c] sm:$0xf] %v1516_v59  ;;  %v766_v58 = vadd.f32 %v765_v33, %v2381_v14  ;;  %v767_v42 = vpop.f32.mrb[23].mxu0 }
 0x23e   :  { %1354 = vst [vmem:[%s2683_s5 + $0x14] sm:$0xf] %v1512_v26  ;;  %v1529_v1 = vpack.c.bf16 %v764_v13, %v762_v32  ;;  %v768_v6 = vadd.f32 %v767_v42, %v2384_v30  ;;  %v1619_v2 = vpop.f32.mrb[20].mxu1 }
 0x23f   :  { %v929_v18 = vadd.f32 %v1619_v2, %v2463_v25  ;;  %v920_v54 = vpop.f32.mrb[21].mxu1 }
 0x240   :  { %1371 = vst [vmem:[%s2683_s5 + $0x78] sm:$0xff] %v1529_v1  ;;  %v1531_v4 = vpack.c.bf16 %v768_v6, %v766_v58  ;;  %v921_v39 = vadd.f32 %v920_v54, %v2463_v25  ;;  %v1620_v28 = vpop.f32.mrb[22].mxu1 }
 0x241   :  { %v1522_v29 = vpack.c.bf16 %v929_v18, %v929_v18  ;;  %v932_v5 = vadd.f32 %v1620_v28, %v2463_v25  ;;  %v923_v31 = vpop.f32.mrb[23].mxu1 }
 0x242   :  { %1373 = vst [vmem:[%s2683_s5 + $0x84] sm:$0xff] %v1531_v4  ;;  %v1518_v35 = vpack.c.bf16 %v921_v39, %v921_v39  ;;  %v924_v8 = vadd.f32 %v923_v31, %v2463_v25  ;;  %v771_v38 = vpop.f32.mrb[24].mxu0 }
 0x243   :  { %1364 = vst [vmem:[%s2683_s5 + $0x50] sm:$0xf] %v1522_v29  ;;  %v1524_v55 = vpack.c.bf16 %v932_v5, %v932_v5  ;;  %v772_v34 = vadd.f32 %v771_v38, %v2381_v14  ;;  %v773_v36 = vpop.f32.mrb[25].mxu0 }
 0x244   :  { %1360 = vst [vmem:[%s2683_s5 + $0x38] sm:$0xf] %v1518_v35  ;;  %v1520_v37 = vpack.c.bf16 %v924_v8, %v924_v8  ;;  %v774_v24 = vadd.f32 %v773_v36, %v2384_v30  ;;  %v775_v52 = vpop.f32.mrb[26].mxu0 }
 0x245   :  { %1366 = vst [vmem:[%s2683_s5 + $0x5c] sm:$0xf] %v1524_v55  ;;  %v776_v62 = vadd.f32 %v775_v52, %v2381_v14  ;;  %v777_v46 = vpop.f32.mrb[27].mxu0 }
 0x246   :  { %1362 = vst [vmem:[%s2683_s5 + $0x44] sm:$0xf] %v1520_v37  ;;  %v1533_v41 = vpack.c.bf16 %v774_v24, %v772_v34  ;;  %v778_v19 = vadd.f32 %v777_v46, %v2384_v30  ;;  %v1623_v45 = vpop.f32.mrb[24].mxu1 }
 0x247   :  { %v945_v15 = vadd.f32 %v1623_v45, %v2463_v25  ;;  %v936_v16 = vpop.f32.mrb[25].mxu1 }
 0x248   :  { %1375 = vst [vmem:[%s2683_s5 + $0x90] sm:$0xff] %v1533_v41  ;;  %v1535_v43 = vpack.c.bf16 %v778_v19, %v776_v62  ;;  %v937_v44 = vadd.f32 %v936_v16, %v2463_v25  ;;  %v1624_v10 = vpop.f32.mrb[26].mxu1 }
 0x249   :  { %v1530_v48 = vpack.c.bf16 %v945_v15, %v945_v15  ;;  %v948_v7 = vadd.f32 %v1624_v10, %v2463_v25  ;;  %v939_v22 = vpop.f32.mrb[27].mxu1 }
 0x24a   :  { %1377 = vst [vmem:[%s2683_s5 + $0x9c] sm:$0xff] %v1535_v43  ;;  %v1526_v63 = vpack.c.bf16 %v937_v44, %v937_v44  ;;  %v940_v40 = vadd.f32 %v939_v22, %v2463_v25  ;;  %v781_v27 = vpop.f32.mrb[28].mxu0 }
 0x24b   :  { %1372 = vst [vmem:[%s2683_s5 + $0x80] sm:$0xf] %v1530_v48  ;;  %v1532_v51 = vpack.c.bf16 %v948_v7, %v948_v7  ;;  %v782_v0 = vadd.f32 %v781_v27, %v2381_v14  ;;  %v783_v53 = vpop.f32.mrb[29].mxu0 }
 0x24c   :  { %1368 = vst [vmem:[%s2683_s5 + $0x68] sm:$0xf] %v1526_v63  ;;  %v1528_v11 = vpack.c.bf16 %v940_v40, %v940_v40  ;;  %v784_v3 = vadd.f32 %v783_v53, %v2384_v30  ;;  %v785_v60 = vpop.f32.mrb[30].mxu0 }
 0x24d   :  { %1374 = vst [vmem:[%s2683_s5 + $0x8c] sm:$0xf] %v1532_v51  ;;  %v786_v56 = vadd.f32 %v785_v60, %v2381_v14  ;;  %v787_v57 = vpop.f32.mrb[31].mxu0 }
 0x24e   :  { %1370 = vst [vmem:[%s2683_s5 + $0x74] sm:$0xf] %v1528_v11  ;;  %v1537_v21 = vpack.c.bf16 %v784_v3, %v782_v0  ;;  %v788_v9 = vadd.f32 %v787_v57, %v2384_v30  ;;  %v1627_v12 = vpop.f32.mrb[28].mxu1 }
 0x24f   :  { %v961_v49 = vadd.f32 %v1627_v12, %v2463_v25  ;;  %v952_v50 = vpop.f32.mrb[29].mxu1 }
 0x250   :  { %1379 = vst [vmem:[%s2683_s5 + $0xa8] sm:$0xff] %v1537_v21  ;;  %v1539_v17 = vpack.c.bf16 %v788_v9, %v786_v56  ;;  %v953_v23 = vadd.f32 %v952_v50, %v2463_v25  ;;  %v1628_v20 = vpop.f32.mrb[30].mxu1 }
 0x251   :  { %v1538_v47 = vpack.c.bf16 %v961_v49, %v961_v49  ;;  %v964_v59 = vadd.f32 %v1628_v20, %v2463_v25  ;;  %v955_v32 = vpop.f32.mrb[31].mxu1 }
 0x252   :  { %1381 = vst [vmem:[%s2683_s5 + $0xb4] sm:$0xff] %v1539_v17  ;;  %v1534_v61 = vpack.c.bf16 %v953_v23, %v953_v23  ;;  %v956_v26 = vadd.f32 %v955_v32, %v2463_v25  ;;  %v791_v13 = vpop.f32.mrb[32].mxu0 }
 0x253   :  { %1380 = vst [vmem:[%s2683_s5 + $0xb0] sm:$0xf] %v1538_v47  ;;  %v1540_v33 = vpack.c.bf16 %v964_v59, %v964_v59  ;;  %v792_v58 = vadd.f32 %v791_v13, %v2381_v14  ;;  %v793_v42 = vpop.f32.mrb[33].mxu0 }
 0x254   :  { %1376 = vst [vmem:[%s2683_s5 + $0x98] sm:$0xf] %v1534_v61  ;;  %v1536_v1 = vpack.c.bf16 %v956_v26, %v956_v26  ;;  %v794_v6 = vadd.f32 %v793_v42, %v2384_v30  ;;  %v795_v2 = vpop.f32.mrb[34].mxu0 }
 0x255   :  { %1382 = vst [vmem:[%s2683_s5 + $0xbc] sm:$0xf] %v1540_v33  ;;  %v796_v18 = vadd.f32 %v795_v2, %v2381_v14  ;;  %v797_v54 = vpop.f32.mrb[35].mxu0 }
 0x256   :  { %1378 = vst [vmem:[%s2683_s5 + $0xa4] sm:$0xf] %v1536_v1  ;;  %v1541_v4 = vpack.c.bf16 %v794_v6, %v792_v58  ;;  %v798_v39 = vadd.f32 %v797_v54, %v2384_v30  ;;  %v1631_v28 = vpop.f32.mrb[32].mxu1 }
 0x257   :  { %v977_v29 = vadd.f32 %v1631_v28, %v2463_v25  ;;  %v968_v5 = vpop.f32.mrb[33].mxu1 }
 0x258   :  { %1383 = vst [vmem:[%s2683_s5 + $0xc0] sm:$0xff] %v1541_v4  ;;  %v1543_v31 = vpack.c.bf16 %v798_v39, %v796_v18  ;;  %v969_v35 = vadd.f32 %v968_v5, %v2463_v25  ;;  %v1632_v8 = vpop.f32.mrb[34].mxu1 }
 0x259   :  { %v1546_v38 = vpack.c.bf16 %v977_v29, %v977_v29  ;;  %v980_v55 = vadd.f32 %v1632_v8, %v2463_v25  ;;  %v971_v34 = vpop.f32.mrb[35].mxu1 }
 0x25a   :  { %1385 = vst [vmem:[%s2683_s5 + $0xcc] sm:$0xff] %v1543_v31  ;;  %v1542_v36 = vpack.c.bf16 %v969_v35, %v969_v35  ;;  %v972_v37 = vadd.f32 %v971_v34, %v2463_v25  ;;  %v801_v24 = vpop.f32.mrb[36].mxu0 }
 0x25b   :  { %1388 = vst [vmem:[%s2683_s5 + $0xe0] sm:$0xf] %v1546_v38  ;;  %v1548_v52 = vpack.c.bf16 %v980_v55, %v980_v55  ;;  %v802_v62 = vadd.f32 %v801_v24, %v2381_v14  ;;  %v803_v46 = vpop.f32.mrb[37].mxu0 }
 0x25c   :  { %1384 = vst [vmem:[%s2683_s5 + $0xc8] sm:$0xf] %v1542_v36  ;;  %v1544_v41 = vpack.c.bf16 %v972_v37, %v972_v37  ;;  %v804_v19 = vadd.f32 %v803_v46, %v2384_v30  ;;  %v805_v45 = vpop.f32.mrb[38].mxu0 }
 0x25d   :  { %1390 = vst [vmem:[%s2683_s5 + $0xec] sm:$0xf] %v1548_v52  ;;  %v806_v15 = vadd.f32 %v805_v45, %v2381_v14  ;;  %v807_v16 = vpop.f32.mrb[39].mxu0 }
 0x25e   :  { %1386 = vst [vmem:[%s2683_s5 + $0xd4] sm:$0xf] %v1544_v41  ;;  %v1545_v43 = vpack.c.bf16 %v804_v19, %v802_v62  ;;  %v808_v44 = vadd.f32 %v807_v16, %v2384_v30  ;;  %v1635_v10 = vpop.f32.mrb[36].mxu1 }
 0x25f   :  { %v993_v48 = vadd.f32 %v1635_v10, %v2463_v25  ;;  %v984_v7 = vpop.f32.mrb[37].mxu1 }
 0x260   :  { %1387 = vst [vmem:[%s2683_s5 + $0xd8] sm:$0xff] %v1545_v43  ;;  %v1547_v22 = vpack.c.bf16 %v808_v44, %v806_v15  ;;  %v985_v63 = vadd.f32 %v984_v7, %v2463_v25  ;;  %v1636_v40 = vpop.f32.mrb[38].mxu1 }
 0x261   :  { %v1554_v27 = vpack.c.bf16 %v993_v48, %v993_v48  ;;  %v996_v51 = vadd.f32 %v1636_v40, %v2463_v25  ;;  %v987_v0 = vpop.f32.mrb[39].mxu1 }
 0x262   :  { %1389 = vst [vmem:[%s2683_s5 + $0xe4] sm:$0xff] %v1547_v22  ;;  %v1550_v53 = vpack.c.bf16 %v985_v63, %v985_v63  ;;  %v988_v11 = vadd.f32 %v987_v0, %v2463_v25  ;;  %v811_v3 = vpop.f32.mrb[40].mxu0 }
 0x263   :  { %1396 = vst [vmem:[%s2683_s5 + $0x110] sm:$0xf] %v1554_v27  ;;  %v1556_v60 = vpack.c.bf16 %v996_v51, %v996_v51  ;;  %v812_v56 = vadd.f32 %v811_v3, %v2381_v14  ;;  %v813_v57 = vpop.f32.mrb[41].mxu0 }
 0x264   :  { %1392 = vst [vmem:[%s2683_s5 + $0xf8] sm:$0xf] %v1550_v53  ;;  %v1552_v21 = vpack.c.bf16 %v988_v11, %v988_v11  ;;  %v814_v9 = vadd.f32 %v813_v57, %v2384_v30  ;;  %v815_v12 = vpop.f32.mrb[42].mxu0 }
 0x265   :  { %1398 = vst [vmem:[%s2683_s5 + $0x11c] sm:$0xf] %v1556_v60  ;;  %v816_v49 = vadd.f32 %v815_v12, %v2381_v14  ;;  %v817_v50 = vpop.f32.mrb[43].mxu0 }
 0x266   :  { %1394 = vst [vmem:[%s2683_s5 + $0x104] sm:$0xf] %v1552_v21  ;;  %v1549_v17 = vpack.c.bf16 %v814_v9, %v812_v56  ;;  %v818_v23 = vadd.f32 %v817_v50, %v2384_v30  ;;  %v1639_v20 = vpop.f32.mrb[40].mxu1 }
 0x267   :  { %v1009_v47 = vadd.f32 %v1639_v20, %v2463_v25  ;;  %v1000_v59 = vpop.f32.mrb[41].mxu1 }
 0x268   :  { %1391 = vst [vmem:[%s2683_s5 + $0xf0] sm:$0xff] %v1549_v17  ;;  %v1551_v32 = vpack.c.bf16 %v818_v23, %v816_v49  ;;  %v1001_v61 = vadd.f32 %v1000_v59, %v2463_v25  ;;  %v1640_v26 = vpop.f32.mrb[42].mxu1 }
 0x269   :  { %v1562_v13 = vpack.c.bf16 %v1009_v47, %v1009_v47  ;;  %v1012_v33 = vadd.f32 %v1640_v26, %v2463_v25  ;;  %v1003_v58 = vpop.f32.mrb[43].mxu1 }
 0x26a   :  { %1393 = vst [vmem:[%s2683_s5 + $0xfc] sm:$0xff] %v1551_v32  ;;  %v1558_v42 = vpack.c.bf16 %v1001_v61, %v1001_v61  ;;  %v1004_v1 = vadd.f32 %v1003_v58, %v2463_v25  ;;  %v821_v6 = vpop.f32.mrb[44].mxu0 }
 0x26b   :  { %1404 = vst [vmem:[%s2683_s5 + $0x140] sm:$0xf] %v1562_v13  ;;  %v1564_v2 = vpack.c.bf16 %v1012_v33, %v1012_v33  ;;  %v822_v18 = vadd.f32 %v821_v6, %v2381_v14  ;;  %v823_v54 = vpop.f32.mrb[45].mxu0 }
 0x26c   :  { %1400 = vst [vmem:[%s2683_s5 + $0x128] sm:$0xf] %v1558_v42  ;;  %v1560_v4 = vpack.c.bf16 %v1004_v1, %v1004_v1  ;;  %v824_v39 = vadd.f32 %v823_v54, %v2384_v30  ;;  %v825_v28 = vpop.f32.mrb[46].mxu0 }
 0x26d   :  { %1406 = vst [vmem:[%s2683_s5 + $0x14c] sm:$0xf] %v1564_v2  ;;  %v826_v29 = vadd.f32 %v825_v28, %v2381_v14  ;;  %v827_v5 = vpop.f32.mrb[47].mxu0 }
 0x26e   :  { %1402 = vst [vmem:[%s2683_s5 + $0x134] sm:$0xf] %v1560_v4  ;;  %v1553_v31 = vpack.c.bf16 %v824_v39, %v822_v18  ;;  %v828_v35 = vadd.f32 %v827_v5, %v2384_v30  ;;  %v1643_v8 = vpop.f32.mrb[44].mxu1 }
 0x26f   :  { %v1025_v38 = vadd.f32 %v1643_v8, %v2463_v25  ;;  %v1016_v55 = vpop.f32.mrb[45].mxu1 }
 0x270   :  { %1395 = vst [vmem:[%s2683_s5 + $0x108] sm:$0xff] %v1553_v31  ;;  %v1555_v34 = vpack.c.bf16 %v828_v35, %v826_v29  ;;  %v1017_v36 = vadd.f32 %v1016_v55, %v2463_v25  ;;  %v1644_v14 = vpop.f32.mrb[46].mxu1 }
 0x271   :  { %v1570_v37 = vpack.c.bf16 %v1025_v38, %v1025_v38  ;;  %v1028_v24 = vadd.f32 %v1644_v14, %v2463_v25  ;;  %v1019_v52 = vpop.f32.mrb[47].mxu1 }
 0x272   :  { %1397 = vst [vmem:[%s2683_s5 + $0x114] sm:$0xff] %v1555_v34  ;;  %v1566_v30 = vpack.c.bf16 %v1017_v36, %v1017_v36  ;;  %v1020_v62 = vadd.f32 %v1019_v52, %v2463_v25 }
 0x273   :  { %1412 = vst [vmem:[%s2683_s5 + $0x170] sm:$0xf] %v1570_v37  ;;  %v1572_v46 = vpack.c.bf16 %v1028_v24, %v1028_v24 }
 0x274   :  { %1408 = vst [vmem:[%s2683_s5 + $0x158] sm:$0xf] %v1566_v30  ;;  %v1568_v41 = vpack.c.bf16 %v1020_v62, %v1020_v62 }
 0x275   :  { %1414 = vst [vmem:[%s2683_s5 + $0x17c] sm:$0xf] %v1572_v46 }
 0x276   :  { %1410 = vst [vmem:[%s2683_s5 + $0x164] sm:$0xf] %v1568_v41 }

// kernel: _lambda_.16
= control target key start
LH: loop header
LB: loop body
LE: loop exit
PB: predicated region body
PF: predicated region fallthrough
CT: control target
= control target key end

     0   :  { %vm230_vm0 = vcmask 519168   ;;  %s391_s0 = inlined_call_operand.vmem [shape: f32[32,128], index: 0, kind: input, shape index: {}]   ;;  %s392_s3 = inlined_call_operand.vmem [shape: bf16[128,64], index: 3, kind: input, shape index: {}]   ;;  %s393_s1 = inlined_call_operand.vmem [shape: f32[1,128], index: 1, kind: input, shape index: {}]   ;;  %s394_s2 = inlined_call_operand.vmem [shape: f32[1,128], index: 2, kind: input, shape index: {}]   ;;  %s395_s4 = inlined_call_operand.vmem [shape: f32[1,64], index: 4, kind: input, shape index: {}]   ;;  %s396_s5 = inlined_call_operand.vmem [shape: bf16[32,64], index: 5, kind: output, shape index: {}]  }
   0x1   :  { %v21_v0 = vld [vmem:[%s391_s0] sm:$0xff]  ;;  %v23_v1 = vld [vmem:[%s391_s0 + $0x10] sm:$0xff]  ;;  %v22_v2 = vld [vmem:[%s391_s0 + $0x8] sm:$0xff] }
   0x2   :  { %27 = vadd.xlane.f32.xlu0 %v21_v0  ;;  %31 = vadd.xlane.f32.xlu1 %v23_v1  ;;  %v24_v3 = vld [vmem:[%s391_s0 + $0x18] sm:$0xff]  ;;  %v288_v4 = vld [vmem:[%s392_s3] sm:$0xff]   ;;  %v289_v21 = vld [vmem:[%s392_s3 + $0x8] sm:$0xff]  }
   0x3   :  { %268 = vmatprep.subr.bf16.mxu0 %v288_v4  ;;  %v290_v22 = vld [vmem:[%s392_s3 + $0x10] sm:$0xff]   ;;  %v291_v23 = vld [vmem:[%s392_s3 + $0x18] sm:$0xff]   ;;  %v292_v24 = vld [vmem:[%s392_s3 + $0x20] sm:$0xff]  }
   0x4   :  { %269 = vmatpush3.bf16.msra.mxu0 %v288_v4  ;;  %v293_v25 = vld [vmem:[%s392_s3 + $0x28] sm:$0xff]   ;;  %v294_v26 = vld [vmem:[%s392_s3 + $0x30] sm:$0xff]   ;;  %v295_v27 = vld [vmem:[%s392_s3 + $0x38] sm:$0xff]  }
   0x5   :  { %270 = vmatprep.subr.bf16.mxu0 %v289_v21  ;;  %v239_v42 = vld [vmem:[%s393_s1] ss:$0 sm:$0xff] }
   0x6   :  { %29 = vadd.xlane.f32.xlu0 %v22_v2  ;;  %33 = vadd.xlane.f32.xlu1 %v24_v3  ;;  %v240_v47 = vld [vmem:[%s394_s2] ss:$0 sm:$0xff] }
   0x7   :  { %v241_v60 = vld [vmem:[%s395_s4] ss:$0 sm:$0xff] }
   0x8   :  { %271 = vmatpush3.bf16.msra.mxu0 %v289_v21 }
   0x9   :  { %272 = vmatprep.subr.bf16.mxu0 %v290_v22 }
   0xc   :  { %273 = vmatpush3.bf16.msra.mxu0 %v290_v22 }
   0xd   :  { %274 = vmatprep.subr.bf16.mxu0 %v291_v23 }
  0x10   :  { %275 = vmatpush3.bf16.msra.mxu0 %v291_v23 }
  0x11   :  { %276 = vmatprep.subr.bf16.mxu0 %v292_v24 }
  0x14   :  { %277 = vmatpush3.bf16.msra.mxu0 %v292_v24 }
  0x15   :  { %278 = vmatprep.subr.bf16.mxu0 %v293_v25 }
  0x18   :  { %279 = vmatpush3.bf16.msra.mxu0 %v293_v25 }
  0x19   :  { %280 = vmatprep.subr.bf16.mxu0 %v294_v26 }
  0x1c   :  { %281 = vmatpush3.bf16.msra.mxu0 %v294_v26 }
  0x1d   :  { %282 = vmatprep.subr.bf16.mxu0 %v295_v27 }
  0x20   :  { %283 = vmatpush3.bf16.msra.mxu0 %v295_v27 }
  0x8f   :  { %v28_v5 = vpop.xlane.xlu0 %27  ;;  %v32_v6 = vpop.xlane.xlu1 %31 }
  0x90   :  { %v36_v7 = vmul.f32 0.0078125, %v28_v5  ;;  %v38_v8 = vmul.f32 0.0078125, %v32_v6 }
  0x92   :  { %v40_v9 = vsub.f32 %v21_v0, %v36_v7  ;;  %v42_v10 = vsub.f32 %v23_v1, %v38_v8 }
  0x93   :  { %v30_v11 = vpop.xlane.xlu0 %29  ;;  %v34_v12 = vpop.xlane.xlu1 %33 }
  0x94   :  { %v37_v13 = vmul.f32 0.0078125, %v30_v11  ;;  %v44_v14 = vmul.f32 %v40_v9, %v40_v9  ;;  %v39_v15 = vmul.f32 0.0078125, %v34_v12  ;;  %v46_v18 = vmul.f32 %v42_v10, %v42_v10 }
  0x96   :  { %v41_v16 = vsub.f32 %v22_v2, %v37_v13  ;;  %48 = vadd.xlane.f32.xlu0 %v44_v14  ;;  %v43_v17 = vsub.f32 %v24_v3, %v39_v15 }
  0x98   :  { %v45_v19 = vmul.f32 %v41_v16, %v41_v16  ;;  %v47_v20 = vmul.f32 %v43_v17, %v43_v17 }
  0x9a   :  { %52 = vadd.xlane.f32.xlu0 %v46_v18  ;;  %50 = vadd.xlane.f32.xlu1 %v45_v19 }
  0x9e   :  { %54 = vadd.xlane.f32.xlu1 %v47_v20 }
 0x123   :  { %v49_v28 = vpop.xlane.xlu0 %48 }
 0x124   :  { %v56_v29 = vmul.f32 0.0078125, %v49_v28 }
 0x126   :  { %v60_v30 = vadd.f32 1e-06, %v56_v29 }
 0x127   :  { %v51_v31 = vpop.xlane.xlu1 %50  ;;  %v53_v32 = vpop.xlane.xlu0 %52 }
 0x128   :  { %296 = vrsqrt.f32 %v60_v30  ;;  %v57_v33 = vmul.f32 0.0078125, %v51_v31  ;;  %v58_v34 = vmul.f32 0.0078125, %v53_v32 }
 0x12a   :  { %v61_v35 = vadd.f32 1e-06, %v57_v33  ;;  %v62_v36 = vadd.f32 1e-06, %v58_v34 }
 0x12b   :  { %v55_v37 = vpop.xlane.xlu1 %54 }
 0x12c   :  { %298 = vrsqrt.f32 %v61_v35  ;;  %v59_v38 = vmul.f32 0.0078125, %v55_v37 }
 0x12d   :  { %300 = vrsqrt.f32 %v62_v36 }
 0x12e   :  { %v63_v39 = vadd.f32 1e-06, %v59_v38 }
 0x130   :  { %302 = vrsqrt.f32 %v63_v39 }
 0x132   :  { %v297_v40 = vpop.eup %296 }
 0x133   :  { %v68_v41 = vmul.f32 %v297_v40, %v40_v9 }
 0x135   :  { %v78_v46 = vmul.f32 %v239_v42, %v68_v41 }
 0x136   :  { %v299_v43 = vpop.eup %298 }
 0x137   :  { %v301_v44 = vpop.eup %300  ;;  %v69_v45 = vmul.f32 %v299_v43, %v41_v16  ;;  %v88_v51 = vadd.f32 %v240_v47, %v78_v46 }
 0x138   :  { %v70_v48 = vmul.f32 %v301_v44, %v42_v10 }
 0x139   :  { %v79_v49 = vmul.f32 %v239_v42, %v69_v45 }
 0x13a   :  { %v303_v50 = vpop.eup %302  ;;  %v80_v54 = vmul.f32 %v239_v42, %v70_v48 }
 0x13b   :  { %v89_v52 = vadd.f32 %v240_v47, %v79_v49  ;;  %v71_v53 = vmul.f32 %v303_v50, %v43_v17 }
 0x13c   :  { %v90_v57 = vadd.f32 %v240_v47, %v80_v54 }
 0x13d   :  { %v92_v55 = vpack.c.bf16 %v89_v52, %v88_v51  ;;  %v81_v56 = vmul.f32 %v239_v42, %v71_v53 }
 0x13f   :  { %284 = vmatprep.mubr.bf16.mxu0 %v92_v55  ;;  %v91_v58 = vadd.f32 %v240_v47, %v81_v56 }
 0x141   :  { %v93_v59 = vpack.c.bf16 %v91_v58, %v90_v57 }
 0x143   :  { %285 = vmatmul.mubr.bf16.vlgmr.msra.gmra.mrb[0].mxu0 %v93_v59 }
 0x216   :  { %v286_v61 = vpop.f32.mrb[0].mxu0 }
 0x217   :  { %v208_v62 = vadd.f32 %v286_v61, %v241_v60  ;;  %v199_v63 = vpop.f32.mrb[1].mxu0 }
 0x218   :  { %v200_v0 = vadd.f32 %v241_v60, %v199_v63  ;;  %v287_v1 = vpop.f32.mrb[2].mxu0 }
 0x219   :  { %v256_v2 = vpack.c.bf16 %v208_v62, %v208_v62  ;;  %v211_v3 = vadd.f32 %v287_v1, %v241_v60  ;;  %v202_v4 = vpop.f32.mrb[3].mxu0 }
 0x21a   :  { %v254_v5 = vpack.c.bf16 %v200_v0, %v200_v0  ;;  %v203_v6 = vadd.f32 %v241_v60, %v202_v4 }
 0x21b   :  { %233 = vst.msk [vmem:[%s396_s5 + $0x8] sm:$0xf] %vm230_vm0, %v256_v2  ;;  %v257_v7 = vpack.c.bf16 %v211_v3, %v211_v3 }
 0x21c   :  { %231 = vst.msk [vmem:[%s396_s5] sm:$0xf] %vm230_vm0, %v254_v5  ;;  %v255_v8 = vpack.c.bf16 %v203_v6, %v203_v6 }
 0x21d   :  { %234 = vst.msk [vmem:[%s396_s5 + $0xc] sm:$0xf] %vm230_vm0, %v257_v7 }
 0x21e   :  { %232 = vst.msk [vmem:[%s396_s5 + $0x4] sm:$0xf] %vm230_vm0, %v255_v8 }

// kernel: _lambda_.11
= control target key start
LH: loop header
LB: loop body
LE: loop exit
PB: predicated region body
PF: predicated region fallthrough
CT: control target
= control target key end

     0   :  { %s4081_s18 = smov 0   ;;  %s4083_s19 = smov 0   ;;  %s5265_s0 = inlined_call_operand.vmem [shape: bf16[2,128,384], index: 0, kind: input, shape index: {}]   ;;  %s5266_s1 = inlined_call_operand.vmem [shape: f32[1,128], index: 1, kind: input, shape index: {}]   ;;  %s5267_s2 = inlined_call_operand.vmem [shape: f32[2,128,128], index: 2, kind: input, shape index: {}]   ;;  %s5268_s3 = inlined_call_operand.vmem [shape: bf16[128,128], index: 3, kind: input, shape index: {}]   ;;  %s5269_s4 = inlined_call_operand.vmem [shape: f32[1,128], index: 4, kind: input, shape index: {}]   ;;  %s5270_s5 = inlined_call_operand.vmem [shape: f32[2,128,128], index: 5, kind: output, shape index: {}]  }
   0x1   :  { %s4085_s20 = smov 0  }
   0x2 LB: > { %s27_s21 = sadd.s32 1, %s4042_s19  ;;  %p3047_p0 = scmp.ge.s32.totalorder %s4046_s20, 1  ;;  %s4046_s20 = sphi %s4085_s20, %s15_s20   ;;  %s4042_s19 = sphi %s4083_s19, %s5291_s19   ;;  %s4038_s18 = sphi %s4081_s18, %s5290_s18  }
   0x3   : > { %p29_p1 = scmp.ge.s32.totalorder %s27_s21, 2  ;;  %p218_p2 = scmp.lt.s32.totalorder %s4046_s20, 3 }
   0x5   : > { %s5293_s21 = smov (%p29_p1, %s27_s21), 0  ;;  %p219_p3 = pnand %p3047_p0, %p218_p2 }
   0x7   : > { %222 = sbr.rel (%p219_p3) target bundleno = 3136 (0xc40), region = 40 }
   0xe   : > { %p259_p4 = scmp.lt.s32.totalorder %s4038_s18, 1  ;;  %vm426_vm0 = vcmask 261120   ;;  %s4048_s26 = smov 96   ;;  %v4190_v35 = vld [vmem:[%s5266_s1] ss:$0 sm:$0xff]  ;;  %vm1487_vm1 = vcmask 523520  }
   0xf   : > { %s4049_s29 = smov 64   ;;  %s4050_s30 = smov 32   ;;  %vm2098_vm2 = vcmask 785920   ;;  %vm2709_vm3 = vcmask 1048320  }
  0x10   : > { %s5295_s18 = smov (!%p259_p4, %s4038_s18), 1 }
  0x11   : > { %s3651_s22 = smul.u32 192, %s5295_s18 }
  0x13   : > { %s4105_s25 = scalar_lea.vmem %s5265_s0, %s3651_s22 }
  0x14   : > { %v3679_v0 = vld [vmem:[%s4105_s25 + $0x4] ss:$12 sps:$4 sm:$0xff]   ;;  %v3680_v1 = vld [vmem:[%s4105_s25 + $0x1c] ss:$12 sps:$4 sm:$0xff]   ;;  %v3681_v4 = vld [vmem:[%s4105_s25 + $0x34] ss:$12 sps:$4 sm:$0xff]  }
  0x15   : > { %3619 = vmatprep.subr.msk.bf16.mxu0 %vm426_vm0, %v3679_v0  ;;  %v452_v2 = vsel %vm426_vm0, %v3679_v0, 0  ;;  %v455_v3 = vsel %vm426_vm0, %v3680_v1, 0  ;;  %v3682_v5 = vld [vmem:[%s4105_s25 + $0x4c] ss:$12 sps:$4 sm:$0xff]   ;;  %v3683_v6 = vld [vmem:[%s4105_s25 + $0x64] ss:$12 sps:$4 sm:$0xff]  }
  0x16   : > { %3316 = vmatpush3.bf16.xpose.msra.mxu0 %v452_v2  ;;  %v4117_v7 = vld [vmem:[%s4105_s25] ss:$12 sps:$4 sm:$0xff]   ;;  %v3684_v8 = vld [vmem:[%s4105_s25 + $0x7c] ss:$12 sps:$4 sm:$0xff]   ;;  %v458_v10 = vsel %vm426_vm0, %v3681_v4, 0  ;;  %v461_v11 = vsel %vm426_vm0, %v3682_v5, 0 }
  0x17   : > { %3620 = vmatprep.subr.msk.bf16.mxu0 %vm426_vm0, %v3680_v1  ;;  %v3685_v9 = vld [vmem:[%s4105_s25 + $0x94] ss:$12 sps:$4 sm:$0xff]   ;;  %3331 = vmatprep.mubr.msk.bf16.mxu0 %vm426_vm0, %v4117_v7  ;;  %v464_v12 = vsel %vm426_vm0, %v3683_v6, 0  ;;  %v467_v13 = vsel %vm426_vm0, %v3684_v8, 0  ;;  %v3695_v15 = vld [vmem:[%s4105_s25 + $0x1c] ss:$12 sps:$4 sm:$0xff]  }
  0x18   : > { %v470_v14 = vsel %vm426_vm0, %v3685_v9, 0  ;;  %v3696_v16 = vld [vmem:[%s4105_s25 + $0x4] ss:$12 sps:$4 sm:$0xff]   ;;  %975 = vrot.lane.b32.xlu1 %v3695_v15, %s4048_s26  ;;  %v3686_v17 = vld [vmem:[%s4105_s25 + $0xac] ss:$12 sps:$4 sm:$0xff]  }
  0x19   : > { %973 = vrot.lane.b32.xlu0 %v3696_v16, %s4048_s26  ;;  %v473_v18 = vsel %vm426_vm0, %v3686_v17, 0  ;;  %v4141_v19 = vld [vmem:[%s4105_s25 + $0x18] ss:$12 sps:$4 sm:$0xff]   ;;  %v4144_v20 = vld [vmem:[%s4105_s25 + $0x30] ss:$12 sps:$4 sm:$0xff]  }
  0x1a   : > { %v4151_v21 = vld [vmem:[%s4105_s25 + $0x48] ss:$12 sps:$4 sm:$0xff]   ;;  %v4154_v22 = vld [vmem:[%s4105_s25 + $0x60] ss:$12 sps:$4 sm:$0xff]   ;;  %v4161_v23 = vld [vmem:[%s4105_s25 + $0x78] ss:$12 sps:$4 sm:$0xff]  }
  0x1b   : > { %v4164_v24 = vld [vmem:[%s4105_s25 + $0x90] ss:$12 sps:$4 sm:$0xff]   ;;  %v4171_v25 = vld [vmem:[%s4105_s25 + $0xa8] ss:$12 sps:$4 sm:$0xff]   ;;  %v3699_v27 = vld [vmem:[%s4105_s25 + $0x20] ss:$12 sps:$4 sm:$0xff]  }
  0x1c   : > { %v3698_v26 = vld [vmem:[%s4105_s25 + $0x8] ss:$12 sps:$4 sm:$0xff]   ;;  %v3700_v28 = vld [vmem:[%s4105_s25 + $0x38] ss:$12 sps:$4 sm:$0xff]   ;;  %v3701_v29 = vld [vmem:[%s4105_s25 + $0x50] ss:$12 sps:$4 sm:$0xff]  }
  0x1d   : > { %3347 = vmatprep.subr.bf16.mxu1 %v3698_v26  ;;  %v3702_v30 = vld [vmem:[%s4105_s25 + $0x68] ss:$12 sps:$4 sm:$0xff]   ;;  %v3703_v31 = vld [vmem:[%s4105_s25 + $0x80] ss:$12 sps:$4 sm:$0xff]   ;;  %v3704_v32 = vld [vmem:[%s4105_s25 + $0x98] ss:$12 sps:$4 sm:$0xff]  }
  0x1e   : > { %3318 = vmatpush3.bf16.xpose.msra.mxu0 %v455_v3  ;;  %3348 = vmatpush3.bf16.msra.mxu1 %v3698_v26  ;;  %v3705_v33 = vld [vmem:[%s4105_s25 + $0xb0] ss:$12 sps:$4 sm:$0xff]   ;;  %v3697_v2 = vld [vmem:[%s4105_s25 + $0x4c] ss:$12 sps:$4 sm:$0xff]   ;;  %v3706_v3 = vld [vmem:[%s4105_s25 + $0x34] ss:$12 sps:$4 sm:$0xff]  }
  0x1f   : > { %3621 = vmatprep.subr.msk.bf16.mxu0 %vm426_vm0, %v3681_v4  ;;  %3349 = vmatprep.subr.bf16.mxu1 %v3699_v27 }
  0x22   : > { %3350 = vmatpush3.bf16.msra.mxu1 %v3699_v27 }
  0x23   : > { %3351 = vmatprep.subr.bf16.mxu1 %v3700_v28 }
  0x26   : > { %3320 = vmatpush3.bf16.xpose.msra.mxu0 %v458_v10  ;;  %3352 = vmatpush3.bf16.msra.mxu1 %v3700_v28 }
  0x27   : > { %3622 = vmatprep.subr.msk.bf16.mxu0 %vm426_vm0, %v3682_v5  ;;  %3353 = vmatprep.subr.bf16.mxu1 %v3701_v29 }
  0x2a   : > { %3354 = vmatpush3.bf16.msra.mxu1 %v3701_v29 }
  0x2b   : > { %3355 = vmatprep.subr.bf16.mxu1 %v3702_v30 }
  0x2e   : > { %3322 = vmatpush3.bf16.xpose.msra.mxu0 %v461_v11  ;;  %3356 = vmatpush3.bf16.msra.mxu1 %v3702_v30 }
  0x2f   : > { %3623 = vmatprep.subr.msk.bf16.mxu0 %vm426_vm0, %v3683_v6  ;;  %3357 = vmatprep.subr.bf16.mxu1 %v3703_v31 }
  0x32   : > { %3358 = vmatpush3.bf16.msra.mxu1 %v3703_v31 }
  0x33   : > { %3359 = vmatprep.subr.bf16.mxu1 %v3704_v32 }
  0x36   : > { %3324 = vmatpush3.bf16.xpose.msra.mxu0 %v464_v12  ;;  %3360 = vmatpush3.bf16.msra.mxu1 %v3704_v32  ;;  %v3707_v32 = vld [vmem:[%s4105_s25 + $0x7c] ss:$12 sps:$4 sm:$0xff]  }
  0x37   : > { %3624 = vmatprep.subr.msk.bf16.mxu0 %vm426_vm0, %v3684_v8  ;;  %3361 = vmatprep.subr.bf16.mxu1 %v3705_v33 }
  0x3a   : > { %3362 = vmatpush3.bf16.msra.mxu1 %v3705_v33  ;;  %v3708_v33 = vld [vmem:[%s4105_s25 + $0x64] ss:$12 sps:$4 sm:$0xff]  }
  0x3e   : > { %3326 = vmatpush3.bf16.xpose.msra.mxu0 %v467_v13 }
  0x3f   : > { %3625 = vmatprep.subr.msk.bf16.mxu0 %vm426_vm0, %v3685_v9 }
  0x46   : > { %3328 = vmatpush3.bf16.xpose.msra.mxu0 %v470_v14 }
  0x47   : > { %3626 = vmatprep.subr.msk.bf16.mxu0 %vm426_vm0, %v3686_v17 }
  0x4e   : > { %3330 = vmatpush3.bf16.xpose.msra.mxu0 %v473_v18 }
  0x55   : > { %3332 = vmatmul.mubr.msk.bf16.vlgmr.msra.gmra.mrb[0].mxu0 %vm426_vm0, %v4141_v19 }
  0x56   : > { %3335 = vmatprep.mubr.msk.bf16.mxu0 %vm426_vm0, %v4144_v20 }
  0x5d   : > { %3336 = vmatmul.mubr.msk.bf16.gmra.mrb[4].mxu0 %vm426_vm0, %v4151_v21 }
  0x5e   : > { %3339 = vmatprep.mubr.msk.bf16.mxu0 %vm426_vm0, %v4154_v22 }
  0x65   : > { %3340 = vmatmul.mubr.msk.bf16.gmra.mrb[8].mxu0 %vm426_vm0, %v4161_v23 }
  0x66   : > { %3343 = vmatprep.mubr.msk.bf16.mxu0 %vm426_vm0, %v4164_v24 }
  0x6d   : > { %3344 = vmatmul.mubr.msk.bf16.gmra.mrb[12].mxu0 %vm426_vm0, %v4171_v25 }
  0x8a   : > { %v4248_v6 = vpop.permute.xlu1 %975 }
  0x8b   : > { %v4183_v34 = vpop.permute.xlu0 %973 }
  0x8c   : > { %3627 = vmatprep.subr.msk.bf16.mxu1 %vm426_vm0, %v4183_v34 }
 0x128   : > { %v3333_v36 = vpop.f32.mrb[0].mxu0 }
 0x129   : > { %v518_v37 = vadd.f32 %v3333_v36, %v4190_v35  ;;  %v509_v38 = vpop.f32.mrb[1].mxu0 }
 0x12a   : > { %v510_v39 = vadd.f32 %v4190_v35, %v509_v38  ;;  %v3334_v40 = vpop.f32.mrb[2].mxu0 }
 0x12b   : > { %576 = vmax.xlane.f32.xlu1 %v518_v37  ;;  %v512_v41 = vpop.f32.mrb[3].mxu0  ;;  %v521_v42 = vadd.f32 %v3334_v40, %v4190_v35 }
 0x12c   : > { %572 = vmax.xlane.f32.xlu0 %v510_v39  ;;  %v513_v43 = vadd.f32 %v4190_v35, %v512_v41 }
 0x12f   : > { %578 = vmax.xlane.f32.xlu1 %v521_v42 }
 0x130   : > { %v3337_v44 = vpop.f32.mrb[4].mxu0  ;;  %574 = vmax.xlane.f32.xlu0 %v513_v43 }
 0x131   : > { %v4197_v45 = vadd.f32 %v3337_v44, %v4190_v35  ;;  %v525_v46 = vpop.f32.mrb[5].mxu0 }
 0x132   : > { %v3338_v47 = vpop.f32.mrb[6].mxu0  ;;  %v4203_v50 = vadd.f32 %v4190_v35, %v525_v46 }
 0x133   : > { %v4200_v48 = vadd.f32 %v3338_v47, %v4190_v35  ;;  %v528_v49 = vpop.f32.mrb[7].mxu0 }
 0x134   : > { %584 = vmax.xlane.f32.xlu0 %v4197_v45  ;;  %v4208_v51 = vadd.f32 %v4190_v35, %v528_v49 }
 0x135   : > { %586 = vmax.xlane.f32.xlu1 %v4200_v48 }
 0x138   : > { %v3341_v52 = vpop.f32.mrb[8].mxu0  ;;  %580 = vmax.xlane.f32.xlu0 %v4203_v50 }
 0x139   : > { %v4212_v53 = vadd.f32 %v3341_v52, %v4190_v35  ;;  %v541_v54 = vpop.f32.mrb[9].mxu0  ;;  %582 = vmax.xlane.f32.xlu1 %v4208_v51 }
 0x13a   : > { %v3342_v55 = vpop.f32.mrb[10].mxu0  ;;  %v4219_v58 = vadd.f32 %v4190_v35, %v541_v54 }
 0x13b   : > { %v4216_v56 = vadd.f32 %v3342_v55, %v4190_v35  ;;  %v544_v57 = vpop.f32.mrb[11].mxu0 }
 0x13c   : > { %592 = vmax.xlane.f32.xlu0 %v4212_v53  ;;  %v4224_v59 = vadd.f32 %v4190_v35, %v544_v57 }
 0x13d   : > { %594 = vmax.xlane.f32.xlu1 %v4216_v56 }
 0x140   : > { %588 = vmax.xlane.f32.xlu0 %v4219_v58  ;;  %v3345_v60 = vpop.f32.mrb[12].mxu0 }
 0x141   : > { %v4228_v61 = vadd.f32 %v3345_v60, %v4190_v35  ;;  %590 = vmax.xlane.f32.xlu1 %v4224_v59  ;;  %v557_v62 = vpop.f32.mrb[13].mxu0 }
 0x142   : > { %v3346_v63 = vpop.f32.mrb[14].mxu0  ;;  %v4233_v1 = vadd.f32 %v4190_v35, %v557_v62 }
 0x143   : > { %v560_v0 = vpop.f32.mrb[15].mxu0  ;;  %v4241_v4 = vadd.f32 %v3346_v63, %v4190_v35 }
 0x144   : > { %600 = vmax.xlane.f32.xlu0 %v4228_v61  ;;  %v4245_v5 = vadd.f32 %v4190_v35, %v560_v0 }
 0x148   : > { %596 = vmax.xlane.f32.xlu0 %v4233_v1 }
 0x152   : > { %979 = vrot.lane.b32.xlu1 %v3697_v2, %s4048_s26 }
 0x15e   : > { %977 = vrot.lane.b32.xlu0 %v3706_v3, %s4048_s26 }
 0x176   : > { %602 = vmax.xlane.f32.xlu1 %v4241_v4 }
 0x17a   : > { %598 = vmax.xlane.f32.xlu1 %v4245_v5 }
 0x1b8   : > { %v577_v8 = vpop.xlane.xlu1 %576 }
 0x1b9   : > { %v606_v9 = vsub.f32 %v518_v37, %v577_v8  ;;  %v573_v10 = vpop.xlane.xlu0 %572 }
 0x1ba   : > { %v604_v11 = vsub.f32 %v510_v39, %v573_v10 }
 0x1bb   : > { %v624_v12 = vmul.f32 1.442695, %v606_v9 }
 0x1bc   : > { %v620_v13 = vmul.f32 1.442695, %v604_v11  ;;  %v579_v14 = vpop.xlane.xlu1 %578 }
 0x1bd   : > { %3759 = vpow2.f32 %v624_v12  ;;  %v607_v15 = vsub.f32 %v521_v42, %v579_v14  ;;  %v575_v16 = vpop.xlane.xlu0 %574 }
 0x1be   : > { %v605_v17 = vsub.f32 %v513_v43, %v575_v16  ;;  %3761 = vpow2.f32 %v620_v13 }
 0x1bf   : > { %v626_v18 = vmul.f32 1.442695, %v607_v15 }
 0x1c0   : > { %v622_v26 = vmul.f32 1.442695, %v605_v17 }
 0x1c1   : > { %3763 = vpow2.f32 %v626_v18  ;;  %v585_v31 = vpop.xlane.xlu0 %584 }
 0x1c2   : > { %3765 = vpow2.f32 %v622_v26  ;;  %v587_v38 = vpop.xlane.xlu1 %586  ;;  %v610_v41 = vsub.f32 %v4197_v45, %v585_v31 }
 0x1c3   : > { %v611_v49 = vsub.f32 %v4200_v48, %v587_v38 }
 0x1c4   : > { %v632_v44 = vmul.f32 1.442695, %v610_v41 }
 0x1c5   : > { %v581_v36 = vpop.xlane.xlu0 %580  ;;  %v634_v60 = vmul.f32 1.442695, %v611_v49 }
 0x1c6   : > { %v583_v40 = vpop.xlane.xlu1 %582  ;;  %v608_v42 = vsub.f32 %v4203_v50, %v581_v36  ;;  %3767 = vpow2.f32 %v632_v44  ;;  %v3710_v36 = vld [vmem:[%s4105_s25 + $0xac] ss:$12 sps:$4 sm:$0xff]   ;;  %v1014_v44 = vsel %vm426_vm0, %v4183_v34, 0 }
 0x1c7   : > { %v4250_v27 = vpop.eup %3759  ;;  %v609_v46 = vsub.f32 %v4208_v51, %v583_v40 }
 0x1c8   : > { %656 = vadd.xlane.f32.xlu0 %v4250_v27  ;;  %v4253_v28 = vpop.eup %3761  ;;  %v628_v52 = vmul.f32 1.442695, %v608_v42 }
 0x1c9   : > { %v593_v37 = vpop.xlane.xlu0 %592  ;;  %v630_v54 = vmul.f32 1.442695, %v609_v46 }
 0x1ca   : > { %v595_v47 = vpop.xlane.xlu1 %594  ;;  %3769 = vpow2.f32 %v628_v52  ;;  %v614_v62 = vsub.f32 %v4212_v53, %v593_v37 }
 0x1cb   : > { %v4255_v29 = vpop.eup %3763  ;;  %3771 = vpow2.f32 %v630_v54  ;;  %v615_v53 = vsub.f32 %v4216_v56, %v595_v47 }
 0x1cc   : > { %658 = vadd.xlane.f32.xlu1 %v4255_v29  ;;  %652 = vadd.xlane.f32.xlu0 %v4253_v28  ;;  %v4259_v30 = vpop.eup %3765  ;;  %3773 = vpow2.f32 %v634_v60  ;;  %v640_v51 = vmul.f32 1.442695, %v614_v62 }
 0x1cd   : > { %v589_v39 = vpop.xlane.xlu0 %588  ;;  %v642_v10 = vmul.f32 1.442695, %v615_v53 }
 0x1ce   : > { %v591_v45 = vpop.xlane.xlu1 %590  ;;  %v612_v0 = vsub.f32 %v4219_v58, %v589_v39 }
 0x1cf   : > { %v613_v11 = vsub.f32 %v4224_v59, %v591_v45 }
 0x1d0   : > { %654 = vadd.xlane.f32.xlu1 %v4259_v30  ;;  %v4276_v3 = vpop.eup %3767 }
 0x1d1   : > { %v601_v43 = vpop.xlane.xlu0 %600 }
 0x1d2   : > { %v618_v55 = vsub.f32 %v4228_v61, %v601_v43  ;;  %v4274_v2 = vpop.permute.xlu1 %979  ;;  %v636_v61 = vmul.f32 1.442695, %v612_v0 }
 0x1d4   : > { %v648_v50 = vmul.f32 1.442695, %v618_v55  ;;  %v4280_v8 = vpop.eup %3769 }
 0x1d5   : > { %v597_v57 = vpop.xlane.xlu0 %596  ;;  %v4282_v9 = vpop.eup %3771 }
 0x1d6   : > { %v616_v63 = vsub.f32 %v4233_v1, %v597_v57  ;;  %3775 = vpow2.f32 %v648_v50  ;;  %v4288_v13 = vpop.eup %3773 }
 0x1d7   : > { %3777 = vpow2.f32 %v640_v51 }
 0x1d8   : > { %v644_v48 = vmul.f32 1.442695, %v616_v63 }
 0x1da   : > { %3779 = vpow2.f32 %v644_v48 }
 0x1db   : > { %3781 = vpow2.f32 %v636_v61 }
 0x1e0   : > { %v4290_v14 = vpop.eup %3775 }
 0x1e1   : > { %983 = vrot.lane.b32.xlu1 %v3707_v32, %s4048_s26  ;;  %v4295_v16 = vpop.eup %3777 }
 0x1e2   : > { %981 = vrot.lane.b32.xlu0 %v3708_v33, %s4048_s26  ;;  %v3709_v33 = vld [vmem:[%s4105_s25 + $0x94] ss:$12 sps:$4 sm:$0xff]  }
 0x1e4   : > { %v4297_v17 = vpop.eup %3779 }
 0x1e5   : > { %v4301_v18 = vpop.eup %3781 }
 0x201   : > { %664 = vadd.xlane.f32.xlu0 %v4276_v3 }
 0x203   : > { %v603_v1 = vpop.xlane.xlu1 %602 }
 0x204   : > { %v619_v58 = vsub.f32 %v4241_v4, %v603_v1  ;;  %v638_v4 = vmul.f32 1.442695, %v613_v11 }
 0x205   : > { %662 = vadd.xlane.f32.xlu0 %v4282_v9  ;;  %660 = vadd.xlane.f32.xlu1 %v4280_v8 }
 0x206   : > { %v650_v12 = vmul.f32 1.442695, %v619_v58 }
 0x207   : > { %v599_v56 = vpop.xlane.xlu1 %598 }
 0x208   : > { %3783 = vpow2.f32 %v650_v12  ;;  %v617_v15 = vsub.f32 %v4245_v5, %v599_v56 }
 0x209   : > { %666 = vadd.xlane.f32.xlu1 %v4288_v13  ;;  %680 = vadd.xlane.f32.xlu0 %v4290_v14  ;;  %3785 = vpow2.f32 %v642_v10 }
 0x20a   : > { %3787 = vpow2.f32 %v638_v4  ;;  %v646_v59 = vmul.f32 1.442695, %v617_v15 }
 0x20c   : > { %3789 = vpow2.f32 %v646_v59 }
 0x20d   : > { %672 = vadd.xlane.f32.xlu1 %v4295_v16  ;;  %676 = vadd.xlane.f32.xlu0 %v4297_v17 }
 0x211   : > { %668 = vadd.xlane.f32.xlu1 %v4301_v18 }
 0x212   : > { %v4304_v26 = vpop.eup %3783 }
 0x213   : > { %682 = vadd.xlane.f32.xlu0 %v4304_v26  ;;  %v4307_v5 = vpop.eup %3785 }
 0x214   : > { %v4310_v31 = vpop.eup %3787 }
 0x215   : > { %674 = vadd.xlane.f32.xlu1 %v4307_v5 }
 0x216   : > { %v4313_v32 = vpop.eup %3789 }
 0x219   : > { %670 = vadd.xlane.f32.xlu1 %v4310_v31 }
 0x21d   : > { %678 = vadd.xlane.f32.xlu1 %v4313_v32 }
 0x229   : > { %985 = vrot.lane.b32.xlu0 %v3709_v33, %s4048_s26 }
 0x22d   : > { %917 = vrot.lane.b32.xlu0 %v4117_v7, %s4048_s26  ;;  %v978_v7 = vpop.permute.xlu0 %977 }
 0x22e   : > { %987 = vrot.lane.b32.xlu1 %v3710_v36, %s4048_s26 }
 0x231   : > { %921 = vrot.lane.b32.xlu0 %v4144_v20, %s4048_s26 }
 0x232   : > { %919 = vrot.lane.b32.xlu1 %v4141_v19, %s4048_s26 }
 0x235   : > { %925 = vrot.lane.b32.xlu0 %v4154_v22, %s4048_s26 }
 0x236   : > { %923 = vrot.lane.b32.xlu1 %v4151_v21, %s4048_s26 }
 0x239   : > { %929 = vrot.lane.b32.xlu0 %v4164_v24, %s4048_s26 }
 0x23a   : > { %927 = vrot.lane.b32.xlu1 %v4161_v23, %s4048_s26 }
 0x23e   : > { %931 = vrot.lane.b32.xlu1 %v4171_v25, %s4048_s26 }
 0x255   : > { %v657_v20 = vpop.xlane.xlu0 %656 }
 0x259   : > { %v659_v37 = vpop.xlane.xlu1 %658  ;;  %v653_v38 = vpop.xlane.xlu0 %652 }
 0x25a   : > { %3791 = vrcp.f32 %v659_v37 }
 0x25b   : > { %3793 = vrcp.f32 %v653_v38 }
 0x25c   : > { %3795 = vrcp.f32 %v657_v20 }
 0x25d   : > { %v655_v19 = vpop.xlane.xlu1 %654  ;;  %v982_v34 = vpop.permute.xlu0 %981 }
 0x25e   : > { %3797 = vrcp.f32 %v655_v19  ;;  %v1026_v46 = vsel %vm426_vm0, %v982_v34, 0 }
 0x264   : > { %v3792_v22 = vpop.eup %3791 }
 0x265   : > { %v3794_v21 = vpop.eup %3793  ;;  %v703_v24 = vmul.f32 %v3792_v22, %v4255_v29  ;;  %v1017_v29 = vsel %vm426_vm0, %v4248_v6, 0 }
 0x266   : > { %v3796_v39 = vpop.eup %3795  ;;  %v700_v23 = vmul.f32 %v3794_v21, %v4253_v28  ;;  %v1020_v28 = vsel %vm426_vm0, %v978_v7, 0 }
 0x267   : > { %v702_v25 = vmul.f32 %v3796_v39, %v4250_v27  ;;  %v1023_v27 = vsel %vm426_vm0, %v4274_v2, 0 }
 0x268   : > { %v3798_v40 = vpop.eup %3797 }
 0x269   : > { %v701_v41 = vmul.f32 %v3798_v40, %v4259_v30  ;;  %v717_v43 = vpack.c.bf16 %v703_v24, %v702_v25  ;;  %v984_v30 = vpop.permute.xlu1 %983  ;;  %v3712_v25 = vld [vmem:[%s4105_s25 + $0x20] ss:$12 sps:$4 sm:$0xff]  }
 0x26a   : > { %v1029_v54 = vsel %vm426_vm0, %v984_v30, 0  ;;  %1328 = vrot.lane.b32.xlu1 %v3712_v25, %s4048_s26 }
 0x26b   : > { %v716_v42 = vpack.c.bf16 %v701_v41, %v700_v23 }
 0x26d   : > { %3363 = vmatprep.mubr.bf16.mxu1 %v716_v42 }
 0x26e   : > { %3364 = vmatmul.mubr.bf16.vlgmr.msra.gmra.mrb[0].mxu1 %v717_v43 }
 0x26f   : > { %3380 = vmatpush3.bf16.xpose.msra.mxu1 %v1014_v44  ;;  %v3715_v44 = vld [vmem:[%s4105_s25 + $0x68] ss:$12 sps:$4 sm:$0xff]  }
 0x270   : > { %3628 = vmatprep.subr.msk.bf16.mxu1 %vm426_vm0, %v4248_v6 }
 0x277   : > { %3382 = vmatpush3.bf16.xpose.msra.mxu1 %v1017_v29  ;;  %v3716_v29 = vld [vmem:[%s4105_s25 + $0x80] ss:$12 sps:$4 sm:$0xff]  }
 0x278   : > { %3629 = vmatprep.subr.msk.bf16.mxu1 %vm426_vm0, %v978_v7 }
 0x27f   : > { %3384 = vmatpush3.bf16.xpose.msra.mxu1 %v1020_v28  ;;  %v3717_v28 = vld [vmem:[%s4105_s25 + $0xb0] ss:$12 sps:$4 sm:$0xff]  }
 0x280   : > { %3630 = vmatprep.subr.msk.bf16.mxu1 %vm426_vm0, %v4274_v2 }
 0x287   : > { %3386 = vmatpush3.bf16.xpose.msra.mxu1 %v1023_v27  ;;  %v3718_v27 = vld [vmem:[%s4105_s25 + $0x98] ss:$12 sps:$4 sm:$0xff]  }
 0x288   : > { %3631 = vmatprep.subr.msk.bf16.mxu1 %vm426_vm0, %v982_v34 }
 0x28e   : > { %v665_v6 = vpop.xlane.xlu0 %664 }
 0x28f   : > { %3388 = vmatpush3.bf16.xpose.msra.mxu1 %v1026_v46 }
 0x290   : > { %3632 = vmatprep.subr.msk.bf16.mxu1 %vm426_vm0, %v984_v30 }
 0x292   : > { %v661_v47 = vpop.xlane.xlu1 %660  ;;  %v663_v49 = vpop.xlane.xlu0 %662 }
 0x293   : > { %3799 = vrcp.f32 %v661_v47  ;;  %v3720_v47 = vld [vmem:[%s4105_s25 + $0x4] ss:$12 sps:$4 sm:$0xff]  }
 0x294   : > { %3801 = vrcp.f32 %v663_v49 }
 0x295   : > { %3803 = vrcp.f32 %v665_v6  ;;  %v3719_v6 = vld [vmem:[%s4105_s25 + $0x1c] ss:$12 sps:$4 sm:$0xff]  }
 0x296   : > { %v667_v52 = vpop.xlane.xlu1 %666  ;;  %v681_v55 = vpop.xlane.xlu0 %680 }
 0x297   : > { %3805 = vrcp.f32 %v667_v52  ;;  %3390 = vmatpush3.bf16.xpose.msra.mxu1 %v1029_v54 }
 0x29a   : > { %v673_v57 = vpop.xlane.xlu1 %672  ;;  %v677_v60 = vpop.xlane.xlu0 %676 }
 0x29d   : > { %v3800_v62 = vpop.eup %3799 }
 0x29e   : > { %v3802_v45 = vpop.eup %3801  ;;  %v669_v50 = vpop.xlane.xlu1 %668  ;;  %v704_v63 = vmul.f32 %v3800_v62, %v4280_v8 }
 0x29f   : > { %v3804_v51 = vpop.eup %3803  ;;  %v705_v0 = vmul.f32 %v3802_v45, %v4282_v9 }
 0x2a0   : > { %v683_v48 = vpop.xlane.xlu0 %682  ;;  %v706_v1 = vmul.f32 %v3804_v51, %v4276_v3 }
 0x2a1   : > { %v3806_v2 = vpop.eup %3805  ;;  %v718_v53 = vpack.c.bf16 %v705_v0, %v704_v63 }
 0x2a2   : > { %v675_v61 = vpop.xlane.xlu1 %674  ;;  %v707_v58 = vmul.f32 %v3806_v2, %v4288_v13 }
 0x2a3   : > { %3367 = vmatprep.mubr.bf16.mxu1 %v718_v53  ;;  %3807 = vrcp.f32 %v675_v61 }
 0x2a4   : > { %v719_v10 = vpack.c.bf16 %v707_v58, %v706_v1  ;;  %v986_v11 = vpop.permute.xlu0 %985  ;;  %3809 = vrcp.f32 %v669_v50 }
 0x2a5   : > { %3633 = vmatprep.subr.msk.bf16.mxu1 %vm426_vm0, %v986_v11  ;;  %v1032_v8 = vsel %vm426_vm0, %v986_v11, 0  ;;  %3811 = vrcp.f32 %v673_v57 }
 0x2a6   : > { %v671_v12 = vpop.xlane.xlu1 %670  ;;  %3368 = vmatmul.mubr.bf16.gmra.mrb[4].mxu1 %v719_v10 }
 0x2a7   : > { %3813 = vrcp.f32 %v671_v12  ;;  %3392 = vmatpush3.bf16.xpose.msra.mxu1 %v1032_v8 }
 0x2a8   : > { %3815 = vrcp.f32 %v677_v60  ;;  %v918_v23 = vpop.permute.xlu0 %917 }
 0x2aa   : > { %v679_v9 = vpop.xlane.xlu1 %678 }
 0x2ab   : > { %3817 = vrcp.f32 %v679_v9 }
 0x2ac   : > { %3819 = vrcp.f32 %v683_v48  ;;  %v922_v41 = vpop.permute.xlu0 %921 }
 0x2ad   : > { %v3808_v3 = vpop.eup %3807  ;;  %3821 = vrcp.f32 %v681_v55 }
 0x2ae   : > { %v988_v13 = vpop.permute.xlu1 %987  ;;  %v3810_v56 = vpop.eup %3809  ;;  %v711_v33 = vmul.f32 %v3808_v3, %v4307_v5 }
 0x2af   : > { %3634 = vmatprep.subr.msk.bf16.mxu1 %vm426_vm0, %v988_v13  ;;  %v1035_v4 = vsel %vm426_vm0, %v988_v13, 0  ;;  %v3812_v15 = vpop.eup %3811  ;;  %v708_v36 = vmul.f32 %v3810_v56, %v4301_v18 }
 0x2b0   : > { %3394 = vmatpush3.bf16.xpose.msra.mxu1 %v1035_v4  ;;  %v710_v37 = vmul.f32 %v3812_v15, %v4295_v16  ;;  %v926_v43 = vpop.permute.xlu0 %925 }
 0x2b1   : > { %v3814_v59 = vpop.eup %3813 }
 0x2b2   : > { %v709_v7 = vmul.f32 %v3814_v59, %v4310_v31  ;;  %v3816_v20 = vpop.eup %3815  ;;  %v721_v22 = vpack.c.bf16 %v711_v33, %v710_v37 }
 0x2b3   : > { %v712_v39 = vmul.f32 %v3816_v20, %v4297_v17  ;;  %v920_v17 = vpop.permute.xlu1 %919 }
 0x2b4   : > { %v720_v38 = vpack.c.bf16 %v709_v7, %v708_v36  ;;  %v930_v30 = vpop.permute.xlu0 %929 }
 0x2b5   : > { %v3818_v19 = vpop.eup %3817 }
 0x2b6   : > { %v3820_v21 = vpop.eup %3819  ;;  %3371 = vmatprep.mubr.bf16.mxu1 %v720_v38  ;;  %v713_v40 = vmul.f32 %v3818_v19, %v4313_v32  ;;  %v3711_v32 = vld [vmem:[%s4105_s25 + $0x8] ss:$12 sps:$4 sm:$0xff]  }
 0x2b7   : > { %3372 = vmatmul.mubr.bf16.gmra.mrb[8].mxu1 %v721_v22  ;;  %v3822_v5 = vpop.eup %3821  ;;  %v715_v18 = vmul.f32 %v3820_v21, %v4304_v26  ;;  %1326 = vrot.lane.b32.xlu0 %v3711_v32, %s4048_s26  ;;  %v3714_v26 = vld [vmem:[%s4105_s25 + $0x50] ss:$12 sps:$4 sm:$0xff]   ;;  %v924_v42 = vpop.permute.xlu1 %923 }
 0x2b8   : > { %v722_v24 = vpack.c.bf16 %v713_v40, %v712_v39  ;;  %v714_v16 = vmul.f32 %v3822_v5, %v4290_v14  ;;  %v3713_v14 = vld [vmem:[%s4105_s25 + $0x38] ss:$12 sps:$4 sm:$0xff]   ;;  %1332 = vrot.lane.b32.xlu1 %v3714_v26, %s4048_s26 }
 0x2ba   : > { %3375 = vmatprep.mubr.bf16.mxu1 %v722_v24  ;;  %v723_v31 = vpack.c.bf16 %v715_v18, %v714_v16 }
 0x2bb   : > { %1330 = vrot.lane.b32.xlu0 %v3713_v14, %s4048_s26  ;;  %v928_v34 = vpop.permute.xlu1 %927 }
 0x2bc   : > { %1336 = vrot.lane.b32.xlu1 %v3716_v29, %s4048_s26 }
 0x2bf   : > { %3376 = vmatmul.mubr.bf16.gmra.mrb[12].mxu1 %v723_v31  ;;  %1334 = vrot.lane.b32.xlu0 %v3715_v44, %s4048_s26  ;;  %v932_v46 = vpop.permute.xlu1 %931 }
 0x2c0   : > { %3395 = vmatprep.mubr.msk.bf16.mxu1 %vm426_vm0, %v918_v23  ;;  %1340 = vrot.lane.b32.xlu1 %v3717_v28, %s4048_s26 }
 0x2c3   : > { %1338 = vrot.lane.b32.xlu0 %v3718_v27, %s4048_s26 }
 0x2c4   : > { %1586 = vrot.lane.b32.xlu1 %v3719_v6, %s4049_s29 }
 0x2c7   : > { %3396 = vmatmul.mubr.msk.bf16.vlgmr.msra.gmra.mrb[16].mxu1 %vm426_vm0, %v920_v17  ;;  %1584 = vrot.lane.b32.xlu0 %v3720_v47, %s4049_s29 }
 0x2c8   : > { %3399 = vmatprep.mubr.msk.bf16.mxu1 %vm426_vm0, %v922_v41 }
 0x2cf   : > { %3400 = vmatmul.mubr.msk.bf16.gmra.mrb[20].mxu1 %vm426_vm0, %v924_v42 }
 0x2d0   : > { %3403 = vmatprep.mubr.msk.bf16.mxu1 %vm426_vm0, %v926_v43 }
 0x2d7   : > { %3404 = vmatmul.mubr.msk.bf16.gmra.mrb[24].mxu1 %vm426_vm0, %v928_v34 }
 0x2d8   : > { %3407 = vmatprep.mubr.msk.bf16.mxu1 %vm426_vm0, %v930_v30 }
 0x2dc   : > { %v1329_v45 = vpop.permute.xlu1 %1328 }
 0x2df   : > { %3408 = vmatmul.mubr.msk.bf16.gmra.mrb[28].mxu1 %vm426_vm0, %v932_v46 }
 0x329   : > { %v1327_v60 = vpop.permute.xlu0 %1326 }
 0x32a   : > { %3411 = vmatprep.subr.bf16.mxu0 %v1327_v60  ;;  %v1333_v63 = vpop.permute.xlu1 %1332 }
 0x32b   : > { %3412 = vmatpush3.bf16.msra.mxu0 %v1327_v60 }
 0x32c   : > { %3413 = vmatprep.subr.bf16.mxu0 %v1329_v45 }
 0x32d   : > { %v1331_v50 = vpop.permute.xlu0 %1330 }
 0x32e   : > { %v1337_v0 = vpop.permute.xlu1 %1336 }
 0x32f   : > { %3414 = vmatpush3.bf16.msra.mxu0 %v1329_v45 }
 0x330   : > { %3415 = vmatprep.subr.bf16.mxu0 %v1331_v50 }
 0x331   : > { %v1335_v51 = vpop.permute.xlu0 %1334 }
 0x332   : > { %v1341_v2 = vpop.permute.xlu1 %1340 }
 0x333   : > { %3416 = vmatpush3.bf16.msra.mxu0 %v1331_v50 }
 0x334   : > { %3417 = vmatprep.subr.bf16.mxu0 %v1333_v63 }
 0x335   : > { %v1339_v48 = vpop.permute.xlu0 %1338 }
 0x337   : > { %3418 = vmatpush3.bf16.msra.mxu0 %v1333_v63 }
 0x338   : > { %3419 = vmatprep.subr.bf16.mxu0 %v1335_v51 }
 0x339   : > { %v4402_v53 = vpop.permute.xlu0 %1584 }
 0x33b   : > { %3420 = vmatpush3.bf16.msra.mxu0 %v1335_v51 }
 0x33c   : > { %3421 = vmatprep.subr.bf16.mxu0 %v1337_v0 }
 0x33f   : > { %3422 = vmatpush3.bf16.msra.mxu0 %v1337_v0 }
 0x340   : > { %3423 = vmatprep.subr.bf16.mxu0 %v1339_v48 }
 0x341   : > { %v3365_v49 = vpop.f32.mrb[0].mxu1 }
 0x342   : > { %v806_v52 = vpop.f32.mrb[1].mxu1 }
 0x343   : > { %v3366_v54 = vpop.f32.mrb[2].mxu1  ;;  %3424 = vmatpush3.bf16.msra.mxu0 %v1339_v48 }
 0x344   : > { %v870_v55 = vpack.c.bf16 %v3366_v54, %v3365_v49  ;;  %v809_v57 = vpop.f32.mrb[3].mxu1  ;;  %3425 = vmatprep.subr.bf16.mxu0 %v1341_v2  ;;  %v3721_v49 = vld [vmem:[%s4105_s25 + $0x4c] ss:$12 sps:$4 sm:$0xff]  }
 0x345   : > { %v869_v62 = vpack.c.bf16 %v809_v57, %v806_v52  ;;  %v3722_v52 = vld [vmem:[%s4105_s25 + $0x34] ss:$12 sps:$4 sm:$0xff]   ;;  %v4468_v57 = vpop.permute.xlu1 %1586 }
 0x346   : > { %878 = vst.msk [vmem:[#allocation2 + $0x8] sm:$0xff] %vm426_vm0, %v870_v55 }
 0x347   : > { %877 = vst.msk [vmem:[#allocation2] sm:$0xff] %vm426_vm0, %v869_v62  ;;  %3426 = vmatpush3.bf16.msra.mxu0 %v1341_v2 }
 0x348   : > { %3635 = vmatprep.subr.msk.bf16.mxu0 %vm426_vm0, %v4402_v53 }
 0x379   : > { %v3369_v61 = vpop.f32.mrb[4].mxu1 }
 0x37a   : > { %v822_v1 = vpop.f32.mrb[5].mxu1 }
 0x37b   : > { %v3370_v58 = vpop.f32.mrb[6].mxu1 }
 0x37c   : > { %v872_v10 = vpack.c.bf16 %v3370_v58, %v3369_v61  ;;  %v825_v11 = vpop.f32.mrb[7].mxu1 }
 0x37d   : > { %v871_v8 = vpack.c.bf16 %v825_v11, %v822_v1 }
 0x37e   : > { %880 = vst.msk [vmem:[#allocation2 + $0x18] sm:$0xff] %vm426_vm0, %v872_v10 }
 0x37f   : > { %879 = vst.msk [vmem:[#allocation2 + $0x10] sm:$0xff] %vm426_vm0, %v871_v8 }
 0x38a   : > { %v3373_v12 = vpop.f32.mrb[8].mxu1 }
 0x38b   : > { %v838_v9 = vpop.f32.mrb[9].mxu1 }
 0x38c   : > { %v3374_v3 = vpop.f32.mrb[10].mxu1 }
 0x38d   : > { %v874_v13 = vpack.c.bf16 %v3374_v3, %v3373_v12  ;;  %v841_v56 = vpop.f32.mrb[11].mxu1  ;;  %v3724_v3 = vld [vmem:[%s4105_s25 + $0x7c] ss:$12 sps:$4 sm:$0xff]  }
 0x38e   : > { %v873_v4 = vpack.c.bf16 %v841_v56, %v838_v9  ;;  %v3723_v9 = vld [vmem:[%s4105_s25 + $0x64] ss:$12 sps:$4 sm:$0xff]  }
 0x38f   : > { %882 = vst.msk [vmem:[#allocation2 + $0x28] sm:$0xff] %vm426_vm0, %v874_v13 }
 0x390   : > { %881 = vst.msk [vmem:[#allocation2 + $0x20] sm:$0xff] %vm426_vm0, %v873_v4 }
 0x392   : > { %v3377_v15 = vpop.f32.mrb[12].mxu1 }
 0x393   : > { %v854_v59 = vpop.f32.mrb[13].mxu1 }
 0x394   : > { %v3378_v33 = vpop.f32.mrb[14].mxu1 }
 0x395   : > { %v876_v36 = vpack.c.bf16 %v3378_v33, %v3377_v15  ;;  %v857_v7 = vpop.f32.mrb[15].mxu1 }
 0x396   : > { %v875_v20 = vpack.c.bf16 %v857_v7, %v854_v59 }
 0x397   : > { %884 = vst.msk [vmem:[#allocation2 + $0x38] sm:$0xff] %vm426_vm0, %v876_v36 }
 0x398   : > { %883 = vst.msk [vmem:[#allocation2 + $0x30] sm:$0xff] %vm426_vm0, %v875_v20 }
 0x39a   : > { %v3397_v37 = vpop.f32.mrb[16].mxu1 }
 0x39b   : > { %v1080_v38 = vadd.f32 %v3397_v37, %v4190_v35  ;;  %v1071_v19 = vpop.f32.mrb[17].mxu1 }
 0x39c   : > { %v3398_v22 = vpop.f32.mrb[18].mxu1  ;;  %v1072_v40 = vadd.f32 %v4190_v35, %v1071_v19 }
 0x39d   : > { %1138 = vmax.xlane.f32.xlu0 %v1080_v38  ;;  %v1074_v21 = vpop.f32.mrb[19].mxu1  ;;  %v1083_v24 = vadd.f32 %v3398_v22, %v4190_v35 }
 0x39e   : > { %v1075_v39 = vadd.f32 %v4190_v35, %v1074_v21 }
 0x3a0   : > { %1136 = vmax.xlane.f32.xlu1 %v1075_v39 }
 0x3a1   : > { %1134 = vmax.xlane.f32.xlu0 %v1072_v40 }
 0x3a2   : > { %v3401_v5 = vpop.f32.mrb[20].mxu1 }
 0x3a3   : > { %v1087_v18 = vpop.f32.mrb[21].mxu1  ;;  %v4417_v31 = vadd.f32 %v3401_v5, %v4190_v35 }
 0x3a4   : > { %v3402_v16 = vpop.f32.mrb[22].mxu1  ;;  %v4428_v25 = vadd.f32 %v4190_v35, %v1087_v18 }
 0x3a5   : > { %v4420_v23 = vadd.f32 %v3402_v16, %v4190_v35  ;;  %1140 = vmax.xlane.f32.xlu0 %v1083_v24  ;;  %v1090_v17 = vpop.f32.mrb[23].mxu1 }
 0x3a6   : > { %v4424_v41 = vadd.f32 %v4190_v35, %v1090_v17 }
 0x3a7   : > { %1148 = vmax.xlane.f32.xlu1 %v4420_v23 }
 0x3a9   : > { %1146 = vmax.xlane.f32.xlu0 %v4417_v31 }
 0x3aa   : > { %v3405_v32 = vpop.f32.mrb[24].mxu1 }
 0x3ab   : > { %1144 = vmax.xlane.f32.xlu1 %v4424_v41  ;;  %v1103_v14 = vpop.f32.mrb[25].mxu1  ;;  %v4432_v42 = vadd.f32 %v3405_v32, %v4190_v35 }
 0x3ac   : > { %v3406_v26 = vpop.f32.mrb[26].mxu1  ;;  %v4444_v27 = vadd.f32 %v4190_v35, %v1103_v14 }
 0x3ad   : > { %v4435_v43 = vadd.f32 %v3406_v26, %v4190_v35  ;;  %1142 = vmax.xlane.f32.xlu0 %v4428_v25  ;;  %v1106_v44 = vpop.f32.mrb[27].mxu1 }
 0x3ae   : > { %v4440_v29 = vadd.f32 %v4190_v35, %v1106_v44 }
 0x3af   : > { %1156 = vmax.xlane.f32.xlu1 %v4435_v43 }
 0x3b1   : > { %1154 = vmax.xlane.f32.xlu0 %v4432_v42 }
 0x3b2   : > { %v3409_v28 = vpop.f32.mrb[28].mxu1 }
 0x3b3   : > { %1152 = vmax.xlane.f32.xlu1 %v4440_v29  ;;  %v1119_v34 = vpop.f32.mrb[29].mxu1  ;;  %v4449_v46 = vadd.f32 %v3409_v28, %v4190_v35 }
 0x3b4   : > { %v3410_v30 = vpop.f32.mrb[30].mxu1  ;;  %v4453_v47 = vadd.f32 %v4190_v35, %v1119_v34 }
 0x3b5   : > { %1150 = vmax.xlane.f32.xlu0 %v4444_v27  ;;  %v1122_v6 = vpop.f32.mrb[31].mxu1  ;;  %v4461_v54 = vadd.f32 %v3410_v30, %v4190_v35 }
 0x3b6   : > { %v4465_v55 = vadd.f32 %v4190_v35, %v1122_v6 }
 0x3b9   : > { %1162 = vmax.xlane.f32.xlu0 %v4449_v46 }
 0x3bd   : > { %1158 = vmax.xlane.f32.xlu0 %v4453_v47 }
 0x3c4   : > { %1590 = vrot.lane.b32.xlu1 %v3721_v49, %s4049_s29 }
 0x3d3   : > { %1588 = vrot.lane.b32.xlu0 %v3722_v52, %s4049_s29 }
 0x3e8   : > { %1164 = vmax.xlane.f32.xlu1 %v4461_v54 }
 0x3ec   : > { %1160 = vmax.xlane.f32.xlu1 %v4465_v55 }
 0x42a   : > { %v1139_v60 = vpop.xlane.xlu0 %1138 }
 0x42b   : > { %v1168_v62 = vsub.f32 %v1080_v38, %v1139_v60 }
 0x42d   : > { %v1186_v45 = vmul.f32 1.442695, %v1168_v62  ;;  %v1137_v50 = vpop.xlane.xlu1 %1136 }
 0x42e   : > { %v1167_v63 = vsub.f32 %v1075_v39, %v1137_v50  ;;  %v1135_v51 = vpop.xlane.xlu0 %1134 }
 0x42f   : > { %3823 = vpow2.f32 %v1186_v45  ;;  %v1166_v0 = vsub.f32 %v1072_v40, %v1135_v51  ;;  %v3725_v51 = vld [vmem:[%s4105_s25 + $0x94] ss:$12 sps:$4 sm:$0xff]  }
 0x430   : > { %v1184_v48 = vmul.f32 1.442695, %v1167_v63 }
 0x431   : > { %v1182_v2 = vmul.f32 1.442695, %v1166_v0  ;;  %v3726_v0 = vld [vmem:[%s4105_s25 + $0xac] ss:$12 sps:$4 sm:$0xff]  }
 0x432   : > { %3825 = vpow2.f32 %v1184_v48  ;;  %v1141_v61 = vpop.xlane.xlu0 %1140  ;;  %v4541_v48 = vld [vmem:[%s4105_s25] ss:$12 sps:$4 sm:$0xff]  }
 0x433   : > { %3827 = vpow2.f32 %v1182_v2  ;;  %v1169_v35 = vsub.f32 %v1083_v24, %v1141_v61  ;;  %v4546_v2 = vld [vmem:[%s4105_s25 + $0x18] ss:$12 sps:$4 sm:$0xff]   ;;  %v4551_v61 = vld [vmem:[%s4105_s25 + $0x30] ss:$12 sps:$4 sm:$0xff]  }
 0x434   : > { %v1149_v56 = vpop.xlane.xlu1 %1148 }
 0x435   : > { %v1188_v1 = vmul.f32 1.442695, %v1169_v35  ;;  %v1173_v19 = vsub.f32 %v4420_v23, %v1149_v56  ;;  %v4556_v35 = vld [vmem:[%s4105_s25 + $0x48] ss:$12 sps:$4 sm:$0xff]  }
 0x436   : > { %v1147_v12 = vpop.xlane.xlu0 %1146 }
 0x437   : > { %3829 = vpow2.f32 %v1188_v1  ;;  %v1172_v15 = vsub.f32 %v4417_v31, %v1147_v12  ;;  %v1196_v40 = vmul.f32 1.442695, %v1173_v19  ;;  %v4561_v1 = vld [vmem:[%s4105_s25 + $0x60] ss:$12 sps:$4 sm:$0xff]   ;;  %v4566_v12 = vld [vmem:[%s4105_s25 + $0x78] ss:$12 sps:$4 sm:$0xff]  }
 0x438   : > { %v1145_v59 = vpop.xlane.xlu1 %1144 }
 0x439   : > { %v4470_v58 = vpop.eup %3823  ;;  %v1194_v36 = vmul.f32 1.442695, %v1172_v15  ;;  %v1171_v20 = vsub.f32 %v4424_v41, %v1145_v59 }
 0x43a   : > { %1218 = vadd.xlane.f32.xlu1 %v4470_v58  ;;  %v1143_v13 = vpop.xlane.xlu0 %1142 }
 0x43b   : > { %v1170_v7 = vsub.f32 %v4428_v25, %v1143_v13  ;;  %3831 = vpow2.f32 %v1194_v36  ;;  %v1192_v21 = vmul.f32 1.442695, %v1171_v20 }
 0x43c   : > { %v4473_v10 = vpop.eup %3825  ;;  %v1157_v37 = vpop.xlane.xlu1 %1156 }
 0x43d   : > { %v4475_v11 = vpop.eup %3827  ;;  %1216 = vadd.xlane.f32.xlu0 %v4473_v10  ;;  %v1190_v22 = vmul.f32 1.442695, %v1170_v7  ;;  %v1177_v23 = vsub.f32 %v4435_v43, %v1157_v37 }
 0x43e   : > { %1214 = vadd.xlane.f32.xlu1 %v4475_v11  ;;  %v1155_v4 = vpop.xlane.xlu0 %1154 }
 0x43f   : > { %v1176_v39 = vsub.f32 %v4432_v42, %v1155_v4  ;;  %3833 = vpow2.f32 %v1190_v22  ;;  %v1204_v42 = vmul.f32 1.442695, %v1177_v23 }
 0x440   : > { %v1153_v5 = vpop.xlane.xlu1 %1152  ;;  %3835 = vpow2.f32 %v1192_v21 }
 0x441   : > { %v4479_v8 = vpop.eup %3829  ;;  %v1202_v18 = vmul.f32 1.442695, %v1176_v39  ;;  %3837 = vpow2.f32 %v1196_v40  ;;  %v1175_v44 = vsub.f32 %v4440_v29, %v1153_v5  ;;  %v1625_v40 = vsel %vm426_vm0, %v4402_v53, 0 }
 0x442   : > { %1220 = vadd.xlane.f32.xlu1 %v4479_v8  ;;  %v1151_v33 = vpop.xlane.xlu0 %1150 }
 0x443   : > { %v1174_v16 = vsub.f32 %v4444_v27, %v1151_v33  ;;  %3839 = vpow2.f32 %v1202_v18  ;;  %v1200_v30 = vmul.f32 1.442695, %v1175_v44 }
 0x444   : > { %v4497_v14 = vpop.permute.xlu1 %1590 }
 0x445   : > { %v1198_v32 = vmul.f32 1.442695, %v1174_v16  ;;  %v4495_v25 = vpop.eup %3831 }
 0x446   : > { %v1163_v38 = vpop.xlane.xlu0 %1162 }
 0x447   : > { %v1180_v24 = vsub.f32 %v4449_v46, %v1163_v38 }
 0x449   : > { %v1210_v17 = vmul.f32 1.442695, %v1180_v24  ;;  %v4501_v28 = vpop.eup %3833 }
 0x44a   : > { %v1159_v31 = vpop.xlane.xlu0 %1158  ;;  %v4503_v34 = vpop.eup %3835 }
 0x44b   : > { %v1178_v41 = vsub.f32 %v4453_v47, %v1159_v31  ;;  %3841 = vpow2.f32 %v1210_v17  ;;  %v4508_v6 = vpop.eup %3837 }
 0x44c   : > { %3843 = vpow2.f32 %v1198_v32 }
 0x44d   : > { %v1206_v26 = vmul.f32 1.442695, %v1178_v41  ;;  %v4510_v29 = vpop.eup %3839 }
 0x44e   : > { %v1589_v13 = vpop.permute.xlu0 %1588 }
 0x44f   : > { %3845 = vpow2.f32 %v1206_v26 }
 0x450   : > { %3847 = vpow2.f32 %v1204_v42 }
 0x453   : > { %1592 = vrot.lane.b32.xlu0 %v3723_v9, %s4049_s29  ;;  %1594 = vrot.lane.b32.xlu1 %v3724_v3, %s4049_s29  ;;  %v4571_v9 = vld [vmem:[%s4105_s25 + $0x90] ss:$12 sps:$4 sm:$0xff]   ;;  %v4576_v3 = vld [vmem:[%s4105_s25 + $0xa8] ss:$12 sps:$4 sm:$0xff]  }
 0x472   : > { %1226 = vadd.xlane.f32.xlu0 %v4495_v25 }
 0x475   : > { %v1165_v27 = vpop.xlane.xlu1 %1164 }
 0x476   : > { %v1181_v43 = vsub.f32 %v4461_v54, %v1165_v27  ;;  %1222 = vadd.xlane.f32.xlu0 %v4501_v28  ;;  %v4515_v54 = vpop.eup %3841 }
 0x477   : > { %1224 = vadd.xlane.f32.xlu1 %v4503_v34  ;;  %v4517_v60 = vpop.eup %3843 }
 0x478   : > { %v1212_v46 = vmul.f32 1.442695, %v1181_v43  ;;  %v4521_v62 = vpop.eup %3845 }
 0x479   : > { %v1161_v47 = vpop.xlane.xlu1 %1160 }
 0x47a   : > { %3849 = vpow2.f32 %v1212_v46  ;;  %v1179_v49 = vsub.f32 %v4465_v55, %v1161_v47  ;;  %1228 = vadd.xlane.f32.xlu0 %v4508_v6  ;;  %v4523_v55 = vpop.eup %3847 }
 0x47b   : > { %1234 = vadd.xlane.f32.xlu1 %v4510_v29  ;;  %3851 = vpow2.f32 %v1200_v30 }
 0x47c   : > { %v1208_v52 = vmul.f32 1.442695, %v1179_v49 }
 0x47e   : > { %1242 = vadd.xlane.f32.xlu0 %v4515_v54  ;;  %3853 = vpow2.f32 %v1208_v52 }
 0x47f   : > { %1230 = vadd.xlane.f32.xlu1 %v4517_v60 }
 0x482   : > { %1238 = vadd.xlane.f32.xlu0 %v4521_v62 }
 0x483   : > { %1236 = vadd.xlane.f32.xlu1 %v4523_v55 }
 0x484   : > { %v4527_v45 = vpop.eup %3849 }
 0x485   : > { %v4529_v50 = vpop.eup %3851 }
 0x486   : > { %1244 = vadd.xlane.f32.xlu0 %v4527_v45 }
 0x487   : > { %1232 = vadd.xlane.f32.xlu1 %v4529_v50 }
 0x488   : > { %v4533_v63 = vpop.eup %3853 }
 0x48b   : > { %1240 = vadd.xlane.f32.xlu1 %v4533_v63 }
 0x49c   : > { %1596 = vrot.lane.b32.xlu0 %v3725_v51, %s4049_s29  ;;  %1598 = vrot.lane.b32.xlu1 %v3726_v0, %s4049_s29 }
 0x4a0   : > { %1528 = vrot.lane.b32.xlu0 %v4541_v48, %s4049_s29  ;;  %1530 = vrot.lane.b32.xlu1 %v4546_v2, %s4049_s29 }
 0x4a4   : > { %1532 = vrot.lane.b32.xlu0 %v4551_v61, %s4049_s29  ;;  %1534 = vrot.lane.b32.xlu1 %v4556_v35, %s4049_s29 }
 0x4a8   : > { %1536 = vrot.lane.b32.xlu0 %v4561_v1, %s4049_s29  ;;  %1538 = vrot.lane.b32.xlu1 %v4566_v12, %s4049_s29 }
 0x4ac   : > { %1540 = vrot.lane.b32.xlu0 %v4571_v9, %s4049_s29  ;;  %1542 = vrot.lane.b32.xlu1 %v4576_v3, %s4049_s29 }
 0x4c7   : > { %v1219_v56 = vpop.xlane.xlu1 %1218 }
 0x4ca   : > { %v1217_v4 = vpop.xlane.xlu0 %1216 }
 0x4cb   : > { %3855 = vrcp.f32 %v1217_v4  ;;  %v1215_v15 = vpop.xlane.xlu1 %1214 }
 0x4cc   : > { %3857 = vrcp.f32 %v1215_v15 }
 0x4cd   : > { %3859 = vrcp.f32 %v1219_v56 }
 0x4ce   : > { %v1593_v53 = vpop.permute.xlu0 %1592 }
 0x4cf   : > { %v1221_v59 = vpop.xlane.xlu1 %1220 }
 0x4d0   : > { %3861 = vrcp.f32 %v1221_v59 }
 0x4d5   : > { %v3856_v33 = vpop.eup %3855 }
 0x4d6   : > { %v3858_v36 = vpop.eup %3857  ;;  %v1263_v7 = vmul.f32 %v3856_v33, %v4473_v10  ;;  %v1628_v10 = vsel %vm426_vm0, %v4468_v57, 0 }
 0x4d7   : > { %v1262_v20 = vmul.f32 %v3858_v36, %v4475_v11  ;;  %v3860_v37 = vpop.eup %3859  ;;  %v1634_v11 = vsel %vm426_vm0, %v4497_v14, 0 }
 0x4d8   : > { %v1264_v22 = vmul.f32 %v3860_v37, %v4470_v58  ;;  %v1631_v58 = vsel %vm426_vm0, %v1589_v13, 0 }
 0x4d9   : > { %v1278_v38 = vpack.c.bf16 %v1263_v7, %v1262_v20 }
 0x4da   : > { %v3862_v19 = vpop.eup %3861 }
 0x4db   : > { %v1265_v21 = vmul.f32 %v3862_v19, %v4479_v8  ;;  %3427 = vmatprep.mubr.bf16.mxu0 %v1278_v38  ;;  %v1637_v8 = vsel %vm426_vm0, %v1593_v53, 0 }
 0x4dd   : > { %v1279_v39 = vpack.c.bf16 %v1265_v21, %v1264_v22 }
 0x4df   : > { %3428 = vmatmul.mubr.bf16.vlgmr.msra.gmra.mrb[16].mxu0 %v1279_v39 }
 0x4e0   : > { %3444 = vmatpush3.bf16.xpose.msra.mxu0 %v1625_v40 }
 0x4e1   : > { %3636 = vmatprep.subr.msk.bf16.mxu0 %vm426_vm0, %v4468_v57  ;;  %v1595_v57 = vpop.permute.xlu1 %1594 }
 0x4e2   : > { %v1640_v16 = vsel %vm426_vm0, %v1595_v57, 0 }
 0x4e8   : > { %3446 = vmatpush3.bf16.xpose.msra.mxu0 %v1628_v10 }
 0x4e9   : > { %3637 = vmatprep.subr.msk.bf16.mxu0 %vm426_vm0, %v1589_v13 }
 0x4f0   : > { %3448 = vmatpush3.bf16.xpose.msra.mxu0 %v1631_v58 }
 0x4f1   : > { %3638 = vmatprep.subr.msk.bf16.mxu0 %vm426_vm0, %v4497_v14 }
 0x4f8   : > { %3450 = vmatpush3.bf16.xpose.msra.mxu0 %v1634_v11  ;;  %v3727_v11 = vld [vmem:[%s4105_s25 + $0x8] ss:$12 sps:$4 sm:$0xff]  }
 0x4f9   : > { %3639 = vmatprep.subr.msk.bf16.mxu0 %vm426_vm0, %v1593_v53  ;;  %1937 = vrot.lane.b32.xlu0 %v3727_v11, %s4049_s29  ;;  %v3730_v53 = vld [vmem:[%s4105_s25 + $0x50] ss:$12 sps:$4 sm:$0xff]  }
 0x4ff   : > { %v1227_v5 = vpop.xlane.xlu0 %1226 }
 0x500   : > { %3452 = vmatpush3.bf16.xpose.msra.mxu0 %v1637_v8 }
 0x501   : > { %3640 = vmatprep.subr.msk.bf16.mxu0 %vm426_vm0, %v1595_v57  ;;  %v3731_v57 = vld [vmem:[%s4105_s25 + $0x68] ss:$12 sps:$4 sm:$0xff]  }
 0x503   : > { %v1223_v24 = vpop.xlane.xlu0 %1222 }
 0x504   : > { %3863 = vrcp.f32 %v1223_v24  ;;  %v1225_v18 = vpop.xlane.xlu1 %1224  ;;  %v3732_v24 = vld [vmem:[%s4105_s25 + $0x80] ss:$12 sps:$4 sm:$0xff]  }
 0x505   : > { %3865 = vrcp.f32 %v1225_v18  ;;  %v3733_v18 = vld [vmem:[%s4105_s25 + $0xb0] ss:$12 sps:$4 sm:$0xff]  }
 0x506   : > { %3867 = vrcp.f32 %v1227_v5 }
 0x507   : > { %v1229_v31 = vpop.xlane.xlu0 %1228 }
 0x508   : > { %3454 = vmatpush3.bf16.xpose.msra.mxu0 %v1640_v16  ;;  %3869 = vrcp.f32 %v1229_v31  ;;  %v1235_v17 = vpop.xlane.xlu1 %1234  ;;  %v3734_v16 = vld [vmem:[%s4105_s25 + $0x98] ss:$12 sps:$4 sm:$0xff]  }
 0x50b   : > { %v1243_v41 = vpop.xlane.xlu0 %1242 }
 0x50c   : > { %v1231_v23 = vpop.xlane.xlu1 %1230 }
 0x50e   : > { %v3864_v32 = vpop.eup %3863 }
 0x50f   : > { %v3866_v14 = vpop.eup %3865  ;;  %v1239_v26 = vpop.xlane.xlu0 %1238  ;;  %v1266_v42 = vmul.f32 %v3864_v32, %v4501_v28  ;;  %v3736_v32 = vld [vmem:[%s4105_s25 + $0x4] ss:$12 sps:$4 sm:$0xff]  }
 0x510   : > { %v3868_v44 = vpop.eup %3867  ;;  %v1237_v27 = vpop.xlane.xlu1 %1236  ;;  %v1267_v43 = vmul.f32 %v3866_v14, %v4503_v34 }
 0x511   : > { %3871 = vrcp.f32 %v1237_v27  ;;  %v1268_v49 = vmul.f32 %v3868_v44, %v4495_v25 }
 0x512   : > { %v3870_v30 = vpop.eup %3869  ;;  %v1280_v46 = vpack.c.bf16 %v1267_v43, %v1266_v42  ;;  %3873 = vrcp.f32 %v1231_v23 }
 0x513   : > { %v1245_v47 = vpop.xlane.xlu0 %1244  ;;  %v1269_v52 = vmul.f32 %v3870_v30, %v4508_v6  ;;  %3875 = vrcp.f32 %v1235_v17 }
 0x514   : > { %v1233_v51 = vpop.xlane.xlu1 %1232  ;;  %3431 = vmatprep.mubr.bf16.mxu0 %v1280_v46 }
 0x515   : > { %3877 = vrcp.f32 %v1233_v51  ;;  %v1281_v0 = vpack.c.bf16 %v1269_v52, %v1268_v49 }
 0x516   : > { %3879 = vrcp.f32 %v1239_v26 }
 0x517   : > { %3432 = vmatmul.mubr.bf16.gmra.mrb[20].mxu0 %v1281_v0  ;;  %v1597_v28 = vpop.permute.xlu0 %1596 }
 0x518   : > { %v1241_v13 = vpop.xlane.xlu1 %1240  ;;  %3641 = vmatprep.subr.msk.bf16.mxu0 %vm426_vm0, %v1597_v28  ;;  %v1643_v34 = vsel %vm426_vm0, %v1597_v28, 0 }
 0x519   : > { %3881 = vrcp.f32 %v1241_v13  ;;  %3456 = vmatpush3.bf16.xpose.msra.mxu0 %v1643_v34 }
 0x51a   : > { %3883 = vrcp.f32 %v1245_v47 }
 0x51b   : > { %v3872_v56 = vpop.eup %3871  ;;  %3885 = vrcp.f32 %v1243_v41  ;;  %v1529_v58 = vpop.permute.xlu0 %1528  ;;  %v3735_v41 = vld [vmem:[%s4105_s25 + $0x1c] ss:$12 sps:$4 sm:$0xff]  }
 0x51c   : > { %v1599_v25 = vpop.permute.xlu1 %1598  ;;  %v3874_v6 = vpop.eup %3873  ;;  %v1273_v33 = vmul.f32 %v3872_v56, %v4523_v55 }
 0x51d   : > { %3642 = vmatprep.subr.msk.bf16.mxu0 %vm426_vm0, %v1599_v25  ;;  %v3876_v4 = vpop.eup %3875  ;;  %v1646_v15 = vsel %vm426_vm0, %v1599_v25, 0  ;;  %v1270_v36 = vmul.f32 %v3874_v6, %v4517_v60 }
 0x51e   : > { %v1272_v37 = vmul.f32 %v3876_v4, %v4510_v29 }
 0x51f   : > { %v3878_v59 = vpop.eup %3877 }
 0x520   : > { %v1271_v7 = vmul.f32 %v3878_v59, %v4529_v50  ;;  %v3880_v20 = vpop.eup %3879  ;;  %v1283_v22 = vpack.c.bf16 %v1273_v33, %v1272_v37 }
 0x521   : > { %3458 = vmatpush3.bf16.xpose.msra.mxu0 %v1646_v15  ;;  %v1274_v39 = vmul.f32 %v3880_v20, %v4521_v62  ;;  %v1531_v62 = vpop.permute.xlu1 %1530 }
 0x522   : > { %v1282_v38 = vpack.c.bf16 %v1271_v7, %v1270_v36 }
 0x523   : > { %v3882_v19 = vpop.eup %3881 }
 0x524   : > { %v3884_v21 = vpop.eup %3883  ;;  %3435 = vmatprep.mubr.bf16.mxu0 %v1282_v38  ;;  %v1275_v40 = vmul.f32 %v3882_v19, %v4533_v63  ;;  %v1533_v63 = vpop.permute.xlu0 %1532 }
 0x525   : > { %3436 = vmatmul.mubr.bf16.gmra.mrb[24].mxu0 %v1283_v22  ;;  %v3886_v55 = vpop.eup %3885  ;;  %v1277_v50 = vmul.f32 %v3884_v21, %v4527_v45  ;;  %v3728_v45 = vld [vmem:[%s4105_s25 + $0x20] ss:$12 sps:$4 sm:$0xff]   ;;  %v1535_v8 = vpop.permute.xlu1 %1534 }
 0x526   : > { %v1284_v60 = vpack.c.bf16 %v1275_v40, %v1274_v39  ;;  %v1276_v29 = vmul.f32 %v3886_v55, %v4515_v54  ;;  %1939 = vrot.lane.b32.xlu1 %v3728_v45, %s4049_s29  ;;  %v3729_v54 = vld [vmem:[%s4105_s25 + $0x38] ss:$12 sps:$4 sm:$0xff]  }
 0x527   : > { %1941 = vrot.lane.b32.xlu0 %v3729_v54, %s4049_s29 }
 0x528   : > { %3439 = vmatprep.mubr.bf16.mxu0 %v1284_v60  ;;  %v1285_v10 = vpack.c.bf16 %v1277_v50, %v1276_v29  ;;  %v1537_v5 = vpop.permute.xlu0 %1536  ;;  %v4699_v60 = vld [vmem:[%s5266_s1] ss:$0 sm:$0xff] }
 0x529   : > { %v1539_v31 = vpop.permute.xlu1 %1538 }
 0x52a   : > { %1943 = vrot.lane.b32.xlu1 %v3730_v53, %s4049_s29 }
 0x52b   : > { %1945 = vrot.lane.b32.xlu0 %v3731_v57, %s4049_s29 }
 0x52c   : > { %v1541_v17 = vpop.permute.xlu0 %1540 }
 0x52d   : > { %3440 = vmatmul.mubr.bf16.gmra.mrb[28].mxu0 %v1285_v10  ;;  %v1543_v23 = vpop.permute.xlu1 %1542 }
 0x52e   : > { %3459 = vmatprep.mubr.msk.bf16.mxu0 %vm426_vm0, %v1529_v58  ;;  %1947 = vrot.lane.b32.xlu1 %v3732_v24, %s4049_s29 }
 0x52f   : > { %1949 = vrot.lane.b32.xlu0 %v3734_v16, %s4049_s29 }
 0x532   : > { %1951 = vrot.lane.b32.xlu1 %v3733_v18, %s4049_s29 }
 0x533   : > { %2195 = vrot.lane.b32.xlu0 %v3736_v32, %s4050_s30 }
 0x535   : > { %3460 = vmatmul.mubr.msk.bf16.vlgmr.msra.gmra.mrb[32].mxu0 %vm426_vm0, %v1531_v62 }
 0x536   : > { %3463 = vmatprep.mubr.msk.bf16.mxu0 %vm426_vm0, %v1533_v63  ;;  %2197 = vrot.lane.b32.xlu1 %v3735_v41, %s4050_s30 }
 0x53d   : > { %3464 = vmatmul.mubr.msk.bf16.gmra.mrb[36].mxu0 %vm426_vm0, %v1535_v8 }
 0x53e   : > { %3467 = vmatprep.mubr.msk.bf16.mxu0 %vm426_vm0, %v1537_v5 }
 0x545   : > { %3468 = vmatmul.mubr.msk.bf16.gmra.mrb[40].mxu0 %vm426_vm0, %v1539_v31 }
 0x546   : > { %3471 = vmatprep.mubr.msk.bf16.mxu0 %vm426_vm0, %v1541_v17 }
 0x54d   : > { %3472 = vmatmul.mubr.msk.bf16.gmra.mrb[44].mxu0 %vm426_vm0, %v1543_v23 }
 0x56b   : > { %v1938_v26 = vpop.permute.xlu0 %1937 }
 0x56c   : > { %3475 = vmatprep.subr.bf16.mxu1 %v1938_v26 }
 0x56d   : > { %3476 = vmatpush3.bf16.msra.mxu1 %v1938_v26 }
 0x598   : > { %v1940_v44 = vpop.permute.xlu1 %1939 }
 0x599   : > { %3477 = vmatprep.subr.bf16.mxu1 %v1940_v44  ;;  %v1942_v47 = vpop.permute.xlu0 %1941 }
 0x59a   : > { %3478 = vmatpush3.bf16.msra.mxu1 %v1940_v44 }
 0x59b   : > { %3479 = vmatprep.subr.bf16.mxu1 %v1942_v47 }
 0x59c   : > { %v1944_v49 = vpop.permute.xlu1 %1943 }
 0x59d   : > { %v1946_v52 = vpop.permute.xlu0 %1945 }
 0x59e   : > { %3480 = vmatpush3.bf16.msra.mxu1 %v1942_v47 }
 0x59f   : > { %3481 = vmatprep.subr.bf16.mxu1 %v1944_v49 }
 0x5a0   : > { %v1948_v51 = vpop.permute.xlu1 %1947 }
 0x5a1   : > { %v1950_v0 = vpop.permute.xlu0 %1949 }
 0x5a2   : > { %3482 = vmatpush3.bf16.msra.mxu1 %v1944_v49 }
 0x5a3   : > { %3483 = vmatprep.subr.bf16.mxu1 %v1946_v52 }
 0x5a4   : > { %v1952_v28 = vpop.permute.xlu1 %1951 }
 0x5a5   : > { %v4656_v13 = vpop.permute.xlu0 %2195 }
 0x5a6   : > { %3484 = vmatpush3.bf16.msra.mxu1 %v1946_v52 }
 0x5a7   : > { %3485 = vmatprep.subr.bf16.mxu1 %v1948_v51 }
 0x5aa   : > { %3486 = vmatpush3.bf16.msra.mxu1 %v1948_v51 }
 0x5ab   : > { %3487 = vmatprep.subr.bf16.mxu1 %v1950_v0 }
 0x5ae   : > { %3488 = vmatpush3.bf16.msra.mxu1 %v1950_v0 }
 0x5af   : > { %3489 = vmatprep.subr.bf16.mxu1 %v1952_v28 }
 0x5b2   : > { %v4644_v14 = vpop.f32.mrb[16].mxu0  ;;  %3490 = vmatpush3.bf16.msra.mxu1 %v1952_v28 }
 0x5b3   : > { %v4646_v42 = vpop.f32.mrb[17].mxu0  ;;  %3643 = vmatprep.subr.msk.bf16.mxu1 %vm426_vm0, %v4656_v13 }
 0x5b4   : > { %v4648_v27 = vpop.f32.mrb[18].mxu0 }
 0x5b5   : > { %v4652_v30 = vpop.f32.mrb[19].mxu0 }
 0x5ea   : > { %v4660_v34 = vpop.f32.mrb[20].mxu0 }
 0x5eb   : > { %v4662_v56 = vpop.f32.mrb[21].mxu0 }
 0x5ec   : > { %v4664_v25 = vpop.f32.mrb[22].mxu0 }
 0x5ed   : > { %v4668_v4 = vpop.f32.mrb[23].mxu0 }
 0x5f8   : > { %v4672_v59 = vpop.f32.mrb[24].mxu0 }
 0x5f9   : > { %v4674_v33 = vpop.f32.mrb[25].mxu0 }
 0x5fa   : > { %v4676_v36 = vpop.f32.mrb[26].mxu0 }
 0x5fb   : > { %v4680_v20 = vpop.f32.mrb[27].mxu0 }
 0x600   : > { %v4684_v38 = vpop.f32.mrb[28].mxu0 }
 0x601   : > { %v4686_v19 = vpop.f32.mrb[29].mxu0 }
 0x602   : > { %v4688_v22 = vpop.f32.mrb[30].mxu0 }
 0x603   : > { %v4692_v39 = vpop.f32.mrb[31].mxu0 }
 0x608   : > { %v3461_v55 = vpop.f32.mrb[32].mxu0 }
 0x609   : > { %v1691_v50 = vadd.f32 %v4699_v60, %v3461_v55  ;;  %v1682_v29 = vpop.f32.mrb[33].mxu0  ;;  %v3737_v55 = vld [vmem:[%s4105_s25 + $0x4c] ss:$12 sps:$4 sm:$0xff]  }
 0x60a   : > { %v3462_v10 = vpop.f32.mrb[34].mxu0  ;;  %v1683_v63 = vadd.f32 %v4699_v60, %v1682_v29  ;;  %v3738_v29 = vld [vmem:[%s4105_s25 + $0x34] ss:$12 sps:$4 sm:$0xff]  }
 0x60b   : > { %1749 = vmax.xlane.f32.xlu0 %v1691_v50  ;;  %v1685_v58 = vpop.f32.mrb[35].mxu0  ;;  %v1694_v45 = vadd.f32 %v4699_v60, %v3462_v10 }
 0x60c   : > { %v1686_v62 = vadd.f32 %v4699_v60, %v1685_v58 }
 0x60e   : > { %1747 = vmax.xlane.f32.xlu1 %v1686_v62 }
 0x60f   : > { %1745 = vmax.xlane.f32.xlu0 %v1683_v63 }
 0x610   : > { %v3465_v11 = vpop.f32.mrb[36].mxu0 }
 0x611   : > { %v1698_v54 = vpop.f32.mrb[37].mxu0  ;;  %v4706_v8 = vadd.f32 %v4699_v60, %v3465_v11  ;;  %v4757_v11 = vpop.permute.xlu1 %2197 }
 0x612   : > { %v3466_v53 = vpop.f32.mrb[38].mxu0  ;;  %v4717_v16 = vadd.f32 %v4699_v60, %v1698_v54 }
 0x613   : > { %v4709_v5 = vadd.f32 %v4699_v60, %v3466_v53  ;;  %1751 = vmax.xlane.f32.xlu0 %v1694_v45  ;;  %v1701_v57 = vpop.f32.mrb[39].mxu0 }
 0x614   : > { %v4713_v24 = vadd.f32 %v4699_v60, %v1701_v57 }
 0x615   : > { %1759 = vmax.xlane.f32.xlu1 %v4709_v5 }
 0x617   : > { %1757 = vmax.xlane.f32.xlu0 %v4706_v8 }
 0x618   : > { %v3469_v18 = vpop.f32.mrb[40].mxu0 }
 0x619   : > { %1755 = vmax.xlane.f32.xlu1 %v4713_v24  ;;  %v1714_v31 = vpop.f32.mrb[41].mxu0  ;;  %v4721_v41 = vadd.f32 %v4699_v60, %v3469_v18 }
 0x61a   : > { %v3470_v17 = vpop.f32.mrb[42].mxu0  ;;  %v4733_v47 = vadd.f32 %v4699_v60, %v1714_v31 }
 0x61b   : > { %v4724_v23 = vadd.f32 %v4699_v60, %v3470_v17  ;;  %1753 = vmax.xlane.f32.xlu0 %v4717_v16  ;;  %v1717_v32 = vpop.f32.mrb[43].mxu0 }
 0x61c   : > { %v4729_v26 = vadd.f32 %v4699_v60, %v1717_v32 }
 0x61d   : > { %1767 = vmax.xlane.f32.xlu1 %v4724_v23 }
 0x61f   : > { %1765 = vmax.xlane.f32.xlu0 %v4721_v41 }
 0x620   : > { %v3473_v44 = vpop.f32.mrb[44].mxu0 }
 0x621   : > { %1763 = vmax.xlane.f32.xlu1 %v4729_v26  ;;  %v1730_v49 = vpop.f32.mrb[45].mxu0  ;;  %v4738_v51 = vadd.f32 %v4699_v60, %v3473_v44 }
 0x622   : > { %v3474_v52 = vpop.f32.mrb[46].mxu0  ;;  %v4742_v28 = vadd.f32 %v4699_v60, %v1730_v49 }
 0x623   : > { %1761 = vmax.xlane.f32.xlu0 %v4733_v47  ;;  %v1733_v0 = vpop.f32.mrb[47].mxu0  ;;  %v4750_v10 = vadd.f32 %v4699_v60, %v3474_v52 }
 0x624   : > { %v4754_v58 = vadd.f32 %v4699_v60, %v1733_v0 }
 0x627   : > { %1773 = vmax.xlane.f32.xlu0 %v4738_v51 }
 0x62b   : > { %1769 = vmax.xlane.f32.xlu0 %v4742_v28 }
 0x632   : > { %2201 = vrot.lane.b32.xlu1 %v3737_v55, %s4050_s30 }
 0x641   : > { %2199 = vrot.lane.b32.xlu0 %v3738_v29, %s4050_s30 }
 0x656   : > { %1775 = vmax.xlane.f32.xlu1 %v4750_v10 }
 0x65a   : > { %1771 = vmax.xlane.f32.xlu1 %v4754_v58 }
 0x698   : > { %v1750_v54 = vpop.xlane.xlu0 %1749 }
 0x699   : > { %v1779_v53 = vsub.f32 %v1691_v50, %v1750_v54 }
 0x69b   : > { %v1797_v57 = vmul.f32 1.442695, %v1779_v53  ;;  %v1748_v18 = vpop.xlane.xlu1 %1747  ;;  %v3740_v53 = vld [vmem:[%s4105_s25 + $0x7c] ss:$12 sps:$4 sm:$0xff]  }
 0x69c   : > { %v1778_v31 = vsub.f32 %v1686_v62, %v1748_v18  ;;  %v1746_v17 = vpop.xlane.xlu0 %1745 }
 0x69d   : > { %3887 = vpow2.f32 %v1797_v57  ;;  %v1777_v32 = vsub.f32 %v1683_v63, %v1746_v17 }
 0x69e   : > { %v1795_v44 = vmul.f32 1.442695, %v1778_v31 }
 0x69f   : > { %v1793_v49 = vmul.f32 1.442695, %v1777_v32 }
 0x6a0   : > { %3889 = vpow2.f32 %v1795_v44  ;;  %v1752_v52 = vpop.xlane.xlu0 %1751 }
 0x6a1   : > { %3891 = vpow2.f32 %v1793_v49  ;;  %v1780_v0 = vsub.f32 %v1694_v45, %v1752_v52  ;;  %v3739_v45 = vld [vmem:[%s4105_s25 + $0x64] ss:$12 sps:$4 sm:$0xff]  }
 0x6a2   : > { %v1760_v18 = vpop.xlane.xlu1 %1759 }
 0x6a3   : > { %v1799_v55 = vmul.f32 1.442695, %v1780_v0  ;;  %v1784_v15 = vsub.f32 %v4709_v5, %v1760_v18 }
 0x6a4   : > { %v1758_v54 = vpop.xlane.xlu0 %1757 }
 0x6a5   : > { %3893 = vpow2.f32 %v1799_v55  ;;  %v1783_v17 = vsub.f32 %v4706_v8, %v1758_v54  ;;  %v1807_v21 = vmul.f32 1.442695, %v1784_v15 }
 0x6a6   : > { %v1756_v32 = vpop.xlane.xlu1 %1755 }
 0x6a7   : > { %v4759_v29 = vpop.eup %3887  ;;  %v1805_v49 = vmul.f32 1.442695, %v1783_v17  ;;  %v1782_v0 = vsub.f32 %v4713_v24, %v1756_v32 }
 0x6a8   : > { %1829 = vadd.xlane.f32.xlu1 %v4759_v29  ;;  %v1754_v57 = vpop.xlane.xlu0 %1753 }
 0x6a9   : > { %v1781_v52 = vsub.f32 %v4717_v16, %v1754_v57  ;;  %3895 = vpow2.f32 %v1805_v49  ;;  %v1803_v46 = vmul.f32 1.442695, %v1782_v0 }
 0x6aa   : > { %v4762_v50 = vpop.eup %3889  ;;  %v1768_v55 = vpop.xlane.xlu1 %1767 }
 0x6ab   : > { %v4764_v62 = vpop.eup %3891  ;;  %1827 = vadd.xlane.f32.xlu0 %v4762_v50  ;;  %v1788_v5 = vsub.f32 %v4724_v23, %v1768_v55 }
 0x6ac   : > { %1825 = vadd.xlane.f32.xlu1 %v4764_v62  ;;  %v1766_v31 = vpop.xlane.xlu0 %1765 }
 0x6ae   : > { %v1764_v40 = vpop.xlane.xlu1 %1763 }
 0x6af   : > { %v4768_v63 = vpop.eup %3893 }
 0x6b0   : > { %1831 = vadd.xlane.f32.xlu1 %v4768_v63  ;;  %v1762_v44 = vpop.xlane.xlu0 %1761 }
 0x6b1   : > { %v1785_v16 = vsub.f32 %v4733_v47, %v1762_v44 }
 0x6b2   : > { %v4786_v15 = vpop.permute.xlu1 %2201 }
 0x6b3   : > { %v1809_v18 = vmul.f32 1.442695, %v1785_v16  ;;  %v4784_v32 = vpop.eup %3895  ;;  %v3742_v16 = vld [vmem:[%s4105_s25 + $0xac] ss:$12 sps:$4 sm:$0xff]  }
 0x6b4   : > { %v1774_v6 = vpop.xlane.xlu0 %1773 }
 0x6b5   : > { %v1791_v8 = vsub.f32 %v4738_v51, %v1774_v6  ;;  %v1815_v6 = vmul.f32 1.442695, %v1788_v5 }
 0x6b7   : > { %v1821_v24 = vmul.f32 1.442695, %v1791_v8 }
 0x6b8   : > { %v1770_v57 = vpop.xlane.xlu0 %1769 }
 0x6b9   : > { %v1789_v17 = vsub.f32 %v4742_v28, %v1770_v57 }
 0x6c1   : > { %2203 = vrot.lane.b32.xlu0 %v3739_v45, %s4050_s30  ;;  %2205 = vrot.lane.b32.xlu1 %v3740_v53, %s4050_s30  ;;  %v1801_v45 = vmul.f32 1.442695, %v1781_v52  ;;  %v1787_v53 = vsub.f32 %v4721_v41, %v1766_v31  ;;  %v1786_v41 = vsub.f32 %v4729_v26, %v1764_v40 }
 0x6c3   : > { %3897 = vpow2.f32 %v1801_v45  ;;  %v1813_v54 = vmul.f32 1.442695, %v1787_v53  ;;  %v1811_v28 = vmul.f32 1.442695, %v1786_v41  ;;  %v2236_v41 = vsel %vm426_vm0, %v4656_v13, 0 }
 0x6c4   : > { %3899 = vpow2.f32 %v1803_v46  ;;  %v1817_v46 = vmul.f32 1.442695, %v1789_v17 }
 0x6c5   : > { %3901 = vpow2.f32 %v1807_v21 }
 0x6c6   : > { %3903 = vpow2.f32 %v1813_v54  ;;  %v3741_v54 = vld [vmem:[%s4105_s25 + $0x94] ss:$12 sps:$4 sm:$0xff]  }
 0x6c7   : > { %3905 = vpow2.f32 %v1821_v24 }
 0x6c8   : > { %3907 = vpow2.f32 %v1809_v18 }
 0x6c9   : > { %3909 = vpow2.f32 %v1817_v46 }
 0x6ca   : > { %3911 = vpow2.f32 %v1815_v6 }
 0x6cd   : > { %v4790_v21 = vpop.eup %3897 }
 0x6ce   : > { %v4792_v51 = vpop.eup %3899 }
 0x6cf   : > { %v4797_v44 = vpop.eup %3901 }
 0x6d0   : > { %v4799_v40 = vpop.eup %3903 }
 0x6d1   : > { %v4804_v52 = vpop.eup %3905 }
 0x6d2   : > { %v4806_v0 = vpop.eup %3907 }
 0x6d3   : > { %v4810_v55 = vpop.eup %3909 }
 0x6e0   : > { %1837 = vadd.xlane.f32.xlu0 %v4784_v32 }
 0x6e3   : > { %v1776_v47 = vpop.xlane.xlu1 %1775 }
 0x6e4   : > { %v1792_v23 = vsub.f32 %v4750_v10, %v1776_v47  ;;  %1833 = vadd.xlane.f32.xlu0 %v4790_v21 }
 0x6e5   : > { %1835 = vadd.xlane.f32.xlu1 %v4792_v51 }
 0x6e6   : > { %v1823_v31 = vmul.f32 1.442695, %v1792_v23 }
 0x6e7   : > { %v1772_v49 = vpop.xlane.xlu1 %1771 }
 0x6e8   : > { %3913 = vpow2.f32 %v1823_v31  ;;  %v1790_v26 = vsub.f32 %v4754_v58, %v1772_v49  ;;  %1839 = vadd.xlane.f32.xlu0 %v4797_v44  ;;  %v4812_v58 = vpop.eup %3911 }
 0x6e9   : > { %1845 = vadd.xlane.f32.xlu1 %v4799_v40  ;;  %3915 = vpow2.f32 %v1811_v28 }
 0x6ea   : > { %v1819_v10 = vmul.f32 1.442695, %v1790_v26 }
 0x6ec   : > { %1853 = vadd.xlane.f32.xlu0 %v4804_v52  ;;  %3917 = vpow2.f32 %v1819_v10 }
 0x6ed   : > { %1841 = vadd.xlane.f32.xlu1 %v4806_v0 }
 0x6f0   : > { %1849 = vadd.xlane.f32.xlu0 %v4810_v55 }
 0x6f1   : > { %1847 = vadd.xlane.f32.xlu1 %v4812_v58 }
 0x6f2   : > { %v4816_v45 = vpop.eup %3913 }
 0x6f3   : > { %v4818_v53 = vpop.eup %3915 }
 0x6f4   : > { %1855 = vadd.xlane.f32.xlu0 %v4816_v45 }
 0x6f5   : > { %1843 = vadd.xlane.f32.xlu1 %v4818_v53 }
 0x6f6   : > { %v4822_v8 = vpop.eup %3917 }
 0x6f9   : > { %1851 = vadd.xlane.f32.xlu1 %v4822_v8 }
 0x70a   : > { %2207 = vrot.lane.b32.xlu0 %v3741_v54, %s4050_s30  ;;  %2209 = vrot.lane.b32.xlu1 %v3742_v16, %s4050_s30 }
 0x70e   : > { %2139 = vrot.lane.b32.xlu0 %v4541_v48, %s4050_s30  ;;  %2141 = vrot.lane.b32.xlu1 %v4546_v2, %s4050_s30  ;;  %v2200_v48 = vpop.permute.xlu0 %2199 }
 0x712   : > { %2143 = vrot.lane.b32.xlu0 %v4551_v61, %s4050_s30  ;;  %2145 = vrot.lane.b32.xlu1 %v4556_v35, %s4050_s30 }
 0x716   : > { %2147 = vrot.lane.b32.xlu0 %v4561_v1, %s4050_s30  ;;  %2149 = vrot.lane.b32.xlu1 %v4566_v12, %s4050_s30 }
 0x71a   : > { %2151 = vrot.lane.b32.xlu0 %v4571_v9, %s4050_s30  ;;  %2153 = vrot.lane.b32.xlu1 %v4576_v3, %s4050_s30 }
 0x735   : > { %v1830_v2 = vpop.xlane.xlu1 %1829 }
 0x738   : > { %v1828_v57 = vpop.xlane.xlu0 %1827 }
 0x739   : > { %3919 = vrcp.f32 %v1828_v57  ;;  %v1826_v61 = vpop.xlane.xlu1 %1825 }
 0x73a   : > { %3921 = vrcp.f32 %v1826_v61 }
 0x73b   : > { %3923 = vrcp.f32 %v1830_v2 }
 0x73c   : > { %v2204_v13 = vpop.permute.xlu0 %2203 }
 0x73d   : > { %v1832_v35 = vpop.xlane.xlu1 %1831 }
 0x73e   : > { %3925 = vrcp.f32 %v1832_v35 }
 0x743   : > { %v3920_v24 = vpop.eup %3919 }
 0x744   : > { %v3922_v1 = vpop.eup %3921  ;;  %v1874_v17 = vmul.f32 %v3920_v24, %v4762_v50  ;;  %v2239_v50 = vsel %vm426_vm0, %v4757_v11, 0 }
 0x745   : > { %v1873_v12 = vmul.f32 %v3922_v1, %v4764_v62  ;;  %v3924_v5 = vpop.eup %3923  ;;  %v2245_v62 = vsel %vm426_vm0, %v4786_v15, 0 }
 0x746   : > { %v1875_v3 = vmul.f32 %v3924_v5, %v4759_v29  ;;  %v2242_v29 = vsel %vm426_vm0, %v2200_v48, 0 }
 0x747   : > { %v1889_v9 = vpack.c.bf16 %v1874_v17, %v1873_v12 }
 0x748   : > { %v3926_v18 = vpop.eup %3925 }
 0x749   : > { %v1876_v46 = vmul.f32 %v3926_v18, %v4768_v63  ;;  %3491 = vmatprep.mubr.bf16.mxu1 %v1889_v9  ;;  %v2248_v63 = vsel %vm426_vm0, %v2204_v13, 0 }
 0x74b   : > { %v1890_v6 = vpack.c.bf16 %v1876_v46, %v1875_v3 }
 0x74d   : > { %3492 = vmatmul.mubr.bf16.vlgmr.msra.gmra.mrb[32].mxu1 %v1890_v6 }
 0x74e   : > { %3508 = vmatpush3.bf16.xpose.msra.mxu1 %v2236_v41 }
 0x74f   : > { %3644 = vmatprep.subr.msk.bf16.mxu1 %vm426_vm0, %v4757_v11  ;;  %v2206_v11 = vpop.permute.xlu1 %2205 }
 0x750   : > { %v2251_v31 = vsel %vm426_vm0, %v2206_v11, 0 }
 0x756   : > { %3510 = vmatpush3.bf16.xpose.msra.mxu1 %v2239_v50 }
 0x757   : > { %3645 = vmatprep.subr.msk.bf16.mxu1 %vm426_vm0, %v2200_v48 }
 0x75e   : > { %3512 = vmatpush3.bf16.xpose.msra.mxu1 %v2242_v29 }
 0x75f   : > { %3646 = vmatprep.subr.msk.bf16.mxu1 %vm426_vm0, %v4786_v15 }
 0x766   : > { %3514 = vmatpush3.bf16.xpose.msra.mxu1 %v2245_v62 }
 0x767   : > { %3647 = vmatprep.subr.msk.bf16.mxu1 %vm426_vm0, %v2204_v13 }
 0x76d   : > { %v1838_v47 = vpop.xlane.xlu0 %1837 }
 0x76e   : > { %3516 = vmatpush3.bf16.xpose.msra.mxu1 %v2248_v63 }
 0x76f   : > { %3648 = vmatprep.subr.msk.bf16.mxu1 %vm426_vm0, %v2206_v11 }
 0x771   : > { %v1834_v23 = vpop.xlane.xlu0 %1833 }
 0x772   : > { %3927 = vrcp.f32 %v1834_v23  ;;  %v1836_v28 = vpop.xlane.xlu1 %1835 }
 0x773   : > { %3929 = vrcp.f32 %v1836_v28 }
 0x774   : > { %3931 = vrcp.f32 %v1838_v47 }
 0x775   : > { %v1840_v49 = vpop.xlane.xlu0 %1839 }
 0x776   : > { %3518 = vmatpush3.bf16.xpose.msra.mxu1 %v2251_v31  ;;  %3933 = vrcp.f32 %v1840_v49  ;;  %v1846_v15 = vpop.xlane.xlu1 %1845 }
 0x779   : > { %v1854_v26 = vpop.xlane.xlu0 %1853 }
 0x77a   : > { %v1842_v10 = vpop.xlane.xlu1 %1841 }
 0x77c   : > { %v3928_v54 = vpop.eup %3927 }
 0x77d   : > { %v3930_v16 = vpop.eup %3929  ;;  %v1850_v48 = vpop.xlane.xlu0 %1849  ;;  %v1877_v2 = vmul.f32 %v3928_v54, %v4790_v21 }
 0x77e   : > { %v3932_v57 = vpop.eup %3931  ;;  %v1848_v61 = vpop.xlane.xlu1 %1847  ;;  %v1878_v35 = vmul.f32 %v3930_v16, %v4792_v51 }
 0x77f   : > { %3935 = vrcp.f32 %v1848_v61  ;;  %v1879_v12 = vmul.f32 %v3932_v57, %v4784_v32  ;;  %v3745_v61 = vld [vmem:[%s4105_s25 + $0x38] ss:$12 sps:$4 sm:$0xff]  }
 0x780   : > { %v3934_v24 = vpop.eup %3933  ;;  %v1891_v1 = vpack.c.bf16 %v1878_v35, %v1877_v2  ;;  %3937 = vrcp.f32 %v1842_v10 }
 0x781   : > { %v1856_v17 = vpop.xlane.xlu0 %1855  ;;  %v1880_v5 = vmul.f32 %v3934_v24, %v4797_v44  ;;  %3939 = vrcp.f32 %v1846_v15 }
 0x782   : > { %v1844_v9 = vpop.xlane.xlu1 %1843  ;;  %3495 = vmatprep.mubr.bf16.mxu1 %v1891_v1 }
 0x783   : > { %3941 = vrcp.f32 %v1844_v9  ;;  %v1892_v18 = vpack.c.bf16 %v1880_v5, %v1879_v12 }
 0x784   : > { %3943 = vrcp.f32 %v1850_v48 }
 0x785   : > { %3496 = vmatmul.mubr.bf16.gmra.mrb[36].mxu1 %v1892_v18  ;;  %v2208_v21 = vpop.permute.xlu0 %2207 }
 0x786   : > { %v1852_v3 = vpop.xlane.xlu1 %1851  ;;  %v2254_v51 = vsel %vm426_vm0, %v2208_v21, 0  ;;  %3649 = vmatprep.subr.msk.bf16.mxu1 %vm426_vm0, %v2208_v21 }
 0x787   : > { %3945 = vrcp.f32 %v1852_v3  ;;  %3520 = vmatpush3.bf16.xpose.msra.mxu1 %v2254_v51 }
 0x788   : > { %3947 = vrcp.f32 %v1856_v17 }
 0x789   : > { %v3936_v46 = vpop.eup %3935  ;;  %3949 = vrcp.f32 %v1854_v26  ;;  %v2140_v10 = vpop.permute.xlu0 %2139 }
 0x78a   : > { %v2210_v32 = vpop.permute.xlu1 %2209  ;;  %v3938_v44 = vpop.eup %3937  ;;  %v1884_v29 = vmul.f32 %v3936_v46, %v4812_v58 }
 0x78b   : > { %3650 = vmatprep.subr.msk.bf16.mxu1 %vm426_vm0, %v2210_v32  ;;  %v3940_v6 = vpop.eup %3939  ;;  %v2257_v41 = vsel %vm426_vm0, %v2210_v32, 0  ;;  %v1881_v62 = vmul.f32 %v3938_v44, %v4806_v0 }
 0x78c   : > { %v1883_v47 = vmul.f32 %v3940_v6, %v4799_v40 }
 0x78d   : > { %v3942_v50 = vpop.eup %3941  ;;  %v2144_v16 = vpop.permute.xlu0 %2143 }
 0x78e   : > { %v1882_v13 = vmul.f32 %v3942_v50, %v4818_v53  ;;  %v3944_v63 = vpop.eup %3943  ;;  %v1894_v28 = vpack.c.bf16 %v1884_v29, %v1883_v47  ;;  %v2142_v54 = vpop.permute.xlu1 %2141 }
 0x78f   : > { %3522 = vmatpush3.bf16.xpose.msra.mxu1 %v2257_v41  ;;  %v1885_v49 = vmul.f32 %v3944_v63, %v4810_v55  ;;  %v3743_v55 = vld [vmem:[%s4105_s25 + $0x8] ss:$12 sps:$4 sm:$0xff]  }
 0x790   : > { %v1893_v11 = vpack.c.bf16 %v1882_v13, %v1881_v62  ;;  %2548 = vrot.lane.b32.xlu0 %v3743_v55, %s4050_s30 }
 0x791   : > { %v3946_v23 = vpop.eup %3945 }
 0x792   : > { %v3948_v31 = vpop.eup %3947  ;;  %3499 = vmatprep.mubr.bf16.mxu1 %v1893_v11  ;;  %v1886_v15 = vmul.f32 %v3946_v23, %v4822_v8  ;;  %v3744_v8 = vld [vmem:[%s4105_s25 + $0x20] ss:$12 sps:$4 sm:$0xff]  }
 0x793   : > { %3500 = vmatmul.mubr.bf16.gmra.mrb[40].mxu1 %v1894_v28  ;;  %v3950_v58 = vpop.eup %3949  ;;  %v1888_v53 = vmul.f32 %v3948_v31, %v4816_v45  ;;  %2550 = vrot.lane.b32.xlu1 %v3744_v8, %s4050_s30  ;;  %v2146_v45 = vpop.permute.xlu1 %2145 }
 0x794   : > { %v1895_v0 = vpack.c.bf16 %v1886_v15, %v1885_v49  ;;  %v1887_v40 = vmul.f32 %v3950_v58, %v4804_v52  ;;  %v2148_v52 = vpop.permute.xlu0 %2147  ;;  %2552 = vrot.lane.b32.xlu0 %v3745_v61, %s4050_s30 }
 0x796   : > { %3503 = vmatprep.mubr.bf16.mxu1 %v1895_v0  ;;  %v1896_v26 = vpack.c.bf16 %v1888_v53, %v1887_v40 }
 0x797   : > { %v2150_v48 = vpop.permute.xlu1 %2149 }
 0x798   : > { %v2152_v2 = vpop.permute.xlu0 %2151 }
 0x79b   : > { %3504 = vmatmul.mubr.bf16.gmra.mrb[44].mxu1 %v1896_v26  ;;  %v2154_v57 = vpop.permute.xlu1 %2153 }
 0x79c   : > { %3523 = vmatprep.mubr.msk.bf16.mxu1 %vm426_vm0, %v2140_v10 }
 0x7a3   : > { %3524 = vmatmul.mubr.msk.bf16.vlgmr.msra.gmra.mrb[48].mxu1 %vm426_vm0, %v2142_v54 }
 0x7a4   : > { %3527 = vmatprep.mubr.msk.bf16.mxu1 %vm426_vm0, %v2144_v16 }
 0x7ab   : > { %3528 = vmatmul.mubr.msk.bf16.gmra.mrb[52].mxu1 %vm426_vm0, %v2146_v45 }
 0x7ac   : > { %3531 = vmatprep.mubr.msk.bf16.mxu1 %vm426_vm0, %v2148_v52 }
 0x7b3   : > { %3532 = vmatmul.mubr.msk.bf16.gmra.mrb[56].mxu1 %vm426_vm0, %v2150_v48 }
 0x7b4   : > { %3535 = vmatprep.mubr.msk.bf16.mxu1 %vm426_vm0, %v2152_v2 }
 0x7bb   : > { %3536 = vmatmul.mubr.msk.bf16.gmra.mrb[60].mxu1 %vm426_vm0, %v2154_v57 }
 0x802   : > { %v2549_v9 = vpop.permute.xlu0 %2548 }
 0x803   : > { %3539 = vmatprep.subr.bf16.mxu0 %v2549_v9 }
 0x804   : > { %3540 = vmatpush3.bf16.msra.mxu0 %v2549_v9 }
 0x805   : > { %v2551_v18 = vpop.permute.xlu1 %2550 }
 0x806   : > { %3541 = vmatprep.subr.bf16.mxu0 %v2551_v18  ;;  %v2553_v21 = vpop.permute.xlu0 %2552 }
 0x808   : > { %3542 = vmatpush3.bf16.msra.mxu0 %v2551_v18 }
 0x809   : > { %3543 = vmatprep.subr.bf16.mxu0 %v2553_v21 }
 0x80c   : > { %3544 = vmatpush3.bf16.msra.mxu0 %v2553_v21 }
 0x820   : > { %v4895_v35 = vpop.f32.mrb[32].mxu1 }
 0x821   : > { %v4897_v24 = vpop.f32.mrb[33].mxu1 }
 0x822   : > { %v4899_v1 = vpop.f32.mrb[34].mxu1 }
 0x823   : > { %v4903_v12 = vpop.f32.mrb[35].mxu1 }
 0x858   : > { %v4907_v3 = vpop.f32.mrb[36].mxu1 }
 0x859   : > { %v4909_v51 = vpop.f32.mrb[37].mxu1 }
 0x85a   : > { %v4911_v46 = vpop.f32.mrb[38].mxu1 }
 0x85b   : > { %v4915_v44 = vpop.f32.mrb[39].mxu1 }
 0x866   : > { %v4919_v41 = vpop.f32.mrb[40].mxu1 }
 0x867   : > { %v4921_v50 = vpop.f32.mrb[41].mxu1 }
 0x868   : > { %v4923_v29 = vpop.f32.mrb[42].mxu1 }
 0x869   : > { %v4927_v13 = vpop.f32.mrb[43].mxu1 }
 0x86e   : > { %v4931_v47 = vpop.f32.mrb[44].mxu1 }
 0x86f   : > { %5272 = vst [vmem:[#allocation3_spill] sm:$0xff] %v4931_v47  ;;  %v4933_v11 = vpop.f32.mrb[45].mxu1 }
 0x870   : > { %v4935_v23 = vpop.f32.mrb[46].mxu1 }
 0x871   : > { %v4939_v31 = vpop.f32.mrb[47].mxu1 }
 0x876   : > { %v3525_v15 = vpop.f32.mrb[48].mxu1 }
 0x877   : > { %v2302_v58 = vadd.f32 %v4699_v60, %v3525_v15  ;;  %v2293_v0 = vpop.f32.mrb[49].mxu1 }
 0x878   : > { %v3526_v53 = vpop.f32.mrb[50].mxu1  ;;  %v2294_v10 = vadd.f32 %v4699_v60, %v2293_v0 }
 0x879   : > { %2360 = vmax.xlane.f32.xlu0 %v2302_v58  ;;  %v2296_v40 = vpop.f32.mrb[51].mxu1  ;;  %v2305_v16 = vadd.f32 %v4699_v60, %v3526_v53 }
 0x87a   : > { %v2297_v26 = vadd.f32 %v4699_v60, %v2296_v40 }
 0x87c   : > { %2358 = vmax.xlane.f32.xlu1 %v2297_v26 }
 0x87d   : > { %2356 = vmax.xlane.f32.xlu0 %v2294_v10 }
 0x87e   : > { %v3529_v54 = vpop.f32.mrb[52].mxu1 }
 0x87f   : > { %v2309_v55 = vpop.f32.mrb[53].mxu1  ;;  %v2318_v45 = vadd.f32 %v4699_v60, %v3529_v54 }
 0x880   : > { %v3530_v8 = vpop.f32.mrb[54].mxu1  ;;  %v2310_v61 = vadd.f32 %v4699_v60, %v2309_v55 }
 0x881   : > { %v4949_v52 = vadd.f32 %v4699_v60, %v3530_v8  ;;  %2362 = vmax.xlane.f32.xlu0 %v2305_v16  ;;  %v2312_v48 = vpop.f32.mrb[55].mxu1 }
 0x882   : > { %v2313_v2 = vadd.f32 %v4699_v60, %v2312_v48 }
 0x883   : > { %2370 = vmax.xlane.f32.xlu1 %v4949_v52 }
 0x885   : > { %2368 = vmax.xlane.f32.xlu0 %v2318_v45 }
 0x886   : > { %v3533_v57 = vpop.f32.mrb[56].mxu1 }
 0x887   : > { %2366 = vmax.xlane.f32.xlu1 %v2313_v2  ;;  %v2325_v9 = vpop.f32.mrb[57].mxu1  ;;  %v4955_v21 = vadd.f32 %v4699_v60, %v3533_v57 }
 0x888   : > { %v3534_v18 = vpop.f32.mrb[58].mxu1  ;;  %v4966_v54 = vadd.f32 %v4699_v60, %v2325_v9  ;;  %v3746_v9 = vld [vmem:[%s4105_s25 + $0x68] ss:$12 sps:$4 sm:$0xff]  }
 0x889   : > { %v4958_v15 = vadd.f32 %v4699_v60, %v3534_v18  ;;  %2364 = vmax.xlane.f32.xlu0 %v2310_v61  ;;  %v2328_v0 = vpop.f32.mrb[59].mxu1 }
 0x88a   : > { %v4962_v53 = vadd.f32 %v4699_v60, %v2328_v0  ;;  %v3747_v0 = vld [vmem:[%s4105_s25 + $0x50] ss:$12 sps:$4 sm:$0xff]  }
 0x88b   : > { %2378 = vmax.xlane.f32.xlu1 %v4958_v15 }
 0x88d   : > { %2376 = vmax.xlane.f32.xlu0 %v4955_v21 }
 0x88e   : > { %v3537_v40 = vpop.f32.mrb[60].mxu1 }
 0x88f   : > { %2374 = vmax.xlane.f32.xlu1 %v4962_v53  ;;  %v2341_v55 = vpop.f32.mrb[61].mxu1  ;;  %v4971_v48 = vadd.f32 %v4699_v60, %v3537_v40 }
 0x890   : > { %v3538_v8 = vpop.f32.mrb[62].mxu1  ;;  %v4975_v18 = vadd.f32 %v4699_v60, %v2341_v55  ;;  %v3748_v55 = vld [vmem:[%s4105_s25 + $0x80] ss:$12 sps:$4 sm:$0xff]  }
 0x891   : > { %2372 = vmax.xlane.f32.xlu0 %v4966_v54  ;;  %v2344_v57 = vpop.f32.mrb[63].mxu1  ;;  %v4983_v28 = vadd.f32 %v4699_v60, %v3538_v8 }
 0x892   : > { %v4987_v40 = vadd.f32 %v4699_v60, %v2344_v57 }
 0x895   : > { %2384 = vmax.xlane.f32.xlu0 %v4971_v48 }
 0x899   : > { %2380 = vmax.xlane.f32.xlu0 %v4975_v18 }
 0x8a0   : > { %2556 = vrot.lane.b32.xlu1 %v3746_v9, %s4050_s30 }
 0x8af   : > { %2554 = vrot.lane.b32.xlu0 %v3747_v0, %s4050_s30 }
 0x8c4   : > { %2386 = vmax.xlane.f32.xlu1 %v4983_v28 }
 0x8c8   : > { %2382 = vmax.xlane.f32.xlu1 %v4987_v40 }
 0x8d9   : > { %2558 = vrot.lane.b32.xlu1 %v3748_v55, %s4050_s30 }
 0x906   : > { %v2361_v32 = vpop.xlane.xlu0 %2360 }
 0x907   : > { %v2390_v6 = vsub.f32 %v2302_v58, %v2361_v32 }
 0x909   : > { %v2408_v17 = vmul.f32 1.442695, %v2390_v6  ;;  %v2359_v5 = vpop.xlane.xlu1 %2358 }
 0x90a   : > { %v2357_v9 = vpop.xlane.xlu0 %2356  ;;  %v2389_v8 = vsub.f32 %v2297_v26, %v2359_v5 }
 0x90b   : > { %3951 = vpow2.f32 %v2408_v17  ;;  %v2388_v0 = vsub.f32 %v2294_v10, %v2357_v9 }
 0x90c   : > { %v2406_v57 = vmul.f32 1.442695, %v2389_v8 }
 0x90d   : > { %v2404_v49 = vmul.f32 1.442695, %v2388_v0 }
 0x90e   : > { %v2363_v62 = vpop.xlane.xlu0 %2362 }
 0x90f   : > { %3953 = vpow2.f32 %v2404_v49  ;;  %v2391_v63 = vsub.f32 %v2305_v16, %v2363_v62 }
 0x910   : > { %v2371_v7 = vpop.xlane.xlu1 %2370 }
 0x911   : > { %v2410_v60 = vmul.f32 1.442695, %v2391_v63  ;;  %v2395_v5 = vsub.f32 %v4949_v52, %v2371_v7 }
 0x912   : > { %v2369_v43 = vpop.xlane.xlu0 %2368 }
 0x913   : > { %3955 = vpow2.f32 %v2410_v60  ;;  %v2394_v37 = vsub.f32 %v2318_v45, %v2369_v43  ;;  %v2418_v10 = vmul.f32 1.442695, %v2395_v5 }
 0x914   : > { %v2367_v47 = vpop.xlane.xlu1 %2366  ;;  %3957 = vpow2.f32 %v2406_v57 }
 0x915   : > { %v4992_v55 = vpop.eup %3951  ;;  %v2416_v32 = vmul.f32 1.442695, %v2394_v37  ;;  %v2393_v6 = vsub.f32 %v2313_v2, %v2367_v47 }
 0x916   : > { %2440 = vadd.xlane.f32.xlu1 %v4992_v55  ;;  %v2365_v17 = vpop.xlane.xlu0 %2364 }
 0x917   : > { %3959 = vpow2.f32 %v2416_v32  ;;  %v2414_v49 = vmul.f32 1.442695, %v2393_v6  ;;  %v2392_v62 = vsub.f32 %v2310_v61, %v2365_v17 }
 0x918   : > { %v2379_v26 = vpop.xlane.xlu1 %2378 }
 0x919   : > { %v4996_v58 = vpop.eup %3953  ;;  %v2412_v63 = vmul.f32 1.442695, %v2392_v62  ;;  %3961 = vpow2.f32 %v2414_v49  ;;  %v2399_v16 = vsub.f32 %v4958_v15, %v2379_v26 }
 0x91a   : > { %2436 = vadd.xlane.f32.xlu1 %v4996_v58  ;;  %v2377_v43 = vpop.xlane.xlu0 %2376 }
 0x91b   : > { %3963 = vpow2.f32 %v2412_v63  ;;  %v2398_v37 = vsub.f32 %v4955_v21, %v2377_v43  ;;  %v2426_v8 = vmul.f32 1.442695, %v2399_v16  ;;  %v3749_v16 = vld [vmem:[%s4105_s25 + $0xb0] ss:$12 sps:$4 sm:$0xff]  }
 0x91c   : > { %3965 = vpow2.f32 %v2418_v10  ;;  %v2375_v52 = vpop.xlane.xlu1 %2374 }
 0x91d   : > { %v5000_v47 = vpop.eup %3955  ;;  %v2424_v7 = vmul.f32 1.442695, %v2398_v37  ;;  %v2397_v21 = vsub.f32 %v4962_v53, %v2375_v52  ;;  %v5274_v52 = vpack.c.bf16 %v4648_v27, %v4644_v14  ;;  %v5277_v14 = vpack.c.bf16 %v4923_v29, %v4919_v41 }
 0x91e   : > { %2442 = vadd.xlane.f32.xlu1 %v5000_v47  ;;  %v2373_v45 = vpop.xlane.xlu0 %2372  ;;  %v5005_v61 = vpop.eup %3957  ;;  %v5280_v41 = vpack.c.bf16 %v4939_v31, %v4933_v11 }
 0x91f   : > { %v2396_v2 = vsub.f32 %v4966_v54, %v2373_v45  ;;  %3967 = vpow2.f32 %v2424_v7  ;;  %v2422_v6 = vmul.f32 1.442695, %v2397_v21  ;;  %v3750_v7 = vld [vmem:[%s4105_s25 + $0x98] ss:$12 sps:$4 sm:$0xff]   ;;  %v5273_v45 = vpack.c.bf16 %v4680_v20, %v4674_v33 }
 0x920   : > { %v2557_v63 = vpop.permute.xlu1 %2556  ;;  %v5276_v21 = vpack.c.bf16 %v4927_v13, %v4921_v50  ;;  %v5279_v13 = vpack.c.bf16 %v4688_v22, %v4684_v38  ;;  %v5282_v38 = vpack.c.bf16 %v4903_v12, %v4897_v24  ;;  %v5283_v22 = vpack.c.bf16 %v4899_v1, %v4895_v35 }
 0x921   : > { %v5007_v9 = vpop.eup %3959  ;;  %v2420_v0 = vmul.f32 1.442695, %v2396_v2 }
 0x922   : > { %2438 = vadd.xlane.f32.xlu1 %v5005_v61  ;;  %2448 = vadd.xlane.f32.xlu0 %v5007_v9  ;;  %v2385_v15 = vpop.xlane.xlu0 %2384 }
 0x923   : > { %3969 = vpow2.f32 %v2420_v0  ;;  %v2402_v60 = vsub.f32 %v4971_v48, %v2385_v15  ;;  %v5013_v57 = vpop.eup %3961  ;;  %v5275_v0 = vpack.c.bf16 %v4676_v36, %v4672_v59  ;;  %v5278_v36 = vpack.c.bf16 %v4692_v39, %v4686_v19 }
 0x924   : > { %3971 = vpow2.f32 %v2426_v8  ;;  %v5281_v19 = vpack.c.bf16 %v4652_v30, %v4646_v42  ;;  %v5284_v39 = vpack.c.bf16 %v4668_v4, %v4662_v56  ;;  %v5285_v42 = vpack.c.bf16 %v4664_v25, %v4660_v34 }
 0x925   : > { %v5015_v54 = vpop.eup %3963  ;;  %v2432_v32 = vmul.f32 1.442695, %v2402_v60  ;;  %v5286_v30 = vpack.c.bf16 %v4915_v44, %v4909_v51 }
 0x926   : > { %2446 = vadd.xlane.f32.xlu1 %v5013_v57  ;;  %2444 = vadd.xlane.f32.xlu0 %v5015_v54  ;;  %v2381_v53 = vpop.xlane.xlu0 %2380  ;;  %v5020_v5 = vpop.eup %3965 }
 0x927   : > { %3973 = vpow2.f32 %v2432_v32  ;;  %v2400_v17 = vsub.f32 %v4975_v18, %v2381_v53 }
 0x928   : > { %3975 = vpow2.f32 %v2422_v6 }
 0x929   : > { %v2428_v49 = vmul.f32 1.442695, %v2400_v17  ;;  %v5023_v62 = vpop.eup %3967 }
 0x92a   : > { %2450 = vadd.xlane.f32.xlu0 %v5020_v5  ;;  %v2555_v48 = vpop.permute.xlu0 %2554 }
 0x92b   : > { %3977 = vpow2.f32 %v2428_v49  ;;  %3545 = vmatprep.subr.bf16.mxu0 %v2555_v48 }
 0x92c   : > { %3546 = vmatpush3.bf16.msra.mxu0 %v2555_v48 }
 0x92d   : > { %v5025_v26 = vpop.eup %3969  ;;  %3547 = vmatprep.subr.bf16.mxu0 %v2557_v63 }
 0x92e   : > { %2456 = vadd.xlane.f32.xlu0 %v5023_v62  ;;  %2452 = vadd.xlane.f32.xlu1 %v5025_v26  ;;  %v5029_v18 = vpop.eup %3971 }
 0x930   : > { %3548 = vmatpush3.bf16.msra.mxu0 %v2557_v63 }
 0x931   : > { %v5031_v43 = vpop.eup %3973 }
 0x932   : > { %2458 = vadd.xlane.f32.xlu0 %v5029_v18  ;;  %2464 = vadd.xlane.f32.xlu1 %v5031_v43  ;;  %v5035_v10 = vpop.eup %3975 }
 0x935   : > { %v5037_v37 = vpop.eup %3977 }
 0x936   : > { %2454 = vadd.xlane.f32.xlu0 %v5035_v10  ;;  %2460 = vadd.xlane.f32.xlu1 %v5037_v37 }
 0x947   : > { %2562 = vrot.lane.b32.xlu1 %v3749_v16, %s4050_s30 }
 0x94b   : > { %1471 = vrot.lane.b32.xlu1 %v5273_v45, %s4050_s30 }
 0x94c   : > { %2560 = vrot.lane.b32.xlu0 %v3750_v7, %s4050_s30 }
 0x94f   : > { %1465 = vrot.lane.b32.xlu1 %v5274_v52, %s4050_s30 }
 0x951   : > { %v2387_v2 = vpop.xlane.xlu1 %2386 }
 0x952   : > { %v2403_v27 = vsub.f32 %v4983_v28, %v2387_v2 }
 0x953   : > { %1473 = vrot.lane.b32.xlu1 %v5275_v0, %s4050_s30 }
 0x954   : > { %v2434_v50 = vmul.f32 1.442695, %v2403_v27 }
 0x955   : > { %v2383_v8 = vpop.xlane.xlu1 %2382 }
 0x956   : > { %v2401_v33 = vsub.f32 %v4987_v40, %v2383_v8 }
 0x957   : > { %2082 = vrot.lane.b32.xlu1 %v5276_v21, %s4049_s29 }
 0x958   : > { %v2430_v59 = vmul.f32 1.442695, %v2401_v33 }
 0x959   : > { %v2559_v20 = vpop.permute.xlu1 %2558 }
 0x95a   : > { %3549 = vmatprep.subr.bf16.mxu0 %v2559_v20  ;;  %3979 = vpow2.f32 %v2430_v59 }
 0x95b   : > { %2084 = vrot.lane.b32.xlu1 %v5277_v14, %s4049_s29  ;;  %3550 = vmatpush3.bf16.msra.mxu0 %v2559_v20  ;;  %3981 = vpow2.f32 %v2434_v50 }
 0x95f   : > { %1475 = vrot.lane.b32.xlu1 %v5278_v36, %s4050_s30 }
 0x963   : > { %1477 = vrot.lane.b32.xlu1 %v5279_v13, %s4050_s30 }
 0x964   : > { %v5079_v29 = vpop.eup %3979 }
 0x965   : > { %v5082_v28 = vpop.eup %3981 }
 0x967   : > { %2086 = vrot.lane.b32.xlu1 %v5280_v41, %s4049_s29 }
 0x96b   : > { %2462 = vadd.xlane.f32.xlu0 %v5079_v29 }
 0x96f   : > { %2466 = vadd.xlane.f32.xlu0 %v5082_v28 }
 0x985   : > { %1463 = vrot.lane.b32.xlu0 %v5281_v19, %s4050_s30 }
 0x989   : > { %2074 = vrot.lane.b32.xlu0 %v5282_v38, %s4049_s29 }
 0x98d   : > { %2076 = vrot.lane.b32.xlu0 %v5283_v22, %s4049_s29 }
 0x991   : > { %1467 = vrot.lane.b32.xlu0 %v5284_v39, %s4050_s30 }
 0x995   : > { %1469 = vrot.lane.b32.xlu0 %v5285_v42, %s4050_s30 }
 0x999   : > { %2078 = vrot.lane.b32.xlu0 %v5286_v30, %s4049_s29 }
 0x9a3   : > { %v2441_v24 = vpop.xlane.xlu1 %2440 }
 0x9a7   : > { %v2437_v12 = vpop.xlane.xlu1 %2436 }
 0x9a8   : > { %3983 = vrcp.f32 %v2437_v12 }
 0x9ab   : > { %v2443_v11 = vpop.xlane.xlu1 %2442 }
 0x9af   : > { %v2439_v35 = vpop.xlane.xlu1 %2438  ;;  %v2449_v1 = vpop.xlane.xlu0 %2448 }
 0x9b0   : > { %3985 = vrcp.f32 %v2439_v35 }
 0x9b1   : > { %3987 = vrcp.f32 %v2443_v11 }
 0x9b2   : > { %v3984_v40 = vpop.eup %3983 }
 0x9b3   : > { %v2445_v31 = vpop.xlane.xlu0 %2444  ;;  %v2447_v56 = vpop.xlane.xlu1 %2446  ;;  %v2484_v25 = vmul.f32 %v3984_v40, %v4996_v58 }
 0x9b4   : > { %3989 = vrcp.f32 %v2447_v56 }
 0x9b5   : > { %3991 = vrcp.f32 %v2445_v31 }
 0x9b6   : > { %3993 = vrcp.f32 %v2441_v24 }
 0x9b7   : > { %v2451_v4 = vpop.xlane.xlu0 %2450 }
 0x9b8   : > { %3995 = vrcp.f32 %v2451_v4 }
 0x9ba   : > { %v3986_v15 = vpop.eup %3985 }
 0x9bb   : > { %v2453_v60 = vpop.xlane.xlu1 %2452  ;;  %v2457_v34 = vpop.xlane.xlu0 %2456  ;;  %v2485_v32 = vmul.f32 %v3986_v15, %v5005_v61 }
 0x9bc   : > { %v3988_v49 = vpop.eup %3987 }
 0x9bd   : > { %v2500_v51 = vpack.c.bf16 %v2485_v32, %v2484_v25  ;;  %v2487_v7 = vmul.f32 %v3988_v49, %v5000_v47  ;;  %v3751_v32 = vld [vmem:[%s5268_s3] sm:$0xff]   ;;  %v3758_v49 = vld [vmem:[%s5268_s3 + $0x38] sm:$0xff]  }
 0x9be   : > { %v3990_v48 = vpop.eup %3989  ;;  %3603 = vmatprep.subr.bf16.mxu1 %v3751_v32 }
 0x9bf   : > { %3555 = vmatprep.mubr.bf16.mxu0 %v2500_v51  ;;  %v5111_v44 = vpop.xlane.xlu1 %2464  ;;  %v2459_v6 = vpop.xlane.xlu0 %2458  ;;  %v2489_v2 = vmul.f32 %v3990_v48, %v5013_v57  ;;  %3611 = vmatpush3.bf16.msra.mxu1 %v3751_v32  ;;  %v3754_v51 = vld [vmem:[%s5268_s3 + $0x18] sm:$0xff]  }
 0x9c0   : > { %v3992_v16 = vpop.eup %3991 }
 0x9c1   : > { %v3994_v61 = vpop.eup %3993  ;;  %v2488_v52 = vmul.f32 %v3992_v16, %v5015_v54 }
 0x9c2   : > { %v2486_v0 = vmul.f32 %v3994_v61, %v4992_v55  ;;  %v3996_v21 = vpop.eup %3995 }
 0x9c3   : > { %v2461_v53 = vpop.xlane.xlu1 %2460  ;;  %v2455_v17 = vpop.xlane.xlu0 %2454  ;;  %v2502_v20 = vpack.c.bf16 %v2489_v2, %v2488_v52  ;;  %v2491_v57 = vmul.f32 %v3996_v21, %v5020_v5  ;;  %v5287_v21 = vpack.c.bf16 %v4911_v46, %v4907_v3 }
 0x9c4   : > { %3997 = vrcp.f32 %v2455_v17  ;;  %v2501_v8 = vpack.c.bf16 %v2487_v7, %v2486_v0 }
 0x9c5   : > { %3999 = vrcp.f32 %v2449_v1 }
 0x9c6   : > { %4001 = vrcp.f32 %v2453_v60 }
 0x9c7   : > { %v2563_v63 = vpop.permute.xlu1 %2562  ;;  %v2561_v58 = vpop.permute.xlu0 %2560  ;;  %4003 = vrcp.f32 %v2459_v6  ;;  %v3756_v6 = vld [vmem:[%s5268_s3 + $0x28] sm:$0xff]  }
 0x9c8   : > { %3551 = vmatprep.subr.bf16.mxu0 %v2561_v58  ;;  %4005 = vrcp.f32 %v2457_v34 }
 0x9c9   : > { %3552 = vmatpush3.bf16.msra.mxu0 %v2561_v58  ;;  %4007 = vrcp.f32 %v2461_v53  ;;  %v3757_v53 = vld [vmem:[%s5268_s3 + $0x30] sm:$0xff]  }
 0x9ca   : > { %3553 = vmatprep.subr.bf16.mxu0 %v2563_v63 }
 0x9cb   : > { %v1472_v45 = vpop.permute.xlu1 %1471 }
 0x9cc   : > { %1492 = vst.msk [vmem:[#allocation2 + $0x20] sm:$0xff] %vm1487_vm1, %v1472_v45 }
 0x9cd   : > { %3554 = vmatpush3.bf16.msra.mxu0 %v2563_v63 }
 0x9ce   : > { %v3998_v14 = vpop.eup %3997  ;;  %3571 = vmatprep.subr.bf16.mxu0 %v3751_v32 }
 0x9cf   : > { %v1466_v33 = vpop.permute.xlu1 %1465  ;;  %v4000_v47 = vpop.eup %3999  ;;  %v2493_v55 = vmul.f32 %v3998_v14, %v5035_v10 }
 0x9d0   : > { %1489 = vst.msk [vmem:[#allocation2 + $0x8] sm:$0xff] %vm1487_vm1, %v1466_v33  ;;  %3556 = vmatmul.mubr.bf16.vlgmr.msra.gmra.mrb[48].mxu0 %v2501_v8  ;;  %v4002_v54 = vpop.eup %4001  ;;  %v2490_v59 = vmul.f32 %v4000_v47, %v5007_v9 }
 0x9d1   : > { %3559 = vmatprep.mubr.bf16.mxu0 %v2502_v20  ;;  %v2492_v36 = vmul.f32 %v4002_v54, %v5025_v26  ;;  %v4004_v13 = vpop.eup %4003  ;;  %3572 = vmatpush3.bf16.msra.mxu0 %v3751_v32 }
 0x9d2   : > { %v2503_v50 = vpack.c.bf16 %v2491_v57, %v2490_v59  ;;  %v4006_v38 = vpop.eup %4005  ;;  %v2495_v5 = vmul.f32 %v4004_v13, %v5029_v18 }
 0x9d3   : > { %v1474_v27 = vpop.permute.xlu1 %1473  ;;  %v2504_v19 = vpack.c.bf16 %v2493_v55, %v2492_v36  ;;  %v2494_v10 = vmul.f32 %v4006_v38, %v5023_v62  ;;  %v4008_v62 = vpop.eup %4007 }
 0x9d4   : > { %1493 = vst.msk [vmem:[#allocation2 + $0x28] sm:$0xff] %vm1487_vm1, %v1474_v27  ;;  %v2496_v35 = vmul.f32 %v4008_v62, %v5037_v37  ;;  %v5288_v27 = vld [vmem:[#allocation3_spill] sm:$0xff] }
 0x9d5   : > { %v2505_v9 = vpack.c.bf16 %v2495_v5, %v2494_v10  ;;  %v5289_v55 = vpack.c.bf16 %v4935_v23, %v5288_v27 }
 0x9d7   : > { %v2083_v41 = vpop.permute.xlu1 %2082 }
 0x9d8   : > { %2103 = vst.msk [vmem:[#allocation2 + $0x20] sm:$0xff] %vm2098_vm2, %v2083_v41  ;;  %3560 = vmatmul.mubr.bf16.gmra.mrb[52].mxu0 %v2503_v50 }
 0x9d9   : > { %3563 = vmatprep.mubr.bf16.mxu0 %v2504_v19 }
 0x9db   : > { %v2085_v22 = vpop.permute.xlu1 %2084 }
 0x9dc   : > { %2104 = vst.msk [vmem:[#allocation2 + $0x28] sm:$0xff] %vm2098_vm2, %v2085_v22 }
 0x9df   : > { %v1476_v39 = vpop.permute.xlu1 %1475 }
 0x9e0   : > { %1494 = vst.msk [vmem:[#allocation2 + $0x30] sm:$0xff] %vm1487_vm1, %v1476_v39  ;;  %3564 = vmatmul.mubr.bf16.gmra.mrb[56].mxu0 %v2505_v9 }
 0x9e3   : > { %v1478_v26 = vpop.permute.xlu1 %1477 }
 0x9e4   : > { %1495 = vst.msk [vmem:[#allocation2 + $0x38] sm:$0xff] %vm1487_vm1, %v1478_v26 }
 0x9e7   : > { %v2087_v42 = vpop.permute.xlu1 %2086 }
 0x9e8   : > { %2105 = vst.msk [vmem:[#allocation2 + $0x30] sm:$0xff] %vm2098_vm2, %v2087_v42 }
 0x9f8   : > { %v2463_v30 = vpop.xlane.xlu0 %2462 }
 0x9f9   : > { %4009 = vrcp.f32 %v2463_v30 }
 0x9fa   : > { %4011 = vrcp.f32 %v5111_v44  ;;  %v3755_v44 = vld [vmem:[%s5268_s3 + $0x20] sm:$0xff]  }
 0x9fc   : > { %v2467_v18 = vpop.xlane.xlu0 %2466 }
 0x9fd   : > { %4013 = vrcp.f32 %v2467_v18 }
 0xa00   : > { %v1464_v24 = vpop.permute.xlu0 %1463 }
 0xa01   : > { %1488 = vst.msk [vmem:[#allocation2] sm:$0xff] %vm1487_vm1, %v1464_v24 }
 0xa03   : > { %v4010_v12 = vpop.eup %4009 }
 0xa04   : > { %v2075_v11 = vpop.permute.xlu0 %2074  ;;  %v2497_v1 = vmul.f32 %v4010_v12, %v5079_v29  ;;  %v4012_v31 = vpop.eup %4011 }
 0xa05   : > { %2099 = vst.msk [vmem:[#allocation2] sm:$0xff] %vm2098_vm2, %v2075_v11  ;;  %v2498_v15 = vmul.f32 %v4012_v31, %v5031_v43  ;;  %v3752_v43 = vld [vmem:[%s5268_s3 + $0x8] sm:$0xff]  }
 0xa06   : > { %v2506_v56 = vpack.c.bf16 %v2497_v1, %v2496_v35  ;;  %3573 = vmatprep.subr.bf16.mxu0 %v3752_v43  ;;  %3604 = vmatprep.subr.bf16.mxu1 %v3752_v43  ;;  %v5201_v1 = vld [vmem:[%s5269_s4] ss:$0 sm:$0xff] }
 0xa07   : > { %v4014_v4 = vpop.eup %4013  ;;  %3574 = vmatpush3.bf16.msra.mxu0 %v3752_v43  ;;  %3612 = vmatpush3.bf16.msra.mxu1 %v3752_v43 }
 0xa08   : > { %3567 = vmatprep.mubr.bf16.mxu0 %v2506_v56  ;;  %v2077_v40 = vpop.permute.xlu0 %2076  ;;  %v2499_v60 = vmul.f32 %v4014_v4, %v5082_v28  ;;  %v3753_v28 = vld [vmem:[%s5268_s3 + $0x10] sm:$0xff]  }
 0xa09   : > { %2100 = vst.msk [vmem:[#allocation2 + $0x8] sm:$0xff] %vm2098_vm2, %v2077_v40  ;;  %3575 = vmatprep.subr.bf16.mxu0 %v3753_v28  ;;  %3605 = vmatprep.subr.bf16.mxu1 %v3753_v28 }
 0xa0a   : > { %v2507_v34 = vpack.c.bf16 %v2499_v60, %v2498_v15 }
 0xa0b   : > { %3576 = vmatpush3.bf16.msra.mxu0 %v3753_v28  ;;  %3613 = vmatpush3.bf16.msra.mxu1 %v3753_v28 }
 0xa0c   : > { %3568 = vmatmul.mubr.bf16.gmra.mrb[60].mxu0 %v2507_v34  ;;  %v1468_v25 = vpop.permute.xlu0 %1467  ;;  %3577 = vmatprep.subr.bf16.mxu0 %v3754_v51 }
 0xa0d   : > { %1490 = vst.msk [vmem:[#allocation2 + $0x10] sm:$0xff] %vm1487_vm1, %v1468_v25  ;;  %3606 = vmatprep.subr.bf16.mxu1 %v3754_v51 }
 0xa0f   : > { %3578 = vmatpush3.bf16.msra.mxu0 %v3754_v51  ;;  %3614 = vmatpush3.bf16.msra.mxu1 %v3754_v51 }
 0xa10   : > { %v1470_v37 = vpop.permute.xlu0 %1469  ;;  %3579 = vmatprep.subr.bf16.mxu0 %v3755_v44  ;;  %3607 = vmatprep.subr.bf16.mxu1 %v3755_v44 }
 0xa11   : > { %1491 = vst.msk [vmem:[#allocation2 + $0x18] sm:$0xff] %vm1487_vm1, %v1470_v37 }
 0xa13   : > { %3580 = vmatpush3.bf16.msra.mxu0 %v3755_v44  ;;  %3615 = vmatpush3.bf16.msra.mxu1 %v3755_v44 }
 0xa14   : > { %v2079_v29 = vpop.permute.xlu0 %2078  ;;  %3581 = vmatprep.subr.bf16.mxu0 %v3756_v6  ;;  %3608 = vmatprep.subr.bf16.mxu1 %v3756_v6 }
 0xa15   : > { %2101 = vst.msk [vmem:[#allocation2 + $0x10] sm:$0xff] %vm2098_vm2, %v2079_v29 }
 0xa17   : > { %3582 = vmatpush3.bf16.msra.mxu0 %v3756_v6  ;;  %3616 = vmatpush3.bf16.msra.mxu1 %v3756_v6 }
 0xa18   : > { %3583 = vmatprep.subr.bf16.mxu0 %v3757_v53  ;;  %3609 = vmatprep.subr.bf16.mxu1 %v3757_v53 }
 0xa1b   : > { %3584 = vmatpush3.bf16.msra.mxu0 %v3757_v53  ;;  %3617 = vmatpush3.bf16.msra.mxu1 %v3757_v53 }
 0xa1c   : > { %3585 = vmatprep.subr.bf16.mxu0 %v3758_v49  ;;  %3610 = vmatprep.subr.bf16.mxu1 %v3758_v49 }
 0xa1f   : > { %3586 = vmatpush3.bf16.msra.mxu0 %v3758_v49  ;;  %3618 = vmatpush3.bf16.msra.mxu1 %v3758_v49 }
 0xaa3   : > { %v3557_v17 = vpop.f32.mrb[48].mxu0 }
 0xaa4   : > { %v2606_v48 = vpop.f32.mrb[49].mxu0 }
 0xaa5   : > { %v3558_v63 = vpop.f32.mrb[50].mxu0 }
 0xaa6   : > { %v2670_v58 = vpack.c.bf16 %v3558_v63, %v3557_v17  ;;  %v2609_v16 = vpop.f32.mrb[51].mxu0 }
 0xaa7   : > { %v2669_v61 = vpack.c.bf16 %v2609_v16, %v2606_v48 }
 0xaa8   : > { %2687 = vrot.lane.b32.xlu0 %v2670_v58, %s4048_s26 }
 0xaab   : > { %v3561_v7 = vpop.f32.mrb[52].mxu0 }
 0xaac   : > { %2685 = vrot.lane.b32.xlu0 %v2669_v61, %s4048_s26  ;;  %v2622_v45 = vpop.f32.mrb[53].mxu0 }
 0xaad   : > { %v3562_v52 = vpop.f32.mrb[54].mxu0 }
 0xaae   : > { %v2672_v2 = vpack.c.bf16 %v3562_v52, %v3561_v7  ;;  %v2625_v0 = vpop.f32.mrb[55].mxu0 }
 0xaaf   : > { %v2671_v8 = vpack.c.bf16 %v2625_v0, %v2622_v45 }
 0xab0   : > { %2080 = vrot.lane.b32.xlu0 %v5287_v21, %s4049_s29 }
 0xab3   : > { %v3565_v33 = vpop.f32.mrb[56].mxu0 }
 0xab4   : > { %2689 = vrot.lane.b32.xlu0 %v2671_v8, %s4048_s26  ;;  %v2638_v20 = vpop.f32.mrb[57].mxu0 }
 0xab5   : > { %v3566_v14 = vpop.f32.mrb[58].mxu0 }
 0xab6   : > { %v2674_v47 = vpack.c.bf16 %v3566_v14, %v3565_v33  ;;  %v2641_v54 = vpop.f32.mrb[59].mxu0 }
 0xab7   : > { %v2673_v57 = vpack.c.bf16 %v2641_v54, %v2638_v20 }
 0xab8   : > { %2691 = vrot.lane.b32.xlu0 %v2672_v2, %s4048_s26  ;;  %2695 = vrot.lane.b32.xlu1 %v2674_v47, %s4048_s26 }
 0xabc   : > { %2693 = vrot.lane.b32.xlu1 %v2673_v57, %s4048_s26 }
 0xac0   : > { %2088 = vrot.lane.b32.xlu1 %v5289_v55, %s4049_s29 }
 0xadf   : > { %v3569_v3 = vpop.f32.mrb[60].mxu0 }
 0xae0   : > { %v2654_v46 = vpop.f32.mrb[61].mxu0 }
 0xae1   : > { %v3570_v59 = vpop.f32.mrb[62].mxu0 }
 0xae2   : > { %v2676_v36 = vpack.c.bf16 %v3570_v59, %v3569_v3  ;;  %v2657_v50 = vpop.f32.mrb[63].mxu0 }
 0xae3   : > { %v2675_v13 = vpack.c.bf16 %v2657_v50, %v2654_v46 }
 0xae5   : > { %2697 = vrot.lane.b32.xlu1 %v2675_v13, %s4048_s26 }
 0xae9   : > { %2699 = vrot.lane.b32.xlu1 %v2676_v36, %s4048_s26  ;;  %s3169_s26 = sshll.u32 %s5295_s18, 7 }
 0xaea   : > { %s5196_s6 = scalar_lea.vmem %s5267_s2, %s3169_s26  ;;  %s5209_s10 = scalar_lea.vmem %s5270_s5, %s3169_s26 }
 0xaeb   : > { %v2896_v56 = vld [vmem:[%s5196_s6 + $0x10] sm:$0xff]  ;;  %v2894_v15 = vld [vmem:[%s5196_s6] sm:$0xff]  ;;  %v2897_v25 = vld [vmem:[%s5196_s6 + $0x18] sm:$0xff] }
 0xaec   : > { %v2895_v43 = vld [vmem:[%s5196_s6 + $0x8] sm:$0xff]  ;;  %v2900_v17 = vld [vmem:[%s5196_s6 + $0x30] sm:$0xff]  ;;  %v2898_v63 = vld [vmem:[%s5196_s6 + $0x20] sm:$0xff] }
 0xaed   : > { %v2901_v61 = vld [vmem:[%s5196_s6 + $0x38] sm:$0xff]  ;;  %v2899_v2 = vld [vmem:[%s5196_s6 + $0x28] sm:$0xff]  ;;  %v2904_v20 = vld [vmem:[%s5196_s6 + $0x50] sm:$0xff] }
 0xaee   : > { %v2902_v57 = vld [vmem:[%s5196_s6 + $0x40] sm:$0xff]  ;;  %v2905_v3 = vld [vmem:[%s5196_s6 + $0x58] sm:$0xff]  ;;  %v2903_v50 = vld [vmem:[%s5196_s6 + $0x48] sm:$0xff] }
 0xb1a   : > { %v2688_v41 = vpop.permute.xlu0 %2687 }
 0xb1b   : > { %2711 = vst.msk [vmem:[#allocation2 + $0x8] sm:$0xff] %vm2709_vm3, %v2688_v41 }
 0xb1e   : > { %v2686_v19 = vpop.permute.xlu0 %2685 }
 0xb1f   : > { %2710 = vst.msk [vmem:[#allocation2] sm:$0xff] %vm2709_vm3, %v2686_v19 }
 0xb22   : > { %v2081_v38 = vpop.permute.xlu0 %2080  ;;  %v2719_v22 = vld [vmem:[#allocation2 + $0x8] sm:$0xff] }
 0xb23   : > { %2102 = vst.msk [vmem:[#allocation2 + $0x18] sm:$0xff] %vm2098_vm2, %v2081_v38 }
 0xb26   : > { %v2690_v23 = vpop.permute.xlu0 %2689  ;;  %v2718_v5 = vld [vmem:[#allocation2] sm:$0xff] }
 0xb27   : > { %2712 = vst.msk [vmem:[#allocation2 + $0x10] sm:$0xff] %vm2709_vm3, %v2690_v23  ;;  %3587 = vmatprep.mubr.bf16.mxu0 %v2718_v5  ;;  %v2908_v5 = vld [vmem:[%s5196_s6 + $0x70] sm:$0xff] }
 0xb28   : > { %3588 = vmatmul.mubr.bf16.vlgmr.msra.gmra.mrb[64].mxu0 %v2719_v22 }
 0xb2a   : > { %v2696_v10 = vpop.permute.xlu1 %2695  ;;  %v2692_v9 = vpop.permute.xlu0 %2691 }
 0xb2b   : > { %2715 = vst.msk [vmem:[#allocation2 + $0x28] sm:$0xff] %vm2709_vm3, %v2696_v10  ;;  %2713 = vst.msk [vmem:[#allocation2 + $0x18] sm:$0xff] %vm2709_vm3, %v2692_v9  ;;  %v2906_v9 = vld [vmem:[%s5196_s6 + $0x60] sm:$0xff] }
 0xb2e   : > { %v2694_v39 = vpop.permute.xlu1 %2693  ;;  %v2720_v26 = vld [vmem:[#allocation2 + $0x10] sm:$0xff] }
 0xb2f   : > { %2714 = vst.msk [vmem:[#allocation2 + $0x20] sm:$0xff] %vm2709_vm3, %v2694_v39  ;;  %3591 = vmatprep.mubr.bf16.mxu0 %v2720_v26 }
 0xb32   : > { %v2089_v42 = vpop.permute.xlu1 %2088  ;;  %v2721_v30 = vld [vmem:[#allocation2 + $0x18] sm:$0xff]  ;;  %v2723_v24 = vld [vmem:[#allocation2 + $0x28] sm:$0xff] }
 0xb33   : > { %2106 = vst.msk [vmem:[#allocation2 + $0x38] sm:$0xff] %vm2098_vm2, %v2089_v42  ;;  %3592 = vmatmul.mubr.bf16.gmra.mrb[68].mxu0 %v2721_v30  ;;  %v2909_v42 = vld [vmem:[%s5196_s6 + $0x78] sm:$0xff] }
 0xb36   : > { %v2722_v18 = vld [vmem:[#allocation2 + $0x20] sm:$0xff] }
 0xb37   : > { %3595 = vmatprep.mubr.bf16.mxu1 %v2722_v18 }
 0xb38   : > { %3596 = vmatmul.mubr.bf16.vlgmr.msra.gmra.mrb[64].mxu1 %v2723_v24 }
 0xb57   : > { %v2698_v62 = vpop.permute.xlu1 %2697 }
 0xb58   : > { %2716 = vst.msk [vmem:[#allocation2 + $0x30] sm:$0xff] %vm2709_vm3, %v2698_v62  ;;  %v2907_v62 = vld [vmem:[%s5196_s6 + $0x68] sm:$0xff] }
 0xb5b   : > { %v2700_v12 = vpop.permute.xlu1 %2699 }
 0xb5c   : > { %2717 = vst.msk [vmem:[#allocation2 + $0x38] sm:$0xff] %vm2709_vm3, %v2700_v12 }
 0xb5f   : > { %v2724_v11 = vld [vmem:[#allocation2 + $0x30] sm:$0xff] }
 0xb60   : > { %3599 = vmatprep.mubr.bf16.mxu1 %v2724_v11 }
 0xb63   : > { %v2725_v35 = vld [vmem:[#allocation2 + $0x38] sm:$0xff] }
 0xb64   : > { %3600 = vmatmul.mubr.bf16.gmra.mrb[68].mxu1 %v2725_v35 }
 0xbfb   : > { %v3589_v31 = vpop.f32.mrb[64].mxu0 }
 0xbfc   : > { %v2840_v4 = vadd.f32 %v3589_v31, %v5201_v1  ;;  %v2831_v40 = vpop.f32.mrb[65].mxu0 }
 0xbfd   : > { %v2832_v60 = vadd.f32 %v5201_v1, %v2831_v40  ;;  %v3590_v34 = vpop.f32.mrb[66].mxu0 }
 0xbfe   : > { %v2912_v37 = vadd.f32 %v2896_v56, %v2840_v4  ;;  %v2843_v29 = vadd.f32 %v3590_v34, %v5201_v1  ;;  %v2834_v32 = vpop.f32.mrb[67].mxu0 }
 0xbff   : > { %v2910_v28 = vadd.f32 %v2894_v15, %v2832_v60  ;;  %v2835_v51 = vadd.f32 %v5201_v1, %v2834_v32 }
 0xc00   : > { %2928 = vst [vmem:[%s5209_s10 + $0x10] sm:$0xff] %v2912_v37  ;;  %v2913_v44 = vadd.f32 %v2897_v25, %v2843_v29 }
 0xc01   : > { %2926 = vst [vmem:[%s5209_s10] sm:$0xff] %v2910_v28  ;;  %v2911_v6 = vadd.f32 %v2895_v43, %v2835_v51 }
 0xc02   : > { %2929 = vst [vmem:[%s5209_s10 + $0x18] sm:$0xff] %v2913_v44 }
 0xc03   : > { %2927 = vst [vmem:[%s5209_s10 + $0x8] sm:$0xff] %v2911_v6 }
 0xc06   : > { %v3593_v53 = vpop.f32.mrb[68].mxu0 }
 0xc07   : > { %v2856_v49 = vadd.f32 %v3593_v53, %v5201_v1  ;;  %v2847_v48 = vpop.f32.mrb[69].mxu0 }
 0xc08   : > { %v2848_v58 = vadd.f32 %v5201_v1, %v2847_v48  ;;  %v3594_v16 = vpop.f32.mrb[70].mxu0 }
 0xc09   : > { %v2916_v7 = vadd.f32 %v2900_v17, %v2856_v49  ;;  %v2859_v45 = vadd.f32 %v3594_v16, %v5201_v1  ;;  %v2850_v52 = vpop.f32.mrb[71].mxu0 }
 0xc0a   : > { %v2914_v0 = vadd.f32 %v2898_v63, %v2848_v58  ;;  %v2851_v8 = vadd.f32 %v5201_v1, %v2850_v52 }
 0xc0b   : > { %2932 = vst [vmem:[%s5209_s10 + $0x30] sm:$0xff] %v2916_v7  ;;  %v2917_v21 = vadd.f32 %v2901_v61, %v2859_v45  ;;  %v3597_v33 = vpop.f32.mrb[64].mxu1 }
 0xc0c   : > { %2930 = vst [vmem:[%s5209_s10 + $0x20] sm:$0xff] %v2914_v0  ;;  %v2915_v14 = vadd.f32 %v2899_v2, %v2851_v8  ;;  %v2872_v47 = vadd.f32 %v3597_v33, %v5201_v1  ;;  %v2863_v54 = vpop.f32.mrb[65].mxu1 }
 0xc0d   : > { %2933 = vst [vmem:[%s5209_s10 + $0x38] sm:$0xff] %v2917_v21  ;;  %v2864_v27 = vadd.f32 %v5201_v1, %v2863_v54  ;;  %v3598_v55 = vpop.f32.mrb[66].mxu1 }
 0xc0e   : > { %2931 = vst [vmem:[%s5209_s10 + $0x28] sm:$0xff] %v2915_v14  ;;  %v2920_v46 = vadd.f32 %v2904_v20, %v2872_v47  ;;  %v2875_v59 = vadd.f32 %v3598_v55, %v5201_v1  ;;  %v2866_v36 = vpop.f32.mrb[67].mxu1 }
 0xc0f   : > { %v2918_v13 = vadd.f32 %v2902_v57, %v2864_v27  ;;  %v2867_v41 = vadd.f32 %v5201_v1, %v2866_v36 }
 0xc10   : > { %2936 = vst [vmem:[%s5209_s10 + $0x50] sm:$0xff] %v2920_v46  ;;  %v2921_v19 = vadd.f32 %v2905_v3, %v2875_v59 }
 0xc11   : > { %2934 = vst [vmem:[%s5209_s10 + $0x40] sm:$0xff] %v2918_v13  ;;  %v2919_v38 = vadd.f32 %v2903_v50, %v2867_v41 }
 0xc12   : > { %2937 = vst [vmem:[%s5209_s10 + $0x58] sm:$0xff] %v2921_v19 }
 0xc13   : > { %2935 = vst [vmem:[%s5209_s10 + $0x48] sm:$0xff] %v2919_v38 }
 0xc37   : > { %v3601_v23 = vpop.f32.mrb[68].mxu1 }
 0xc38   : > { %v2888_v22 = vadd.f32 %v3601_v23, %v5201_v1  ;;  %v2879_v10 = vpop.f32.mrb[69].mxu1 }
 0xc39   : > { %v2880_v39 = vadd.f32 %v5201_v1, %v2879_v10  ;;  %v3602_v26 = vpop.f32.mrb[70].mxu1 }
 0xc3a   : > { %v2924_v30 = vadd.f32 %v2908_v5, %v2888_v22  ;;  %v2891_v18 = vadd.f32 %v3602_v26, %v5201_v1  ;;  %v2882_v24 = vpop.f32.mrb[71].mxu1 }
 0xc3b   : > { %v2922_v12 = vadd.f32 %v2906_v9, %v2880_v39  ;;  %v2883_v11 = vadd.f32 %v5201_v1, %v2882_v24 }
 0xc3c   : > { %2940 = vst [vmem:[%s5209_s10 + $0x70] sm:$0xff] %v2924_v30  ;;  %v2925_v35 = vadd.f32 %v2909_v42, %v2891_v18 }
 0xc3d   : > { %2938 = vst [vmem:[%s5209_s10 + $0x60] sm:$0xff] %v2922_v12  ;;  %v2923_v31 = vadd.f32 %v2907_v62, %v2883_v11 }
 0xc3e   : > { %2941 = vst [vmem:[%s5209_s10 + $0x78] sm:$0xff] %v2925_v35 }
 0xc3f   : > { %2939 = vst [vmem:[%s5209_s10 + $0x68] sm:$0xff] %v2923_v31 }
 0xc40 PF: > { %s15_s20 = sadd.s32 1, %s4046_s20   ;;  %s5290_s18 = smov %s4042_s19 }
 0xc41   : > { %p12_p5 = scmp.ge.s32.totalorder %s15_s20, 4   ;;  %s5291_s19 = smov %s5293_s21 }
 0xc43   :  { %14 = sbr.rel (!%p12_p5) target bundleno = 2 (0x2), region = 74 }

// kernel: _lambda_.12
= control target key start
LH: loop header
LB: loop body
LE: loop exit
PB: predicated region body
PF: predicated region fallthrough
CT: control target
= control target key end

     0   :  { %s6988_s0 = inlined_call_operand.vmem [shape: f32[256,128], index: 0, kind: input, shape index: {}]   ;;  %s6989_s3 = inlined_call_operand.vmem [shape: bf16[128,512], index: 3, kind: input, shape index: {}]   ;;  %s6990_s1 = inlined_call_operand.vmem [shape: f32[1,128], index: 1, kind: input, shape index: {}]   ;;  %s6991_s2 = inlined_call_operand.vmem [shape: f32[1,128], index: 2, kind: input, shape index: {}]   ;;  %s6992_s5 = inlined_call_operand.vmem [shape: bf16[512,128], index: 5, kind: input, shape index: {}]   ;;  %s6993_s4 = inlined_call_operand.vmem [shape: f32[1,512], index: 4, kind: input, shape index: {}]   ;;  %s6994_s6 = inlined_call_operand.vmem [shape: f32[1,128], index: 6, kind: input, shape index: {}]   ;;  %s6995_s7 = inlined_call_operand.vmem [shape: f32[256,128], index: 7, kind: output, shape index: {}]  }
   0x1   :  { %v31_v0 = vld [vmem:[%s6988_s0] sm:$0xff]  ;;  %v3977_v1 = vld [vmem:[%s6988_s0 + $0x10] sm:$0xff]  ;;  %v32_v2 = vld [vmem:[%s6988_s0 + $0x8] sm:$0xff] }
   0x2   :  { %65 = vadd.xlane.f32.xlu0 %v31_v0  ;;  %69 = vadd.xlane.f32.xlu1 %v3977_v1  ;;  %v3986_v3 = vld [vmem:[%s6988_s0 + $0x18] sm:$0xff]  ;;  %v3992_v4 = vld [vmem:[%s6988_s0 + $0x20] sm:$0xff]  ;;  %v3997_v5 = vld [vmem:[%s6988_s0 + $0x28] sm:$0xff] }
   0x3   :  { %v4004_v6 = vld [vmem:[%s6988_s0 + $0x30] sm:$0xff]  ;;  %v4009_v7 = vld [vmem:[%s6988_s0 + $0x38] sm:$0xff]  ;;  %v4016_v8 = vld [vmem:[%s6988_s0 + $0x40] sm:$0xff] }
   0x4   :  { %v4021_v9 = vld [vmem:[%s6988_s0 + $0x48] sm:$0xff]  ;;  %v4028_v10 = vld [vmem:[%s6988_s0 + $0x50] sm:$0xff]  ;;  %v4033_v11 = vld [vmem:[%s6988_s0 + $0x58] sm:$0xff] }
   0x5   :  { %v4040_v12 = vld [vmem:[%s6988_s0 + $0x60] sm:$0xff]  ;;  %v4045_v13 = vld [vmem:[%s6988_s0 + $0x68] sm:$0xff]  ;;  %v4052_v14 = vld [vmem:[%s6988_s0 + $0x70] sm:$0xff] }
   0x6   :  { %67 = vadd.xlane.f32.xlu0 %v32_v2  ;;  %71 = vadd.xlane.f32.xlu1 %v3986_v3  ;;  %v4057_v15 = vld [vmem:[%s6988_s0 + $0x78] sm:$0xff]  ;;  %v4064_v16 = vld [vmem:[%s6988_s0 + $0x80] sm:$0xff]  ;;  %v4069_v17 = vld [vmem:[%s6988_s0 + $0x88] sm:$0xff] }
   0x7   :  { %v4076_v18 = vld [vmem:[%s6988_s0 + $0x90] sm:$0xff]  ;;  %v4081_v19 = vld [vmem:[%s6988_s0 + $0x98] sm:$0xff]  ;;  %v4115_v38 = vld [vmem:[%s6988_s0 + $0xa0] sm:$0xff] }
   0x8   :  { %v3530_v20 = vld [vmem:[%s6989_s3 + $0x4] ss:$16 sps:$4 sm:$0xff]   ;;  %v3532_v21 = vld [vmem:[%s6989_s3 + $0xc] ss:$16 sps:$4 sm:$0xff]   ;;  %v3534_v22 = vld [vmem:[%s6989_s3] ss:$16 sps:$4 sm:$0xff]  }
   0x9   :  { %788 = vmatprep.subr.bf16.mxu0 %v3530_v20  ;;  %v3535_v23 = vld [vmem:[%s6989_s3 + $0x8] ss:$16 sps:$4 sm:$0xff]   ;;  %981 = vmatprep.subr.bf16.mxu1 %v3532_v21  ;;  %v3536_v24 = vld [vmem:[%s6989_s3 + $0x24] ss:$16 sps:$4 sm:$0xff]   ;;  %v3538_v25 = vld [vmem:[%s6989_s3 + $0x2c] ss:$16 sps:$4 sm:$0xff]  }
   0xa   :  { %73 = vadd.xlane.f32.xlu0 %v3992_v4  ;;  %75 = vadd.xlane.f32.xlu1 %v3997_v5  ;;  %v4128_v44 = vld [vmem:[%s6988_s0 + $0xa8] sm:$0xff]  ;;  %v4139_v49 = vld [vmem:[%s6988_s0 + $0xb0] sm:$0xff]  ;;  %v4156_v56 = vld [vmem:[%s6988_s0 + $0xb8] sm:$0xff] }
   0xb   :  { %789 = vmatpush1.bf16.msra.mxu0 %v3534_v22  ;;  %982 = vmatpush1.bf16.msra.mxu1 %v3535_v23  ;;  %v3540_v54 = vld [vmem:[%s6989_s3 + $0x20] ss:$16 sps:$4 sm:$0xff]   ;;  %v3541_v55 = vld [vmem:[%s6989_s3 + $0x28] ss:$16 sps:$4 sm:$0xff]   ;;  %v3542_v58 = vld [vmem:[%s6989_s3 + $0x44] ss:$16 sps:$4 sm:$0xff]  }
   0xc   :  { %790 = vmatprep.subr.bf16.mxu0 %v3536_v24  ;;  %983 = vmatprep.subr.bf16.mxu1 %v3538_v25  ;;  %v3544_v59 = vld [vmem:[%s6989_s3 + $0x4c] ss:$16 sps:$4 sm:$0xff]   ;;  %v3546_v63 = vld [vmem:[%s6989_s3 + $0x40] ss:$16 sps:$4 sm:$0xff]   ;;  %v3553_v22 = vld [vmem:[%s6989_s3 + $0x68] ss:$16 sps:$4 sm:$0xff]  }
   0xd   :  { %v3552_v21 = vld [vmem:[%s6989_s3 + $0x60] ss:$16 sps:$4 sm:$0xff]   ;;  %v4202_v23 = vld [vmem:[%s6988_s0 + $0xc8] sm:$0xff]  ;;  %v3554_v25 = vld [vmem:[%s6989_s3 + $0x84] ss:$16 sps:$4 sm:$0xff]  }
   0xe   :  { %77 = vadd.xlane.f32.xlu0 %v4004_v6  ;;  %79 = vadd.xlane.f32.xlu1 %v4009_v7 }
   0xf   :  { %791 = vmatpush1.bf16.msra.mxu0 %v3540_v54  ;;  %984 = vmatpush1.bf16.msra.mxu1 %v3541_v55 }
  0x10   :  { %792 = vmatprep.subr.bf16.mxu0 %v3542_v58  ;;  %985 = vmatprep.subr.bf16.mxu1 %v3544_v59  ;;  %v3571_v58 = vld [vmem:[%s6989_s3 + $0xc8] ss:$16 sps:$4 sm:$0xff]   ;;  %v4271_v59 = vld [vmem:[%s6988_s0 + $0xe0] sm:$0xff] }
  0x12   :  { %81 = vadd.xlane.f32.xlu0 %v4016_v8  ;;  %83 = vadd.xlane.f32.xlu1 %v4021_v9 }
  0x13   :  { %793 = vmatpush1.bf16.msra.mxu0 %v3546_v63 }
  0x16   :  { %85 = vadd.xlane.f32.xlu0 %v4028_v10  ;;  %87 = vadd.xlane.f32.xlu1 %v4033_v11 }
  0x1a   :  { %89 = vadd.xlane.f32.xlu0 %v4040_v12  ;;  %91 = vadd.xlane.f32.xlu1 %v4045_v13 }
  0x1e   :  { %93 = vadd.xlane.f32.xlu0 %v4052_v14  ;;  %95 = vadd.xlane.f32.xlu1 %v4057_v15 }
  0x22   :  { %97 = vadd.xlane.f32.xlu0 %v4064_v16  ;;  %99 = vadd.xlane.f32.xlu1 %v4069_v17 }
  0x26   :  { %101 = vadd.xlane.f32.xlu0 %v4076_v18  ;;  %103 = vadd.xlane.f32.xlu1 %v4081_v19 }
  0x8f   :  { %v66_v26 = vpop.xlane.xlu0 %65  ;;  %v70_v27 = vpop.xlane.xlu1 %69 }
  0x90   :  { %v130_v28 = vmul.f32 0.0078125, %v66_v26  ;;  %v132_v30 = vmul.f32 0.0078125, %v70_v27  ;;  %v3556_v26 = vld [vmem:[%s6989_s3 + $0x8c] ss:$16 sps:$4 sm:$0xff]  }
  0x92   :  { %v4103_v29 = vsub.f32 %v31_v0, %v130_v28  ;;  %v4110_v36 = vsub.f32 %v3977_v1, %v132_v30  ;;  %v3547_v0 = vld [vmem:[%s6989_s3 + $0x48] ss:$16 sps:$4 sm:$0xff]   ;;  %v4179_v1 = vld [vmem:[%s6988_s0 + $0xc0] sm:$0xff] }
  0x93   :  { %v68_v31 = vpop.xlane.xlu0 %67  ;;  %v72_v32 = vpop.xlane.xlu1 %71  ;;  %986 = vmatpush1.bf16.msra.mxu1 %v3547_v0 }
  0x94   :  { %v131_v33 = vmul.f32 0.0078125, %v68_v31  ;;  %v194_v34 = vmul.f32 %v4103_v29, %v4103_v29  ;;  %v133_v37 = vmul.f32 0.0078125, %v72_v32  ;;  %v196_v42 = vmul.f32 %v4110_v36, %v4110_v36  ;;  %v3558_v31 = vld [vmem:[%s6989_s3 + $0x80] ss:$16 sps:$4 sm:$0xff]   ;;  %v3559_v32 = vld [vmem:[%s6989_s3 + $0x88] ss:$16 sps:$4 sm:$0xff]  }
  0x96   :  { %v4107_v35 = vsub.f32 %v32_v2, %v131_v33  ;;  %226 = vadd.xlane.f32.xlu0 %v194_v34  ;;  %v4121_v41 = vsub.f32 %v3986_v3, %v133_v37  ;;  %v3548_v3 = vld [vmem:[%s6989_s3 + $0x64] ss:$16 sps:$4 sm:$0xff]  }
  0x97   :  { %v74_v39 = vpop.xlane.xlu0 %73  ;;  %v76_v45 = vpop.xlane.xlu1 %75  ;;  %794 = vmatprep.subr.bf16.mxu0 %v3548_v3  ;;  %v4225_v33 = vld [vmem:[%s6988_s0 + $0xd0] sm:$0xff] }
  0x98   :  { %v195_v40 = vmul.f32 %v4107_v35, %v4107_v35  ;;  %v134_v43 = vmul.f32 0.0078125, %v74_v39  ;;  %v197_v47 = vmul.f32 %v4121_v41, %v4121_v41  ;;  %v135_v48 = vmul.f32 0.0078125, %v76_v45  ;;  %795 = vmatpush1.bf16.msra.mxu0 %v3552_v21  ;;  %v3560_v37 = vld [vmem:[%s6989_s3 + $0xa4] ss:$16 sps:$4 sm:$0xff]   ;;  %v3562_v39 = vld [vmem:[%s6989_s3 + $0xac] ss:$16 sps:$4 sm:$0xff]  }
  0x99   :  { %796 = vmatprep.subr.bf16.mxu0 %v3554_v25  ;;  %v3564_v45 = vld [vmem:[%s6989_s3 + $0xa0] ss:$16 sps:$4 sm:$0xff]  }
  0x9a   :  { %105 = vadd.xlane.f32.xlu0 %v4115_v38  ;;  %228 = vadd.xlane.f32.xlu1 %v195_v40  ;;  %v4132_v46 = vsub.f32 %v3992_v4, %v134_v43  ;;  %v4143_v51 = vsub.f32 %v3997_v5, %v135_v48  ;;  %v3550_v4 = vld [vmem:[%s6989_s3 + $0x6c] ss:$16 sps:$4 sm:$0xff]   ;;  %v3576_v3 = vld [vmem:[%s6989_s3 + $0xe0] ss:$16 sps:$4 sm:$0xff]  }
  0x9b   :  { %v78_v50 = vpop.xlane.xlu0 %77  ;;  %v80_v57 = vpop.xlane.xlu1 %79  ;;  %987 = vmatprep.subr.bf16.mxu1 %v3550_v4  ;;  %v4248_v48 = vld [vmem:[%s6988_s0 + $0xd8] sm:$0xff]  ;;  %v4305_v25 = vld [vmem:[%s6988_s0 + $0xf0] sm:$0xff] }
  0x9c   :  { %v198_v52 = vmul.f32 %v4132_v46, %v4132_v46  ;;  %v136_v53 = vmul.f32 0.0078125, %v78_v50  ;;  %v199_v61 = vmul.f32 %v4143_v51, %v4143_v51  ;;  %v137_v62 = vmul.f32 0.0078125, %v80_v57  ;;  %988 = vmatpush1.bf16.msra.mxu1 %v3553_v22  ;;  %797 = vmatpush1.bf16.msra.mxu0 %v3558_v31  ;;  %v3566_v50 = vld [vmem:[%s6989_s3 + $0xc4] ss:$16 sps:$4 sm:$0xff]   ;;  %v3570_v57 = vld [vmem:[%s6989_s3 + $0xc0] ss:$16 sps:$4 sm:$0xff]  }
  0x9d   :  { %989 = vmatprep.subr.bf16.mxu1 %v3556_v26  ;;  %798 = vmatprep.subr.bf16.mxu0 %v3560_v37  ;;  %v3577_v4 = vld [vmem:[%s6989_s3 + $0xe8] ss:$16 sps:$4 sm:$0xff]   ;;  %v3930_v26 = vmov 0  }
  0x9e   :  { %230 = vadd.xlane.f32.xlu0 %v196_v42  ;;  %107 = vadd.xlane.f32.xlu1 %v4128_v44  ;;  %v4166_v60 = vsub.f32 %v4004_v6, %v136_v53  ;;  %v4189_v5 = vsub.f32 %v4009_v7, %v137_v62  ;;  %v3574_v62 = vld [vmem:[%s6989_s3 + $0xec] ss:$16 sps:$4 sm:$0xff]  }
  0x9f   :  { %v82_v2 = vpop.xlane.xlu0 %81  ;;  %v84_v24 = vpop.xlane.xlu1 %83  ;;  %820 = vmatprep.mubr.bf16.mxu0 %v3930_v26  ;;  %1013 = vmatprep.mubr.bf16.mxu1 %v3930_v26 }
  0xa0   :  { %v200_v6 = vmul.f32 %v4166_v60, %v4166_v60  ;;  %v138_v20 = vmul.f32 0.0078125, %v82_v2  ;;  %v201_v28 = vmul.f32 %v4189_v5, %v4189_v5  ;;  %v139_v30 = vmul.f32 0.0078125, %v84_v24  ;;  %990 = vmatpush1.bf16.msra.mxu1 %v3559_v32  ;;  %799 = vmatpush1.bf16.msra.mxu0 %v3564_v45 }
  0xa1   :  { %991 = vmatprep.subr.bf16.mxu1 %v3562_v39  ;;  %800 = vmatprep.subr.bf16.mxu0 %v3566_v50 }
  0xa2   :  { %109 = vadd.xlane.f32.xlu0 %v4139_v49  ;;  %232 = vadd.xlane.f32.xlu1 %v197_v47  ;;  %v4212_v27 = vsub.f32 %v4016_v8, %v138_v20  ;;  %v4235_v40 = vsub.f32 %v4021_v9, %v139_v30  ;;  %v3565_v47 = vld [vmem:[%s6989_s3 + $0xa8] ss:$16 sps:$4 sm:$0xff]  }
  0xa3   :  { %v86_v7 = vpop.xlane.xlu0 %85  ;;  %v88_v8 = vpop.xlane.xlu1 %87 }
  0xa4   :  { %v202_v42 = vmul.f32 %v4212_v27, %v4212_v27  ;;  %v140_v43 = vmul.f32 0.0078125, %v86_v7  ;;  %992 = vmatpush1.bf16.msra.mxu1 %v3565_v47  ;;  %v203_v54 = vmul.f32 %v4235_v40, %v4235_v40  ;;  %v141_v55 = vmul.f32 0.0078125, %v88_v8  ;;  %801 = vmatpush1.bf16.msra.mxu0 %v3570_v57 }
  0xa6   :  { %111 = vadd.xlane.f32.xlu1 %v4156_v56  ;;  %234 = vadd.xlane.f32.xlu0 %v198_v52  ;;  %v3568_v52 = vld [vmem:[%s6989_s3 + $0xcc] ss:$16 sps:$4 sm:$0xff]   ;;  %v4258_v53 = vsub.f32 %v4028_v10, %v140_v43  ;;  %v3572_v10 = vld [vmem:[%s6989_s3 + $0xe4] ss:$16 sps:$4 sm:$0xff]   ;;  %v4281_v63 = vsub.f32 %v4033_v11, %v141_v55 }
  0xa7   :  { %v90_v34 = vpop.xlane.xlu0 %89  ;;  %v92_v9 = vpop.xlane.xlu1 %91  ;;  %993 = vmatprep.subr.bf16.mxu1 %v3568_v52  ;;  %802 = vmatprep.subr.bf16.mxu0 %v3572_v10 }
  0xa8   :  { %994 = vmatpush1.bf16.msra.mxu1 %v3571_v58  ;;  %v204_v0 = vmul.f32 %v4258_v53, %v4258_v53  ;;  %v142_v2 = vmul.f32 0.0078125, %v90_v34  ;;  %803 = vmatpush1.bf16.msra.mxu0 %v3576_v3  ;;  %v143_v11 = vmul.f32 0.0078125, %v92_v9  ;;  %v205_v24 = vmul.f32 %v4281_v63, %v4281_v63  ;;  %v4321_v34 = vld [vmem:[%s6988_s0 + $0xf8] sm:$0xff] }
  0xa9   :  { %995 = vmatprep.subr.bf16.mxu1 %v3574_v62 }
  0xaa   :  { %236 = vadd.xlane.f32.xlu1 %v199_v61  ;;  %113 = vadd.xlane.f32.xlu0 %v4179_v1  ;;  %v4298_v22 = vsub.f32 %v4040_v12, %v142_v2 }
  0xab   :  { %v94_v61 = vpop.xlane.xlu0 %93  ;;  %v96_v20 = vpop.xlane.xlu1 %95 }
  0xac   :  { %996 = vmatpush1.bf16.msra.mxu1 %v3577_v4  ;;  %v144_v7 = vmul.f32 0.0078125, %v94_v61  ;;  %v145_v30 = vmul.f32 0.0078125, %v96_v20  ;;  %v206_v32 = vmul.f32 %v4298_v22, %v4298_v22 }
  0xae   :  { %115 = vadd.xlane.f32.xlu1 %v4202_v23  ;;  %238 = vadd.xlane.f32.xlu0 %v200_v6  ;;  %v4294_v6 = vld [vmem:[%s6988_s0 + $0xe8] sm:$0xff]  ;;  %v4314_v31 = vsub.f32 %v4052_v14, %v144_v7 }
  0xaf   :  { %v98_v21 = vpop.xlane.xlu0 %97  ;;  %v100_v12 = vpop.xlane.xlu1 %99 }
  0xb0   :  { %v146_v8 = vmul.f32 0.0078125, %v98_v21  ;;  %v147_v43 = vmul.f32 0.0078125, %v100_v12 }
  0xb2   :  { %240 = vadd.xlane.f32.xlu1 %v201_v28  ;;  %117 = vadd.xlane.f32.xlu0 %v4225_v33  ;;  %v4310_v28 = vsub.f32 %v4045_v13, %v143_v11  ;;  %v4324_v13 = vsub.f32 %v4057_v15, %v145_v30  ;;  %v4330_v14 = vsub.f32 %v4064_v16, %v146_v8 }
  0xb3   :  { %v102_v37 = vpop.xlane.xlu0 %101  ;;  %v104_v47 = vpop.xlane.xlu1 %103  ;;  %v4337_v15 = vsub.f32 %v4069_v17, %v147_v43 }
  0xb4   :  { %v207_v39 = vmul.f32 %v4310_v28, %v4310_v28  ;;  %v148_v45 = vmul.f32 0.0078125, %v102_v37  ;;  %v209_v9 = vmul.f32 %v4324_v13, %v4324_v13  ;;  %v210_v16 = vmul.f32 %v4330_v14, %v4330_v14 }
  0xb5   :  { %v149_v52 = vmul.f32 0.0078125, %v104_v47  ;;  %v211_v55 = vmul.f32 %v4337_v15, %v4337_v15 }
  0xb6   :  { %119 = vadd.xlane.f32.xlu1 %v4248_v48  ;;  %242 = vadd.xlane.f32.xlu0 %v202_v42  ;;  %v208_v42 = vmul.f32 %v4314_v31, %v4314_v31  ;;  %v4340_v50 = vsub.f32 %v4076_v18, %v148_v45 }
  0xb8   :  { %v212_v57 = vmul.f32 %v4340_v50, %v4340_v50 }
  0xba   :  { %244 = vadd.xlane.f32.xlu1 %v203_v54  ;;  %121 = vadd.xlane.f32.xlu0 %v4271_v59  ;;  %v4345_v54 = vsub.f32 %v4081_v19, %v149_v52 }
  0xbc   :  { %v213_v17 = vmul.f32 %v4345_v54, %v4345_v54 }
  0xbe   :  { %123 = vadd.xlane.f32.xlu1 %v4294_v6  ;;  %246 = vadd.xlane.f32.xlu0 %v204_v0 }
  0xc2   :  { %248 = vadd.xlane.f32.xlu1 %v205_v24  ;;  %125 = vadd.xlane.f32.xlu0 %v4305_v25 }
  0xc6   :  { %127 = vadd.xlane.f32.xlu1 %v4321_v34  ;;  %250 = vadd.xlane.f32.xlu0 %v206_v32 }
  0xca   :  { %252 = vadd.xlane.f32.xlu1 %v207_v39  ;;  %254 = vadd.xlane.f32.xlu0 %v208_v42 }
  0xce   :  { %256 = vadd.xlane.f32.xlu1 %v209_v9  ;;  %258 = vadd.xlane.f32.xlu0 %v210_v16 }
  0xd2   :  { %260 = vadd.xlane.f32.xlu1 %v211_v55  ;;  %262 = vadd.xlane.f32.xlu0 %v212_v57  ;;  %v4372_v55 = vld [vmem:[%s6990_s1] ss:$0 sm:$0xff] }
  0xd6   :  { %264 = vadd.xlane.f32.xlu1 %v213_v17 }
 0x123   :  { %v227_v18 = vpop.xlane.xlu0 %226 }
 0x124   :  { %v290_v58 = vmul.f32 0.0078125, %v227_v18 }
 0x126   :  { %v322_v61 = vadd.f32 1e-06, %v290_v58 }
 0x127   :  { %v229_v10 = vpop.xlane.xlu1 %228  ;;  %v106_v62 = vpop.xlane.xlu0 %105 }
 0x128   :  { %3610 = vrsqrt.f32 %v322_v61  ;;  %v291_v19 = vmul.f32 0.0078125, %v229_v10  ;;  %v150_v0 = vmul.f32 0.0078125, %v106_v62 }
 0x12a   :  { %v323_v2 = vadd.f32 1e-06, %v291_v19  ;;  %v4354_v3 = vsub.f32 %v4115_v38, %v150_v0  ;;  %v4384_v0 = vld [vmem:[%s6991_s2] ss:$0 sm:$0xff] }
 0x12b   :  { %v108_v4 = vpop.xlane.xlu1 %107  ;;  %v231_v20 = vpop.xlane.xlu0 %230 }
 0x12c   :  { %3612 = vrsqrt.f32 %v323_v2  ;;  %v151_v11 = vmul.f32 0.0078125, %v108_v4  ;;  %v292_v21 = vmul.f32 0.0078125, %v231_v20  ;;  %v214_v24 = vmul.f32 %v4354_v3, %v4354_v3 }
 0x12e   :  { %v4359_v7 = vsub.f32 %v4128_v44, %v151_v11  ;;  %v324_v30 = vadd.f32 1e-06, %v292_v21  ;;  %266 = vadd.xlane.f32.xlu0 %v214_v24 }
 0x12f   :  { %v233_v12 = vpop.xlane.xlu1 %232  ;;  %v110_v32 = vpop.xlane.xlu0 %109 }
 0x130   :  { %3614 = vrsqrt.f32 %v324_v30  ;;  %v293_v8 = vmul.f32 0.0078125, %v233_v12  ;;  %v152_v37 = vmul.f32 0.0078125, %v110_v32  ;;  %v215_v38 = vmul.f32 %v4359_v7, %v4359_v7 }
 0x132   :  { %v3611_v39 = vpop.eup %3610  ;;  %v325_v42 = vadd.f32 1e-06, %v293_v8  ;;  %v4364_v43 = vsub.f32 %v4139_v49, %v152_v37  ;;  %268 = vadd.xlane.f32.xlu1 %v215_v38 }
 0x133   :  { %v112_v45 = vpop.xlane.xlu1 %111  ;;  %v235_v47 = vpop.xlane.xlu0 %234  ;;  %v386_v44 = vmul.f32 %v3611_v39, %v4103_v29 }
 0x134   :  { %3616 = vrsqrt.f32 %v325_v42  ;;  %v153_v9 = vmul.f32 0.0078125, %v112_v45  ;;  %v294_v16 = vmul.f32 0.0078125, %v235_v47  ;;  %v216_v52 = vmul.f32 %v4364_v43, %v4364_v43 }
 0x135   :  { %v424_v61 = vmul.f32 %v4372_v55, %v386_v44 }
 0x136   :  { %v3613_v57 = vpop.eup %3612  ;;  %v4375_v49 = vsub.f32 %v4156_v56, %v153_v9  ;;  %v326_v17 = vadd.f32 1e-06, %v294_v16  ;;  %270 = vadd.xlane.f32.xlu0 %v216_v52 }
 0x137   :  { %v237_v18 = vpop.xlane.xlu1 %236  ;;  %v114_v58 = vpop.xlane.xlu0 %113  ;;  %v387_v29 = vmul.f32 %v3613_v57, %v4107_v35  ;;  %v462_v21 = vadd.f32 %v4384_v0, %v424_v61 }
 0x138   :  { %3618 = vrsqrt.f32 %v326_v17  ;;  %v295_v10 = vmul.f32 0.0078125, %v237_v18  ;;  %v154_v62 = vmul.f32 0.0078125, %v114_v58  ;;  %v217_v19 = vmul.f32 %v4375_v49, %v4375_v49 }
 0x139   :  { %v425_v56 = vmul.f32 %v4372_v55, %v387_v29 }
 0x13a   :  { %v3615_v2 = vpop.eup %3614  ;;  %v327_v4 = vadd.f32 1e-06, %v295_v10  ;;  %v4388_v20 = vsub.f32 %v4179_v1, %v154_v62  ;;  %272 = vadd.xlane.f32.xlu1 %v217_v19 }
 0x13b   :  { %v116_v35 = vpop.xlane.xlu1 %115  ;;  %v239_v11 = vpop.xlane.xlu0 %238  ;;  %v463_v24 = vadd.f32 %v4384_v0, %v425_v56  ;;  %v388_v30 = vmul.f32 %v3615_v2, %v4110_v36 }
 0x13c   :  { %3620 = vrsqrt.f32 %v327_v4  ;;  %v155_v12 = vmul.f32 0.0078125, %v116_v35  ;;  %v296_v32 = vmul.f32 0.0078125, %v239_v11  ;;  %v218_v8 = vmul.f32 %v4388_v20, %v4388_v20 }
 0x13d   :  { %v494_v37 = vpack.c.bf16 %v463_v24, %v462_v21  ;;  %v426_v36 = vmul.f32 %v4372_v55, %v388_v30 }
 0x13e   :  { %v3617_v38 = vpop.eup %3616  ;;  %v4396_v1 = vsub.f32 %v4202_v23, %v155_v12  ;;  %v328_v39 = vadd.f32 1e-06, %v296_v32  ;;  %274 = vadd.xlane.f32.xlu0 %v218_v8 }
 0x13f   :  { %v241_v42 = vpop.xlane.xlu1 %240  ;;  %821 = vmatmul.mubr.bf16.vlgmr.msra.gmra.mrb[0].mxu0 %v494_v37  ;;  %1014 = vmatmul.mubr.bf16.vlgmr.msra.gmra.mrb[0].mxu1 %v494_v37  ;;  %v118_v45 = vpop.xlane.xlu0 %117  ;;  %v389_v47 = vmul.f32 %v3617_v38, %v4121_v41  ;;  %v464_v58 = vadd.f32 %v4384_v0, %v426_v36 }
 0x140   :  { %3622 = vrsqrt.f32 %v328_v39  ;;  %v297_v44 = vmul.f32 0.0078125, %v241_v42  ;;  %v156_v9 = vmul.f32 0.0078125, %v118_v45  ;;  %v219_v16 = vmul.f32 %v4396_v1, %v4396_v1  ;;  %830 = vmatprep.mubr.bf16.mxu0 %v3930_v26  ;;  %1023 = vmatprep.mubr.bf16.mxu1 %v3930_v26 }
 0x141   :  { %v427_v23 = vmul.f32 %v4372_v55, %v389_v47 }
 0x142   :  { %v3619_v52 = vpop.eup %3618  ;;  %v329_v57 = vadd.f32 1e-06, %v297_v44  ;;  %v4406_v17 = vsub.f32 %v4225_v33, %v156_v9  ;;  %276 = vadd.xlane.f32.xlu1 %v219_v16 }
 0x143   :  { %v120_v41 = vpop.xlane.xlu1 %119  ;;  %v243_v18 = vpop.xlane.xlu0 %242  ;;  %v465_v29 = vadd.f32 %v4384_v0, %v427_v23  ;;  %v390_v61 = vmul.f32 %v3619_v52, %v4132_v46 }
 0x144   :  { %3624 = vrsqrt.f32 %v329_v57  ;;  %v157_v10 = vmul.f32 0.0078125, %v120_v41  ;;  %v298_v62 = vmul.f32 0.0078125, %v243_v18  ;;  %v220_v19 = vmul.f32 %v4406_v17, %v4406_v17 }
 0x145   :  { %v495_v56 = vpack.c.bf16 %v465_v29, %v464_v58  ;;  %v428_v46 = vmul.f32 %v4372_v55, %v390_v61 }
 0x146   :  { %v3621_v2 = vpop.eup %3620  ;;  %v4414_v33 = vsub.f32 %v4248_v48, %v157_v10  ;;  %v330_v4 = vadd.f32 1e-06, %v298_v62  ;;  %278 = vadd.xlane.f32.xlu0 %v220_v19 }
 0x147   :  { %v245_v35 = vpop.xlane.xlu1 %244  ;;  %831 = vmatmul.mubr.bf16.gmra.mrb[4].mxu0 %v495_v56  ;;  %1024 = vmatmul.mubr.bf16.gmra.mrb[4].mxu1 %v495_v56  ;;  %v122_v11 = vpop.xlane.xlu0 %121  ;;  %v391_v21 = vmul.f32 %v3621_v2, %v4143_v51  ;;  %v466_v39 = vadd.f32 %v4384_v0, %v428_v46 }
 0x148   :  { %3626 = vrsqrt.f32 %v330_v4  ;;  %v299_v24 = vmul.f32 0.0078125, %v245_v35  ;;  %v158_v30 = vmul.f32 0.0078125, %v122_v11  ;;  %v221_v12 = vmul.f32 %v4414_v33, %v4414_v33  ;;  %840 = vmatprep.mubr.bf16.mxu0 %v3930_v26  ;;  %1033 = vmatprep.mubr.bf16.mxu1 %v3930_v26 }
 0x149   :  { %v429_v48 = vmul.f32 %v4372_v55, %v391_v21 }
 0x14a   :  { %v3623_v32 = vpop.eup %3622  ;;  %v331_v8 = vadd.f32 1e-06, %v299_v24  ;;  %v4424_v37 = vsub.f32 %v4271_v59, %v158_v30  ;;  %280 = vadd.xlane.f32.xlu1 %v221_v12 }
 0x14b   :  { %v124_v51 = vpop.xlane.xlu1 %123  ;;  %v247_v38 = vpop.xlane.xlu0 %246  ;;  %v467_v42 = vadd.f32 %v4384_v0, %v429_v48  ;;  %v392_v45 = vmul.f32 %v3623_v32, %v4166_v60 }
 0x14c   :  { %3628 = vrsqrt.f32 %v331_v8  ;;  %v159_v47 = vmul.f32 0.0078125, %v124_v51  ;;  %v300_v36 = vmul.f32 0.0078125, %v247_v38  ;;  %v222_v44 = vmul.f32 %v4424_v37, %v4424_v37 }
 0x14d   :  { %v496_v9 = vpack.c.bf16 %v467_v42, %v466_v39  ;;  %v430_v60 = vmul.f32 %v4372_v55, %v392_v45 }
 0x14e   :  { %v3625_v16 = vpop.eup %3624  ;;  %v4432_v59 = vsub.f32 %v4294_v6, %v159_v47  ;;  %v332_v23 = vadd.f32 1e-06, %v300_v36  ;;  %282 = vadd.xlane.f32.xlu0 %v222_v44 }
 0x14f   :  { %v249_v52 = vpop.xlane.xlu1 %248  ;;  %841 = vmatmul.mubr.bf16.gmra.mrb[8].mxu0 %v496_v9  ;;  %1034 = vmatmul.mubr.bf16.gmra.mrb[8].mxu1 %v496_v9  ;;  %v126_v57 = vpop.xlane.xlu0 %125  ;;  %v393_v41 = vmul.f32 %v3625_v16, %v4189_v5  ;;  %v468_v56 = vadd.f32 %v4384_v0, %v430_v60 }
 0x150   :  { %3630 = vrsqrt.f32 %v332_v23  ;;  %v301_v18 = vmul.f32 0.0078125, %v249_v52  ;;  %v160_v58 = vmul.f32 0.0078125, %v126_v57  ;;  %v223_v29 = vmul.f32 %v4432_v59, %v4432_v59  ;;  %850 = vmatprep.mubr.bf16.mxu0 %v3930_v26  ;;  %1043 = vmatprep.mubr.bf16.mxu1 %v3930_v26 }
 0x151   :  { %v431_v6 = vmul.f32 %v4372_v55, %v393_v41 }
 0x152   :  { %v3627_v61 = vpop.eup %3626  ;;  %v333_v10 = vadd.f32 1e-06, %v301_v18  ;;  %v4442_v62 = vsub.f32 %v4305_v25, %v160_v58  ;;  %284 = vadd.xlane.f32.xlu1 %v223_v29 }
 0x153   :  { %v128_v5 = vpop.xlane.xlu1 %127  ;;  %v251_v19 = vpop.xlane.xlu0 %250  ;;  %v469_v2 = vadd.f32 %v4384_v0, %v431_v6  ;;  %v394_v4 = vmul.f32 %v3627_v61, %v4212_v27 }
 0x154   :  { %3632 = vrsqrt.f32 %v333_v10  ;;  %v161_v35 = vmul.f32 0.0078125, %v128_v5  ;;  %v302_v11 = vmul.f32 0.0078125, %v251_v19  ;;  %v224_v21 = vmul.f32 %v4442_v62, %v4442_v62 }
 0x155   :  { %v497_v46 = vpack.c.bf16 %v469_v2, %v468_v56  ;;  %v432_v27 = vmul.f32 %v4372_v55, %v394_v4 }
 0x156   :  { %v3629_v24 = vpop.eup %3628  ;;  %v4450_v25 = vsub.f32 %v4321_v34, %v161_v35  ;;  %v334_v30 = vadd.f32 1e-06, %v302_v11  ;;  %286 = vadd.xlane.f32.xlu0 %v224_v21 }
 0x157   :  { %v253_v12 = vpop.xlane.xlu1 %252  ;;  %851 = vmatmul.mubr.bf16.gmra.mrb[12].mxu0 %v497_v46  ;;  %1044 = vmatmul.mubr.bf16.gmra.mrb[12].mxu1 %v497_v46  ;;  %v255_v48 = vpop.xlane.xlu0 %254  ;;  %v395_v32 = vmul.f32 %v3629_v24, %v4235_v40  ;;  %v470_v36 = vadd.f32 %v4384_v0, %v432_v27 }
 0x158   :  { %3634 = vrsqrt.f32 %v334_v30  ;;  %v303_v8 = vmul.f32 0.0078125, %v253_v12  ;;  %v304_v51 = vmul.f32 0.0078125, %v255_v48  ;;  %v225_v38 = vmul.f32 %v4450_v25, %v4450_v25  ;;  %860 = vmatprep.mubr.bf16.mxu0 %v3930_v26  ;;  %1053 = vmatprep.mubr.bf16.mxu1 %v3930_v26 }
 0x159   :  { %v433_v34 = vmul.f32 %v4372_v55, %v395_v32 }
 0x15a   :  { %v3631_v39 = vpop.eup %3630  ;;  %v335_v42 = vadd.f32 1e-06, %v303_v8  ;;  %v336_v45 = vadd.f32 1e-06, %v304_v51  ;;  %288 = vadd.xlane.f32.xlu1 %v225_v38 }
 0x15b   :  { %v257_v47 = vpop.xlane.xlu1 %256  ;;  %v259_v40 = vpop.xlane.xlu0 %258  ;;  %v471_v44 = vadd.f32 %v4384_v0, %v433_v34  ;;  %v396_v9 = vmul.f32 %v3631_v39, %v4258_v53 }
 0x15c   :  { %3636 = vrsqrt.f32 %v335_v42  ;;  %v305_v16 = vmul.f32 0.0078125, %v257_v47  ;;  %v306_v41 = vmul.f32 0.0078125, %v259_v40 }
 0x15d   :  { %v498_v23 = vpack.c.bf16 %v471_v44, %v470_v36  ;;  %3638 = vrsqrt.f32 %v336_v45  ;;  %v434_v58 = vmul.f32 %v4372_v55, %v396_v9 }
 0x15e   :  { %v3633_v52 = vpop.eup %3632  ;;  %v337_v57 = vadd.f32 1e-06, %v305_v16  ;;  %v338_v61 = vadd.f32 1e-06, %v306_v41  ;;  %v3580_v41 = vld [vmem:[%s6992_s5] sm:$0xff]  }
 0x15f   :  { %v261_v60 = vpop.xlane.xlu1 %260  ;;  %861 = vmatmul.mubr.bf16.gmra.mrb[16].mxu0 %v498_v23  ;;  %1054 = vmatmul.mubr.bf16.gmra.mrb[16].mxu1 %v498_v23  ;;  %v397_v18 = vmul.f32 %v3633_v52, %v4281_v63  ;;  %v263_v5 = vpop.xlane.xlu0 %262  ;;  %v472_v56 = vadd.f32 %v4384_v0, %v434_v58  ;;  %v3581_v58 = vld [vmem:[%s6992_s5 + $0x80] sm:$0xff]  }
 0x160   :  { %3640 = vrsqrt.f32 %v337_v57  ;;  %v307_v29 = vmul.f32 0.0078125, %v261_v60  ;;  %870 = vmatprep.mubr.bf16.mxu0 %v3930_v26  ;;  %1063 = vmatprep.mubr.bf16.mxu1 %v3930_v26  ;;  %v308_v21 = vmul.f32 0.0078125, %v263_v5  ;;  %v3579_v57 = vld [vmem:[%s6992_s5 + $0xc0] sm:$0xff]  }
 0x161   :  { %v435_v53 = vmul.f32 %v4372_v55, %v397_v18  ;;  %3417 = vmatprep.subr.bf16.mxu1 %v3579_v57 }
 0x162   :  { %v3635_v6 = vpop.eup %3634  ;;  %v339_v10 = vadd.f32 1e-06, %v307_v29  ;;  %v340_v32 = vadd.f32 1e-06, %v308_v21  ;;  %3418 = vmatpush3.bf16.msra.mxu1 %v3581_v58  ;;  %v3591_v21 = vld [vmem:[%s6992_s5 + $0xd8] sm:$0xff]  }
 0x163   :  { %v265_v19 = vpop.xlane.xlu1 %264  ;;  %v473_v2 = vadd.f32 %v4384_v0, %v435_v53  ;;  %v398_v63 = vmul.f32 %v3635_v6, %v4298_v22  ;;  %v3582_v6 = vld [vmem:[%s6992_s5 + $0x48] sm:$0xff]  }
 0x164   :  { %3642 = vrsqrt.f32 %v339_v10  ;;  %v309_v4 = vmul.f32 0.0078125, %v265_v19  ;;  %v3585_v10 = vld [vmem:[%s6992_s5 + $0x88] sm:$0xff]  }
 0x165   :  { %v499_v35 = vpack.c.bf16 %v473_v2, %v472_v56  ;;  %3644 = vrsqrt.f32 %v338_v61  ;;  %v436_v24 = vmul.f32 %v4372_v55, %v398_v63  ;;  %v3584_v61 = vld [vmem:[%s6992_s5 + $0x8] sm:$0xff]   ;;  %v3586_v2 = vld [vmem:[%s6992_s5 + $0x50] sm:$0xff]  }
 0x166   :  { %v3637_v11 = vpop.eup %3636  ;;  %v341_v12 = vadd.f32 1e-06, %v309_v4  ;;  %v3587_v63 = vld [vmem:[%s6992_s5 + $0xd0] sm:$0xff]  }
 0x167   :  { %871 = vmatmul.mubr.bf16.gmra.mrb[20].mxu0 %v499_v35  ;;  %1064 = vmatmul.mubr.bf16.gmra.mrb[20].mxu1 %v499_v35  ;;  %v399_v46 = vmul.f32 %v3637_v11, %v4310_v28  ;;  %v3639_v30 = vpop.eup %3638  ;;  %v474_v27 = vadd.f32 %v4384_v0, %v436_v24  ;;  %v3588_v4 = vld [vmem:[%s6992_s5 + $0x10] sm:$0xff]   ;;  %v3590_v11 = vld [vmem:[%s6992_s5 + $0x58] sm:$0xff]  }
 0x168   :  { %880 = vmatprep.mubr.bf16.mxu0 %v3930_v26  ;;  %1073 = vmatprep.mubr.bf16.mxu1 %v3930_v26  ;;  %v400_v51 = vmul.f32 %v3639_v30, %v4314_v31  ;;  %3646 = vrsqrt.f32 %v341_v12  ;;  %v3589_v35 = vld [vmem:[%s6992_s5 + $0x90] sm:$0xff]   ;;  %v3593_v24 = vld [vmem:[%s6992_s5 + $0x98] sm:$0xff]   ;;  %v3594_v30 = vld [vmem:[%s6992_s5 + $0x60] sm:$0xff]  }
 0x169   :  { %v437_v22 = vmul.f32 %v4372_v55, %v399_v46  ;;  %3648 = vrsqrt.f32 %v340_v32  ;;  %v3592_v46 = vld [vmem:[%s6992_s5 + $0x18] sm:$0xff]   ;;  %v3595_v12 = vld [vmem:[%s6992_s5 + $0xe0] sm:$0xff]   ;;  %v3598_v32 = vld [vmem:[%s6992_s5 + $0x68] sm:$0xff]  }
 0x16a   :  { %v3641_v48 = vpop.eup %3640  ;;  %v438_v42 = vmul.f32 %v4372_v55, %v400_v51  ;;  %v3601_v51 = vld [vmem:[%s6992_s5 + $0xa8] sm:$0xff]  }
 0x16b   :  { %v475_v8 = vadd.f32 %v4384_v0, %v437_v22  ;;  %v401_v28 = vmul.f32 %v3641_v48, %v4324_v13  ;;  %v3596_v22 = vld [vmem:[%s6992_s5 + $0x20] sm:$0xff]  }
 0x16c   :  { %v476_v13 = vadd.f32 %v4384_v0, %v438_v42  ;;  %v3597_v48 = vld [vmem:[%s6992_s5 + $0xa0] sm:$0xff]   ;;  %v3606_v42 = vld [vmem:[%s6992_s5 + $0x78] sm:$0xff]  }
 0x16d   :  { %v500_v38 = vpack.c.bf16 %v475_v8, %v474_v27  ;;  %v439_v34 = vmul.f32 %v4372_v55, %v401_v28  ;;  %v3599_v27 = vld [vmem:[%s6992_s5 + $0xe8] sm:$0xff]   ;;  %v3602_v28 = vld [vmem:[%s6992_s5 + $0x70] sm:$0xff]  }
 0x16e   :  { %v3643_v39 = vpop.eup %3642  ;;  %v3600_v8 = vld [vmem:[%s6992_s5 + $0x28] sm:$0xff]  }
 0x16f   :  { %881 = vmatmul.mubr.bf16.gmra.mrb[24].mxu0 %v500_v38  ;;  %1074 = vmatmul.mubr.bf16.gmra.mrb[24].mxu1 %v500_v38  ;;  %v3645_v45 = vpop.eup %3644  ;;  %v477_v47 = vadd.f32 %v4384_v0, %v439_v34  ;;  %v403_v31 = vmul.f32 %v3643_v39, %v4337_v15  ;;  %v3578_v15 = vld [vmem:[%s6992_s5 + $0x40] sm:$0xff]   ;;  %v3603_v38 = vld [vmem:[%s6992_s5 + $0xf0] sm:$0xff]  }
 0x170   :  { %890 = vmatprep.mubr.bf16.mxu0 %v3930_v26  ;;  %1083 = vmatprep.mubr.bf16.mxu1 %v3930_v26  ;;  %v402_v40 = vmul.f32 %v3645_v45, %v4330_v14  ;;  %v3604_v34 = vld [vmem:[%s6992_s5 + $0x30] sm:$0xff]   ;;  %v3607_v45 = vld [vmem:[%s6992_s5 + $0xf8] sm:$0xff]  }
 0x171   :  { %v501_v36 = vpack.c.bf16 %v477_v47, %v476_v13  ;;  %v441_v44 = vmul.f32 %v4372_v55, %v403_v31  ;;  %3305 = vmatprep.subr.bf16.mxu0 %v3578_v15  ;;  %v3605_v39 = vld [vmem:[%s6992_s5 + $0xb0] sm:$0xff]   ;;  %v3608_v47 = vld [vmem:[%s6992_s5 + $0x38] sm:$0xff]  }
 0x172   :  { %v3647_v9 = vpop.eup %3646  ;;  %v440_v16 = vmul.f32 %v4372_v55, %v402_v40  ;;  %3306 = vmatpush3.bf16.msra.mxu0 %v3580_v41  ;;  %v3609_v31 = vld [vmem:[%s6992_s5 + $0xb8] sm:$0xff]  }
 0x173   :  { %v3649_v23 = vpop.eup %3648  ;;  %v479_v52 = vadd.f32 %v4384_v0, %v441_v44  ;;  %v405_v14 = vmul.f32 %v3647_v9, %v4345_v54  ;;  %3307 = vmatprep.subr.bf16.mxu0 %v3582_v6 }
 0x174   :  { %v478_v60 = vadd.f32 %v4384_v0, %v440_v16  ;;  %v404_v18 = vmul.f32 %v3649_v23, %v4340_v50  ;;  %v3583_v50 = vld [vmem:[%s6992_s5 + $0xc8] sm:$0xff]  }
 0x175   :  { %v443_v29 = vmul.f32 %v4372_v55, %v405_v14  ;;  %3419 = vmatprep.subr.bf16.mxu1 %v3583_v50 }
 0x176   :  { %v502_v54 = vpack.c.bf16 %v479_v52, %v478_v60  ;;  %v442_v53 = vmul.f32 %v4372_v55, %v404_v18  ;;  %3308 = vmatpush3.bf16.msra.mxu0 %v3584_v61  ;;  %3420 = vmatpush3.bf16.msra.mxu1 %v3585_v10 }
 0x177   :  { %891 = vmatmul.mubr.bf16.gmra.mrb[28].mxu0 %v501_v36  ;;  %1084 = vmatmul.mubr.bf16.gmra.mrb[28].mxu1 %v501_v36  ;;  %v481_v5 = vadd.f32 %v4384_v0, %v443_v29 }
 0x178   :  { %900 = vmatprep.mubr.bf16.mxu0 %v3930_v26  ;;  %1093 = vmatprep.mubr.bf16.mxu1 %v3930_v26  ;;  %v480_v19 = vadd.f32 %v4384_v0, %v442_v53 }
 0x179   :  { %3309 = vmatprep.subr.bf16.mxu0 %v3586_v2  ;;  %3421 = vmatprep.subr.bf16.mxu1 %v3587_v63 }
 0x17a   :  { %v503_v56 = vpack.c.bf16 %v481_v5, %v480_v19  ;;  %3310 = vmatpush3.bf16.msra.mxu0 %v3588_v4  ;;  %3422 = vmatpush3.bf16.msra.mxu1 %v3589_v35 }
 0x17b   :  { %3311 = vmatprep.subr.bf16.mxu0 %v3590_v11  ;;  %3423 = vmatprep.subr.bf16.mxu1 %v3591_v21 }
 0x17e   :  { %3312 = vmatpush3.bf16.msra.mxu0 %v3592_v46  ;;  %3424 = vmatpush3.bf16.msra.mxu1 %v3593_v24 }
 0x17f   :  { %901 = vmatmul.mubr.bf16.gmra.mrb[32].mxu0 %v502_v54  ;;  %1094 = vmatmul.mubr.bf16.gmra.mrb[32].mxu1 %v502_v54 }
 0x180   :  { %910 = vmatprep.mubr.bf16.mxu0 %v3930_v26  ;;  %1103 = vmatprep.mubr.bf16.mxu1 %v3930_v26 }
 0x181   :  { %3313 = vmatprep.subr.bf16.mxu0 %v3594_v30  ;;  %3425 = vmatprep.subr.bf16.mxu1 %v3595_v12 }
 0x182   :  { %3314 = vmatpush3.bf16.msra.mxu0 %v3596_v22  ;;  %3426 = vmatpush3.bf16.msra.mxu1 %v3597_v48 }
 0x183   :  { %3315 = vmatprep.subr.bf16.mxu0 %v3598_v32  ;;  %3427 = vmatprep.subr.bf16.mxu1 %v3599_v27 }
 0x186   :  { %3316 = vmatpush3.bf16.msra.mxu0 %v3600_v8  ;;  %3428 = vmatpush3.bf16.msra.mxu1 %v3601_v51 }
 0x187   :  { %911 = vmatmul.mubr.bf16.gmra.mrb[36].mxu0 %v503_v56  ;;  %1104 = vmatmul.mubr.bf16.gmra.mrb[36].mxu1 %v503_v56 }
 0x188   :  { %920 = vmatprep.mubr.bf16.mxu0 %v3930_v26  ;;  %1113 = vmatprep.mubr.bf16.mxu1 %v3930_v26 }
 0x189   :  { %3317 = vmatprep.subr.bf16.mxu0 %v3602_v28  ;;  %3429 = vmatprep.subr.bf16.mxu1 %v3603_v38 }
 0x18a   :  { %3318 = vmatpush3.bf16.msra.mxu0 %v3604_v34  ;;  %3430 = vmatpush3.bf16.msra.mxu1 %v3605_v39 }
 0x18b   :  { %3319 = vmatprep.subr.bf16.mxu0 %v3606_v42  ;;  %3431 = vmatprep.subr.bf16.mxu1 %v3607_v45 }
 0x18e   :  { %3320 = vmatpush3.bf16.msra.mxu0 %v3608_v47  ;;  %3432 = vmatpush3.bf16.msra.mxu1 %v3609_v31 }
 0x1bb   :  { %v267_v13 = vpop.xlane.xlu0 %266 }
 0x1bc   :  { %v310_v40 = vmul.f32 0.0078125, %v267_v13 }
 0x1be   :  { %v342_v36 = vadd.f32 1e-06, %v310_v40 }
 0x1bf   :  { %v269_v44 = vpop.xlane.xlu1 %268 }
 0x1c0   :  { %3650 = vrsqrt.f32 %v342_v36  ;;  %v311_v9 = vmul.f32 0.0078125, %v269_v44 }
 0x1c2   :  { %v343_v16 = vadd.f32 1e-06, %v311_v9 }
 0x1c3   :  { %v271_v23 = vpop.xlane.xlu0 %270 }
 0x1c4   :  { %3652 = vrsqrt.f32 %v343_v16  ;;  %v312_v15 = vmul.f32 0.0078125, %v271_v23 }
 0x1c6   :  { %v344_v52 = vadd.f32 1e-06, %v312_v15 }
 0x1c7   :  { %v273_v14 = vpop.xlane.xlu1 %272 }
 0x1c8   :  { %3654 = vrsqrt.f32 %v344_v52  ;;  %v313_v57 = vmul.f32 0.0078125, %v273_v14 }
 0x1ca   :  { %v3651_v41 = vpop.eup %3650  ;;  %v345_v60 = vadd.f32 1e-06, %v313_v57 }
 0x1cb   :  { %v275_v18 = vpop.xlane.xlu0 %274  ;;  %v406_v58 = vmul.f32 %v3651_v41, %v4354_v3 }
 0x1cc   :  { %3656 = vrsqrt.f32 %v345_v60  ;;  %v314_v54 = vmul.f32 0.0078125, %v275_v18 }
 0x1cd   :  { %v444_v61 = vmul.f32 %v4372_v55, %v406_v58 }
 0x1ce   :  { %v3653_v29 = vpop.eup %3652  ;;  %v346_v53 = vadd.f32 1e-06, %v314_v54 }
 0x1cf   :  { %v277_v6 = vpop.xlane.xlu1 %276  ;;  %v407_v50 = vmul.f32 %v3653_v29, %v4359_v7  ;;  %v482_v63 = vadd.f32 %v4384_v0, %v444_v61 }
 0x1d0   :  { %3658 = vrsqrt.f32 %v346_v53  ;;  %v315_v10 = vmul.f32 0.0078125, %v277_v6 }
 0x1d1   :  { %v445_v5 = vmul.f32 %v4372_v55, %v407_v50 }
 0x1d2   :  { %v3655_v19 = vpop.eup %3654  ;;  %v347_v56 = vadd.f32 1e-06, %v315_v10 }
 0x1d3   :  { %v279_v2 = vpop.xlane.xlu0 %278  ;;  %v483_v3 = vadd.f32 %v4384_v0, %v445_v5  ;;  %v408_v4 = vmul.f32 %v3655_v19, %v4364_v43 }
 0x1d4   :  { %3660 = vrsqrt.f32 %v347_v56  ;;  %v316_v35 = vmul.f32 0.0078125, %v279_v2 }
 0x1d5   :  { %v504_v11 = vpack.c.bf16 %v483_v3, %v482_v63  ;;  %v446_v30 = vmul.f32 %v4372_v55, %v408_v4 }
 0x1d6   :  { %v3657_v21 = vpop.eup %3656  ;;  %v348_v7 = vadd.f32 1e-06, %v316_v35 }
 0x1d7   :  { %v281_v46 = vpop.xlane.xlu1 %280  ;;  %921 = vmatmul.mubr.bf16.gmra.mrb[40].mxu0 %v504_v11  ;;  %1114 = vmatmul.mubr.bf16.gmra.mrb[40].mxu1 %v504_v11  ;;  %v409_v24 = vmul.f32 %v3657_v21, %v4375_v49  ;;  %v484_v27 = vadd.f32 %v4384_v0, %v446_v30 }
 0x1d8   :  { %3662 = vrsqrt.f32 %v348_v7  ;;  %v317_v12 = vmul.f32 0.0078125, %v281_v46  ;;  %930 = vmatprep.mubr.bf16.mxu0 %v3930_v26  ;;  %1123 = vmatprep.mubr.bf16.mxu1 %v3930_v26 }
 0x1d9   :  { %v447_v43 = vmul.f32 %v4372_v55, %v409_v24 }
 0x1da   :  { %v3659_v22 = vpop.eup %3658  ;;  %v349_v48 = vadd.f32 1e-06, %v317_v12 }
 0x1db   :  { %v283_v32 = vpop.xlane.xlu0 %282  ;;  %v485_v8 = vadd.f32 %v4384_v0, %v447_v43  ;;  %v410_v51 = vmul.f32 %v3659_v22, %v4388_v20 }
 0x1dc   :  { %3664 = vrsqrt.f32 %v349_v48  ;;  %v318_v49 = vmul.f32 0.0078125, %v283_v32 }
 0x1dd   :  { %v505_v28 = vpack.c.bf16 %v485_v8, %v484_v27  ;;  %v448_v45 = vmul.f32 %v4372_v55, %v410_v51 }
 0x1de   :  { %v3661_v38 = vpop.eup %3660  ;;  %v350_v34 = vadd.f32 1e-06, %v318_v49 }
 0x1df   :  { %v285_v39 = vpop.xlane.xlu1 %284  ;;  %931 = vmatmul.mubr.bf16.gmra.mrb[44].mxu0 %v505_v28  ;;  %1124 = vmatmul.mubr.bf16.gmra.mrb[44].mxu1 %v505_v28  ;;  %v411_v42 = vmul.f32 %v3661_v38, %v4396_v1  ;;  %v486_v36 = vadd.f32 %v4384_v0, %v448_v45 }
 0x1e0   :  { %3666 = vrsqrt.f32 %v350_v34  ;;  %v319_v47 = vmul.f32 0.0078125, %v285_v39  ;;  %940 = vmatprep.mubr.bf16.mxu0 %v3930_v26  ;;  %1133 = vmatprep.mubr.bf16.mxu1 %v3930_v26 }
 0x1e1   :  { %v449_v20 = vmul.f32 %v4372_v55, %v411_v42 }
 0x1e2   :  { %v3663_v31 = vpop.eup %3662  ;;  %v351_v13 = vadd.f32 1e-06, %v319_v47 }
 0x1e3   :  { %v287_v40 = vpop.xlane.xlu0 %286  ;;  %v487_v44 = vadd.f32 %v4384_v0, %v449_v20  ;;  %v412_v9 = vmul.f32 %v3663_v31, %v4406_v17 }
 0x1e4   :  { %3668 = vrsqrt.f32 %v351_v13  ;;  %v320_v1 = vmul.f32 0.0078125, %v287_v40 }
 0x1e5   :  { %v506_v16 = vpack.c.bf16 %v487_v44, %v486_v36  ;;  %v450_v57 = vmul.f32 %v4372_v55, %v412_v9 }
 0x1e6   :  { %v3665_v23 = vpop.eup %3664  ;;  %v352_v15 = vadd.f32 1e-06, %v320_v1 }
 0x1e7   :  { %v289_v52 = vpop.xlane.xlu1 %288  ;;  %941 = vmatmul.mubr.bf16.gmra.mrb[48].mxu0 %v506_v16  ;;  %1134 = vmatmul.mubr.bf16.gmra.mrb[48].mxu1 %v506_v16  ;;  %v413_v14 = vmul.f32 %v3665_v23, %v4414_v33  ;;  %v488_v58 = vadd.f32 %v4384_v0, %v450_v57 }
 0x1e8   :  { %3670 = vrsqrt.f32 %v352_v15  ;;  %v321_v41 = vmul.f32 0.0078125, %v289_v52  ;;  %950 = vmatprep.mubr.bf16.mxu0 %v3930_v26  ;;  %1143 = vmatprep.mubr.bf16.mxu1 %v3930_v26 }
 0x1e9   :  { %v451_v17 = vmul.f32 %v4372_v55, %v413_v14 }
 0x1ea   :  { %v3667_v60 = vpop.eup %3666  ;;  %v353_v18 = vadd.f32 1e-06, %v321_v41 }
 0x1eb   :  { %v489_v54 = vadd.f32 %v4384_v0, %v451_v17  ;;  %v414_v29 = vmul.f32 %v3667_v60, %v4424_v37 }
 0x1ec   :  { %3672 = vrsqrt.f32 %v353_v18 }
 0x1ed   :  { %v507_v33 = vpack.c.bf16 %v489_v54, %v488_v58  ;;  %v452_v50 = vmul.f32 %v4372_v55, %v414_v29 }
 0x1ee   :  { %v3669_v53 = vpop.eup %3668 }
 0x1ef   :  { %951 = vmatmul.mubr.bf16.gmra.mrb[52].mxu0 %v507_v33  ;;  %1144 = vmatmul.mubr.bf16.gmra.mrb[52].mxu1 %v507_v33  ;;  %v415_v6 = vmul.f32 %v3669_v53, %v4432_v59  ;;  %v490_v5 = vadd.f32 %v4384_v0, %v452_v50 }
 0x1f0   :  { %960 = vmatprep.mubr.bf16.mxu0 %v3930_v26  ;;  %1153 = vmatprep.mubr.bf16.mxu1 %v3930_v26 }
 0x1f1   :  { %v453_v61 = vmul.f32 %v4372_v55, %v415_v6 }
 0x1f2   :  { %v3671_v10 = vpop.eup %3670 }
 0x1f3   :  { %v491_v37 = vadd.f32 %v4384_v0, %v453_v61  ;;  %v416_v19 = vmul.f32 %v3671_v10, %v4442_v62  ;;  %v608_v62 = vlaneseq }
 0x1f5   :  { %v508_v56 = vpack.c.bf16 %v491_v37, %v490_v5  ;;  %v454_v63 = vmul.f32 %v4372_v55, %v416_v19  ;;  %v609_v21 = vshrl.u32 %v608_v62, 7 }
 0x1f6   :  { %v3673_v2 = vpop.eup %3672 }
 0x1f7   :  { %961 = vmatmul.mubr.bf16.gmra.mrb[56].mxu0 %v508_v56  ;;  %1154 = vmatmul.mubr.bf16.gmra.mrb[56].mxu1 %v508_v56  ;;  %v417_v59 = vmul.f32 %v3673_v2, %v4450_v25  ;;  %v492_v4 = vadd.f32 %v4384_v0, %v454_v63  ;;  %v610_v7 = vsub.s32 0, %v609_v21  ;;  %v618_v46 = vsub.s32 2, %v609_v21  ;;  %v606_v25 = vld [vmem:[%s6993_s4] sm:$0xf] }
 0x1f8   :  { %970 = vmatprep.mubr.bf16.mxu0 %v3930_v26  ;;  %1163 = vmatprep.mubr.bf16.mxu1 %v3930_v26  ;;  %v614_v24 = vsub.s32 1, %v609_v21  ;;  %v622_v30 = vsub.s32 3, %v609_v21 }
 0x1f9   :  { %v455_v3 = vmul.f32 %v4372_v55, %v417_v59  ;;  %v4648_v26 = vrot.slane %v606_v25, %v610_v7  ;;  %v4650_v55 = vrot.slane %v606_v25, %v618_v46 }
 0x1fa   :  { %v4652_v12 = vrot.slane %v606_v25, %v614_v24 }
 0x1fb   :  { %v493_v35 = vadd.f32 %v4384_v0, %v455_v3  ;;  %7114 = vst [vmem:[#allocation4_spill] sm:$0xff] %v4648_v26  ;;  %7115 = vst [vmem:[#allocation5_spill] sm:$0xff] %v4650_v55  ;;  %v4654_v0 = vrot.slane %v606_v25, %v622_v30 }
 0x1fc   :  { %7116 = vst [vmem:[#allocation6_spill] sm:$0xff] %v4652_v12 }
 0x1fd   :  { %v509_v11 = vpack.c.bf16 %v493_v35, %v492_v4  ;;  %7117 = vst [vmem:[#allocation7_spill] sm:$0xff] %v4654_v0 }
 0x1ff   :  { %971 = vmatmul.mubr.bf16.gmra.mrb[60].mxu0 %v509_v11  ;;  %1164 = vmatmul.mubr.bf16.gmra.mrb[60].mxu1 %v509_v11 }
 0x212   :  { %v822_v43 = vpop.f32.mrb[0].mxu0  ;;  %v1015_v22 = vpop.f32.mrb[0].mxu1 }
 0x213   :  { %v823_v48 = vadd.f32 %v822_v43, %v4648_v26  ;;  %v1016_v32 = vadd.f32 %v1015_v22, %v4650_v55  ;;  %v824_v27 = vpop.f32.mrb[1].mxu0  ;;  %v1017_v8 = vpop.f32.mrb[1].mxu1 }
 0x214   :  { %v4659_v51 = vadd.f32 %v824_v27, %v4652_v12  ;;  %v4662_v49 = vadd.f32 %v1017_v8, %v4654_v0  ;;  %v826_v28 = vpop.f32.mrb[2].mxu0  ;;  %v1019_v38 = vpop.f32.mrb[2].mxu1 }
 0x215   :  { %v4664_v34 = vmul.f32 0.5, %v823_v48  ;;  %v1302_v39 = vmul.f32 0.044715, %v823_v48  ;;  %v1304_v42 = vmul.f32 0.044715, %v1016_v32  ;;  %v827_v20 = vadd.f32 %v826_v28, %v4648_v26  ;;  %v828_v13 = vpop.f32.mrb[3].mxu0 }
 0x216   :  { %v1303_v45 = vmul.f32 0.044715, %v4659_v51  ;;  %v1305_v47 = vmul.f32 0.044715, %v4662_v49  ;;  %v1020_v31 = vadd.f32 %v1019_v38, %v4650_v55  ;;  %v1021_v40 = vpop.f32.mrb[3].mxu1  ;;  %v4671_v9 = vadd.f32 %v828_v13, %v4652_v12 }
 0x217   :  { %v1430_v36 = vmul.f32 %v1302_v39, %v823_v48  ;;  %v1432_v44 = vmul.f32 %v1304_v42, %v1016_v32  ;;  %v4674_v1 = vadd.f32 %v1021_v40, %v4654_v0  ;;  %v4676_v16 = vmul.f32 0.5, %v1016_v32 }
 0x218   :  { %v1431_v23 = vmul.f32 %v1303_v45, %v4659_v51  ;;  %v1433_v15 = vmul.f32 %v1305_v47, %v4662_v49  ;;  %v1306_v52 = vmul.f32 0.044715, %v827_v20  ;;  %v4680_v41 = vmul.f32 0.5, %v827_v20 }
 0x219   :  { %v1558_v14 = vmul.f32 %v1430_v36, %v823_v48  ;;  %v1560_v57 = vmul.f32 %v1432_v44, %v1016_v32  ;;  %v1308_v17 = vmul.f32 0.044715, %v1020_v31  ;;  %v4685_v58 = vmul.f32 0.5, %v1020_v31 }
 0x21a   :  { %v4683_v60 = vmul.f32 %v1431_v23, %v4659_v51  ;;  %v1434_v18 = vmul.f32 %v1306_v52, %v827_v20  ;;  %v1307_v54 = vmul.f32 0.044715, %v4671_v9  ;;  %v832_v29 = vpop.f32.mrb[4].mxu0  ;;  %v1025_v33 = vpop.f32.mrb[4].mxu1  ;;  %v1309_v61 = vmul.f32 0.044715, %v4674_v1 }
 0x21b   :  { %v1686_v53 = vadd.f32 %v1558_v14, %v823_v48  ;;  %v1688_v6 = vadd.f32 %v1560_v57, %v1016_v32  ;;  %v1436_v50 = vmul.f32 %v1308_v17, %v1020_v31  ;;  %v834_v10 = vpop.f32.mrb[5].mxu0  ;;  %v1027_v5 = vpop.f32.mrb[5].mxu1  ;;  %v4691_v56 = vadd.f32 %v832_v29, %v4648_v26 }
 0x21c   :  { %v1562_v37 = vmul.f32 %v1434_v18, %v827_v20  ;;  %v1435_v19 = vmul.f32 %v1307_v54, %v4671_v9  ;;  %v4694_v2 = vadd.f32 %v1025_v33, %v4650_v55  ;;  %v836_v59 = vpop.f32.mrb[6].mxu0  ;;  %v1029_v63 = vpop.f32.mrb[6].mxu1  ;;  %v4697_v35 = vmul.f32 %v1433_v15, %v4662_v49 }
 0x21d   :  { %v1814_v3 = vmul.f32 0.7978846, %v1686_v53  ;;  %v1816_v4 = vmul.f32 0.7978846, %v1688_v6  ;;  %v1564_v11 = vmul.f32 %v1436_v50, %v1020_v31  ;;  %v838_v62 = vpop.f32.mrb[7].mxu0  ;;  %v1031_v21 = vpop.f32.mrb[7].mxu1  ;;  %v1437_v46 = vmul.f32 %v1309_v61, %v4674_v1 }
 0x21e   :  { %v1690_v7 = vadd.f32 %v1562_v37, %v827_v20  ;;  %v1310_v25 = vmul.f32 0.044715, %v4691_v56  ;;  %v1312_v24 = vmul.f32 0.044715, %v4694_v2  ;;  %v4703_v43 = vmul.f32 %v1435_v19, %v4671_v9 }
 0x21f   :  { %3674 = vtanh.f32 %v1814_v3  ;;  %v1692_v30 = vadd.f32 %v1564_v11, %v1020_v31  ;;  %v4706_v22 = vadd.f32 %v834_v10, %v4652_v12  ;;  %v4712_v38 = vadd.f32 %v1027_v5, %v4654_v0 }
 0x220   :  { %3676 = vtanh.f32 %v1816_v4  ;;  %v1818_v48 = vmul.f32 0.7978846, %v1690_v7  ;;  %v1438_v32 = vmul.f32 %v1310_v25, %v4691_v56  ;;  %v1440_v27 = vmul.f32 %v1312_v24, %v4694_v2 }
 0x221   :  { %v1820_v8 = vmul.f32 0.7978846, %v1692_v30  ;;  %v1311_v28 = vmul.f32 0.044715, %v4706_v22  ;;  %v4715_v39 = vadd.f32 %v836_v59, %v4648_v26  ;;  %v4718_v42 = vmul.f32 %v1437_v46, %v4674_v1 }
 0x222   :  { %3678 = vtanh.f32 %v1818_v48  ;;  %v4721_v45 = vmul.f32 %v1438_v32, %v4691_v56  ;;  %v4724_v47 = vadd.f32 %v1029_v63, %v4650_v55  ;;  %v842_v20 = vpop.f32.mrb[8].mxu0  ;;  %v1035_v31 = vpop.f32.mrb[8].mxu1  ;;  %v4727_v13 = vmul.f32 %v1440_v27, %v4694_v2 }
 0x223   :  { %v1439_v40 = vmul.f32 %v1311_v28, %v4706_v22  ;;  %v1313_v36 = vmul.f32 0.044715, %v4712_v38  ;;  %v1314_v44 = vmul.f32 0.044715, %v4715_v39  ;;  %v844_v23 = vpop.f32.mrb[9].mxu0  ;;  %v1037_v15 = vpop.f32.mrb[9].mxu1  ;;  %v4734_v14 = vadd.f32 %v838_v62, %v4652_v12 }
 0x224   :  { %v1316_v52 = vmul.f32 0.044715, %v4724_v47  ;;  %v4737_v57 = vadd.f32 %v1031_v21, %v4654_v0  ;;  %v4740_v17 = vadd.f32 %v842_v20, %v4648_v26  ;;  %v846_v18 = vpop.f32.mrb[10].mxu0  ;;  %v1039_v54 = vpop.f32.mrb[10].mxu1  ;;  %3680 = vtanh.f32 %v1820_v8 }
 0x225   :  { %v1441_v29 = vmul.f32 %v1313_v36, %v4712_v38  ;;  %v1442_v33 = vmul.f32 %v1314_v44, %v4715_v39  ;;  %v4745_v53 = vadd.f32 %v1035_v31, %v4650_v55  ;;  %v848_v6 = vpop.f32.mrb[11].mxu0  ;;  %v1041_v50 = vpop.f32.mrb[11].mxu1  ;;  %v1315_v10 = vmul.f32 0.044715, %v4734_v14 }
 0x226   :  { %7118 = vst [vmem:[#allocation8_spill] sm:$0xff] %v4740_v17  ;;  %v1444_v61 = vmul.f32 %v1316_v52, %v4724_v47  ;;  %v1317_v5 = vmul.f32 0.044715, %v4737_v57  ;;  %v1318_v37 = vmul.f32 0.044715, %v4740_v17  ;;  %v4752_v19 = vmul.f32 %v1439_v40, %v4706_v22 }
 0x227   :  { %7119 = vst [vmem:[#allocation9_spill] sm:$0xff] %v4745_v53  ;;  %v4755_v59 = vmul.f32 %v1441_v29, %v4712_v38  ;;  %v1320_v63 = vmul.f32 0.044715, %v4745_v53  ;;  %v4759_v3 = vadd.f32 %v844_v23, %v4652_v12  ;;  %v4762_v4 = vmul.f32 %v1442_v33, %v4715_v39 }
 0x228   :  { %v1443_v11 = vmul.f32 %v1315_v10, %v4734_v14  ;;  %v1445_v62 = vmul.f32 %v1317_v5, %v4737_v57  ;;  %v1446_v21 = vmul.f32 %v1318_v37, %v4740_v17  ;;  %v4772_v24 = vadd.f32 %v1037_v15, %v4654_v0 }
 0x229   :  { %7120 = vst [vmem:[#allocation10_spill] sm:$0xff] %v4759_v3  ;;  %v4767_v7 = vpop.eup %3674  ;;  %v1448_v46 = vmul.f32 %v1320_v63, %v4745_v53  ;;  %v1319_v25 = vmul.f32 0.044715, %v4759_v3  ;;  %v4775_v30 = vadd.f32 %v846_v18, %v4648_v26  ;;  %v4780_v32 = vmul.f32 %v1444_v61, %v4724_v47 }
 0x22a   :  { %7121 = vst [vmem:[#allocation11_spill] sm:$0xff] %v4772_v24  ;;  %v4777_v48 = vpop.eup %3676  ;;  %v4783_v27 = vmul.f32 %v1443_v11, %v4734_v14  ;;  %v4786_v8 = vmul.f32 %v1445_v62, %v4737_v57  ;;  %v4789_v28 = vadd.f32 %v1039_v54, %v4650_v55  ;;  %v852_v20 = vpop.f32.mrb[12].mxu0  ;;  %v4792_v40 = vmul.f32 %v1446_v21, %v4740_v17 }
 0x22b   :  { %7122 = vst [vmem:[#allocation12_spill] sm:$0xff] %v4775_v30  ;;  %7123 = vst [vmem:[#allocation13_spill] sm:$0xff] %v4780_v32  ;;  %v1045_v31 = vpop.f32.mrb[12].mxu1  ;;  %v1447_v36 = vmul.f32 %v1319_v25, %v4759_v3  ;;  %v1321_v44 = vmul.f32 0.044715, %v4772_v24  ;;  %v854_v15 = vpop.f32.mrb[13].mxu0  ;;  %v4801_v54 = vadd.f32 %v848_v6, %v4652_v12  ;;  %v4804_v33 = vadd.f32 %v1041_v50, %v4654_v0 }
 0x22c   :  { %7124 = vst [vmem:[#allocation14_spill] sm:$0xff] %v4789_v28  ;;  %7125 = vst [vmem:[#allocation15_spill] sm:$0xff] %v4792_v40  ;;  %v1322_v23 = vmul.f32 0.044715, %v4775_v30  ;;  %v1047_v52 = vpop.f32.mrb[13].mxu1  ;;  %v4797_v18 = vpop.eup %3678  ;;  %v4807_v61 = vadd.f32 %v852_v20, %v4648_v26  ;;  %v4810_v37 = vmul.f32 %v1448_v46, %v4745_v53  ;;  %v4815_v62 = vadd.f32 %v1045_v31, %v4650_v55 }
 0x22d   :  { %v1324_v29 = vmul.f32 0.044715, %v4789_v28  ;;  %7126 = vst [vmem:[#allocation16_spill] sm:$0xff] %v4801_v54  ;;  %7127 = vst [vmem:[#allocation17_spill] sm:$0xff] %v4804_v33  ;;  %v856_v10 = vpop.f32.mrb[14].mxu0  ;;  %v1049_v5 = vpop.f32.mrb[14].mxu1  ;;  %v1449_v63 = vmul.f32 %v1321_v44, %v4772_v24  ;;  %v4824_v46 = vmul.f32 %v1447_v36, %v4759_v3 }
 0x22e   :  { %7128 = vst [vmem:[#allocation18_spill] sm:$0xff] %v4807_v61  ;;  %7129 = vst [vmem:[#allocation19_spill] sm:$0xff] %v4810_v37  ;;  %v1450_v11 = vmul.f32 %v1322_v23, %v4775_v30  ;;  %v858_v6 = vpop.f32.mrb[15].mxu0  ;;  %v1051_v21 = vpop.f32.mrb[15].mxu1  ;;  %v1323_v25 = vmul.f32 0.044715, %v4801_v54  ;;  %v4831_v23 = vadd.f32 %v854_v15, %v4652_v12 }
 0x22f   :  { %7130 = vst [vmem:[#allocation20_spill] sm:$0xff] %v4815_v62  ;;  %v1452_v50 = vmul.f32 %v1324_v29, %v4789_v28  ;;  %v1325_v20 = vmul.f32 0.044715, %v4804_v33  ;;  %v1326_v40 = vmul.f32 0.044715, %v4807_v61  ;;  %v4821_v17 = vpop.eup %3680  ;;  %7131 = vst [vmem:[#allocation21_spill] sm:$0xff] %v4824_v46  ;;  %v4827_v44 = vmul.f32 %v1449_v63, %v4772_v24 }
 0x230   :  { %v1328_v31 = vmul.f32 0.044715, %v4815_v62  ;;  %v4834_v29 = vmul.f32 %v1450_v11, %v4775_v30  ;;  %v1451_v37 = vmul.f32 %v1323_v25, %v4801_v54  ;;  %v1327_v46 = vmul.f32 0.044715, %v4831_v23 }
 0x231   :  { %7132 = vst [vmem:[#allocation22_spill] sm:$0xff] %v4827_v44  ;;  %v1453_v53 = vmul.f32 %v1325_v20, %v4804_v33  ;;  %v1454_v32 = vmul.f32 %v1326_v40, %v4807_v61  ;;  %v4842_v63 = vadd.f32 %v1047_v52, %v4654_v0  ;;  %v4845_v44 = vadd.f32 %v856_v10, %v4648_v26 }
 0x232   :  { %7133 = vst [vmem:[#allocation23_spill] sm:$0xff] %v4834_v29  ;;  %v1456_v36 = vmul.f32 %v1328_v31, %v4815_v62  ;;  %v4848_v15 = vmul.f32 %v1452_v50, %v4789_v28  ;;  %v4851_v11 = vmul.f32 %v1451_v37, %v4801_v54  ;;  %v4857_v40 = vadd.f32 %v1049_v5, %v4650_v55  ;;  %v862_v20 = vpop.f32.mrb[16].mxu0  ;;  %v1055_v31 = vpop.f32.mrb[16].mxu1 }
 0x233   :  { %7134 = vst [vmem:[#allocation24_spill] sm:$0xff] %v4842_v63  ;;  %7135 = vst [vmem:[#allocation25_spill] sm:$0xff] %v4845_v44  ;;  %v4854_v25 = vmul.f32 %v1453_v53, %v4804_v33  ;;  %v4860_v52 = vmul.f32 %v1454_v32, %v4807_v61  ;;  %v1455_v10 = vmul.f32 %v1327_v46, %v4831_v23  ;;  %v1329_v29 = vmul.f32 0.044715, %v4842_v63  ;;  %v1057_v37 = vpop.f32.mrb[17].mxu1 }
 0x234   :  { %7136 = vst [vmem:[#allocation26_spill] sm:$0xff] %v4848_v15  ;;  %7137 = vst [vmem:[#allocation27_spill] sm:$0xff] %v4851_v11  ;;  %v1330_v50 = vmul.f32 0.044715, %v4845_v44  ;;  %v864_v15 = vpop.f32.mrb[17].mxu0  ;;  %v4867_v53 = vadd.f32 %v858_v6, %v4652_v12  ;;  %v4870_v5 = vadd.f32 %v1051_v21, %v4654_v0  ;;  %v4873_v30 = vadd.f32 %v862_v20, %v4648_v26 }
 0x235   :  { %7138 = vst [vmem:[#allocation28_spill] sm:$0xff] %v4854_v25  ;;  %7139 = vst [vmem:[#allocation29_spill] sm:$0xff] %v4857_v40  ;;  %v1332_v28 = vmul.f32 0.044715, %v4857_v40  ;;  %v866_v32 = vpop.f32.mrb[18].mxu0  ;;  %v4876_v46 = vmul.f32 %v1456_v36, %v4815_v62  ;;  %v1457_v61 = vmul.f32 %v1329_v29, %v4842_v63  ;;  %v4881_v33 = vadd.f32 %v1055_v31, %v4650_v55 }
 0x236   :  { %7140 = vst [vmem:[#allocation30_spill] sm:$0xff] %v4860_v52  ;;  %7141 = vst [vmem:[#allocation31_spill] sm:$0xff] %v4867_v53  ;;  %v1059_v52 = vpop.f32.mrb[18].mxu1  ;;  %v1458_v25 = vmul.f32 %v1330_v50, %v4845_v44  ;;  %v4883_v6 = vpop.f32.mrb[19].mxu0  ;;  %v1331_v20 = vmul.f32 0.044715, %v4867_v53  ;;  %v4899_v50 = vadd.f32 %v864_v15, %v4652_v12 }
 0x237   :  { %7142 = vst [vmem:[#allocation32_spill] sm:$0xff] %v4870_v5  ;;  %7143 = vst [vmem:[#allocation33_spill] sm:$0xff] %v4873_v30  ;;  %v4885_v24 = vpop.f32.mrb[19].mxu1  ;;  %v1460_v21 = vmul.f32 %v1332_v28, %v4857_v40  ;;  %v1333_v11 = vmul.f32 0.044715, %v4870_v5  ;;  %v4895_v29 = vmul.f32 %v1457_v61, %v4842_v63  ;;  %v4913_v63 = vadd.f32 %v1057_v37, %v4654_v0 }
 0x238   :  { %7144 = vst [vmem:[#allocation34_spill] sm:$0xff] %v4876_v46  ;;  %7145 = vst [vmem:[#allocation35_spill] sm:$0xff] %v4881_v33  ;;  %v1334_v36 = vmul.f32 0.044715, %v4873_v30  ;;  %v4892_v46 = vmul.f32 %v1455_v10, %v4831_v23  ;;  %v1336_v31 = vmul.f32 0.044715, %v4881_v33  ;;  %v4902_v62 = vmul.f32 %v1458_v25, %v4845_v44 }
 0x239   :  { %7147 = vst [vmem:[#allocation37_spill] sm:$0xff] %v4895_v29  ;;  %7148 = vst [vmem:[#allocation38_spill] sm:$0xff] %v4899_v50  ;;  %v1459_v28 = vmul.f32 %v1331_v20, %v4867_v53  ;;  %v1461_v54 = vmul.f32 %v1333_v11, %v4870_v5  ;;  %v4908_v10 = vmul.f32 %v1460_v21, %v4857_v40  ;;  %v1335_v29 = vmul.f32 0.044715, %v4899_v50 }
 0x23a   :  { %7146 = vst [vmem:[#allocation36_spill] sm:$0xff] %v4892_v46  ;;  %7149 = vst [vmem:[#allocation39_spill] sm:$0xff] %v4902_v62  ;;  %v1462_v3 = vmul.f32 %v1334_v36, %v4873_v30  ;;  %v1464_v61 = vmul.f32 %v1336_v31, %v4881_v33  ;;  %v4925_v20 = vmul.f32 0.5, %v4659_v51  ;;  %v872_v21 = vpop.f32.mrb[20].mxu0  ;;  %v1065_v36 = vpop.f32.mrb[20].mxu1  ;;  %v4930_v37 = vmul.f32 0.5, %v4671_v9 }
 0x23b   :  { %7150 = vst [vmem:[#allocation40_spill] sm:$0xff] %v4908_v10  ;;  %7151 = vst [vmem:[#allocation41_spill] sm:$0xff] %v4913_v63  ;;  %v4916_v15 = vmul.f32 %v1459_v28, %v4867_v53  ;;  %v4919_v25 = vmul.f32 %v1461_v54, %v4870_v5  ;;  %v1463_v31 = vmul.f32 %v1335_v29, %v4899_v50  ;;  %v1337_v10 = vmul.f32 0.044715, %v4913_v63  ;;  %v874_v54 = vpop.f32.mrb[21].mxu0  ;;  %v1067_v40 = vpop.f32.mrb[21].mxu1 }
 0x23c   :  { %v4922_v11 = vmul.f32 %v1462_v3, %v4873_v30  ;;  %v1687_v28 = vadd.f32 %v4683_v60, %v4659_v51  ;;  %v4935_v3 = vmul.f32 %v1464_v61, %v4881_v33  ;;  %v4940_v30 = vmul.f32 0.5, %v4662_v49  ;;  %v4944_v62 = vpop.f32.mrb[22].mxu0  ;;  %v4946_v44 = vpop.f32.mrb[22].mxu1 }
 0x23d   :  { %7152 = vst [vmem:[#allocation42_spill] sm:$0xff] %v4916_v15  ;;  %7153 = vst [vmem:[#allocation43_spill] sm:$0xff] %v4919_v25  ;;  %v1689_v29 = vadd.f32 %v4697_v35, %v4662_v49  ;;  %v4949_v51 = vmul.f32 %v1463_v31, %v4899_v50  ;;  %v4952_v61 = vmul.f32 0.5, %v4674_v1  ;;  %v4961_v35 = vadd.f32 %v866_v32, %v4648_v26 }
 0x23e   :  { %7154 = vst [vmem:[#allocation44_spill] sm:$0xff] %v4922_v11  ;;  %7155 = vst [vmem:[#allocation45_spill] sm:$0xff] %v4935_v3  ;;  %v1691_v11 = vadd.f32 %v4703_v43, %v4671_v9  ;;  %v1815_v60 = vmul.f32 0.7978846, %v1687_v28  ;;  %v1693_v9 = vadd.f32 %v4718_v42, %v4674_v1  ;;  %v4956_v43 = vpop.f32.mrb[23].mxu0  ;;  %v4958_v3 = vpop.f32.mrb[23].mxu1  ;;  %v4964_v25 = vadd.f32 %v1059_v52, %v4650_v55 }
 0x23f   :  { %7156 = vst [vmem:[#allocation46_spill] sm:$0xff] %v4949_v51  ;;  %v1817_v49 = vmul.f32 0.7978846, %v1689_v29  ;;  %7157 = vst [vmem:[#allocation47_spill] sm:$0xff] %v4961_v35  ;;  %v1465_v31 = vmul.f32 %v1337_v10, %v4913_v63  ;;  %v2070_v51 = vadd.f32 1.0, %v4767_v7  ;;  %v2072_v52 = vadd.f32 1.0, %v4777_v48 }
 0x240   :  { %v1819_v33 = vmul.f32 0.7978846, %v1691_v11  ;;  %7158 = vst [vmem:[#allocation48_spill] sm:$0xff] %v4964_v25  ;;  %3682 = vtanh.f32 %v1815_v60  ;;  %v1821_v28 = vmul.f32 0.7978846, %v1693_v9  ;;  %v2074_v11 = vadd.f32 1.0, %v4797_v18 }
 0x241   :  { %v1338_v1 = vmul.f32 0.044715, %v4961_v35  ;;  %v1340_v42 = vmul.f32 0.044715, %v4964_v25  ;;  %v4972_v32 = vmul.f32 %v2070_v51, %v4664_v34  ;;  %v2076_v29 = vadd.f32 1.0, %v4821_v17 }
 0x242   :  { %3684 = vtanh.f32 %v1819_v33  ;;  %v4979_v33 = vmul.f32 %v2074_v11, %v4680_v41  ;;  %v4981_v60 = vpop.f32.mrb[24].mxu0  ;;  %v4983_v9 = vpop.f32.mrb[24].mxu1  ;;  %v4986_v18 = vmul.f32 %v2072_v52, %v4676_v16  ;;  %v4993_v17 = vadd.f32 %v4883_v6, %v4652_v12 }
 0x243   :  { %3686 = vtanh.f32 %v1817_v49  ;;  %v1466_v10 = vmul.f32 %v1338_v1, %v4961_v35  ;;  %v1468_v7 = vmul.f32 %v1340_v42, %v4964_v25  ;;  %v4989_v34 = vmul.f32 %v2076_v29, %v4685_v58  ;;  %v4999_v41 = vpop.f32.mrb[25].mxu0  ;;  %v5001_v51 = vpop.f32.mrb[25].mxu1 }
 0x244   :  { %3688 = vtanh.f32 %v1821_v28  ;;  %7159 = vst [vmem:[#allocation49_spill] sm:$0xff] %v4993_v17  ;;  %v4997_v48 = vadd.f32 %v4885_v24, %v4654_v0  ;;  %v5004_v49 = vmul.f32 %v1465_v31, %v4913_v63  ;;  %v5012_v6 = vadd.f32 %v872_v21, %v4648_v26  ;;  %v5014_v28 = vpop.f32.mrb[26].mxu0  ;;  %v5016_v24 = vpop.f32.mrb[26].mxu1 }
 0x245   :  { %v5007_v16 = vmul.f32 %v1466_v10, %v4961_v35  ;;  %v1339_v42 = vmul.f32 0.044715, %v4993_v17  ;;  %v5023_v11 = vadd.f32 %v1065_v36, %v4650_v55  ;;  %v5025_v52 = vpop.f32.mrb[27].mxu0  ;;  %v5027_v29 = vpop.f32.mrb[27].mxu1  ;;  %v5030_v21 = vmul.f32 %v1468_v7, %v4964_v25 }
 0x246   :  { %7160 = vst [vmem:[#allocation50_spill] sm:$0xff] %v4997_v48  ;;  %7161 = vst [vmem:[#allocation51_spill] sm:$0xff] %v5004_v49  ;;  %v1341_v31 = vmul.f32 0.044715, %v4997_v48  ;;  %v1342_v10 = vmul.f32 0.044715, %v5012_v6  ;;  %v5034_v58 = vadd.f32 %v874_v54, %v4652_v12  ;;  %v5037_v1 = vadd.f32 %v1067_v40, %v4654_v0 }
 0x247   :  { %7162 = vst [vmem:[#allocation52_spill] sm:$0xff] %v5007_v16  ;;  %7163 = vst [vmem:[#allocation53_spill] sm:$0xff] %v5012_v6  ;;  %v1467_v16 = vmul.f32 %v1339_v42, %v4993_v17  ;;  %v1344_v35 = vmul.f32 0.044715, %v5023_v11  ;;  %v5043_v49 = vmul.f32 0.5, %v4706_v22  ;;  %v1695_v54 = vadd.f32 %v4752_v19, %v4706_v22 }
 0x248   :  { %7164 = vst [vmem:[#allocation54_spill] sm:$0xff] %v5023_v11  ;;  %7165 = vst [vmem:[#allocation55_spill] sm:$0xff] %v5030_v21  ;;  %v1469_v36 = vmul.f32 %v1341_v31, %v4997_v48  ;;  %v1470_v7 = vmul.f32 %v1342_v10, %v5012_v6  ;;  %v1343_v21 = vmul.f32 0.044715, %v5034_v58  ;;  %v1345_v25 = vmul.f32 0.044715, %v5037_v1 }
 0x249   :  { %v5051_v63 = vmul.f32 %v1467_v16, %v4993_v17  ;;  %v1472_v42 = vmul.f32 %v1344_v35, %v5023_v11  ;;  %v5055_v31 = vmul.f32 0.5, %v4734_v14  ;;  %v1699_v50 = vadd.f32 %v4783_v27, %v4734_v14 }
 0x24a   :  { %v3683_v40 = vpop.eup %3682  ;;  %v5060_v15 = vmul.f32 %v1469_v36, %v4997_v48  ;;  %v1471_v53 = vmul.f32 %v1343_v21, %v5034_v58  ;;  %v1473_v22 = vmul.f32 %v1345_v25, %v5037_v1  ;;  %v5064_v19 = vpop.f32.mrb[28].mxu0  ;;  %v5069_v17 = vmul.f32 %v1470_v7, %v5012_v6 }
 0x24b   :  { %7166 = vst [vmem:[#allocation56_spill] sm:$0xff] %v5051_v63  ;;  %v2071_v5 = vadd.f32 1.0, %v3683_v40  ;;  %v5066_v16 = vpop.f32.mrb[28].mxu1  ;;  %v1823_v46 = vmul.f32 0.7978846, %v1695_v54  ;;  %v5071_v27 = vpop.f32.mrb[29].mxu0  ;;  %v5075_v21 = vmul.f32 %v1472_v42, %v5023_v11  ;;  %v1697_v42 = vadd.f32 %v4755_v59, %v4712_v38 }
 0x24c   :  { %v3685_v10 = vpop.eup %3684  ;;  %7167 = vst [vmem:[#allocation57_spill] sm:$0xff] %v5060_v15  ;;  %7168 = vst [vmem:[#allocation58_spill] sm:$0xff] %v5069_v17  ;;  %v1827_v14 = vmul.f32 0.7978846, %v1699_v50  ;;  %v5078_v25 = vmul.f32 %v1471_v53, %v5034_v58  ;;  %v5080_v48 = vpop.f32.mrb[29].mxu1  ;;  %v5086_v50 = vmul.f32 %v1473_v22, %v5037_v1  ;;  %v5094_v53 = vmul.f32 0.5, %v4712_v38 }
 0x24d   :  { %v3687_v35 = vpop.eup %3686  ;;  %v2075_v63 = vadd.f32 1.0, %v3685_v10  ;;  %v2199_v36 = vmul.f32 %v2071_v5, %v4925_v20  ;;  %7169 = vst [vmem:[#allocation59_spill] sm:$0xff] %v5075_v21  ;;  %v5082_v10 = vpop.f32.mrb[30].mxu0  ;;  %3690 = vtanh.f32 %v1823_v46  ;;  %v1701_v46 = vadd.f32 %v4786_v8, %v4737_v57 }
 0x24e   :  { %v3689_v40 = vpop.eup %3688  ;;  %v2073_v15 = vadd.f32 1.0, %v3687_v35  ;;  %7170 = vst [vmem:[#allocation60_spill] sm:$0xff] %v5086_v50  ;;  %v5088_v17 = vpop.f32.mrb[30].mxu1  ;;  %3692 = vtanh.f32 %v1827_v14  ;;  %v5105_v22 = vadd.f32 %v4944_v62, %v4648_v26  ;;  %v5112_v14 = vadd.f32 %v4946_v44, %v4650_v55 }
 0x24f   :  { %v2203_v7 = vmul.f32 %v2075_v63, %v4930_v37  ;;  %v2077_v54 = vadd.f32 1.0, %v3689_v40  ;;  %v5090_v5 = vpop.f32.mrb[31].mxu0  ;;  %v5098_v35 = vpop.f32.mrb[31].mxu1  ;;  %v5115_v38 = vmul.f32 0.5, %v4691_v56  ;;  %v1694_v62 = vadd.f32 %v4721_v45, %v4691_v56 }
 0x250   :  { %v2201_v20 = vmul.f32 %v2073_v15, %v4940_v30  ;;  %7171 = vst [vmem:[#allocation61_spill] sm:$0xff] %v5105_v22  ;;  %v5108_v30 = vmul.f32 0.5, %v4737_v57  ;;  %v1825_v15 = vmul.f32 0.7978846, %v1697_v42  ;;  %7172 = vst [vmem:[#allocation62_spill] sm:$0xff] %v5112_v14  ;;  %v7173_v57 = vpack.c.bf16 %v4979_v33, %v4972_v32 }
 0x251   :  { %v2359_v63 = vpack.c.bf16 %v2203_v7, %v2199_v36  ;;  %v2205_v37 = vmul.f32 %v2077_v54, %v4952_v61  ;;  %v1829_v61 = vmul.f32 0.7978846, %v1701_v46  ;;  %v1346_v8 = vmul.f32 0.044715, %v5105_v22 }
 0x252   :  { %3694 = vtanh.f32 %v1825_v15  ;;  %v1348_v40 = vmul.f32 0.044715, %v5112_v14  ;;  %v5125_v44 = vmul.f32 0.5, %v4715_v39  ;;  %v1698_v36 = vadd.f32 %v4762_v4, %v4715_v39  ;;  %v5129_v7 = vpop.f32.mrb[32].mxu0  ;;  %v5131_v54 = vpop.f32.mrb[32].mxu1 }
 0x253   :  { %2710 = vmatprep.mubr.bf16.mxu0 %v2359_v63  ;;  %v2361_v59 = vpack.c.bf16 %v2205_v37, %v2201_v20  ;;  %3696 = vtanh.f32 %v1829_v61  ;;  %v1474_v56 = vmul.f32 %v1346_v8, %v5105_v22  ;;  %v1822_v45 = vmul.f32 0.7978846, %v1694_v62  ;;  %v5137_v33 = vpop.f32.mrb[33].mxu0  ;;  %v5139_v20 = vpop.f32.mrb[33].mxu1  ;;  %v7175_v37 = vld [vmem:[#allocation13_spill] sm:$0xff] }
 0x254   :  { %2711 = vmatmul.mubr.bf16.vlgmr.msra.gmra.mrb[64].mxu0 %v7173_v57  ;;  %v5135_v32 = vmul.f32 0.5, %v4694_v2  ;;  %v7174_v42 = vpack.c.bf16 %v4989_v34, %v4986_v18  ;;  %v1826_v39 = vmul.f32 0.7978846, %v1698_v36  ;;  %v5145_v4 = vmul.f32 0.5, %v4724_v47  ;;  %v5151_v15 = vpop.f32.mrb[34].mxu0 }
 0x255   :  { %2871 = vmatprep.mubr.bf16.mxu1 %v2361_v59  ;;  %v1696_v63 = vadd.f32 %v4727_v13, %v4694_v2  ;;  %v1700_v46 = vadd.f32 %v7175_v37, %v4724_v47  ;;  %v5153_v59 = vpop.f32.mrb[34].mxu1  ;;  %v1476_v61 = vmul.f32 %v1348_v40, %v5112_v14  ;;  %3698 = vtanh.f32 %v1822_v45  ;;  %v5164_v8 = vpop.f32.mrb[35].mxu0 }
 0x256   :  { %2872 = vmatmul.mubr.bf16.vlgmr.msra.gmra.mrb[64].mxu1 %v7174_v42  ;;  %v5158_v18 = vadd.f32 %v4956_v43, %v4652_v12  ;;  %v5162_v34 = vadd.f32 %v4958_v3, %v4654_v0  ;;  %v5166_v2 = vpop.f32.mrb[35].mxu1  ;;  %v5169_v47 = vmul.f32 %v1474_v56, %v5105_v22  ;;  %3700 = vtanh.f32 %v1826_v39  ;;  %v7183_v22 = vld [vmem:[#allocation10_spill] sm:$0xff] }
 0x257   :  { %v1824_v13 = vmul.f32 0.7978846, %v1696_v63  ;;  %v1828_v62 = vmul.f32 0.7978846, %v1700_v46  ;;  %v3691_v57 = vpop.eup %3690  ;;  %v5175_v36 = vadd.f32 %v4981_v60, %v4648_v26  ;;  %v5179_v3 = vadd.f32 %v4983_v9, %v4650_v55 }
 0x258   :  { %7176 = vst [vmem:[#allocation13_spill] sm:$0xff] %v5162_v34  ;;  %7177 = vst [vmem:[#allocation63_spill] sm:$0xff] %v5169_v47  ;;  %v1347_v40 = vmul.f32 0.044715, %v5158_v18  ;;  %v1349_v43 = vmul.f32 0.044715, %v5162_v34  ;;  %v3693_v45 = vpop.eup %3692  ;;  %v5183_v56 = vadd.f32 %v4999_v41, %v4652_v12  ;;  %v5187_v39 = vadd.f32 %v5001_v51, %v4654_v0 }
 0x259   :  { %7178 = vst [vmem:[#allocation64_spill] sm:$0xff] %v5175_v36  ;;  %7179 = vst [vmem:[#allocation65_spill] sm:$0xff] %v5179_v3  ;;  %v2079_v42 = vadd.f32 1.0, %v3691_v57  ;;  %3702 = vtanh.f32 %v1824_v13  ;;  %v2083_v63 = vadd.f32 1.0, %v3693_v45  ;;  %v5192_v9 = vmul.f32 %v1476_v61, %v5112_v14 }
 0x25a   :  { %7180 = vst [vmem:[#allocation66_spill] sm:$0xff] %v5183_v56  ;;  %3704 = vtanh.f32 %v1828_v62  ;;  %v1475_v60 = vmul.f32 %v1347_v40, %v5158_v18  ;;  %v1477_v37 = vmul.f32 %v1349_v43, %v5162_v34  ;;  %v1350_v46 = vmul.f32 0.044715, %v5175_v36  ;;  %v5203_v40 = vpop.f32.mrb[36].mxu0  ;;  %v5205_v43 = vpop.f32.mrb[36].mxu1 }
 0x25b   :  { %7181 = vst [vmem:[#allocation67_spill] sm:$0xff] %v5192_v9  ;;  %v1352_v13 = vmul.f32 0.044715, %v5179_v3  ;;  %v1351_v41 = vmul.f32 0.044715, %v5183_v56  ;;  %v2207_v57 = vmul.f32 %v2079_v42, %v5043_v49  ;;  %v2211_v51 = vmul.f32 %v2083_v63, %v5055_v31  ;;  %v5213_v31 = vpop.f32.mrb[37].mxu0 }
 0x25c   :  { %v5200_v45 = vmul.f32 %v1475_v60, %v5158_v18  ;;  %v1353_v62 = vmul.f32 0.044715, %v5187_v39  ;;  %v3695_v61 = vpop.eup %3694  ;;  %v5208_v9 = vmul.f32 %v1477_v37, %v5162_v34  ;;  %v1478_v14 = vmul.f32 %v1350_v46, %v5175_v36  ;;  %v5215_v42 = vpop.f32.mrb[37].mxu1  ;;  %v7188_v34 = vld [vmem:[#allocation16_spill] sm:$0xff] }
 0x25d   :  { %v1480_v21 = vmul.f32 %v1352_v13, %v5179_v3  ;;  %v1479_v49 = vmul.f32 %v1351_v41, %v5183_v56  ;;  %v3697_v63 = vpop.eup %3696  ;;  %v2363_v60 = vpack.c.bf16 %v2211_v51, %v2207_v57  ;;  %v2081_v11 = vadd.f32 1.0, %v3695_v61  ;;  %v5221_v37 = vpop.f32.mrb[38].mxu0 }
 0x25e   :  { %7182 = vst [vmem:[#allocation68_spill] sm:$0xff] %v5208_v9  ;;  %v1481_v47 = vmul.f32 %v1353_v62, %v5187_v39  ;;  %v5219_v6 = vmul.f32 0.5, %v7183_v22  ;;  %7184 = vst [vmem:[#allocation10_spill] sm:$0xff] %v5221_v37  ;;  %v5223_v9 = vpop.f32.mrb[38].mxu1  ;;  %v2085_v46 = vadd.f32 1.0, %v3697_v63  ;;  %v5226_v13 = vmul.f32 %v1478_v14, %v5175_v36  ;;  %v5234_v57 = vpop.f32.mrb[39].mxu0 }
 0x25f   :  { %7185 = vst [vmem:[#allocation69_spill] sm:$0xff] %v5223_v9  ;;  %v5229_v41 = vmul.f32 %v1480_v21, %v5179_v3  ;;  %v5232_v50 = vmul.f32 0.5, %v7188_v34  ;;  %7189 = vst [vmem:[#allocation16_spill] sm:$0xff] %v5234_v57  ;;  %v5236_v51 = vpop.f32.mrb[39].mxu1  ;;  %v3699_v62 = vpop.eup %3698  ;;  %2718 = vmatprep.mubr.bf16.mxu0 %v2363_v60  ;;  %v2209_v61 = vmul.f32 %v2081_v11, %v5094_v53  ;;  %v7192_v14 = vld [vmem:[#allocation21_spill] sm:$0xff]  ;;  %v7193_v21 = vld [vmem:[#allocation27_spill] sm:$0xff] }
 0x260   :  { %7186 = vst [vmem:[#allocation70_spill] sm:$0xff] %v5226_v13  ;;  %7190 = vst [vmem:[#allocation72_spill] sm:$0xff] %v5236_v51  ;;  %v5240_v9 = vmul.f32 %v1479_v49, %v5183_v56  ;;  %v1703_v63 = vadd.f32 %v7192_v14, %v7183_v22  ;;  %v3701_v3 = vpop.eup %3700  ;;  %v2213_v13 = vmul.f32 %v2085_v46, %v5108_v30  ;;  %v2078_v36 = vadd.f32 1.0, %v3699_v62  ;;  %v7194_v51 = vld [vmem:[#allocation11_spill] sm:$0xff]  ;;  %v7197_v37 = vld [vmem:[#allocation28_spill] sm:$0xff] }
 0x261   :  { %7187 = vst [vmem:[#allocation71_spill] sm:$0xff] %v5229_v41  ;;  %v1707_v41 = vadd.f32 %v7193_v21, %v7188_v34  ;;  %v5248_v57 = vmul.f32 %v1481_v47, %v5187_v39  ;;  %v5251_v60 = vmul.f32 0.5, %v7194_v51  ;;  %v2082_v11 = vadd.f32 1.0, %v3701_v3  ;;  %v7196_v21 = vld [vmem:[#allocation17_spill] sm:$0xff] }
 0x262   :  { %7191 = vst [vmem:[#allocation73_spill] sm:$0xff] %v5240_v9  ;;  %v1831_v53 = vmul.f32 0.7978846, %v1703_v63  ;;  %v7195_v9 = vld [vmem:[#allocation22_spill] sm:$0xff]  ;;  %v2365_v14 = vpack.c.bf16 %v2213_v13, %v2209_v61  ;;  %v2206_v34 = vmul.f32 %v2078_v36, %v5115_v38  ;;  %v1709_v30 = vadd.f32 %v7197_v37, %v7196_v21  ;;  %v7198_v61 = vld [vmem:[#allocation8_spill] sm:$0xff] }
 0x263   :  { %v1835_v49 = vmul.f32 0.7978846, %v1707_v41  ;;  %v1705_v56 = vadd.f32 %v7195_v9, %v7194_v51  ;;  %v3703_v22 = vpop.eup %3702  ;;  %v5260_v47 = vadd.f32 %v5014_v28, %v4648_v26  ;;  %v2210_v62 = vmul.f32 %v2082_v11, %v5125_v44 }
 0x264   :  { %v3705_v46 = vpop.eup %3704  ;;  %v2080_v3 = vadd.f32 1.0, %v3703_v22  ;;  %3706 = vtanh.f32 %v1831_v53  ;;  %2879 = vmatprep.mubr.bf16.mxu1 %v2365_v14  ;;  %v1837_v9 = vmul.f32 0.7978846, %v1709_v30  ;;  %v1197_v36 = vmul.f32 0.5, %v7196_v21  ;;  %v7199_v53 = vld [vmem:[#allocation15_spill] sm:$0xff]  ;;  %v7200_v22 = vld [vmem:[#allocation12_spill] sm:$0xff] }
 0x265   :  { %v1833_v41 = vmul.f32 0.7978846, %v1705_v56  ;;  %v2084_v63 = vadd.f32 1.0, %v3705_v46  ;;  %3708 = vtanh.f32 %v1835_v49  ;;  %v1354_v13 = vmul.f32 0.044715, %v5260_v47  ;;  %v7201_v14 = vld [vmem:[#allocation23_spill] sm:$0xff] }
 0x266   :  { %v2362_v38 = vpack.c.bf16 %v2210_v62, %v2206_v34  ;;  %v5267_v28 = vadd.f32 %v5016_v24, %v4650_v55  ;;  %v2208_v37 = vmul.f32 %v2080_v3, %v5135_v32  ;;  %v5274_v11 = vmul.f32 0.5, %v7198_v61  ;;  %v7203_v21 = vld [vmem:[#allocation9_spill] sm:$0xff]  ;;  %v7204_v3 = vld [vmem:[#allocation14_spill] sm:$0xff] }
 0x267   :  { %3710 = vtanh.f32 %v1833_v41  ;;  %v2212_v44 = vmul.f32 %v2084_v63, %v5145_v4  ;;  %v1482_v56 = vmul.f32 %v1354_v13, %v5260_v47  ;;  %v1702_v49 = vadd.f32 %v7199_v53, %v7198_v61  ;;  %v7205_v63 = vld [vmem:[#allocation19_spill] sm:$0xff]  ;;  %v7206_v13 = vld [vmem:[#allocation26_spill] sm:$0xff] }
 0x268   :  { %3712 = vtanh.f32 %v1837_v9  ;;  %2719 = vmatmul.mubr.bf16.gmra.mrb[68].mxu0 %v2362_v38  ;;  %v1356_v51 = vmul.f32 0.044715, %v5267_v28  ;;  %v1706_v24 = vadd.f32 %v7201_v14, %v7200_v22  ;;  %v5284_v4 = vmul.f32 0.5, %v7200_v22 }
 0x269   :  { %v2364_v34 = vpack.c.bf16 %v2212_v44, %v2208_v37  ;;  %v5281_v32 = vmul.f32 %v1482_v56, %v5260_v47  ;;  %v5287_v30 = vmul.f32 0.5, %v7203_v21  ;;  %v1830_v46 = vmul.f32 0.7978846, %v1702_v49 }
 0x26a   :  { %v1834_v62 = vmul.f32 0.7978846, %v1706_v24  ;;  %v5290_v41 = vmul.f32 0.5, %v7204_v3  ;;  %v1704_v9 = vadd.f32 %v7205_v63, %v7203_v21  ;;  %v1708_v38 = vadd.f32 %v7206_v13, %v7204_v3 }
 0x26b   :  { %7202 = vst [vmem:[#allocation21_spill] sm:$0xff] %v5281_v32  ;;  %2880 = vmatmul.mubr.bf16.gmra.mrb[68].mxu1 %v2364_v34  ;;  %v5298_v37 = vadd.f32 %v5025_v52, %v4652_v12  ;;  %v5302_v44 = vadd.f32 %v5027_v29, %v4654_v0  ;;  %v5306_v56 = vadd.f32 %v5064_v19, %v4648_v26  ;;  %3714 = vtanh.f32 %v1830_v46 }
 0x26c   :  { %v1484_v61 = vmul.f32 %v1356_v51, %v5267_v28  ;;  %v1832_v53 = vmul.f32 0.7978846, %v1704_v9  ;;  %v5311_v49 = vadd.f32 %v5066_v16, %v4650_v55  ;;  %3716 = vtanh.f32 %v1834_v62 }
 0x26d   :  { %7207 = vst [vmem:[#allocation27_spill] sm:$0xff] %v5306_v56  ;;  %v1836_v22 = vmul.f32 0.7978846, %v1708_v38  ;;  %v1355_v52 = vmul.f32 0.044715, %v5298_v37  ;;  %v5319_v51 = vadd.f32 %v5071_v27, %v4652_v12 }
 0x26e   :  { %7208 = vst [vmem:[#allocation11_spill] sm:$0xff] %v5311_v49  ;;  %v1357_v14 = vmul.f32 0.044715, %v5302_v44  ;;  %v3707_v29 = vpop.eup %3706  ;;  %3718 = vtanh.f32 %v1832_v53  ;;  %v1358_v24 = vmul.f32 0.044715, %v5306_v56  ;;  %v5328_v32 = vmul.f32 %v1484_v61, %v5267_v28 }
 0x26f   :  { %v1360_v19 = vmul.f32 0.044715, %v5311_v49  ;;  %7209 = vst [vmem:[#allocation22_spill] sm:$0xff] %v5319_v51  ;;  %v3709_v34 = vpop.eup %3708  ;;  %v2087_v21 = vadd.f32 1.0, %v3707_v29  ;;  %3720 = vtanh.f32 %v1836_v22  ;;  %v1483_v16 = vmul.f32 %v1355_v52, %v5298_v37 }
 0x270   :  { %v1485_v46 = vmul.f32 %v1357_v14, %v5302_v44  ;;  %v2091_v3 = vadd.f32 1.0, %v3709_v34  ;;  %v1486_v63 = vmul.f32 %v1358_v24, %v5306_v56  ;;  %v1359_v13 = vmul.f32 0.044715, %v5319_v51 }
 0x271   :  { %v3711_v62 = vpop.eup %3710  ;;  %v1488_v9 = vmul.f32 %v1360_v19, %v5311_v49  ;;  %v2215_v53 = vmul.f32 %v2087_v21, %v5219_v6  ;;  %v5331_v22 = vmul.f32 %v1483_v16, %v5298_v37  ;;  %v5347_v34 = vadd.f32 %v5080_v48, %v4654_v0 }
 0x272   :  { %v3713_v38 = vpop.eup %3712  ;;  %v2089_v27 = vadd.f32 1.0, %v3711_v62  ;;  %v2219_v52 = vmul.f32 %v2091_v3, %v5232_v50  ;;  %v5335_v29 = vmul.f32 %v1485_v46, %v5302_v44  ;;  %v5338_v24 = vmul.f32 %v1486_v63, %v5306_v56  ;;  %v7212_v46 = vld [vmem:[#allocation36_spill] sm:$0xff]  ;;  %v7214_v63 = vld [vmem:[#allocation31_spill] sm:$0xff] }
 0x273   :  { %v2093_v14 = vadd.f32 1.0, %v3713_v38  ;;  %v5342_v6 = vmul.f32 %v1488_v9, %v5311_v49  ;;  %v1487_v61 = vmul.f32 %v1359_v13, %v5319_v51  ;;  %v5350_v16 = vmul.f32 0.5, %v4831_v23  ;;  %v7215_v13 = vld [vmem:[#allocation42_spill] sm:$0xff]  ;;  %v7219_v56 = vld [vmem:[#allocation43_spill] sm:$0xff] }
 0x274   :  { %7210 = vst [vmem:[#allocation17_spill] sm:$0xff] %v5338_v24  ;;  %v2217_v19 = vmul.f32 %v2089_v27, %v5251_v60  ;;  %v2367_v21 = vpack.c.bf16 %v2219_v52, %v2215_v53  ;;  %v1711_v62 = vadd.f32 %v7212_v46, %v4831_v23  ;;  %v1361_v60 = vmul.f32 0.044715, %v5347_v34  ;;  %v7216_v27 = vld [vmem:[#allocation24_spill] sm:$0xff]  ;;  %v7217_v23 = vld [vmem:[#allocation37_spill] sm:$0xff] }
 0x275   :  { %7211 = vst [vmem:[#allocation28_spill] sm:$0xff] %v5342_v6  ;;  %v2221_v50 = vmul.f32 %v2093_v14, %v1197_v36  ;;  %v5355_v3 = vmul.f32 %v1487_v61, %v5319_v51  ;;  %v5359_v9 = vmul.f32 0.5, %v7214_v63  ;;  %v1715_v48 = vadd.f32 %v7215_v13, %v7214_v63  ;;  %v3715_v38 = vpop.eup %3714  ;;  %v7218_v24 = vld [vmem:[#allocation32_spill] sm:$0xff] }
 0x276   :  { %2726 = vmatprep.mubr.bf16.mxu0 %v2367_v21  ;;  %v1839_v53 = vmul.f32 0.7978846, %v1711_v62  ;;  %v5364_v52 = vmul.f32 0.5, %v7216_v27  ;;  %v1713_v14 = vadd.f32 %v7217_v23, %v7216_v27  ;;  %v3717_v61 = vpop.eup %3716  ;;  %v2086_v46 = vadd.f32 1.0, %v3715_v38  ;;  %v7223_v23 = vld [vmem:[#allocation25_spill] sm:$0xff] }
 0x277   :  { %7213 = vst [vmem:[#allocation8_spill] sm:$0xff] %v5355_v3  ;;  %v2369_v36 = vpack.c.bf16 %v2221_v50, %v2217_v19  ;;  %v1489_v6 = vmul.f32 %v1361_v60, %v5347_v34  ;;  %v1843_v49 = vmul.f32 0.7978846, %v1715_v48  ;;  %v1717_v3 = vadd.f32 %v7219_v56, %v7218_v24 }
 0x278   :  { %v3719_v51 = vpop.eup %3718  ;;  %v2090_v63 = vadd.f32 1.0, %v3717_v61  ;;  %3722 = vtanh.f32 %v1839_v53  ;;  %v1841_v19 = vmul.f32 0.7978846, %v1713_v14  ;;  %v5373_v21 = vadd.f32 %v5082_v10, %v4648_v26  ;;  %v7224_v14 = vld [vmem:[#allocation39_spill] sm:$0xff] }
 0x279   :  { %2887 = vmatprep.mubr.bf16.mxu1 %v2369_v36  ;;  %v3721_v50 = vpop.eup %3720  ;;  %v2214_v62 = vmul.f32 %v2086_v46, %v5274_v11  ;;  %v2088_v13 = vadd.f32 1.0, %v3719_v51  ;;  %3724 = vtanh.f32 %v1843_v49  ;;  %v5377_v60 = vmul.f32 0.5, %v7218_v24  ;;  %v7221_v24 = vld [vmem:[#allocation18_spill] sm:$0xff] }
 0x27a   :  { %v2218_v48 = vmul.f32 %v2090_v63, %v5284_v4  ;;  %v2092_v56 = vadd.f32 1.0, %v3721_v50  ;;  %v1845_v38 = vmul.f32 0.7978846, %v1717_v3  ;;  %3726 = vtanh.f32 %v1841_v19  ;;  %v7226_v19 = vld [vmem:[#allocation34_spill] sm:$0xff] }
 0x27b   :  { %v2216_v36 = vmul.f32 %v2088_v13, %v5287_v30  ;;  %v5382_v53 = vmul.f32 %v1489_v6, %v5347_v34  ;;  %v1362_v10 = vmul.f32 0.044715, %v5373_v21  ;;  %v5387_v11 = vadd.f32 %v5088_v17, %v4650_v55  ;;  %v7222_v6 = vld [vmem:[#allocation30_spill] sm:$0xff] }
 0x27c   :  { %v2366_v49 = vpack.c.bf16 %v2218_v48, %v2214_v62  ;;  %v2220_v51 = vmul.f32 %v2092_v56, %v5290_v41  ;;  %3728 = vtanh.f32 %v1845_v38  ;;  %v5391_v4 = vmul.f32 0.5, %v7221_v24  ;;  %v7225_v41 = vld [vmem:[#allocation20_spill] sm:$0xff]  ;;  %v7228_v56 = vld [vmem:[#allocation29_spill] sm:$0xff] }
 0x27d   :  { %7220 = vst [vmem:[#allocation15_spill] sm:$0xff] %v5387_v11  ;;  %v1490_v3 = vmul.f32 %v1362_v10, %v5373_v21  ;;  %v1364_v30 = vmul.f32 0.044715, %v5387_v11  ;;  %v1710_v27 = vadd.f32 %v7222_v6, %v7221_v24  ;;  %v1714_v61 = vadd.f32 %v7224_v14, %v7223_v23 }
 0x27e   :  { %2727 = vmatmul.mubr.bf16.gmra.mrb[72].mxu0 %v2366_v49  ;;  %v2368_v17 = vpack.c.bf16 %v2220_v51, %v2216_v36  ;;  %v5400_v46 = vmul.f32 0.5, %v7223_v23  ;;  %v5403_v63 = vmul.f32 0.5, %v7225_v41  ;;  %v1712_v50 = vadd.f32 %v7226_v19, %v7225_v41  ;;  %v7229_v36 = vld [vmem:[#allocation40_spill] sm:$0xff] }
 0x27f   :  { %v5408_v62 = vmul.f32 %v1490_v3, %v5373_v21  ;;  %v1838_v13 = vmul.f32 0.7978846, %v1710_v27  ;;  %v1842_v48 = vmul.f32 0.7978846, %v1714_v61  ;;  %v5411_v38 = vmul.f32 0.5, %v7228_v56 }
 0x280   :  { %2888 = vmatmul.mubr.bf16.gmra.mrb[72].mxu1 %v2368_v17  ;;  %v1716_v10 = vadd.f32 %v7229_v36, %v7228_v56  ;;  %v1840_v49 = vmul.f32 0.7978846, %v1712_v50  ;;  %v5417_v51 = vadd.f32 %v5090_v5, %v4652_v12  ;;  %v5421_v24 = vadd.f32 %v5098_v35, %v4654_v0 }
 0x281   :  { %7227 = vst [vmem:[#allocation12_spill] sm:$0xff] %v5408_v62  ;;  %v1492_v3 = vmul.f32 %v1364_v30, %v5387_v11  ;;  %3730 = vtanh.f32 %v1838_v13  ;;  %v5426_v6 = vadd.f32 %v5129_v7, %v4648_v26  ;;  %v5430_v27 = vadd.f32 %v5131_v54, %v4650_v55 }
 0x282   :  { %v3723_v23 = vpop.eup %3722  ;;  %3732 = vtanh.f32 %v1842_v48  ;;  %v1844_v14 = vmul.f32 0.7978846, %v1716_v10  ;;  %v1363_v5 = vmul.f32 0.044715, %v5417_v51  ;;  %v1365_v61 = vmul.f32 0.044715, %v5421_v24 }
 0x283   :  { %7230 = vst [vmem:[#allocation23_spill] sm:$0xff] %v5426_v6  ;;  %7231 = vst [vmem:[#allocation9_spill] sm:$0xff] %v5430_v27  ;;  %v3725_v35 = vpop.eup %3724  ;;  %v2095_v17 = vadd.f32 1.0, %v3723_v23  ;;  %3734 = vtanh.f32 %v1840_v49  ;;  %v1366_v30 = vmul.f32 0.044715, %v5426_v6  ;;  %v5439_v48 = vmul.f32 %v1492_v3, %v5387_v11 }
 0x284   :  { %v1368_v41 = vmul.f32 0.044715, %v5430_v27  ;;  %v3727_v7 = vpop.eup %3726  ;;  %v2099_v19 = vadd.f32 1.0, %v3725_v35  ;;  %3736 = vtanh.f32 %v1844_v14  ;;  %v1491_v54 = vmul.f32 %v1363_v5, %v5417_v51 }
 0x285   :  { %v1493_v50 = vmul.f32 %v1365_v61, %v5421_v24  ;;  %v2097_v13 = vadd.f32 1.0, %v3727_v7  ;;  %7232 = vst [vmem:[#allocation14_spill] sm:$0xff] %v5439_v48  ;;  %v1494_v56 = vmul.f32 %v1366_v30, %v5426_v6  ;;  %v2223_v49 = vmul.f32 %v2095_v17, %v5350_v16  ;;  %v7235_v7 = vld [vmem:[#allocation38_spill] sm:$0xff] }
 0x286   :  { %v1496_v36 = vmul.f32 %v1368_v41, %v5430_v27  ;;  %v3729_v10 = vpop.eup %3728  ;;  %v2227_v23 = vmul.f32 %v2099_v19, %v5359_v9  ;;  %v5446_v35 = vmul.f32 %v1491_v54, %v5417_v51  ;;  %v5450_v14 = vadd.f32 %v5137_v33, %v4652_v12  ;;  %v7236_v19 = vld [vmem:[#allocation46_spill] sm:$0xff] }
 0x287   :  { %v2101_v5 = vadd.f32 1.0, %v3729_v10  ;;  %v2225_v3 = vmul.f32 %v2097_v13, %v5364_v52  ;;  %v5454_v61 = vmul.f32 %v1493_v50, %v5421_v24  ;;  %v5457_v30 = vmul.f32 %v1494_v56, %v5426_v6  ;;  %v7237_v50 = vld [vmem:[#allocation49_spill] sm:$0xff]  ;;  %v7238_v13 = vld [vmem:[#allocation56_spill] sm:$0xff] }
 0x288   :  { %v2371_v41 = vpack.c.bf16 %v2227_v23, %v2223_v49  ;;  %v5460_v16 = vmul.f32 %v1496_v36, %v5430_v27  ;;  %v1367_v9 = vmul.f32 0.044715, %v5450_v14  ;;  %v5465_v17 = vadd.f32 %v5139_v20, %v4654_v0  ;;  %v7239_v20 = vld [vmem:[#allocation41_spill] sm:$0xff] }
 0x289   :  { %7233 = vst [vmem:[#allocation19_spill] sm:$0xff] %v5457_v30  ;;  %v2229_v33 = vmul.f32 %v2101_v5, %v5377_v60  ;;  %v5469_v52 = vmul.f32 0.5, %v7235_v7  ;;  %v1719_v54 = vadd.f32 %v7236_v19, %v7235_v7  ;;  %v1723_v56 = vadd.f32 %v7238_v13, %v7237_v50  ;;  %v7240_v7 = vld [vmem:[#allocation51_spill] sm:$0xff] }
 0x28a   :  { %7234 = vst [vmem:[#allocation26_spill] sm:$0xff] %v5460_v16  ;;  %2734 = vmatprep.mubr.bf16.mxu0 %v2371_v41  ;;  %v1495_v36 = vmul.f32 %v1367_v9, %v5450_v14  ;;  %v1369_v10 = vmul.f32 0.044715, %v5465_v17  ;;  %v5478_v49 = vmul.f32 0.5, %v7237_v50  ;;  %v5481_v23 = vmul.f32 0.5, %v7239_v20  ;;  %v7241_v9 = vld [vmem:[#allocation50_spill] sm:$0xff] }
 0x28b   :  { %v3731_v60 = vpop.eup %3730  ;;  %v2373_v5 = vpack.c.bf16 %v2229_v33, %v2225_v3  ;;  %v1847_v16 = vmul.f32 0.7978846, %v1719_v54  ;;  %v1851_v27 = vmul.f32 0.7978846, %v1723_v56  ;;  %v1721_v19 = vadd.f32 %v7240_v7, %v7239_v20  ;;  %v7242_v50 = vld [vmem:[#allocation57_spill] sm:$0xff] }
 0x28c   :  { %v3733_v30 = vpop.eup %3732  ;;  %v2094_v13 = vadd.f32 1.0, %v3731_v60  ;;  %v1497_v41 = vmul.f32 %v1369_v10, %v5465_v17  ;;  %v5487_v6 = vmul.f32 0.5, %v7241_v9  ;;  %v1725_v48 = vadd.f32 %v7242_v50, %v7241_v9 }
 0x28d   :  { %v3735_v11 = vpop.eup %3734  ;;  %2895 = vmatprep.mubr.bf16.mxu1 %v2373_v5  ;;  %v2098_v62 = vadd.f32 1.0, %v3733_v30  ;;  %3738 = vtanh.f32 %v1847_v16  ;;  %v1849_v3 = vmul.f32 0.7978846, %v1721_v19  ;;  %v5493_v33 = vadd.f32 %v5151_v15, %v4648_v26  ;;  %v7245_v19 = vld [vmem:[#allocation47_spill] sm:$0xff] }
 0x28e   :  { %v3737_v54 = vpop.eup %3736  ;;  %v2222_v56 = vmul.f32 %v2094_v13, %v5391_v4  ;;  %v2096_v20 = vadd.f32 1.0, %v3735_v11  ;;  %v5497_v10 = vmul.f32 %v1495_v36, %v5450_v14  ;;  %3740 = vtanh.f32 %v1851_v27  ;;  %v7243_v27 = vld [vmem:[#allocation33_spill] sm:$0xff]  ;;  %v7246_v13 = vld [vmem:[#allocation52_spill] sm:$0xff] }
 0x28f   :  { %v2226_v60 = vmul.f32 %v2098_v62, %v5400_v46  ;;  %v2100_v7 = vadd.f32 1.0, %v3737_v54  ;;  %v1853_v9 = vmul.f32 0.7978846, %v1725_v48  ;;  %3742 = vtanh.f32 %v1849_v3  ;;  %v7244_v48 = vld [vmem:[#allocation44_spill] sm:$0xff]  ;;  %v7248_v54 = vld [vmem:[#allocation45_spill] sm:$0xff] }
 0x290   :  { %v2224_v30 = vmul.f32 %v2096_v20, %v5403_v63  ;;  %v5502_v16 = vmul.f32 %v1497_v41, %v5465_v17  ;;  %v1370_v15 = vmul.f32 0.044715, %v5493_v33  ;;  %v5507_v4 = vadd.f32 %v5153_v59, %v4650_v55 }
 0x291   :  { %v2370_v11 = vpack.c.bf16 %v2226_v60, %v2222_v56  ;;  %v2228_v36 = vmul.f32 %v2100_v7, %v5411_v38  ;;  %3744 = vtanh.f32 %v1853_v9  ;;  %v5511_v46 = vmul.f32 0.5, %v7243_v27  ;;  %v7247_v38 = vld [vmem:[#allocation35_spill] sm:$0xff]  ;;  %v7250_v9 = vld [vmem:[#allocation48_spill] sm:$0xff] }
 0x292   :  { %v1498_v62 = vmul.f32 %v1370_v15, %v5493_v33  ;;  %v1372_v63 = vmul.f32 0.044715, %v5507_v4  ;;  %v1718_v5 = vadd.f32 %v7244_v48, %v7243_v27  ;;  %v1722_v41 = vadd.f32 %v7246_v13, %v7245_v19 }
 0x293   :  { %2735 = vmatmul.mubr.bf16.gmra.mrb[76].mxu0 %v2370_v11  ;;  %v2372_v59 = vpack.c.bf16 %v2228_v36, %v2224_v30  ;;  %v5520_v50 = vmul.f32 0.5, %v7245_v19  ;;  %v5523_v3 = vmul.f32 0.5, %v7247_v38  ;;  %v1720_v56 = vadd.f32 %v7248_v54, %v7247_v38  ;;  %v7251_v30 = vld [vmem:[#allocation55_spill] sm:$0xff] }
 0x294   :  { %v5528_v20 = vmul.f32 %v1498_v62, %v5493_v33  ;;  %v1846_v60 = vmul.f32 0.7978846, %v1718_v5  ;;  %v1850_v7 = vmul.f32 0.7978846, %v1722_v41  ;;  %v5531_v15 = vmul.f32 0.5, %v7250_v9 }
 0x295   :  { %2896 = vmatmul.mubr.bf16.gmra.mrb[76].mxu1 %v2372_v59  ;;  %v1724_v11 = vadd.f32 %v7251_v30, %v7250_v9  ;;  %v1848_v36 = vmul.f32 0.7978846, %v1720_v56  ;;  %v5537_v27 = vadd.f32 %v5164_v8, %v4652_v12  ;;  %v5541_v48 = vadd.f32 %v5166_v2, %v4654_v0 }
 0x296   :  { %7249 = vst [vmem:[#allocation36_spill] sm:$0xff] %v5528_v20  ;;  %v1500_v62 = vmul.f32 %v1372_v63, %v5507_v4  ;;  %3746 = vtanh.f32 %v1846_v60  ;;  %v5546_v5 = vadd.f32 %v5203_v40, %v4648_v26  ;;  %v5550_v19 = vadd.f32 %v5205_v43, %v4650_v55 }
 0x297   :  { %v3739_v13 = vpop.eup %3738  ;;  %3748 = vtanh.f32 %v1850_v7  ;;  %v1852_v41 = vmul.f32 0.7978846, %v1724_v11  ;;  %v1371_v8 = vmul.f32 0.044715, %v5537_v27  ;;  %v1373_v59 = vmul.f32 0.044715, %v5541_v48 }
 0x298   :  { %7252 = vst [vmem:[#allocation31_spill] sm:$0xff] %v5550_v19  ;;  %v3741_v2 = vpop.eup %3740  ;;  %v2103_v38 = vadd.f32 1.0, %v3739_v13  ;;  %3750 = vtanh.f32 %v1848_v36  ;;  %v1374_v63 = vmul.f32 0.044715, %v5546_v5  ;;  %v1376_v54 = vmul.f32 0.044715, %v5550_v19 }
 0x299   :  { %v3743_v40 = vpop.eup %3742  ;;  %v2107_v56 = vadd.f32 1.0, %v3741_v2  ;;  %3752 = vtanh.f32 %v1852_v41  ;;  %v1499_v43 = vmul.f32 %v1371_v8, %v5537_v27  ;;  %v1501_v60 = vmul.f32 %v1373_v59, %v5541_v48 }
 0x29a   :  { %v2105_v7 = vadd.f32 1.0, %v3743_v40  ;;  %v5559_v9 = vmul.f32 %v1500_v62, %v5507_v4  ;;  %v1502_v30 = vmul.f32 %v1374_v63, %v5546_v5  ;;  %v1504_v11 = vmul.f32 %v1376_v54, %v5550_v19 }
 0x29b   :  { %v3745_v36 = vpop.eup %3744  ;;  %v2231_v13 = vmul.f32 %v2103_v38, %v5469_v52  ;;  %v2235_v20 = vmul.f32 %v2107_v56, %v5478_v49  ;;  %v5566_v2 = vmul.f32 %v1499_v43, %v5537_v27  ;;  %v5570_v41 = vadd.f32 %v5213_v31, %v4652_v12 }
 0x29c   :  { %v2109_v8 = vadd.f32 1.0, %v3745_v36  ;;  %v2233_v62 = vmul.f32 %v2105_v7, %v5481_v23  ;;  %v5574_v59 = vmul.f32 %v1501_v60, %v5541_v48  ;;  %v5577_v63 = vmul.f32 %v1502_v30, %v5546_v5 }
 0x29d   :  { %v2375_v54 = vpack.c.bf16 %v2235_v20, %v2231_v13  ;;  %v5580_v52 = vmul.f32 %v1504_v11, %v5550_v19  ;;  %v1375_v49 = vmul.f32 0.044715, %v5570_v41  ;;  %v5585_v38 = vadd.f32 %v5215_v42, %v4654_v0 }
 0x29e   :  { %7253 = vst [vmem:[#allocation42_spill] sm:$0xff] %v5577_v63  ;;  %v2237_v31 = vmul.f32 %v2109_v8, %v5487_v6  ;;  %v5589_v23 = vmul.f32 0.5, %v5034_v58  ;;  %v1727_v40 = vadd.f32 %v5078_v25, %v5034_v58  ;;  %v1731_v20 = vadd.f32 %v5200_v45, %v5158_v18  ;;  %v7255_v58 = vld [vmem:[#allocation60_spill] sm:$0xff]  ;;  %v7256_v8 = vld [vmem:[#allocation13_spill] sm:$0xff] }
 0x29f   :  { %7254 = vst [vmem:[#allocation24_spill] sm:$0xff] %v5580_v52  ;;  %2742 = vmatprep.mubr.bf16.mxu0 %v2375_v54  ;;  %v1503_v56 = vmul.f32 %v1375_v49, %v5570_v41  ;;  %v1377_v43 = vmul.f32 0.044715, %v5585_v38  ;;  %v5598_v60 = vmul.f32 0.5, %v5158_v18  ;;  %v5601_v42 = vmul.f32 0.5, %v5037_v1  ;;  %v7257_v18 = vld [vmem:[#allocation68_spill] sm:$0xff] }
 0x2a0   :  { %v3747_v6 = vpop.eup %3746  ;;  %v2377_v7 = vpack.c.bf16 %v2237_v31, %v2233_v62  ;;  %v1855_v30 = vmul.f32 0.7978846, %v1727_v40  ;;  %v1859_v11 = vmul.f32 0.7978846, %v1731_v20  ;;  %v1729_v25 = vadd.f32 %v7255_v58, %v5037_v1  ;;  %v7258_v31 = vld [vmem:[#allocation10_spill] sm:$0xff] }
 0x2a1   :  { %v3749_v36 = vpop.eup %3748  ;;  %v2102_v45 = vadd.f32 1.0, %v3747_v6  ;;  %v1505_v13 = vmul.f32 %v1377_v43, %v5585_v38  ;;  %v5607_v54 = vmul.f32 0.5, %v7256_v8  ;;  %v1733_v49 = vadd.f32 %v7257_v18, %v7256_v8 }
 0x2a2   :  { %v3751_v52 = vpop.eup %3750  ;;  %2903 = vmatprep.mubr.bf16.mxu1 %v2377_v7  ;;  %v2106_v19 = vadd.f32 1.0, %v3749_v36  ;;  %3754 = vtanh.f32 %v1855_v30  ;;  %v1857_v62 = vmul.f32 0.7978846, %v1729_v25  ;;  %v5613_v40 = vadd.f32 %v7258_v31, %v4648_v26  ;;  %v7260_v36 = vld [vmem:[#allocation69_spill] sm:$0xff] }
 0x2a3   :  { %v3753_v1 = vpop.eup %3752  ;;  %v2230_v20 = vmul.f32 %v2102_v45, %v5511_v46  ;;  %v2104_v6 = vadd.f32 1.0, %v3751_v52  ;;  %v5617_v43 = vmul.f32 %v1503_v56, %v5570_v41  ;;  %3756 = vtanh.f32 %v1859_v11  ;;  %v7261_v11 = vld [vmem:[#allocation53_spill] sm:$0xff]  ;;  %v7262_v45 = vld [vmem:[#allocation58_spill] sm:$0xff] }
 0x2a4   :  { %7259 = vst [vmem:[#allocation37_spill] sm:$0xff] %v5613_v40  ;;  %v2234_v58 = vmul.f32 %v2106_v19, %v5520_v50  ;;  %v2108_v8 = vadd.f32 1.0, %v3753_v1  ;;  %v1861_v18 = vmul.f32 0.7978846, %v1733_v49  ;;  %3758 = vtanh.f32 %v1857_v62  ;;  %v7263_v49 = vld [vmem:[#allocation61_spill] sm:$0xff]  ;;  %v7264_v62 = vld [vmem:[#allocation63_spill] sm:$0xff] }
 0x2a5   :  { %v2232_v7 = vmul.f32 %v2104_v6, %v5523_v3  ;;  %v5622_v30 = vmul.f32 %v1505_v13, %v5585_v38  ;;  %v1378_v25 = vmul.f32 0.044715, %v5613_v40  ;;  %v5627_v46 = vadd.f32 %v7260_v36, %v4650_v55  ;;  %v7271_v55 = vld [vmem:[#allocation72_spill] sm:$0xff] }
 0x2a6   :  { %v2374_v52 = vpack.c.bf16 %v2234_v58, %v2230_v20  ;;  %v2236_v56 = vmul.f32 %v2108_v8, %v5531_v15  ;;  %3760 = vtanh.f32 %v1861_v18  ;;  %v5631_v50 = vmul.f32 0.5, %v7261_v11  ;;  %v7265_v15 = vld [vmem:[#allocation54_spill] sm:$0xff]  ;;  %v7266_v58 = vld [vmem:[#allocation59_spill] sm:$0xff] }
 0x2a7   :  { %v1506_v19 = vmul.f32 %v1378_v25, %v5613_v40  ;;  %v1380_v3 = vmul.f32 0.044715, %v5627_v46  ;;  %v1726_v13 = vadd.f32 %v7262_v45, %v7261_v11  ;;  %v1730_v31 = vadd.f32 %v7264_v62, %v7263_v49  ;;  %v7268_v11 = vld [vmem:[#allocation62_spill] sm:$0xff] }
 0x2a8   :  { %2743 = vmatmul.mubr.bf16.gmra.mrb[80].mxu0 %v2374_v52  ;;  %v2376_v1 = vpack.c.bf16 %v2236_v56, %v2232_v7  ;;  %v5640_v20 = vmul.f32 0.5, %v7263_v49  ;;  %v5643_v6 = vmul.f32 0.5, %v7265_v15  ;;  %v1728_v8 = vadd.f32 %v7266_v58, %v7265_v15  ;;  %v7269_v7 = vld [vmem:[#allocation67_spill] sm:$0xff]  ;;  %v7270_v49 = vld [vmem:[#allocation16_spill] sm:$0xff] }
 0x2a9   :  { %v5648_v18 = vmul.f32 %v1506_v19, %v5613_v40  ;;  %v1854_v25 = vmul.f32 0.7978846, %v1726_v13  ;;  %v1858_v36 = vmul.f32 0.7978846, %v1730_v31  ;;  %v5651_v45 = vmul.f32 0.5, %v7268_v11  ;;  %v7272_v13 = vld [vmem:[#allocation66_spill] sm:$0xff] }
 0x2aa   :  { %2904 = vmatmul.mubr.bf16.gmra.mrb[80].mxu1 %v2376_v1  ;;  %v1732_v52 = vadd.f32 %v7269_v7, %v7268_v11  ;;  %v1856_v56 = vmul.f32 0.7978846, %v1728_v8  ;;  %v5657_v62 = vadd.f32 %v7270_v49, %v4652_v12  ;;  %v5661_v15 = vadd.f32 %v7271_v55, %v4654_v0  ;;  %v5670_v58 = vpop.f32.mrb[40].mxu0  ;;  %v5672_v8 = vpop.f32.mrb[40].mxu1 }
 0x2ab   :  { %7267 = vst [vmem:[#allocation32_spill] sm:$0xff] %v5648_v18  ;;  %v1508_v19 = vmul.f32 %v1380_v3, %v5627_v46  ;;  %3762 = vtanh.f32 %v1854_v25  ;;  %v5665_v31 = vmul.f32 0.5, %v7272_v13  ;;  %v5668_v1 = vmul.f32 0.5, %v5298_v37  ;;  %7273 = vst [vmem:[#allocation43_spill] sm:$0xff] %v5670_v58  ;;  %v7275_v25 = vld [vmem:[#allocation73_spill] sm:$0xff]  ;;  %v5680_v18 = vpop.f32.mrb[41].mxu0 }
 0x2ac   :  { %7274 = vst [vmem:[#allocation18_spill] sm:$0xff] %v5672_v8  ;;  %v3755_v11 = vpop.eup %3754  ;;  %3764 = vtanh.f32 %v1858_v36  ;;  %v1860_v7 = vmul.f32 0.7978846, %v1732_v52  ;;  %v1379_v49 = vmul.f32 0.044715, %v5657_v62  ;;  %v1735_v12 = vadd.f32 %v7275_v25, %v7272_v13  ;;  %v5682_v58 = vpop.f32.mrb[41].mxu1 }
 0x2ad   :  { %v1381_v55 = vmul.f32 0.044715, %v5661_v15  ;;  %v3757_v0 = vpop.eup %3756  ;;  %v2111_v3 = vadd.f32 1.0, %v3755_v11  ;;  %3766 = vtanh.f32 %v1856_v56  ;;  %v1739_v26 = vadd.f32 %v5331_v22, %v5298_v37  ;;  %7276 = vst [vmem:[#allocation30_spill] sm:$0xff] %v5682_v58  ;;  %v5686_v63 = vpop.f32.mrb[42].mxu0 }
 0x2ae   :  { %v3759_v8 = vpop.eup %3758  ;;  %v2115_v36 = vadd.f32 1.0, %v3757_v0  ;;  %3768 = vtanh.f32 %v1860_v7  ;;  %v1507_v52 = vmul.f32 %v1379_v49, %v5657_v62  ;;  %v5688_v56 = vpop.f32.mrb[42].mxu1  ;;  %v5691_v13 = vmul.f32 %v1508_v19, %v5627_v46 }
 0x2af   :  { %v1509_v40 = vmul.f32 %v1381_v55, %v5661_v15  ;;  %7277 = vst [vmem:[#allocation25_spill] sm:$0xff] %v5688_v56  ;;  %v2113_v11 = vadd.f32 1.0, %v3759_v8  ;;  %v1863_v37 = vmul.f32 0.7978846, %v1735_v12  ;;  %v1867_v22 = vmul.f32 0.7978846, %v1739_v26 }
 0x2b0   :  { %v5693_v25 = vpop.f32.mrb[43].mxu0  ;;  %v3761_v58 = vpop.eup %3760  ;;  %v2239_v0 = vmul.f32 %v2111_v3, %v5589_v23  ;;  %v2243_v7 = vmul.f32 %v2115_v36, %v5598_v60  ;;  %v5698_v49 = vmul.f32 %v1507_v52, %v5657_v62  ;;  %v5707_v26 = vmul.f32 0.5, %v5187_v39 }
 0x2b1   :  { %7278 = vst [vmem:[#allocation39_spill] sm:$0xff] %v5693_v25  ;;  %v5701_v55 = vmul.f32 %v1509_v40, %v5661_v15  ;;  %v5703_v56 = vpop.f32.mrb[43].mxu1  ;;  %v2117_v8 = vadd.f32 1.0, %v3761_v58  ;;  %v2241_v19 = vmul.f32 %v2113_v11, %v5601_v42  ;;  %3770 = vtanh.f32 %v1863_v37  ;;  %v7280_v58 = vld [vmem:[#allocation64_spill] sm:$0xff]  ;;  %v7281_v42 = vld [vmem:[#allocation70_spill] sm:$0xff] }
 0x2b2   :  { %7279 = vst [vmem:[#allocation20_spill] sm:$0xff] %v5703_v56  ;;  %v2379_v12 = vpack.c.bf16 %v2243_v7, %v2239_v0  ;;  %3772 = vtanh.f32 %v1867_v22  ;;  %v1737_v23 = vadd.f32 %v5248_v57, %v5187_v39  ;;  %v1741_v60 = vadd.f32 %v5335_v29, %v5302_v44  ;;  %v5722_v11 = vpop.f32.mrb[44].mxu0  ;;  %v5724_v37 = vpop.f32.mrb[44].mxu1  ;;  %v7285_v56 = vld [vmem:[#allocation65_spill] sm:$0xff] }
 0x2b3   :  { %v2245_v40 = vmul.f32 %v2117_v8, %v5607_v54  ;;  %v5715_v3 = vmul.f32 0.5, %v5302_v44  ;;  %v5718_v36 = vmul.f32 0.5, %v7280_v58  ;;  %v1734_v52 = vadd.f32 %v7281_v42, %v7280_v58  ;;  %7282 = vst [vmem:[#allocation34_spill] sm:$0xff] %v5722_v11  ;;  %7283 = vst [vmem:[#allocation29_spill] sm:$0xff] %v5724_v37  ;;  %v7284_v54 = vld [vmem:[#allocation21_spill] sm:$0xff]  ;;  %v5731_v22 = vpop.f32.mrb[45].mxu0 }
 0x2b4   :  { %2750 = vmatprep.mubr.bf16.mxu0 %v2379_v12  ;;  %v1865_v39 = vmul.f32 0.7978846, %v1737_v23  ;;  %v1869_v57 = vmul.f32 0.7978846, %v1741_v60  ;;  %v5727_v29 = vmul.f32 0.5, %v5260_v47  ;;  %v1738_v44 = vadd.f32 %v7284_v54, %v5260_v47  ;;  %v7286_v42 = vld [vmem:[#allocation71_spill] sm:$0xff] }
 0x2b5   :  { %v3763_v0 = vpop.eup %3762  ;;  %v2381_v7 = vpack.c.bf16 %v2245_v40, %v2241_v19  ;;  %v1862_v8 = vmul.f32 0.7978846, %v1734_v52  ;;  %v5734_v58 = vmul.f32 0.5, %v7285_v56  ;;  %v1736_v37 = vadd.f32 %v7286_v42, %v7285_v56  ;;  %v5738_v12 = vpop.f32.mrb[45].mxu1 }
 0x2b6   :  { %7287 = vst [vmem:[#allocation40_spill] sm:$0xff] %v5738_v12  ;;  %v5740_v23 = vpop.f32.mrb[46].mxu0  ;;  %v3765_v60 = vpop.eup %3764  ;;  %v2110_v11 = vadd.f32 1.0, %v3763_v0  ;;  %3774 = vtanh.f32 %v1865_v39  ;;  %v1866_v25 = vmul.f32 0.7978846, %v1738_v44  ;;  %v1740_v47 = vadd.f32 %v5328_v32, %v5267_v28  ;;  %v7291_v12 = vld [vmem:[#allocation22_spill] sm:$0xff] }
 0x2b7   :  { %7288 = vst [vmem:[#allocation38_spill] sm:$0xff] %v5740_v23  ;;  %v5744_v54 = vpop.f32.mrb[46].mxu1  ;;  %v5746_v19 = vpop.f32.mrb[47].mxu0  ;;  %2911 = vmatprep.mubr.bf16.mxu1 %v2381_v7  ;;  %v2114_v52 = vadd.f32 1.0, %v3765_v60  ;;  %3776 = vtanh.f32 %v1869_v57  ;;  %v5749_v56 = vmul.f32 0.5, %v5267_v28  ;;  %v5754_v32 = vmul.f32 0.5, %v7291_v12 }
 0x2b8   :  { %7289 = vst [vmem:[#allocation46_spill] sm:$0xff] %v5744_v54  ;;  %7290 = vst [vmem:[#allocation49_spill] sm:$0xff] %v5746_v19  ;;  %v3767_v40 = vpop.eup %3766  ;;  %v1864_v42 = vmul.f32 0.7978846, %v1736_v37  ;;  %v5751_v23 = vpop.f32.mrb[47].mxu1  ;;  %3778 = vtanh.f32 %v1862_v8  ;;  %v2238_v54 = vmul.f32 %v2110_v11, %v5631_v50  ;;  %v5759_v28 = vmul.f32 0.5, %v5417_v51 }
 0x2b9   :  { %v3769_v0 = vpop.eup %3768  ;;  %v2112_v39 = vadd.f32 1.0, %v3767_v40  ;;  %v1868_v44 = vmul.f32 0.7978846, %v1740_v47  ;;  %v2242_v19 = vmul.f32 %v2114_v52, %v5640_v20  ;;  %3780 = vtanh.f32 %v1866_v25  ;;  %v7292_v37 = vld [vmem:[#allocation8_spill] sm:$0xff] }
 0x2ba   :  { %v2116_v7 = vadd.f32 1.0, %v3769_v0  ;;  %3782 = vtanh.f32 %v1864_v42  ;;  %v1743_v57 = vadd.f32 %v7292_v37, %v7291_v12  ;;  %v1747_v8 = vadd.f32 %v5446_v35, %v5417_v51  ;;  %v5767_v20 = vpop.f32.mrb[48].mxu0  ;;  %v5769_v25 = vpop.f32.mrb[48].mxu1 }
 0x2bb   :  { %v3771_v60 = vpop.eup %3770  ;;  %v2378_v47 = vpack.c.bf16 %v2242_v19, %v2238_v54  ;;  %v2240_v40 = vmul.f32 %v2112_v39, %v5643_v6  ;;  %3784 = vtanh.f32 %v1868_v44  ;;  %v5772_v12 = vmul.f32 0.5, %v5347_v34  ;;  %v5778_v54 = vpop.f32.mrb[49].mxu0 }
 0x2bc   :  { %v2244_v50 = vmul.f32 %v2116_v7, %v5651_v45  ;;  %v3773_v11 = vpop.eup %3772  ;;  %v2119_v52 = vadd.f32 1.0, %v3771_v60  ;;  %v1871_v42 = vmul.f32 0.7978846, %v1743_v57  ;;  %v1875_v0 = vmul.f32 0.7978846, %v1747_v8  ;;  %7293 = vst [vmem:[#allocation56_spill] sm:$0xff] %v5778_v54 }
 0x2bd   :  { %2751 = vmatmul.mubr.bf16.gmra.mrb[84].mxu0 %v2378_v47  ;;  %v2123_v35 = vadd.f32 1.0, %v3773_v11  ;;  %v1745_v6 = vadd.f32 %v5382_v53, %v5347_v34  ;;  %v1749_v45 = vadd.f32 %v5454_v61, %v5421_v24  ;;  %v5780_v19 = vpop.f32.mrb[49].mxu1  ;;  %v5784_v44 = vmul.f32 0.5, %v5421_v24  ;;  %v7295_v7 = vld [vmem:[#allocation27_spill] sm:$0xff]  ;;  %v5789_v57 = vpop.f32.mrb[50].mxu0  ;;  %v7301_v11 = vld [vmem:[#allocation12_spill] sm:$0xff] }
 0x2be   :  { %v2380_v51 = vpack.c.bf16 %v2244_v50, %v2240_v40  ;;  %7294 = vst [vmem:[#allocation41_spill] sm:$0xff] %v5780_v19  ;;  %v2247_v39 = vmul.f32 %v2119_v52, %v5665_v31  ;;  %3786 = vtanh.f32 %v1871_v42  ;;  %v5787_v37 = vmul.f32 0.5, %v7295_v7  ;;  %7296 = vst [vmem:[#allocation51_spill] sm:$0xff] %v5789_v57  ;;  %v5791_v8 = vpop.f32.mrb[50].mxu1  ;;  %v5794_v60 = vpop.f32.mrb[51].mxu0  ;;  %v7300_v40 = vld [vmem:[#allocation17_spill] sm:$0xff] }
 0x2bf   :  { %7297 = vst [vmem:[#allocation50_spill] sm:$0xff] %v5791_v8  ;;  %v2251_v34 = vmul.f32 %v2123_v35, %v5668_v1  ;;  %3788 = vtanh.f32 %v1875_v0  ;;  %v1873_v53 = vmul.f32 0.7978846, %v1745_v6  ;;  %v1877_v61 = vmul.f32 0.7978846, %v1749_v45  ;;  %7298 = vst [vmem:[#allocation57_spill] sm:$0xff] %v5794_v60 }
 0x2c0   :  { %2912 = vmatmul.mubr.bf16.gmra.mrb[84].mxu1 %v2380_v51  ;;  %v5796_v31 = vpop.f32.mrb[51].mxu1  ;;  %v3775_v47 = vpop.eup %3774  ;;  %v5799_v24 = vmul.f32 0.5, %v5373_v21  ;;  %v1742_v50 = vadd.f32 %v7300_v40, %v7295_v7  ;;  %v1746_v52 = vadd.f32 %v7301_v11, %v5373_v21  ;;  %v7302_v42 = vld [vmem:[#allocation11_spill] sm:$0xff]  ;;  %v7303_v6 = vld [vmem:[#allocation28_spill] sm:$0xff]  ;;  %v7305_v11 = vld [vmem:[#allocation14_spill] sm:$0xff] }
 0x2c1   :  { %7299 = vst [vmem:[#allocation33_spill] sm:$0xff] %v5796_v31  ;;  %v5806_v51 = vmul.f32 0.5, %v7302_v42  ;;  %v3777_v1 = vpop.eup %3776  ;;  %v2383_v0 = vpack.c.bf16 %v2251_v34, %v2247_v39  ;;  %v2121_v35 = vadd.f32 1.0, %v3775_v47  ;;  %3790 = vtanh.f32 %v1873_v53  ;;  %v7304_v40 = vld [vmem:[#allocation15_spill] sm:$0xff] }
 0x2c2   :  { %v1744_v45 = vadd.f32 %v7303_v6, %v7302_v42  ;;  %v3779_v31 = vpop.eup %3778  ;;  %v2125_v60 = vadd.f32 1.0, %v3777_v1  ;;  %3792 = vtanh.f32 %v1877_v61  ;;  %v1870_v8 = vmul.f32 0.7978846, %v1742_v50  ;;  %v5815_v34 = vpop.f32.mrb[52].mxu0 }
 0x2c3   :  { %v1874_v57 = vmul.f32 0.7978846, %v1746_v52  ;;  %v3781_v19 = vpop.eup %3780  ;;  %2758 = vmatprep.mubr.bf16.mxu0 %v2383_v0  ;;  %v2118_v7 = vadd.f32 1.0, %v3779_v31  ;;  %v5811_v21 = vmul.f32 0.5, %v7304_v40  ;;  %v1748_v54 = vadd.f32 %v7305_v11, %v7304_v40  ;;  %v5817_v53 = vpop.f32.mrb[52].mxu1 }
 0x2c4   :  { %v1872_v39 = vmul.f32 0.7978846, %v1744_v45  ;;  %7306 = vst [vmem:[#allocation44_spill] sm:$0xff] %v5817_v53  ;;  %v3783_v47 = vpop.eup %3782  ;;  %v2249_v42 = vmul.f32 %v2121_v35, %v5707_v26  ;;  %v2253_v61 = vmul.f32 %v2125_v60, %v5715_v3  ;;  %v2122_v50 = vadd.f32 1.0, %v3781_v19  ;;  %v5821_v52 = vpop.f32.mrb[53].mxu0 }
 0x2c5   :  { %3794 = vtanh.f32 %v1870_v8  ;;  %v5823_v31 = vpop.f32.mrb[53].mxu1  ;;  %v3785_v1 = vpop.eup %3784  ;;  %v2246_v0 = vmul.f32 %v2118_v7, %v5718_v36  ;;  %v2120_v6 = vadd.f32 1.0, %v3783_v47  ;;  %v1876_v45 = vmul.f32 0.7978846, %v1748_v54 }
 0x2c6   :  { %3796 = vtanh.f32 %v1874_v57  ;;  %v5826_v40 = vpop.f32.mrb[54].mxu0  ;;  %v5828_v11 = vpop.f32.mrb[54].mxu1  ;;  %v2385_v53 = vpack.c.bf16 %v2253_v61, %v2249_v42  ;;  %v2250_v26 = vmul.f32 %v2122_v50, %v5727_v29  ;;  %v2124_v3 = vadd.f32 1.0, %v3785_v1 }
 0x2c7   :  { %3798 = vtanh.f32 %v1872_v39  ;;  %v5831_v19 = vpop.f32.mrb[55].mxu0  ;;  %v5833_v8 = vpop.f32.mrb[55].mxu1  ;;  %v2248_v60 = vmul.f32 %v2120_v6, %v5734_v58  ;;  %v5837_v36 = vmul.f32 0.5, %v5450_v14  ;;  %v1751_v54 = vadd.f32 %v5497_v10, %v5450_v14 }
 0x2c8   :  { %3800 = vtanh.f32 %v1876_v45  ;;  %v3787_v57 = vpop.eup %3786  ;;  %2919 = vmatprep.mubr.bf16.mxu1 %v2385_v53  ;;  %v2382_v35 = vpack.c.bf16 %v2250_v26, %v2246_v0  ;;  %v2252_v29 = vmul.f32 %v2124_v3, %v5749_v56  ;;  %v5843_v7 = vmul.f32 0.5, %v5537_v27 }
 0x2c9   :  { %v1755_v39 = vadd.f32 %v5566_v2, %v5537_v27  ;;  %v3789_v47 = vpop.eup %3788  ;;  %v2127_v58 = vadd.f32 1.0, %v3787_v57  ;;  %v1879_v42 = vmul.f32 0.7978846, %v1751_v54  ;;  %v5848_v61 = vmul.f32 0.5, %v5465_v17  ;;  %v7308_v57 = vld [vmem:[#allocation19_spill] sm:$0xff] }
 0x2ca   :  { %v1753_v14 = vadd.f32 %v5502_v16, %v5465_v17  ;;  %2759 = vmatmul.mubr.bf16.gmra.mrb[88].mxu0 %v2382_v35  ;;  %v2384_v10 = vpack.c.bf16 %v2252_v29, %v2248_v60  ;;  %v2131_v53 = vadd.f32 1.0, %v3789_v47  ;;  %v1757_v56 = vadd.f32 %v5574_v59, %v5541_v48  ;;  %v5858_v6 = vpop.f32.mrb[56].mxu0  ;;  %v5860_v45 = vpop.f32.mrb[56].mxu1 }
 0x2cb   :  { %v1883_v50 = vmul.f32 0.7978846, %v1755_v39  ;;  %v3791_v1 = vpop.eup %3790  ;;  %v2255_v0 = vmul.f32 %v2127_v58, %v5754_v32  ;;  %3802 = vtanh.f32 %v1879_v42  ;;  %v5856_v27 = vmul.f32 0.5, %v5541_v48  ;;  %v5863_v59 = vpop.f32.mrb[57].mxu0  ;;  %v7307_v48 = vld [vmem:[#allocation23_spill] sm:$0xff]  ;;  %v7311_v42 = vld [vmem:[#allocation36_spill] sm:$0xff] }
 0x2cc   :  { %v1881_v2 = vmul.f32 0.7978846, %v1753_v14  ;;  %v3793_v17 = vpop.eup %3792  ;;  %2920 = vmatmul.mubr.bf16.gmra.mrb[88].mxu1 %v2384_v10  ;;  %v2259_v16 = vmul.f32 %v2131_v53, %v5759_v28  ;;  %v2129_v26 = vadd.f32 1.0, %v3791_v1  ;;  %v1885_v3 = vmul.f32 0.7978846, %v1757_v56  ;;  %v5865_v60 = vpop.f32.mrb[57].mxu1 }
 0x2cd   :  { %3804 = vtanh.f32 %v1883_v50  ;;  %v2133_v32 = vadd.f32 1.0, %v3793_v17  ;;  %v5868_v54 = vmul.f32 0.5, %v7307_v48  ;;  %v1750_v35 = vadd.f32 %v7308_v57, %v7307_v48  ;;  %v5872_v29 = vpop.f32.mrb[58].mxu0  ;;  %v5874_v39 = vpop.f32.mrb[58].mxu1 }
 0x2ce   :  { %3806 = vtanh.f32 %v1881_v2  ;;  %7309 = vst [vmem:[#allocation47_spill] sm:$0xff] %v5872_v29  ;;  %7310 = vst [vmem:[#allocation52_spill] sm:$0xff] %v5874_v39  ;;  %v2387_v47 = vpack.c.bf16 %v2259_v16, %v2255_v0  ;;  %v5877_v58 = vmul.f32 0.5, %v5493_v33  ;;  %v1754_v14 = vadd.f32 %v7311_v42, %v5493_v33  ;;  %v5881_v10 = vpop.f32.mrb[59].mxu0  ;;  %v5883_v53 = vpop.f32.mrb[59].mxu1  ;;  %v7315_v33 = vld [vmem:[#allocation26_spill] sm:$0xff] }
 0x2cf   :  { %v3795_v28 = vpop.eup %3794  ;;  %3808 = vtanh.f32 %v1885_v3  ;;  %7312 = vst [vmem:[#allocation35_spill] sm:$0xff] %v5881_v10  ;;  %7313 = vst [vmem:[#allocation45_spill] sm:$0xff] %v5883_v53  ;;  %v2257_v56 = vmul.f32 %v2129_v26, %v5772_v12  ;;  %v2261_v1 = vmul.f32 %v2133_v32, %v5784_v44  ;;  %v1878_v17 = vmul.f32 0.7978846, %v1750_v35  ;;  %v7314_v3 = vld [vmem:[#allocation9_spill] sm:$0xff] }
 0x2d0   :  { %v3797_v50 = vpop.eup %3796  ;;  %v2126_v2 = vadd.f32 1.0, %v3795_v28  ;;  %2766 = vmatprep.mubr.bf16.mxu0 %v2387_v47  ;;  %v1882_v16 = vmul.f32 0.7978846, %v1754_v14  ;;  %v5888_v57 = vmul.f32 0.5, %v7314_v3  ;;  %v1752_v42 = vadd.f32 %v7315_v33, %v7314_v3 }
 0x2d1   :  { %v3799_v48 = vpop.eup %3798  ;;  %v2130_v0 = vadd.f32 1.0, %v3797_v50  ;;  %v2389_v39 = vpack.c.bf16 %v2261_v1, %v2257_v56  ;;  %3810 = vtanh.f32 %v1878_v17  ;;  %v1756_v26 = vadd.f32 %v5559_v9, %v5507_v4 }
 0x2d2   :  { %v3801_v10 = vpop.eup %3800  ;;  %v2254_v53 = vmul.f32 %v2126_v2, %v5787_v37  ;;  %v2128_v29 = vadd.f32 1.0, %v3799_v48  ;;  %3812 = vtanh.f32 %v1882_v16  ;;  %v5898_v35 = vmul.f32 0.5, %v5507_v4  ;;  %v5903_v37 = vpop.f32.mrb[60].mxu0 }
 0x2d3   :  { %v2258_v12 = vmul.f32 %v2130_v0, %v5799_v24  ;;  %v2132_v44 = vadd.f32 1.0, %v3801_v10  ;;  %2927 = vmatprep.mubr.bf16.mxu1 %v2389_v39  ;;  %v1880_v28 = vmul.f32 0.7978846, %v1752_v42  ;;  %v5901_v47 = vmul.f32 0.5, %v5570_v41  ;;  %v5905_v14 = vpop.f32.mrb[60].mxu1  ;;  %v5910_v39 = vpop.f32.mrb[61].mxu0 }
 0x2d4   :  { %v2256_v32 = vmul.f32 %v2128_v29, %v5806_v51  ;;  %v1884_v50 = vmul.f32 0.7978846, %v1756_v26  ;;  %v1759_v9 = vadd.f32 %v5617_v43, %v5570_v41  ;;  %v5912_v51 = vpop.f32.mrb[61].mxu1  ;;  %v5915_v29 = vmul.f32 0.5, %v5657_v62 }
 0x2d5   :  { %v2386_v24 = vpack.c.bf16 %v2258_v12, %v2254_v53  ;;  %v2260_v10 = vmul.f32 %v2132_v44, %v5811_v21  ;;  %v3803_v4 = vpop.eup %3802  ;;  %3814 = vtanh.f32 %v1880_v28  ;;  %v1763_v56 = vadd.f32 %v5698_v49, %v5657_v62  ;;  %v5922_v21 = vpop.f32.mrb[62].mxu0 }
 0x2d6   :  { %v5920_v53 = vmul.f32 0.5, %v5585_v38  ;;  %7316 = vst [vmem:[#allocation48_spill] sm:$0xff] %v5922_v21  ;;  %v5924_v1 = vpop.f32.mrb[62].mxu1  ;;  %v2135_v2 = vadd.f32 1.0, %v3803_v4  ;;  %3816 = vtanh.f32 %v1884_v50  ;;  %v1887_v17 = vmul.f32 0.7978846, %v1759_v9 }
 0x2d7   :  { %7317 = vst [vmem:[#allocation55_spill] sm:$0xff] %v5924_v1  ;;  %v3805_v41 = vpop.eup %3804  ;;  %2767 = vmatmul.mubr.bf16.gmra.mrb[92].mxu0 %v2386_v24  ;;  %v2388_v43 = vpack.c.bf16 %v2260_v10, %v2256_v32  ;;  %v5926_v48 = vpop.f32.mrb[63].mxu0  ;;  %v1891_v62 = vmul.f32 0.7978846, %v1763_v56  ;;  %v1761_v49 = vadd.f32 %v5622_v30, %v5585_v38  ;;  %v1765_v33 = vadd.f32 %v5701_v55, %v5661_v15  ;;  %v7320_v55 = vld [vmem:[#allocation42_spill] sm:$0xff]  ;;  %v7322_v56 = vld [vmem:[#allocation32_spill] sm:$0xff] }
 0x2d8   :  { %7318 = vst [vmem:[#allocation60_spill] sm:$0xff] %v5926_v48  ;;  %v5928_v0 = vpop.f32.mrb[63].mxu1  ;;  %v3807_v16 = vpop.eup %3806  ;;  %v2139_v3 = vadd.f32 1.0, %v3805_v41  ;;  %v2263_v12 = vmul.f32 %v2135_v2, %v5837_v36  ;;  %3818 = vtanh.f32 %v1887_v17  ;;  %v5936_v26 = vmul.f32 0.5, %v5661_v15  ;;  %v7321_v15 = vld [vmem:[#allocation37_spill] sm:$0xff] }
 0x2d9   :  { %7319 = vst [vmem:[#allocation13_spill] sm:$0xff] %v5928_v0  ;;  %v3809_v42 = vpop.eup %3808  ;;  %2928 = vmatmul.mubr.bf16.gmra.mrb[92].mxu1 %v2388_v43  ;;  %v2137_v44 = vadd.f32 1.0, %v3807_v16  ;;  %3820 = vtanh.f32 %v1891_v62  ;;  %v1889_v24 = vmul.f32 0.7978846, %v1761_v49  ;;  %v1893_v38 = vmul.f32 0.7978846, %v1765_v33 }
 0x2da   :  { %v2267_v32 = vmul.f32 %v2139_v3, %v5843_v7  ;;  %v2141_v28 = vadd.f32 1.0, %v3809_v42  ;;  %v5941_v30 = vmul.f32 0.5, %v5546_v5  ;;  %v1758_v50 = vadd.f32 %v7320_v55, %v5546_v5  ;;  %v7323_v5 = vld [vmem:[#allocation31_spill] sm:$0xff]  ;;  %v7324_v49 = vld [vmem:[#allocation24_spill] sm:$0xff] }
 0x2db   :  { %v2265_v10 = vmul.f32 %v2137_v44, %v5848_v61  ;;  %v3811_v36 = vpop.eup %3810  ;;  %3822 = vtanh.f32 %v1889_v24  ;;  %v1762_v7 = vadd.f32 %v7322_v56, %v7321_v15  ;;  %v5949_v61 = vmul.f32 0.5, %v7321_v15 }
 0x2dc   :  { %v2391_v9 = vpack.c.bf16 %v2267_v32, %v2263_v12  ;;  %v2269_v4 = vmul.f32 %v2141_v28, %v5856_v27  ;;  %v3813_v41 = vpop.eup %3812  ;;  %v2134_v43 = vadd.f32 1.0, %v3811_v36  ;;  %3824 = vtanh.f32 %v1893_v38  ;;  %v7325_v32 = vld [vmem:[#allocation4_spill] sm:$0xff]  ;;  %v7326_v28 = vld [vmem:[#allocation43_spill] sm:$0xff]  ;;  %v7328_v38 = vld [vmem:[#allocation18_spill] sm:$0xff] }
 0x2dd   :  { %v1886_v2 = vmul.f32 0.7978846, %v1758_v50  ;;  %v2138_v16 = vadd.f32 1.0, %v3813_v41  ;;  %v1890_v3 = vmul.f32 0.7978846, %v1762_v7  ;;  %v5952_v62 = vmul.f32 0.5, %v7323_v5 }
 0x2de   :  { %2774 = vmatprep.mubr.bf16.mxu0 %v2391_v9  ;;  %v2393_v17 = vpack.c.bf16 %v2269_v4, %v2265_v10  ;;  %v2262_v27 = vmul.f32 %v2134_v43, %v5868_v54  ;;  %v1760_v33 = vadd.f32 %v7324_v49, %v7323_v5  ;;  %v1764_v42 = vadd.f32 %v5691_v13, %v5627_v46  ;;  %v7327_v10 = vld [vmem:[#allocation5_spill] sm:$0xff]  ;;  %v7329_v4 = vld [vmem:[#allocation6_spill] sm:$0xff] }
 0x2df   :  { %3826 = vtanh.f32 %v1886_v2  ;;  %v3815_v12 = vpop.eup %3814  ;;  %v2266_v44 = vmul.f32 %v2138_v16, %v5877_v58  ;;  %v5962_v24 = vadd.f32 %v7326_v28, %v7325_v32  ;;  %v5966_v55 = vadd.f32 %v7328_v38, %v7327_v10  ;;  %v7331_v16 = vld [vmem:[#allocation30_spill] sm:$0xff] }
 0x2e0   :  { %2935 = vmatprep.mubr.bf16.mxu1 %v2393_v17  ;;  %3828 = vtanh.f32 %v1890_v3  ;;  %v3817_v54 = vpop.eup %3816  ;;  %v2136_v50 = vadd.f32 1.0, %v3815_v12  ;;  %v1888_v36 = vmul.f32 0.7978846, %v1760_v33  ;;  %v1892_v9 = vmul.f32 0.7978846, %v1764_v42  ;;  %v7330_v17 = vld [vmem:[#allocation7_spill] sm:$0xff] }
 0x2e1   :  { %v5970_v13 = vadd.f32 %v5680_v18, %v7329_v4  ;;  %v2390_v15 = vpack.c.bf16 %v2266_v44, %v2262_v27  ;;  %v2140_v56 = vadd.f32 1.0, %v3817_v54  ;;  %v1382_v58 = vmul.f32 0.044715, %v5962_v24 }
 0x2e2   :  { %v1384_v7 = vmul.f32 0.044715, %v5966_v55  ;;  %v3819_v41 = vpop.eup %3818  ;;  %v2264_v43 = vmul.f32 %v2136_v50, %v5888_v57  ;;  %3830 = vtanh.f32 %v1888_v36  ;;  %v5978_v3 = vadd.f32 %v7331_v16, %v7330_v17 }
 0x2e3   :  { %v1383_v2 = vmul.f32 0.044715, %v5970_v13  ;;  %v3821_v5 = vpop.eup %3820  ;;  %2775 = vmatmul.mubr.bf16.gmra.mrb[96].mxu0 %v2390_v15  ;;  %v2268_v18 = vmul.f32 %v2140_v56, %v5898_v35  ;;  %v2143_v27 = vadd.f32 1.0, %v3819_v41  ;;  %3832 = vtanh.f32 %v1892_v9 }
 0x2e4   :  { %v1510_v49 = vmul.f32 %v1382_v58, %v5962_v24  ;;  %v2147_v33 = vadd.f32 1.0, %v3821_v5  ;;  %v1512_v42 = vmul.f32 %v1384_v7, %v5966_v55  ;;  %v1385_v12 = vmul.f32 0.044715, %v5978_v3  ;;  %v7332_v7 = vld [vmem:[#allocation25_spill] sm:$0xff]  ;;  %v7334_v5 = vld [vmem:[#allocation20_spill] sm:$0xff] }
 0x2e5   :  { %v1511_v57 = vmul.f32 %v1383_v2, %v5970_v13  ;;  %v3823_v44 = vpop.eup %3822  ;;  %v2392_v28 = vpack.c.bf16 %v2268_v18, %v2264_v43  ;;  %v2271_v38 = vmul.f32 %v2143_v27, %v5901_v47  ;;  %v1252_v54 = vmul.f32 0.5, %v5627_v46  ;;  %v7333_v2 = vld [vmem:[#allocation39_spill] sm:$0xff] }
 0x2e6   :  { %v5989_v35 = vadd.f32 %v5686_v63, %v7325_v32  ;;  %v3825_v50 = vpop.eup %3824  ;;  %v2275_v36 = vmul.f32 %v2147_v33, %v5915_v29  ;;  %v2145_v9 = vadd.f32 1.0, %v3823_v44  ;;  %v5993_v15 = vmul.f32 %v1510_v49, %v5962_v24 }
 0x2e7   :  { %v5996_v56 = vmul.f32 %v1512_v42, %v5966_v55  ;;  %2936 = vmatmul.mubr.bf16.gmra.mrb[96].mxu1 %v2392_v28  ;;  %v2149_v58 = vadd.f32 1.0, %v3825_v50  ;;  %v1513_v47 = vmul.f32 %v1385_v12, %v5978_v3  ;;  %v6002_v63 = vadd.f32 %v7332_v7, %v7327_v10 }
 0x2e8   :  { %v1386_v46 = vmul.f32 0.044715, %v5989_v35  ;;  %v2395_v43 = vpack.c.bf16 %v2275_v36, %v2271_v38  ;;  %v6005_v29 = vmul.f32 %v1511_v57, %v5970_v13  ;;  %v6009_v16 = vadd.f32 %v7333_v2, %v7329_v4  ;;  %v7335_v38 = vld [vmem:[#allocation34_spill] sm:$0xff] }
 0x2e9   :  { %v3827_v41 = vpop.eup %3826  ;;  %v6013_v18 = vadd.f32 %v7334_v5, %v7330_v17  ;;  %v2273_v49 = vmul.f32 %v2145_v9, %v5920_v53  ;;  %v2277_v33 = vmul.f32 %v2149_v58, %v5936_v26  ;;  %v1388_v57 = vmul.f32 0.044715, %v6002_v63 }
 0x2ea   :  { %v3829_v27 = vpop.eup %3828  ;;  %v2142_v42 = vadd.f32 1.0, %v3827_v41  ;;  %v1514_v12 = vmul.f32 %v1386_v46, %v5989_v35  ;;  %2782 = vmatprep.mubr.bf16.mxu0 %v2395_v43  ;;  %v1387_v28 = vmul.f32 0.044715, %v6009_v16  ;;  %v6022_v50 = vadd.f32 %v7335_v38, %v7325_v32 }
 0x2eb   :  { %v2146_v44 = vadd.f32 1.0, %v3829_v27  ;;  %v2397_v36 = vpack.c.bf16 %v2277_v33, %v2273_v49  ;;  %v6026_v53 = vmul.f32 %v1513_v47, %v5978_v3  ;;  %v1389_v26 = vmul.f32 0.044715, %v6013_v18 }
 0x2ec   :  { %7336 = vst [vmem:[#allocation68_spill] sm:$0xff] %v6022_v50  ;;  %v2270_v7 = vmul.f32 %v2142_v42, %v5941_v30  ;;  %v3831_v9 = vpop.eup %3830  ;;  %v1516_v46 = vmul.f32 %v1388_v57, %v6002_v63  ;;  %v1515_v41 = vmul.f32 %v1387_v28, %v6009_v16  ;;  %v1390_v43 = vmul.f32 0.044715, %v6022_v50  ;;  %v7337_v30 = vld [vmem:[#allocation29_spill] sm:$0xff] }
 0x2ed   :  { %v2274_v58 = vmul.f32 %v2146_v44, %v5949_v61  ;;  %v3833_v2 = vpop.eup %3832  ;;  %2943 = vmatprep.mubr.bf16.mxu1 %v2397_v36  ;;  %v2144_v5 = vadd.f32 1.0, %v3831_v9  ;;  %v1517_v27 = vmul.f32 %v1389_v26, %v6013_v18  ;;  %v6036_v47 = vadd.f32 %v7337_v30, %v7327_v10  ;;  %v7339_v26 = vld [vmem:[#allocation40_spill] sm:$0xff]  ;;  %v7340_v9 = vld [vmem:[#allocation38_spill] sm:$0xff] }
 0x2ee   :  { %v6040_v49 = vadd.f32 %v5731_v22, %v7329_v4  ;;  %v2148_v33 = vadd.f32 1.0, %v3833_v2  ;;  %v6043_v42 = vmul.f32 %v1514_v12, %v5989_v35  ;;  %v6046_v44 = vmul.f32 %v1516_v46, %v6002_v63 }
 0x2ef   :  { %7338 = vst [vmem:[#allocation10_spill] sm:$0xff] %v6036_v47  ;;  %v2394_v61 = vpack.c.bf16 %v2274_v58, %v2270_v7  ;;  %v2272_v57 = vmul.f32 %v2144_v5, %v5952_v62  ;;  %v6050_v28 = vmul.f32 %v1515_v41, %v6009_v16  ;;  %v1518_v38 = vmul.f32 %v1390_v43, %v6022_v50  ;;  %v7342_v41 = vld [vmem:[#allocation46_spill] sm:$0xff] }
 0x2f0   :  { %v1392_v36 = vmul.f32 0.044715, %v6036_v47  ;;  %v2276_v22 = vmul.f32 %v2148_v33, %v1252_v54  ;;  %v1391_v7 = vmul.f32 0.044715, %v6040_v49  ;;  %v6057_v12 = vadd.f32 %v7339_v26, %v7330_v17  ;;  %v7344_v54 = vld [vmem:[#allocation49_spill] sm:$0xff] }
 0x2f1   :  { %2783 = vmatmul.mubr.bf16.gmra.mrb[100].mxu0 %v2394_v61  ;;  %v6061_v58 = vadd.f32 %v7340_v9, %v7325_v32  ;;  %v6064_v62 = vmul.f32 %v1517_v27, %v6013_v18  ;;  %v6069_v43 = vadd.f32 %v7342_v41, %v7327_v10  ;;  %v6073_v2 = vadd.f32 %v7344_v54, %v7329_v4 }
 0x2f2   :  { %v1520_v46 = vmul.f32 %v1392_v36, %v6036_v47  ;;  %v2396_v5 = vpack.c.bf16 %v2276_v22, %v2272_v57  ;;  %v1519_v30 = vmul.f32 %v1391_v7, %v6040_v49  ;;  %v1393_v61 = vmul.f32 0.044715, %v6057_v12 }
 0x2f3   :  { %7341 = vst [vmem:[#allocation69_spill] sm:$0xff] %v6061_v58  ;;  %7343 = vst [vmem:[#allocation53_spill] sm:$0xff] %v6069_v43  ;;  %v1394_v33 = vmul.f32 0.044715, %v6061_v58  ;;  %v6079_v27 = vmul.f32 %v1518_v38, %v6022_v50  ;;  %v1396_v36 = vmul.f32 0.044715, %v6069_v43  ;;  %v6085_v9 = vadd.f32 %v5751_v23, %v7330_v17 }
 0x2f4   :  { %v1395_v26 = vmul.f32 0.044715, %v6073_v2  ;;  %2944 = vmatmul.mubr.bf16.gmra.mrb[100].mxu1 %v2396_v5  ;;  %v6088_v57 = vmul.f32 %v1520_v46, %v6036_v47  ;;  %v1521_v22 = vmul.f32 %v1393_v61, %v6057_v12  ;;  %v6094_v38 = vadd.f32 %v5767_v20, %v7325_v32  ;;  %v7349_v20 = vld [vmem:[#allocation56_spill] sm:$0xff]  ;;  %v7360_v50 = vld [vmem:[#allocation33_spill] sm:$0xff] }
 0x2f5   :  { %7345 = vst [vmem:[#allocation58_spill] sm:$0xff] %v6079_v27  ;;  %v1522_v7 = vmul.f32 %v1394_v33, %v6061_v58  ;;  %v1524_v41 = vmul.f32 %v1396_v36, %v6069_v43  ;;  %v1397_v0 = vmul.f32 0.044715, %v6085_v9  ;;  %v6101_v23 = vadd.f32 %v5769_v25, %v7327_v10 }
 0x2f6   :  { %7346 = vst [vmem:[#allocation61_spill] sm:$0xff] %v6088_v57  ;;  %7347 = vst [vmem:[#allocation63_spill] sm:$0xff] %v6094_v38  ;;  %v1523_v54 = vmul.f32 %v1395_v26, %v6073_v2  ;;  %v6104_v46 = vmul.f32 %v1519_v30, %v6040_v49  ;;  %v6107_v5 = vmul.f32 %v1521_v22, %v6057_v12  ;;  %v1398_v61 = vmul.f32 0.044715, %v6094_v38  ;;  %v7352_v57 = vld [vmem:[#allocation41_spill] sm:$0xff] }
 0x2f7   :  { %7348 = vst [vmem:[#allocation54_spill] sm:$0xff] %v6101_v23  ;;  %v6112_v33 = vadd.f32 %v7349_v20, %v7329_v4  ;;  %v6115_v36 = vmul.f32 %v1522_v7, %v6061_v58  ;;  %v6118_v26 = vmul.f32 %v1524_v41, %v6069_v43  ;;  %v1525_v25 = vmul.f32 %v1397_v0, %v6085_v9  ;;  %v7353_v20 = vld [vmem:[#allocation51_spill] sm:$0xff]  ;;  %v7355_v0 = vld [vmem:[#allocation50_spill] sm:$0xff] }
 0x2f8   :  { %v1400_v30 = vmul.f32 0.044715, %v6101_v23  ;;  %v1526_v48 = vmul.f32 %v1398_v61, %v6094_v38  ;;  %v6126_v47 = vadd.f32 %v7352_v57, %v7330_v17  ;;  %v6130_v27 = vadd.f32 %v7353_v20, %v7325_v32  ;;  %v7357_v61 = vld [vmem:[#allocation57_spill] sm:$0xff] }
 0x2f9   :  { %7350 = vst [vmem:[#allocation59_spill] sm:$0xff] %v6115_v36  ;;  %7351 = vst [vmem:[#allocation62_spill] sm:$0xff] %v6118_v26  ;;  %v1399_v22 = vmul.f32 0.044715, %v6112_v33  ;;  %v6133_v7 = vmul.f32 %v1523_v54, %v6073_v2  ;;  %v6138_v26 = vadd.f32 %v7355_v0, %v7327_v10  ;;  %v6142_v43 = vadd.f32 %v7357_v61, %v7329_v4 }
 0x2fa   :  { %7354 = vst [vmem:[#allocation67_spill] sm:$0xff] %v6130_v27  ;;  %v1528_v41 = vmul.f32 %v1400_v30, %v6101_v23  ;;  %v6145_v57 = vmul.f32 %v1525_v25, %v6085_v9  ;;  %v1401_v20 = vmul.f32 0.044715, %v6126_v47  ;;  %v1402_v54 = vmul.f32 0.044715, %v6130_v27 }
 0x2fb   :  { %7356 = vst [vmem:[#allocation16_spill] sm:$0xff] %v6138_v26  ;;  %v1527_v36 = vmul.f32 %v1399_v22, %v6112_v33  ;;  %v6151_v58 = vmul.f32 %v1526_v48, %v6094_v38  ;;  %v1404_v30 = vmul.f32 0.044715, %v6138_v26  ;;  %v1403_v0 = vmul.f32 0.044715, %v6142_v43 }
 0x2fc   :  { %7358 = vst [vmem:[#allocation72_spill] sm:$0xff] %v6145_v57  ;;  %v6157_v61 = vadd.f32 %v7360_v50, %v7330_v17  ;;  %v6160_v25 = vmul.f32 %v1528_v41, %v6101_v23  ;;  %v1529_v22 = vmul.f32 %v1401_v20, %v6126_v47  ;;  %v1530_v1 = vmul.f32 %v1402_v54, %v6130_v27  ;;  %v7363_v50 = vld [vmem:[#allocation44_spill] sm:$0xff] }
 0x2fd   :  { %7359 = vst [vmem:[#allocation66_spill] sm:$0xff] %v6151_v58  ;;  %v6166_v21 = vadd.f32 %v5815_v34, %v7325_v32  ;;  %v1532_v48 = vmul.f32 %v1404_v30, %v6138_v26  ;;  %v1531_v58 = vmul.f32 %v1403_v0, %v6142_v43  ;;  %v6173_v57 = vadd.f32 %v7363_v50, %v7327_v10 }
 0x2fe   :  { %7361 = vst [vmem:[#allocation73_spill] sm:$0xff] %v6160_v25  ;;  %v1405_v38 = vmul.f32 0.044715, %v6157_v61  ;;  %v6176_v41 = vmul.f32 %v1527_v36, %v6112_v33  ;;  %v6179_v20 = vmul.f32 %v1529_v22, %v6126_v47  ;;  %v6184_v34 = vadd.f32 %v5821_v52, %v7329_v4 }
 0x2ff   :  { %7362 = vst [vmem:[#allocation64_spill] sm:$0xff] %v6166_v21  ;;  %7364 = vst [vmem:[#allocation70_spill] sm:$0xff] %v6173_v57  ;;  %v1406_v54 = vmul.f32 0.044715, %v6166_v21  ;;  %v6187_v30 = vmul.f32 %v1530_v1, %v6130_v27  ;;  %v6190_v0 = vmul.f32 %v1532_v48, %v6138_v26  ;;  %v1408_v36 = vmul.f32 0.044715, %v6173_v57 }
 0x300   :  { %v1533_v50 = vmul.f32 %v1405_v38, %v6157_v61  ;;  %v1407_v22 = vmul.f32 0.044715, %v6184_v34  ;;  %v6198_v23 = vadd.f32 %v5823_v31, %v7330_v17  ;;  %v6202_v52 = vadd.f32 %v5826_v40, %v7325_v32 }
 0x301   :  { %7365 = vst [vmem:[#allocation21_spill] sm:$0xff] %v6187_v30  ;;  %7366 = vst [vmem:[#allocation65_spill] sm:$0xff] %v6190_v0  ;;  %v1534_v25 = vmul.f32 %v1406_v54, %v6166_v21  ;;  %v6205_v1 = vmul.f32 %v1531_v58, %v6142_v43  ;;  %v1536_v48 = vmul.f32 %v1408_v36, %v6173_v57 }
 0x302   :  { %7367 = vst [vmem:[#allocation71_spill] sm:$0xff] %v6202_v52  ;;  %v6210_v38 = vadd.f32 %v5828_v11, %v7327_v10  ;;  %v6214_v54 = vadd.f32 %v5831_v19, %v7329_v4  ;;  %v6217_v31 = vmul.f32 %v1533_v50, %v6157_v61  ;;  %v1535_v0 = vmul.f32 %v1407_v22, %v6184_v34 }
 0x303   :  { %v1409_v40 = vmul.f32 0.044715, %v6198_v23  ;;  %v1410_v58 = vmul.f32 0.044715, %v6202_v52  ;;  %v6223_v26 = vmul.f32 %v1534_v25, %v6166_v21  ;;  %v6229_v19 = vadd.f32 %v5833_v8, %v7330_v17 }
 0x304   :  { %7368 = vst [vmem:[#allocation22_spill] sm:$0xff] %v6210_v38  ;;  %v1412_v36 = vmul.f32 0.044715, %v6210_v38  ;;  %v1411_v11 = vmul.f32 0.044715, %v6214_v54  ;;  %v6232_v50 = vmul.f32 %v1536_v48, %v6173_v57  ;;  %v6238_v27 = vadd.f32 %v5858_v6, %v7325_v32 }
 0x305   :  { %7369 = vst [vmem:[#allocation8_spill] sm:$0xff] %v6223_v26  ;;  %v1537_v22 = vmul.f32 %v1409_v40, %v6198_v23  ;;  %v1538_v30 = vmul.f32 %v1410_v58, %v6202_v52  ;;  %v1413_v21 = vmul.f32 0.044715, %v6229_v19  ;;  %v6245_v8 = vadd.f32 %v5860_v45, %v7327_v10 }
 0x306   :  { %7370 = vst [vmem:[#allocation27_spill] sm:$0xff] %v6232_v50  ;;  %7371 = vst [vmem:[#allocation17_spill] sm:$0xff] %v6238_v27  ;;  %v1540_v25 = vmul.f32 %v1412_v36, %v6210_v38  ;;  %v1539_v26 = vmul.f32 %v1411_v11, %v6214_v54  ;;  %v6248_v48 = vmul.f32 %v1535_v0, %v6184_v34  ;;  %v1414_v58 = vmul.f32 0.044715, %v6238_v27 }
 0x307   :  { %7372 = vst [vmem:[#allocation12_spill] sm:$0xff] %v6245_v8  ;;  %v6251_v40 = vmul.f32 %v1537_v22, %v6198_v23  ;;  %v6256_v6 = vadd.f32 %v5863_v59, %v7329_v4  ;;  %v6259_v36 = vmul.f32 %v1538_v30, %v6202_v52  ;;  %v1541_v45 = vmul.f32 %v1413_v21, %v6229_v19 }
 0x308   :  { %v6262_v11 = vmul.f32 %v1540_v25, %v6210_v38  ;;  %v1416_v0 = vmul.f32 0.044715, %v6245_v8  ;;  %v6267_v50 = vmul.f32 %v1539_v26, %v6214_v54  ;;  %v1542_v22 = vmul.f32 %v1414_v58, %v6238_v27 }
 0x309   :  { %7373 = vst [vmem:[#allocation11_spill] sm:$0xff] %v6259_v36  ;;  %v1415_v57 = vmul.f32 0.044715, %v6256_v6  ;;  %v6273_v59 = vadd.f32 %v5865_v60, %v7330_v17  ;;  %v6276_v30 = vmul.f32 %v1541_v45, %v6229_v19  ;;  %v6280_v21 = vmul.f32 0.5, %v5970_v13 }
 0x30a   :  { %7374 = vst [vmem:[#allocation28_spill] sm:$0xff] %v6262_v11  ;;  %v1544_v25 = vmul.f32 %v1416_v0, %v6245_v8  ;;  %v1767_v26 = vadd.f32 %v6005_v29, %v5970_v13  ;;  %v6287_v38 = vmul.f32 0.5, %v6009_v16  ;;  %v1771_v60 = vadd.f32 %v6050_v28, %v6009_v16  ;;  %v7378_v28 = vld [vmem:[#allocation47_spill] sm:$0xff] }
 0x30b   :  { %7375 = vst [vmem:[#allocation15_spill] sm:$0xff] %v6276_v30  ;;  %v1543_v11 = vmul.f32 %v1415_v57, %v6256_v6  ;;  %v1417_v58 = vmul.f32 0.044715, %v6273_v59  ;;  %v6292_v45 = vmul.f32 %v1542_v22, %v6238_v27  ;;  %v6298_v52 = vmul.f32 0.5, %v5978_v3 }
 0x30c   :  { %v6295_v0 = vmul.f32 %v1544_v25, %v6245_v8  ;;  %v1895_v36 = vmul.f32 0.7978846, %v1767_v26  ;;  %v1899_v29 = vmul.f32 0.7978846, %v1771_v60  ;;  %v6302_v57 = vmul.f32 0.5, %v6013_v18  ;;  %v7380_v25 = vld [vmem:[#allocation52_spill] sm:$0xff] }
 0x30d   :  { %7376 = vst [vmem:[#allocation14_spill] sm:$0xff] %v6292_v45  ;;  %v1545_v13 = vmul.f32 %v1417_v58, %v6273_v59  ;;  %v1769_v30 = vadd.f32 %v6026_v53, %v5978_v3  ;;  %v1773_v16 = vadd.f32 %v6064_v62, %v6013_v18  ;;  %v6310_v22 = vadd.f32 %v7378_v28, %v7325_v32 }
 0x30e   :  { %7377 = vst [vmem:[#allocation23_spill] sm:$0xff] %v6295_v0  ;;  %3834 = vtanh.f32 %v1895_v36  ;;  %v6314_v26 = vadd.f32 %v7380_v25, %v7327_v10  ;;  %v6317_v58 = vmul.f32 %v1543_v11, %v6256_v6  ;;  %v1766_v62 = vadd.f32 %v5993_v15, %v5962_v24 }
 0x30f   :  { %7379 = vst [vmem:[#allocation19_spill] sm:$0xff] %v6310_v22  ;;  %v6320_v60 = vmul.f32 %v1545_v13, %v6273_v59  ;;  %3836 = vtanh.f32 %v1899_v29  ;;  %v1897_v3 = vmul.f32 0.7978846, %v1769_v30  ;;  %v1901_v53 = vmul.f32 0.7978846, %v1773_v16 }
 0x310   :  { %7381 = vst [vmem:[#allocation36_spill] sm:$0xff] %v6314_v26  ;;  %v1418_v36 = vmul.f32 0.044715, %v6310_v22  ;;  %v1420_v18 = vmul.f32 0.044715, %v6314_v26  ;;  %v6327_v28 = vmul.f32 0.5, %v5962_v24  ;;  %v1770_v13 = vadd.f32 %v6043_v42, %v5989_v35 }
 0x311   :  { %3838 = vtanh.f32 %v1897_v3  ;;  %v6330_v11 = vmul.f32 0.5, %v5989_v35  ;;  %v1894_v29 = vmul.f32 0.7978846, %v1766_v62  ;;  %v6336_v16 = vmul.f32 0.5, %v5966_v55  ;;  %v7383_v42 = vld [vmem:[#allocation35_spill] sm:$0xff]  ;;  %v7384_v62 = vld [vmem:[#allocation45_spill] sm:$0xff] }
 0x312   :  { %3840 = vtanh.f32 %v1901_v53  ;;  %v1546_v30 = vmul.f32 %v1418_v36, %v6310_v22  ;;  %v1548_v25 = vmul.f32 %v1420_v18, %v6314_v26  ;;  %v1898_v15 = vmul.f32 0.7978846, %v1770_v13 }
 0x313   :  { %v1768_v24 = vadd.f32 %v5996_v56, %v5966_v55  ;;  %v1772_v3 = vadd.f32 %v6046_v44, %v6002_v63  ;;  %3842 = vtanh.f32 %v1894_v29  ;;  %v6347_v35 = vmul.f32 0.5, %v6002_v63 }
 0x314   :  { %v6344_v0 = vmul.f32 %v1546_v30, %v6310_v22  ;;  %v6351_v53 = vadd.f32 %v7383_v42, %v7329_v4  ;;  %3844 = vtanh.f32 %v1898_v15  ;;  %v6355_v55 = vadd.f32 %v7384_v62, %v7330_v17 }
 0x315   :  { %v1896_v36 = vmul.f32 0.7978846, %v1768_v24  ;;  %v1900_v18 = vmul.f32 0.7978846, %v1772_v3  ;;  %v6360_v44 = vadd.f32 %v5903_v37, %v7325_v32  ;;  %v6364_v63 = vadd.f32 %v5905_v14, %v7327_v10 }
 0x316   :  { %7382 = vst [vmem:[#allocation9_spill] sm:$0xff] %v6344_v0  ;;  %v1419_v56 = vmul.f32 0.044715, %v6351_v53  ;;  %v6368_v13 = vadd.f32 %v5910_v39, %v7329_v4  ;;  %v6371_v30 = vmul.f32 %v1548_v25, %v6314_v26  ;;  %v1421_v29 = vmul.f32 0.044715, %v6355_v55 }
 0x317   :  { %3846 = vtanh.f32 %v1896_v36  ;;  %v6376_v15 = vadd.f32 %v5912_v51, %v7330_v17  ;;  %v1422_v14 = vmul.f32 0.044715, %v6360_v44  ;;  %v1424_v3 = vmul.f32 0.044715, %v6364_v63 }
 0x318   :  { %7385 = vst [vmem:[#allocation26_spill] sm:$0xff] %v6371_v30  ;;  %v3835_v37 = vpop.eup %3834  ;;  %3848 = vtanh.f32 %v1900_v18  ;;  %v1547_v24 = vmul.f32 %v1419_v56, %v6351_v53  ;;  %v1549_v25 = vmul.f32 %v1421_v29, %v6355_v55  ;;  %v1423_v36 = vmul.f32 0.044715, %v6368_v13 }
 0x319   :  { %v3837_v39 = vpop.eup %3836  ;;  %v2151_v42 = vadd.f32 1.0, %v3835_v37  ;;  %v1425_v62 = vmul.f32 0.044715, %v6376_v15  ;;  %v1550_v51 = vmul.f32 %v1422_v14, %v6360_v44  ;;  %v1552_v26 = vmul.f32 %v1424_v3, %v6364_v63 }
 0x31a   :  { %v2155_v30 = vadd.f32 1.0, %v3837_v39  ;;  %v6387_v18 = vmul.f32 0.5, %v6040_v49  ;;  %v6391_v0 = vmul.f32 %v1547_v24, %v6351_v53  ;;  %v1551_v29 = vmul.f32 %v1423_v36, %v6368_v13 }
 0x31b   :  { %v3839_v56 = vpop.eup %3838  ;;  %v2279_v8 = vmul.f32 %v2151_v42, %v6280_v21  ;;  %v1553_v37 = vmul.f32 %v1425_v62, %v6376_v15  ;;  %v6397_v14 = vmul.f32 %v1549_v25, %v6355_v55  ;;  %v6400_v3 = vmul.f32 %v1550_v51, %v6360_v44 }
 0x31c   :  { %v3841_v22 = vpop.eup %3840  ;;  %v2283_v39 = vmul.f32 %v2155_v30, %v6287_v38  ;;  %v2153_v45 = vadd.f32 1.0, %v3839_v56  ;;  %v6403_v21 = vmul.f32 %v1552_v26, %v6364_v63  ;;  %v6406_v24 = vmul.f32 %v1551_v29, %v6368_v13 }
 0x31d   :  { %v2157_v27 = vadd.f32 1.0, %v3841_v22  ;;  %v6409_v42 = vmul.f32 %v1553_v37, %v6376_v15  ;;  %v3843_v36 = vpop.eup %3842  ;;  %v6412_v38 = vmul.f32 0.5, %v6073_v2  ;;  %v1775_v30 = vadd.f32 %v6104_v46, %v6040_v49 }
 0x31e   :  { %7386 = vst [vmem:[#allocation42_spill] sm:$0xff] %v6403_v21  ;;  %v2399_v62 = vpack.c.bf16 %v2283_v39, %v2279_v8  ;;  %v1779_v22 = vadd.f32 %v6133_v7, %v6073_v2  ;;  %v3845_v25 = vpop.eup %3844  ;;  %v2281_v26 = vmul.f32 %v2153_v45, %v6298_v52  ;;  %v2150_v56 = vadd.f32 1.0, %v3843_v36  ;;  %v7387_v7 = vld [vmem:[#allocation72_spill] sm:$0xff] }
 0x31f   :  { %v2285_v51 = vmul.f32 %v2157_v27, %v6302_v57  ;;  %v6421_v29 = vmul.f32 0.5, %v6057_v12  ;;  %v2154_v8 = vadd.f32 1.0, %v3845_v25  ;;  %v1903_v37 = vmul.f32 0.7978846, %v1775_v30  ;;  %v7388_v27 = vld [vmem:[#allocation48_spill] sm:$0xff] }
 0x320   :  { %2790 = vmatprep.mubr.bf16.mxu0 %v2399_v62  ;;  %v1907_v39 = vmul.f32 0.7978846, %v1779_v22  ;;  %v1777_v21 = vadd.f32 %v6107_v5, %v6057_v12  ;;  %v2278_v2 = vmul.f32 %v2150_v56, %v6327_v28  ;;  %v1781_v52 = vadd.f32 %v7387_v7, %v6085_v9  ;;  %v7394_v7 = vld [vmem:[#allocation10_spill] sm:$0xff] }
 0x321   :  { %v3847_v49 = vpop.eup %3846  ;;  %v2401_v46 = vpack.c.bf16 %v2285_v51, %v2281_v26  ;;  %v6430_v45 = vadd.f32 %v7388_v27, %v7325_v32  ;;  %v2282_v36 = vmul.f32 %v2154_v8, %v6330_v11  ;;  %3850 = vtanh.f32 %v1903_v37  ;;  %v7389_v32 = vld [vmem:[#allocation55_spill] sm:$0xff]  ;;  %v7390_v8 = vld [vmem:[#allocation68_spill] sm:$0xff] }
 0x322   :  { %v3849_v57 = vpop.eup %3848  ;;  %v2152_v62 = vadd.f32 1.0, %v3847_v49  ;;  %v1905_v30 = vmul.f32 0.7978846, %v1777_v21  ;;  %3852 = vtanh.f32 %v1907_v39  ;;  %v1909_v12 = vmul.f32 0.7978846, %v1781_v52  ;;  %v7392_v49 = vld [vmem:[#allocation69_spill] sm:$0xff] }
 0x323   :  { %2951 = vmatprep.mubr.bf16.mxu1 %v2401_v46  ;;  %v2156_v22 = vadd.f32 1.0, %v3849_v57  ;;  %v1426_v5 = vmul.f32 0.044715, %v6430_v45  ;;  %v2398_v28 = vpack.c.bf16 %v2282_v36, %v2278_v2  ;;  %v6435_v25 = vmul.f32 0.5, %v6085_v9  ;;  %v7391_v9 = vld [vmem:[#allocation58_spill] sm:$0xff]  ;;  %v7393_v46 = vld [vmem:[#allocation59_spill] sm:$0xff] }
 0x324   :  { %3854 = vtanh.f32 %v1905_v30  ;;  %v6439_v26 = vadd.f32 %v7389_v32, %v7327_v10  ;;  %v2280_v11 = vmul.f32 %v2152_v62, %v6336_v16  ;;  %v6446_v37 = vmul.f32 0.5, %v7390_v8  ;;  %v7395_v30 = vld [vmem:[#allocation61_spill] sm:$0xff]  ;;  %v7398_v32 = vld [vmem:[#allocation62_spill] sm:$0xff] }
 0x325   :  { %v2284_v51 = vmul.f32 %v2156_v22, %v6347_v35  ;;  %3856 = vtanh.f32 %v1909_v12  ;;  %v1554_v21 = vmul.f32 %v1426_v5, %v6430_v45  ;;  %2791 = vmatmul.mubr.bf16.gmra.mrb[104].mxu0 %v2398_v28  ;;  %v1774_v39 = vadd.f32 %v7391_v9, %v7390_v8  ;;  %v7397_v5 = vld [vmem:[#allocation53_spill] sm:$0xff] }
 0x326   :  { %v1428_v56 = vmul.f32 0.044715, %v6439_v26  ;;  %v1778_v10 = vadd.f32 %v7393_v46, %v7392_v49  ;;  %v6456_v35 = vmul.f32 0.5, %v7392_v49  ;;  %v6459_v52 = vmul.f32 0.5, %v7394_v7 }
 0x327   :  { %v2400_v2 = vpack.c.bf16 %v2284_v51, %v2280_v11  ;;  %v6453_v16 = vmul.f32 %v1554_v21, %v6430_v45  ;;  %v6461_v27 = vpop.f32.mrb[64].mxu0  ;;  %v1902_v36 = vmul.f32 0.7978846, %v1774_v39  ;;  %v1776_v22 = vadd.f32 %v7395_v30, %v7394_v7  ;;  %v7399_v51 = vld [vmem:[#allocation60_spill] sm:$0xff] }
 0x328   :  { %v1556_v57 = vmul.f32 %v1428_v56, %v6439_v26  ;;  %v1906_v62 = vmul.f32 0.7978846, %v1778_v10  ;;  %v6466_v12 = vpop.f32.mrb[65].mxu0  ;;  %v6469_v28 = vmul.f32 0.5, %v7397_v5  ;;  %v1780_v11 = vadd.f32 %v7398_v32, %v7397_v5  ;;  %v7400_v56 = vld [vmem:[#allocation13_spill] sm:$0xff] }
 0x329   :  { %7396 = vst [vmem:[#allocation37_spill] sm:$0xff] %v6466_v12  ;;  %2952 = vmatmul.mubr.bf16.gmra.mrb[104].mxu1 %v2400_v2  ;;  %v6475_v21 = vadd.f32 %v7399_v51, %v7329_v4  ;;  %v6479_v8 = vadd.f32 %v7400_v56, %v7330_v17  ;;  %v6481_v9 = vpop.f32.mrb[64].mxu1  ;;  %v6483_v39 = vpop.f32.mrb[66].mxu0  ;;  %3858 = vtanh.f32 %v1902_v36  ;;  %v1904_v46 = vmul.f32 0.7978846, %v1776_v22 }
 0x32a   :  { %7401 = vst [vmem:[#allocation32_spill] sm:$0xff] %v6481_v9  ;;  %7402 = vst [vmem:[#allocation31_spill] sm:$0xff] %v6483_v39  ;;  %v6486_v49 = vmul.f32 %v1556_v57, %v6439_v26  ;;  %v6489_v10 = vmul.f32 0.5, %v6112_v33  ;;  %v6491_v2 = vpop.f32.mrb[65].mxu1  ;;  %v6493_v4 = vpop.f32.mrb[67].mxu0  ;;  %3860 = vtanh.f32 %v1906_v62  ;;  %v6498_v57 = vmul.f32 0.5, %v6142_v43 }
 0x32b   :  { %7403 = vst [vmem:[#allocation24_spill] sm:$0xff] %v6491_v2  ;;  %7404 = vst [vmem:[#allocation4_spill] sm:$0xff] %v6493_v4  ;;  %v1908_v7 = vmul.f32 0.7978846, %v1780_v11  ;;  %v1427_v17 = vmul.f32 0.044715, %v6475_v21  ;;  %v3851_v5 = vpop.eup %3850  ;;  %3862 = vtanh.f32 %v1904_v46  ;;  %v1783_v36 = vadd.f32 %v6176_v41, %v6112_v33 }
 0x32c   :  { %v1429_v30 = vmul.f32 0.044715, %v6479_v8  ;;  %v1787_v22 = vadd.f32 %v6205_v1, %v6142_v43  ;;  %v6504_v32 = vpop.f32.mrb[66].mxu1  ;;  %v3853_v51 = vpop.eup %3852  ;;  %v2159_v62 = vadd.f32 1.0, %v3851_v5  ;;  %v6511_v33 = vmul.f32 0.5, %v6126_v47 }
 0x32d   :  { %7405 = vst [vmem:[#allocation43_spill] sm:$0xff] %v6504_v32  ;;  %3864 = vtanh.f32 %v1908_v7  ;;  %v1555_v11 = vmul.f32 %v1427_v17, %v6475_v21  ;;  %v6508_v4 = vpop.f32.mrb[67].mxu1  ;;  %v2163_v39 = vadd.f32 1.0, %v3853_v51  ;;  %v1911_v2 = vmul.f32 0.7978846, %v1783_v36 }
 0x32e   :  { %v1557_v56 = vmul.f32 %v1429_v30, %v6479_v8  ;;  %7406 = vst [vmem:[#allocation5_spill] sm:$0xff] %v6508_v4  ;;  %v3855_v46 = vpop.eup %3854  ;;  %v1915_v9 = vmul.f32 0.7978846, %v1787_v22  ;;  %v2287_v43 = vmul.f32 %v2159_v62, %v6387_v18  ;;  %v6518_v7 = vmul.f32 0.5, %v6157_v61  ;;  %v7407_v4 = vld [vmem:[#allocation63_spill] sm:$0xff] }
 0x32f   :  { %v3857_v41 = vpop.eup %3856  ;;  %v2161_v1 = vadd.f32 1.0, %v3855_v46  ;;  %v6515_v5 = vmul.f32 %v1555_v11, %v6475_v21  ;;  %v2291_v17 = vmul.f32 %v2163_v39, %v6412_v38  ;;  %3866 = vtanh.f32 %v1911_v2  ;;  %v7408_v2 = vld [vmem:[#allocation67_spill] sm:$0xff] }
 0x330   :  { %v2165_v30 = vadd.f32 1.0, %v3857_v41  ;;  %v1785_v36 = vadd.f32 %v6179_v20, %v6126_v47  ;;  %v6525_v51 = vmul.f32 %v1557_v56, %v6479_v8  ;;  %3868 = vtanh.f32 %v1915_v9  ;;  %v7409_v47 = vld [vmem:[#allocation66_spill] sm:$0xff] }
 0x331   :  { %v2289_v22 = vmul.f32 %v2161_v1, %v6421_v29  ;;  %v1789_v18 = vadd.f32 %v6217_v31, %v6157_v61  ;;  %v2403_v62 = vpack.c.bf16 %v2291_v17, %v2287_v43  ;;  %v6531_v38 = vmul.f32 0.5, %v7407_v4  ;;  %v7410_v29 = vld [vmem:[#allocation21_spill] sm:$0xff]  ;;  %v7411_v31 = vld [vmem:[#allocation54_spill] sm:$0xff] }
 0x332   :  { %v2293_v11 = vmul.f32 %v2165_v30, %v6435_v25  ;;  %v1913_v46 = vmul.f32 0.7978846, %v1785_v36  ;;  %v6534_v41 = vmul.f32 0.5, %v7408_v2  ;;  %v1782_v20 = vadd.f32 %v7409_v47, %v7407_v4  ;;  %v7412_v43 = vld [vmem:[#allocation73_spill] sm:$0xff]  ;;  %v7413_v47 = vld [vmem:[#allocation16_spill] sm:$0xff] }
 0x333   :  { %v1917_v39 = vmul.f32 0.7978846, %v1789_v18  ;;  %v1786_v9 = vadd.f32 %v7410_v29, %v7408_v2  ;;  %v3859_v56 = vpop.eup %3858  ;;  %2798 = vmatprep.mubr.bf16.mxu0 %v2403_v62  ;;  %v6541_v25 = vmul.f32 0.5, %v7411_v31  ;;  %v1784_v1 = vadd.f32 %v7412_v43, %v7411_v31 }
 0x334   :  { %v2405_v61 = vpack.c.bf16 %v2293_v11, %v2289_v22  ;;  %3870 = vtanh.f32 %v1913_v46  ;;  %v3861_v17 = vpop.eup %3860  ;;  %v2158_v30 = vadd.f32 1.0, %v3859_v56  ;;  %v1910_v36 = vmul.f32 0.7978846, %v1782_v20  ;;  %v7414_v22 = vld [vmem:[#allocation65_spill] sm:$0xff] }
 0x335   :  { %3872 = vtanh.f32 %v1917_v39  ;;  %v1914_v18 = vmul.f32 0.7978846, %v1786_v9  ;;  %v3863_v32 = vpop.eup %3862  ;;  %v2162_v4 = vadd.f32 1.0, %v3861_v17  ;;  %v6546_v2 = vmul.f32 0.5, %v7413_v47 }
 0x336   :  { %2959 = vmatprep.mubr.bf16.mxu1 %v2405_v61  ;;  %v1788_v62 = vadd.f32 %v7414_v22, %v7413_v47  ;;  %v1912_v11 = vmul.f32 0.7978846, %v1784_v1  ;;  %v2286_v29 = vmul.f32 %v2158_v30, %v6446_v37  ;;  %v2160_v12 = vadd.f32 1.0, %v3863_v32  ;;  %v7416_v22 = vld [vmem:[#allocation64_spill] sm:$0xff] }
 0x337   :  { %v3865_v46 = vpop.eup %3864  ;;  %3874 = vtanh.f32 %v1910_v36  ;;  %v6552_v56 = vmul.f32 0.5, %v6184_v34  ;;  %v2290_v39 = vmul.f32 %v2162_v4, %v6456_v35  ;;  %v6556_v61 = vmul.f32 0.5, %v6214_v54 }
 0x338   :  { %v2164_v20 = vadd.f32 1.0, %v3865_v46  ;;  %3876 = vtanh.f32 %v1914_v18  ;;  %v1916_v9 = vmul.f32 0.7978846, %v1788_v62  ;;  %v1791_v31 = vadd.f32 %v6248_v48, %v6184_v34 }
 0x339   :  { %3878 = vtanh.f32 %v1912_v11  ;;  %v1795_v37 = vadd.f32 %v6267_v50, %v6214_v54  ;;  %v3867_v32 = vpop.eup %3866  ;;  %v2402_v43 = vpack.c.bf16 %v2290_v39, %v2286_v29  ;;  %v2288_v1 = vmul.f32 %v2160_v12, %v6459_v52  ;;  %v7415_v50 = vld [vmem:[#allocation15_spill] sm:$0xff] }
 0x33a   :  { %v2292_v17 = vmul.f32 %v2164_v20, %v6469_v28  ;;  %3880 = vtanh.f32 %v1916_v9  ;;  %v3869_v35 = vpop.eup %3868  ;;  %v2167_v30 = vadd.f32 1.0, %v3867_v32  ;;  %v1919_v36 = vmul.f32 0.7978846, %v1791_v31  ;;  %v7417_v9 = vld [vmem:[#allocation71_spill] sm:$0xff] }
 0x33b   :  { %v1923_v18 = vmul.f32 0.7978846, %v1795_v37  ;;  %v6565_v4 = vmul.f32 0.5, %v6198_v23  ;;  %2799 = vmatmul.mubr.bf16.gmra.mrb[108].mxu0 %v2402_v43  ;;  %v2171_v34 = vadd.f32 1.0, %v3869_v35  ;;  %v1793_v54 = vadd.f32 %v6251_v40, %v6198_v23  ;;  %v6571_v52 = vpop.f32.mrb[68].mxu0  ;;  %v7419_v32 = vld [vmem:[#allocation11_spill] sm:$0xff] }
 0x33c   :  { %v2404_v47 = vpack.c.bf16 %v2292_v17, %v2288_v1  ;;  %v1797_v48 = vadd.f32 %v7415_v50, %v6229_v19  ;;  %v2295_v12 = vmul.f32 %v2167_v30, %v6489_v10  ;;  %3882 = vtanh.f32 %v1919_v36  ;;  %v6580_v11 = vpop.f32.mrb[69].mxu0  ;;  %v7421_v30 = vld [vmem:[#allocation70_spill] sm:$0xff] }
 0x33d   :  { %v6575_v28 = vmul.f32 0.5, %v6229_v19  ;;  %v6578_v62 = vmul.f32 0.5, %v7416_v22  ;;  %v2299_v23 = vmul.f32 %v2171_v34, %v6498_v57  ;;  %3884 = vtanh.f32 %v1923_v18  ;;  %v6583_v39 = vpop.f32.mrb[70].mxu0  ;;  %v7418_v19 = vld [vmem:[#allocation8_spill] sm:$0xff] }
 0x33e   :  { %v3871_v46 = vpop.eup %3870  ;;  %2960 = vmatmul.mubr.bf16.gmra.mrb[108].mxu1 %v2404_v47  ;;  %v1921_v40 = vmul.f32 0.7978846, %v1793_v54  ;;  %v1925_v29 = vmul.f32 0.7978846, %v1797_v48  ;;  %v6586_v31 = vmul.f32 0.5, %v7417_v9  ;;  %v1790_v37 = vadd.f32 %v7418_v19, %v7416_v22  ;;  %v6592_v1 = vpop.f32.mrb[68].mxu1 }
 0x33f   :  { %v3873_v20 = vpop.eup %3872  ;;  %v2169_v10 = vadd.f32 1.0, %v3871_v46  ;;  %v1794_v43 = vadd.f32 %v7419_v32, %v7417_v9  ;;  %v6594_v17 = vpop.f32.mrb[71].mxu0  ;;  %v2407_v57 = vpack.c.bf16 %v2299_v23, %v2295_v12  ;;  %v6597_v36 = vmul.f32 0.5, %v7421_v30  ;;  %v7422_v23 = vld [vmem:[#allocation27_spill] sm:$0xff]  ;;  %v7424_v9 = vld [vmem:[#allocation28_spill] sm:$0xff] }
 0x340   :  { %7420 = vst [vmem:[#allocation18_spill] sm:$0xff] %v6594_v17  ;;  %v2173_v35 = vadd.f32 1.0, %v3873_v20  ;;  %3886 = vtanh.f32 %v1921_v40  ;;  %v6599_v18 = vpop.f32.mrb[69].mxu1  ;;  %v1918_v54 = vmul.f32 0.7978846, %v1790_v37  ;;  %v1792_v40 = vadd.f32 %v7422_v23, %v7421_v30  ;;  %v7423_v20 = vld [vmem:[#allocation22_spill] sm:$0xff] }
 0x341   :  { %v3875_v47 = vpop.eup %3874  ;;  %v2297_v34 = vmul.f32 %v2169_v10, %v6511_v33  ;;  %3888 = vtanh.f32 %v1925_v29  ;;  %v1922_v50 = vmul.f32 0.7978846, %v1794_v43  ;;  %v6602_v48 = vpop.f32.mrb[70].mxu1  ;;  %2806 = vmatprep.mubr.bf16.mxu0 %v2407_v57  ;;  %v1796_v19 = vadd.f32 %v7424_v9, %v7423_v20 }
 0x342   :  { %v3877_v22 = vpop.eup %3876  ;;  %v2301_v46 = vmul.f32 %v2173_v35, %v6518_v7  ;;  %v2166_v12 = vadd.f32 1.0, %v3875_v47  ;;  %v6609_v32 = vpop.f32.mrb[71].mxu1  ;;  %3890 = vtanh.f32 %v1918_v54  ;;  %v6612_v29 = vmul.f32 0.5, %v7423_v20 }
 0x343   :  { %v3879_v17 = vpop.eup %3878  ;;  %v2170_v33 = vadd.f32 1.0, %v3877_v22  ;;  %v6615_v10 = vmul.f32 0.5, %v6256_v6  ;;  %3892 = vtanh.f32 %v1922_v50  ;;  %v1920_v47 = vmul.f32 0.7978846, %v1792_v40 }
 0x344   :  { %v3881_v37 = vpop.eup %3880  ;;  %v2409_v7 = vpack.c.bf16 %v2301_v46, %v2297_v34  ;;  %v2294_v43 = vmul.f32 %v2166_v12, %v6531_v38  ;;  %v2168_v57 = vadd.f32 1.0, %v3879_v17  ;;  %v1924_v23 = vmul.f32 0.7978846, %v1796_v19 }
 0x345   :  { %v2298_v35 = vmul.f32 %v2170_v33, %v6534_v41  ;;  %v2172_v30 = vadd.f32 1.0, %v3881_v37  ;;  %v6621_v22 = vmul.f32 0.5, %v6351_v53  ;;  %v1799_v20 = vadd.f32 %v6317_v58, %v6256_v6  ;;  %v7425_v33 = vld [vmem:[#allocation17_spill] sm:$0xff] }
 0x346   :  { %2967 = vmatprep.mubr.bf16.mxu1 %v2409_v7  ;;  %v2296_v54 = vmul.f32 %v2168_v57, %v6541_v25  ;;  %v1803_v34 = vadd.f32 %v6391_v0, %v6351_v53  ;;  %v3883_v38 = vpop.eup %3882  ;;  %3894 = vtanh.f32 %v1920_v47  ;;  %v6629_v41 = vmul.f32 0.5, %v6273_v59  ;;  %v7428_v47 = vld [vmem:[#allocation9_spill] sm:$0xff] }
 0x347   :  { %v2406_v17 = vpack.c.bf16 %v2298_v35, %v2294_v43  ;;  %v2300_v50 = vmul.f32 %v2172_v30, %v6546_v2  ;;  %v3885_v46 = vpop.eup %3884  ;;  %v2175_v12 = vadd.f32 1.0, %v3883_v38  ;;  %3896 = vtanh.f32 %v1924_v23 }
 0x348   :  { %v1927_v25 = vmul.f32 0.7978846, %v1799_v20  ;;  %v1931_v40 = vmul.f32 0.7978846, %v1803_v34  ;;  %v2179_v19 = vadd.f32 1.0, %v3885_v46  ;;  %v1801_v6 = vadd.f32 %v6320_v60, %v6273_v59 }
 0x349   :  { %2807 = vmatmul.mubr.bf16.gmra.mrb[112].mxu0 %v2406_v17  ;;  %v2408_v9 = vpack.c.bf16 %v2300_v50, %v2296_v54  ;;  %v1805_v0 = vadd.f32 %v6397_v14, %v6355_v55  ;;  %v2303_v53 = vmul.f32 %v2175_v12, %v6552_v56  ;;  %v6637_v2 = vmul.f32 0.5, %v6355_v55  ;;  %v7426_v14 = vld [vmem:[#allocation14_spill] sm:$0xff]  ;;  %v7427_v56 = vld [vmem:[#allocation19_spill] sm:$0xff] }
 0x34a   :  { %v3887_v58 = vpop.eup %3886  ;;  %3898 = vtanh.f32 %v1927_v25  ;;  %v6640_v37 = vmul.f32 0.5, %v7425_v33  ;;  %v2307_v43 = vmul.f32 %v2179_v19, %v6556_v61  ;;  %v1929_v59 = vmul.f32 0.7978846, %v1801_v6  ;;  %v7429_v25 = vld [vmem:[#allocation12_spill] sm:$0xff] }
 0x34b   :  { %v3889_v7 = vpop.eup %3888  ;;  %2968 = vmatmul.mubr.bf16.gmra.mrb[112].mxu1 %v2408_v9  ;;  %v2177_v57 = vadd.f32 1.0, %v3887_v58  ;;  %3900 = vtanh.f32 %v1931_v40  ;;  %v1933_v35 = vmul.f32 0.7978846, %v1805_v0  ;;  %v1798_v30 = vadd.f32 %v7426_v14, %v7425_v33  ;;  %v7430_v9 = vld [vmem:[#allocation23_spill] sm:$0xff]  ;;  %v7431_v6 = vld [vmem:[#allocation36_spill] sm:$0xff]  ;;  %v7432_v58 = vld [vmem:[#allocation26_spill] sm:$0xff] }
 0x34c   :  { %v2181_v60 = vadd.f32 1.0, %v3889_v7  ;;  %v1802_v23 = vadd.f32 %v7428_v47, %v7427_v56  ;;  %v3891_v55 = vpop.eup %3890  ;;  %v2411_v54 = vpack.c.bf16 %v2307_v43, %v2303_v53  ;;  %3902 = vtanh.f32 %v1929_v59 }
 0x34d   :  { %v2305_v20 = vmul.f32 %v2177_v57, %v6565_v4  ;;  %v6649_v34 = vmul.f32 0.5, %v7427_v56  ;;  %v3893_v61 = vpop.eup %3892  ;;  %v2174_v17 = vadd.f32 1.0, %v3891_v55  ;;  %3904 = vtanh.f32 %v1933_v35 }
 0x34e   :  { %v2309_v38 = vmul.f32 %v2181_v60, %v6575_v28  ;;  %v1926_v50 = vmul.f32 0.7978846, %v1798_v30  ;;  %2814 = vmatprep.mubr.bf16.mxu0 %v2411_v54  ;;  %v2178_v46 = vadd.f32 1.0, %v3893_v61  ;;  %v1930_v12 = vmul.f32 0.7978846, %v1802_v23 }
 0x34f   :  { %v6653_v40 = vmul.f32 0.5, %v7429_v25  ;;  %v1800_v19 = vadd.f32 %v7430_v9, %v7429_v25  ;;  %v6658_v0 = vmul.f32 0.5, %v7431_v6  ;;  %v1804_v28 = vadd.f32 %v7432_v58, %v7431_v6 }
 0x350   :  { %v2413_v4 = vpack.c.bf16 %v2309_v38, %v2305_v20  ;;  %3906 = vtanh.f32 %v1926_v50  ;;  %v3895_v53 = vpop.eup %3894  ;;  %v2302_v33 = vmul.f32 %v2174_v17, %v6578_v62  ;;  %v2306_v7 = vmul.f32 %v2178_v46, %v6586_v31 }
 0x351   :  { %3908 = vtanh.f32 %v1930_v12  ;;  %v1928_v43 = vmul.f32 0.7978846, %v1800_v19  ;;  %v3897_v57 = vpop.eup %3896  ;;  %v2176_v59 = vadd.f32 1.0, %v3895_v53  ;;  %v1932_v60 = vmul.f32 0.7978846, %v1804_v28  ;;  %v6669_v30 = vpop.f32.mrb[72].mxu0 }
 0x352   :  { %2975 = vmatprep.mubr.bf16.mxu1 %v2413_v4  ;;  %v6665_v35 = vmul.f32 0.5, %v6368_v13  ;;  %v1807_v14 = vadd.f32 %v6406_v24, %v6368_v13  ;;  %v2410_v56 = vpack.c.bf16 %v2306_v7, %v2302_v33  ;;  %v2180_v47 = vadd.f32 1.0, %v3897_v57  ;;  %v6673_v31 = vpop.f32.mrb[73].mxu0 }
 0x353   :  { %3910 = vtanh.f32 %v1928_v43  ;;  %v1811_v62 = vadd.f32 %v6515_v5, %v6475_v21  ;;  %v2304_v55 = vmul.f32 %v2176_v59, %v6597_v36  ;;  %v6677_v54 = vmul.f32 0.5, %v6475_v21  ;;  %v6679_v61 = vpop.f32.mrb[72].mxu1  ;;  %v6681_v13 = vpop.f32.mrb[74].mxu0 }
 0x354   :  { %v3899_v23 = vpop.eup %3898  ;;  %3912 = vtanh.f32 %v1932_v60  ;;  %v1935_v20 = vmul.f32 0.7978846, %v1807_v14  ;;  %2815 = vmatmul.mubr.bf16.gmra.mrb[116].mxu0 %v2410_v56  ;;  %v2308_v38 = vmul.f32 %v2180_v47, %v6612_v29  ;;  %v6685_v50 = vmul.f32 0.5, %v6376_v15  ;;  %v6687_v46 = vpop.f32.mrb[73].mxu1 }
 0x355   :  { %v3901_v24 = vpop.eup %3900  ;;  %v2183_v17 = vadd.f32 1.0, %v3899_v23  ;;  %v1939_v5 = vmul.f32 0.7978846, %v1811_v62  ;;  %v6689_v36 = vpop.f32.mrb[75].mxu0  ;;  %v1809_v12 = vadd.f32 %v6409_v42, %v6376_v15  ;;  %v1813_v25 = vadd.f32 %v6525_v51, %v6479_v8 }
 0x356   :  { %v2187_v21 = vadd.f32 1.0, %v3901_v24  ;;  %3914 = vtanh.f32 %v1935_v20  ;;  %v6695_v9 = vpop.f32.mrb[74].mxu1  ;;  %v3903_v29 = vpop.eup %3902  ;;  %v2412_v19 = vpack.c.bf16 %v2308_v38, %v2304_v55  ;;  %v6699_v6 = vmul.f32 0.5, %v6479_v8 }
 0x357   :  { %v2311_v4 = vmul.f32 %v2183_v17, %v6615_v10  ;;  %3916 = vtanh.f32 %v1939_v5  ;;  %v6701_v58 = vpop.f32.mrb[75].mxu1  ;;  %v3905_v28 = vpop.eup %3904  ;;  %v2185_v33 = vadd.f32 1.0, %v3903_v29  ;;  %v1937_v15 = vmul.f32 0.7978846, %v1809_v12  ;;  %v7434_v12 = vld [vmem:[#allocation37_spill] sm:$0xff]  ;;  %v7436_v29 = vld [vmem:[#allocation24_spill] sm:$0xff] }
 0x358   :  { %v2315_v53 = vmul.f32 %v2187_v21, %v6621_v22  ;;  %v1941_v42 = vmul.f32 0.7978846, %v1813_v25  ;;  %2976 = vmatmul.mubr.bf16.gmra.mrb[116].mxu1 %v2412_v19  ;;  %v2189_v51 = vadd.f32 1.0, %v3905_v28  ;;  %v6705_v7 = vmul.f32 0.5, %v6360_v44  ;;  %v7435_v25 = vld [vmem:[#allocation32_spill] sm:$0xff] }
 0x359   :  { %v1806_v10 = vadd.f32 %v6400_v3, %v6360_v44  ;;  %v1810_v8 = vadd.f32 %v6453_v16, %v6430_v45  ;;  %v2313_v59 = vmul.f32 %v2185_v33, %v6629_v41  ;;  %3918 = vtanh.f32 %v1937_v15  ;;  %v7433_v16 = vld [vmem:[#allocation42_spill] sm:$0xff] }
 0x35a   :  { %v3907_v43 = vpop.eup %3906  ;;  %v2415_v57 = vpack.c.bf16 %v2315_v53, %v2311_v4  ;;  %v6713_v22 = vmul.f32 0.5, %v6430_v45  ;;  %v2317_v14 = vmul.f32 %v2189_v51, %v6637_v2  ;;  %3920 = vtanh.f32 %v1941_v42  ;;  %v7438_v53 = vld [vmem:[#allocation4_spill] sm:$0xff] }
 0x35b   :  { %v3909_v60 = vpop.eup %3908  ;;  %v2182_v56 = vadd.f32 1.0, %v3907_v43  ;;  %v1934_v47 = vmul.f32 0.7978846, %v1806_v10  ;;  %v1938_v44 = vmul.f32 0.7978846, %v1810_v8  ;;  %v6717_v3 = vmul.f32 0.5, %v6364_v63 }
 0x35c   :  { %2822 = vmatprep.mubr.bf16.mxu0 %v2415_v57  ;;  %v2186_v62 = vadd.f32 1.0, %v3909_v60  ;;  %v1808_v23 = vadd.f32 %v7433_v16, %v6364_v63  ;;  %v2417_v55 = vpack.c.bf16 %v2317_v14, %v2313_v59  ;;  %v1812_v2 = vadd.f32 %v6486_v49, %v6439_v26  ;;  %v6733_v49 = vld [vmem:[%s6994_s6] ss:$0 sm:$0xff]  ;;  %v7439_v8 = vld [vmem:[#allocation43_spill] sm:$0xff]  ;;  %v7440_v43 = vld [vmem:[#allocation5_spill] sm:$0xff] }
 0x35d   :  { %v3911_v41 = vpop.eup %3910  ;;  %v2310_v45 = vmul.f32 %v2182_v56, %v6640_v37  ;;  %3922 = vtanh.f32 %v1934_v47  ;;  %v3323_v63 = vadd.f32 %v7434_v12, %v6461_v27  ;;  %v3435_v19 = vadd.f32 %v7436_v29, %v7435_v25  ;;  %v7441_v47 = vld [vmem:[#allocation18_spill] sm:$0xff] }
 0x35e   :  { %v3913_v20 = vpop.eup %3912  ;;  %v2314_v24 = vmul.f32 %v2186_v62, %v6649_v34  ;;  %v2184_v38 = vadd.f32 1.0, %v3911_v41  ;;  %3924 = vtanh.f32 %v1938_v44  ;;  %v1936_v17 = vmul.f32 0.7978846, %v1808_v23  ;;  %2983 = vmatprep.mubr.bf16.mxu1 %v2417_v55  ;;  %v7437_v34 = vld [vmem:[#allocation31_spill] sm:$0xff] }
 0x35f   :  { %v2188_v5 = vadd.f32 1.0, %v3913_v20  ;;  %v1940_v21 = vmul.f32 0.7978846, %v1812_v2  ;;  %v3326_v33 = vadd.f32 %v7438_v53, %v7437_v34  ;;  %v2874_v51 = vadd.f32 %v3435_v19, %v3323_v63  ;;  %v3142_v63 = vld [vmem:[%s6988_s0 + $0x20] sm:$0xff] }
 0x360   :  { %v3915_v37 = vpop.eup %3914  ;;  %v2414_v4 = vpack.c.bf16 %v2314_v24, %v2310_v45  ;;  %v2312_v28 = vmul.f32 %v2184_v38, %v6653_v40  ;;  %3926 = vtanh.f32 %v1936_v17  ;;  %v3138_v40 = vld [vmem:[%s6988_s0] sm:$0xff]  ;;  %v3438_v57 = vadd.f32 %v7440_v43, %v7439_v8 }
 0x361   :  { %v3917_v15 = vpop.eup %3916  ;;  %v2316_v42 = vmul.f32 %v2188_v5, %v6658_v0  ;;  %v2191_v27 = vadd.f32 1.0, %v3915_v37  ;;  %3928 = vtanh.f32 %v1940_v21  ;;  %v3329_v59 = vadd.f32 %v6580_v11, %v6571_v52 }
 0x362   :  { %2823 = vmatmul.mubr.bf16.gmra.mrb[120].mxu0 %v2414_v4  ;;  %v2195_v10 = vadd.f32 1.0, %v3917_v15  ;;  %v3441_v60 = vadd.f32 %v6599_v18, %v6592_v1  ;;  %v3106_v56 = vadd.f32 %v6733_v49, %v2874_v51  ;;  %v3332_v62 = vadd.f32 %v7441_v47, %v6583_v39  ;;  %v3139_v18 = vld [vmem:[%s6988_s0 + $0x8] sm:$0xff]  ;;  %v3140_v39 = vld [vmem:[%s6988_s0 + $0x10] sm:$0xff] }
 0x363   :  { %v2416_v14 = vpack.c.bf16 %v2316_v42, %v2312_v28  ;;  %v2319_v0 = vmul.f32 %v2191_v27, %v6665_v35  ;;  %v3919_v44 = vpop.eup %3918  ;;  %v2877_v23 = vadd.f32 %v3438_v57, %v3326_v33  ;;  %v3444_v55 = vadd.f32 %v6609_v32, %v6602_v48 }
 0x364   :  { %v2323_v16 = vmul.f32 %v2195_v10, %v6677_v54  ;;  %v2882_v41 = vadd.f32 %v3441_v60, %v3329_v59  ;;  %v3921_v52 = vpop.eup %3920  ;;  %v2193_v11 = vadd.f32 1.0, %v3919_v44  ;;  %v3170_v1 = vadd.f32 %v3138_v40, %v3106_v56 }
 0x365   :  { %2984 = vmatmul.mubr.bf16.gmra.mrb[120].mxu1 %v2416_v14  ;;  %v3335_v35 = vadd.f32 %v6673_v31, %v6669_v30  ;;  %v3447_v54 = vadd.f32 %v6687_v46, %v6679_v61  ;;  %v2197_v48 = vadd.f32 1.0, %v3921_v52  ;;  %v3107_v32 = vadd.f32 %v6733_v49, %v2877_v23 }
 0x366   :  { %v2419_v45 = vpack.c.bf16 %v2323_v16, %v2319_v0  ;;  %v3108_v2 = vadd.f32 %v6733_v49, %v2882_v41  ;;  %v2321_v24 = vmul.f32 %v2193_v11, %v6685_v50  ;;  %3202 = vst [vmem:[%s6995_s7] sm:$0xff] %v3170_v1  ;;  %v2885_v38 = vadd.f32 %v3444_v55, %v3332_v62  ;;  %v3339_v31 = vpop.f32.mrb[76].mxu0  ;;  %v3141_v50 = vld [vmem:[%s6988_s0 + $0x18] sm:$0xff]  ;;  %v3144_v62 = vld [vmem:[%s6988_s0 + $0x30] sm:$0xff] }
 0x367   :  { %v3923_v20 = vpop.eup %3922  ;;  %v2890_v17 = vadd.f32 %v3447_v54, %v3335_v35  ;;  %v3338_v30 = vadd.f32 %v6689_v36, %v6681_v13  ;;  %v2325_v46 = vmul.f32 %v2197_v48, %v6699_v6  ;;  %v3171_v21 = vadd.f32 %v3139_v18, %v3107_v32  ;;  %v3340_v25 = vpop.f32.mrb[77].mxu0  ;;  %v3145_v55 = vld [vmem:[%s6988_s0 + $0x38] sm:$0xff] }
 0x368   :  { %v3925_v61 = vpop.eup %3924  ;;  %2830 = vmatprep.mubr.bf16.mxu0 %v2419_v45  ;;  %v2190_v5 = vadd.f32 1.0, %v3923_v20  ;;  %v3172_v12 = vadd.f32 %v3140_v39, %v3108_v2  ;;  %v3109_v13 = vadd.f32 %v6733_v49, %v2885_v38  ;;  %v3450_v6 = vadd.f32 %v6701_v58, %v6695_v9  ;;  %v3451_v19 = vpop.f32.mrb[76].mxu1 }
 0x369   :  { %v2194_v29 = vadd.f32 1.0, %v3925_v61  ;;  %v3110_v36 = vadd.f32 %v6733_v49, %v2890_v17  ;;  %v3342_v37 = vpop.f32.mrb[78].mxu0  ;;  %v2421_v28 = vpack.c.bf16 %v2325_v46, %v2321_v24  ;;  %v1300_v53 = vmul.f32 0.5, %v6439_v26  ;;  %3203 = vst [vmem:[%s6995_s7 + $0x8] sm:$0xff] %v3171_v21  ;;  %v3452_v15 = vpop.f32.mrb[77].mxu1  ;;  %v3147_v46 = vld [vmem:[%s6988_s0 + $0x48] sm:$0xff] }
 0x36a   :  { %v3927_v4 = vpop.eup %3926  ;;  %v2318_v34 = vmul.f32 %v2190_v5, %v6705_v7  ;;  %3204 = vst [vmem:[%s6995_s7 + $0x10] sm:$0xff] %v3172_v12  ;;  %v3341_v33 = vadd.f32 %v3340_v25, %v3339_v31  ;;  %v3343_v42 = vpop.f32.mrb[79].mxu0  ;;  %v3173_v51 = vadd.f32 %v3141_v50, %v3109_v13  ;;  %v2893_v40 = vadd.f32 %v3450_v6, %v3338_v30  ;;  %v3146_v30 = vld [vmem:[%s6988_s0 + $0x40] sm:$0xff] }
 0x36b   :  { %v3929_v9 = vpop.eup %3928  ;;  %v2322_v58 = vmul.f32 %v2194_v29, %v6713_v22  ;;  %v2192_v27 = vadd.f32 1.0, %v3927_v4  ;;  %v3174_v10 = vadd.f32 %v3142_v63, %v3110_v36  ;;  %v3454_v7 = vpop.f32.mrb[78].mxu1  ;;  %2991 = vmatprep.mubr.bf16.mxu1 %v2421_v28  ;;  %v3453_v8 = vadd.f32 %v3452_v15, %v3451_v19  ;;  %v3143_v22 = vld [vmem:[%s6988_s0 + $0x28] sm:$0xff] }
 0x36c   :  { %v2196_v26 = vadd.f32 1.0, %v3929_v9  ;;  %v3344_v43 = vadd.f32 %v3343_v42, %v3342_v37  ;;  %v3455_v57 = vpop.f32.mrb[79].mxu1  ;;  %3205 = vst [vmem:[%s6995_s7 + $0x18] sm:$0xff] %v3173_v51  ;;  %v3111_v56 = vadd.f32 %v6733_v49, %v2893_v40  ;;  %v3149_v9 = vld [vmem:[%s6988_s0 + $0x58] sm:$0xff] }
 0x36d   :  { %v2418_v59 = vpack.c.bf16 %v2322_v58, %v2318_v34  ;;  %3206 = vst [vmem:[%s6995_s7 + $0x20] sm:$0xff] %v3174_v10  ;;  %v3456_v60 = vadd.f32 %v3455_v57, %v3454_v7  ;;  %v2320_v14 = vmul.f32 %v2192_v27, %v6717_v3  ;;  %v2898_v47 = vadd.f32 %v3453_v8, %v3341_v33  ;;  %v3148_v33 = vld [vmem:[%s6988_s0 + $0x50] sm:$0xff] }
 0x36e   :  { %v2324_v0 = vmul.f32 %v2196_v26, %v1300_v53  ;;  %v3175_v23 = vadd.f32 %v3143_v22, %v3111_v56 }
 0x36f   :  { %2831 = vmatmul.mubr.bf16.gmra.mrb[124].mxu0 %v2418_v59  ;;  %v2901_v44 = vadd.f32 %v3456_v60, %v3344_v43  ;;  %v3112_v41 = vadd.f32 %v6733_v49, %v2898_v47  ;;  %v3150_v47 = vld [vmem:[%s6988_s0 + $0x60] sm:$0xff] }
 0x370   :  { %v2420_v16 = vpack.c.bf16 %v2324_v0, %v2320_v14  ;;  %3207 = vst [vmem:[%s6995_s7 + $0x28] sm:$0xff] %v3175_v23 }
 0x371   :  { %v3113_v3 = vadd.f32 %v6733_v49, %v2901_v44  ;;  %v3176_v52 = vadd.f32 %v3144_v62, %v3112_v41 }
 0x372   :  { %2992 = vmatmul.mubr.bf16.gmra.mrb[124].mxu1 %v2420_v16  ;;  %v3151_v16 = vld [vmem:[%s6988_s0 + $0x68] sm:$0xff] }
 0x373   :  { %v3177_v11 = vadd.f32 %v3145_v55, %v3113_v3  ;;  %3208 = vst [vmem:[%s6995_s7 + $0x30] sm:$0xff] %v3176_v52 }
 0x375   :  { %3209 = vst [vmem:[%s6995_s7 + $0x38] sm:$0xff] %v3177_v11 }
 0x37b   :  { %v3345_v1 = vpop.f32.mrb[80].mxu0 }
 0x37c   :  { %v3346_v18 = vpop.f32.mrb[81].mxu0 }
 0x37d   :  { %v3457_v39 = vpop.f32.mrb[80].mxu1  ;;  %v3347_v35 = vadd.f32 %v3346_v18, %v3345_v1  ;;  %v3348_v54 = vpop.f32.mrb[82].mxu0 }
 0x37e   :  { %v3458_v45 = vpop.f32.mrb[81].mxu1  ;;  %v3349_v48 = vpop.f32.mrb[83].mxu0 }
 0x37f   :  { %v3459_v32 = vadd.f32 %v3458_v45, %v3457_v39  ;;  %v3460_v2 = vpop.f32.mrb[82].mxu1  ;;  %v3350_v20 = vadd.f32 %v3349_v48, %v3348_v54 }
 0x380   :  { %v3461_v24 = vpop.f32.mrb[83].mxu1 }
 0x381   :  { %v2906_v38 = vadd.f32 %v3459_v32, %v3347_v35  ;;  %v3462_v17 = vadd.f32 %v3461_v24, %v3460_v2  ;;  %v3152_v24 = vld [vmem:[%s6988_s0 + $0x70] sm:$0xff] }
 0x383   :  { %v3114_v31 = vadd.f32 %v6733_v49, %v2906_v38  ;;  %v2909_v61 = vadd.f32 %v3462_v17, %v3350_v20 }
 0x385   :  { %v3178_v5 = vadd.f32 %v3146_v30, %v3114_v31  ;;  %v3115_v21 = vadd.f32 %v6733_v49, %v2909_v61  ;;  %v3153_v30 = vld [vmem:[%s6988_s0 + $0x78] sm:$0xff] }
 0x387   :  { %3210 = vst [vmem:[%s6995_s7 + $0x40] sm:$0xff] %v3178_v5  ;;  %v3179_v12 = vadd.f32 %v3147_v46, %v3115_v21 }
 0x389   :  { %3211 = vst [vmem:[%s6995_s7 + $0x48] sm:$0xff] %v3179_v12 }
 0x390   :  { %v3351_v50 = vpop.f32.mrb[84].mxu0 }
 0x391   :  { %v3352_v63 = vpop.f32.mrb[85].mxu0 }
 0x392   :  { %v3353_v29 = vadd.f32 %v3352_v63, %v3351_v50  ;;  %v3354_v13 = vpop.f32.mrb[86].mxu0 }
 0x393   :  { %v3463_v25 = vpop.f32.mrb[84].mxu1  ;;  %v3355_v6 = vpop.f32.mrb[87].mxu0 }
 0x394   :  { %v3464_v36 = vpop.f32.mrb[85].mxu1  ;;  %v3356_v4 = vadd.f32 %v3355_v6, %v3354_v13 }
 0x395   :  { %v3465_v19 = vadd.f32 %v3464_v36, %v3463_v25  ;;  %v3466_v37 = vpop.f32.mrb[86].mxu1 }
 0x396   :  { %v3467_v28 = vpop.f32.mrb[87].mxu1 }
 0x397   :  { %v2914_v34 = vadd.f32 %v3465_v19, %v3353_v29  ;;  %v3468_v53 = vadd.f32 %v3467_v28, %v3466_v37  ;;  %v3154_v28 = vld [vmem:[%s6988_s0 + $0x80] sm:$0xff] }
 0x399   :  { %v3116_v15 = vadd.f32 %v6733_v49, %v2914_v34  ;;  %v2917_v42 = vadd.f32 %v3468_v53, %v3356_v4 }
 0x39b   :  { %v3180_v58 = vadd.f32 %v3148_v33, %v3116_v15  ;;  %v3117_v27 = vadd.f32 %v6733_v49, %v2917_v42  ;;  %v3155_v33 = vld [vmem:[%s6988_s0 + $0x88] sm:$0xff] }
 0x39d   :  { %3212 = vst [vmem:[%s6995_s7 + $0x50] sm:$0xff] %v3180_v58  ;;  %v3181_v51 = vadd.f32 %v3149_v9, %v3117_v27  ;;  %v3357_v10 = vpop.f32.mrb[88].mxu0 }
 0x39e   :  { %v3358_v7 = vpop.f32.mrb[89].mxu0 }
 0x39f   :  { %3213 = vst [vmem:[%s6995_s7 + $0x58] sm:$0xff] %v3181_v51  ;;  %v3469_v26 = vpop.f32.mrb[88].mxu1  ;;  %v3359_v40 = vadd.f32 %v3358_v7, %v3357_v10  ;;  %v3360_v8 = vpop.f32.mrb[90].mxu0 }
 0x3a0   :  { %v3470_v43 = vpop.f32.mrb[89].mxu1  ;;  %v3361_v57 = vpop.f32.mrb[91].mxu0 }
 0x3a1   :  { %v3471_v59 = vadd.f32 %v3470_v43, %v3469_v26  ;;  %v3472_v22 = vpop.f32.mrb[90].mxu1  ;;  %v3362_v60 = vadd.f32 %v3361_v57, %v3360_v8 }
 0x3a2   :  { %v3473_v14 = vpop.f32.mrb[91].mxu1 }
 0x3a3   :  { %v2922_v0 = vadd.f32 %v3471_v59, %v3359_v40  ;;  %v3474_v56 = vadd.f32 %v3473_v14, %v3472_v22  ;;  %v3156_v14 = vld [vmem:[%s6988_s0 + $0x90] sm:$0xff] }
 0x3a5   :  { %v3118_v62 = vadd.f32 %v6733_v49, %v2922_v0  ;;  %v2925_v44 = vadd.f32 %v3474_v56, %v3362_v60 }
 0x3a7   :  { %v3182_v23 = vadd.f32 %v3150_v47, %v3118_v62  ;;  %v3119_v41 = vadd.f32 %v6733_v49, %v2925_v44  ;;  %v3157_v47 = vld [vmem:[%s6988_s0 + $0x98] sm:$0xff] }
 0x3a9   :  { %3214 = vst [vmem:[%s6995_s7 + $0x60] sm:$0xff] %v3182_v23  ;;  %v3183_v55 = vadd.f32 %v3151_v16, %v3119_v41 }
 0x3aa   :  { %v3363_v3 = vpop.f32.mrb[92].mxu0 }
 0x3ab   :  { %v3364_v52 = vpop.f32.mrb[93].mxu0  ;;  %3215 = vst [vmem:[%s6995_s7 + $0x68] sm:$0xff] %v3183_v55 }
 0x3ac   :  { %v3475_v11 = vpop.f32.mrb[92].mxu1  ;;  %v3365_v1 = vadd.f32 %v3364_v52, %v3363_v3  ;;  %v3366_v18 = vpop.f32.mrb[94].mxu0 }
 0x3ad   :  { %v3476_v39 = vpop.f32.mrb[93].mxu1  ;;  %v3367_v35 = vpop.f32.mrb[95].mxu0 }
 0x3ae   :  { %v3477_v54 = vadd.f32 %v3476_v39, %v3475_v11  ;;  %v3478_v45 = vpop.f32.mrb[94].mxu1  ;;  %v3368_v48 = vadd.f32 %v3367_v35, %v3366_v18 }
 0x3af   :  { %v3479_v32 = vpop.f32.mrb[95].mxu1 }
 0x3b0   :  { %v2930_v2 = vadd.f32 %v3477_v54, %v3365_v1  ;;  %v3480_v20 = vadd.f32 %v3479_v32, %v3478_v45  ;;  %v3158_v32 = vld [vmem:[%s6988_s0 + $0xa0] sm:$0xff] }
 0x3b2   :  { %v3120_v38 = vadd.f32 %v6733_v49, %v2930_v2  ;;  %v2933_v17 = vadd.f32 %v3480_v20, %v3368_v48 }
 0x3b4   :  { %v3184_v31 = vadd.f32 %v3152_v24, %v3120_v38  ;;  %v3121_v61 = vadd.f32 %v6733_v49, %v2933_v17  ;;  %v3159_v24 = vld [vmem:[%s6988_s0 + $0xa8] sm:$0xff] }
 0x3b6   :  { %3216 = vst [vmem:[%s6995_s7 + $0x70] sm:$0xff] %v3184_v31  ;;  %v3185_v46 = vadd.f32 %v3153_v30, %v3121_v61  ;;  %v3369_v5 = vpop.f32.mrb[96].mxu0 }
 0x3b7   :  { %v3370_v21 = vpop.f32.mrb[97].mxu0 }
 0x3b8   :  { %3217 = vst [vmem:[%s6995_s7 + $0x78] sm:$0xff] %v3185_v46  ;;  %v3371_v12 = vadd.f32 %v3370_v21, %v3369_v5  ;;  %v3372_v50 = vpop.f32.mrb[98].mxu0 }
 0x3b9   :  { %v3373_v63 = vpop.f32.mrb[99].mxu0 }
 0x3ba   :  { %v3481_v25 = vpop.f32.mrb[96].mxu1  ;;  %v3374_v29 = vadd.f32 %v3373_v63, %v3372_v50 }
 0x3bb   :  { %v3482_v13 = vpop.f32.mrb[97].mxu1 }
 0x3bc   :  { %v3483_v36 = vadd.f32 %v3482_v13, %v3481_v25  ;;  %v3484_v6 = vpop.f32.mrb[98].mxu1 }
 0x3bd   :  { %v3485_v19 = vpop.f32.mrb[99].mxu1 }
 0x3be   :  { %v2938_v37 = vadd.f32 %v3483_v36, %v3371_v12  ;;  %v3486_v4 = vadd.f32 %v3485_v19, %v3484_v6  ;;  %v3160_v19 = vld [vmem:[%s6988_s0 + $0xb0] sm:$0xff] }
 0x3c0   :  { %v3122_v34 = vadd.f32 %v6733_v49, %v2938_v37  ;;  %v2941_v53 = vadd.f32 %v3486_v4, %v3374_v29 }
 0x3c2   :  { %v3186_v15 = vadd.f32 %v3154_v28, %v3122_v34  ;;  %v3123_v42 = vadd.f32 %v6733_v49, %v2941_v53  ;;  %v3161_v28 = vld [vmem:[%s6988_s0 + $0xb8] sm:$0xff] }
 0x3c4   :  { %v3375_v9 = vpop.f32.mrb[100].mxu0  ;;  %3218 = vst [vmem:[%s6995_s7 + $0x80] sm:$0xff] %v3186_v15  ;;  %v3187_v58 = vadd.f32 %v3155_v33, %v3123_v42 }
 0x3c5   :  { %v3376_v27 = vpop.f32.mrb[101].mxu0 }
 0x3c6   :  { %v3377_v51 = vadd.f32 %v3376_v27, %v3375_v9  ;;  %v3378_v10 = vpop.f32.mrb[102].mxu0  ;;  %3219 = vst [vmem:[%s6995_s7 + $0x88] sm:$0xff] %v3187_v58 }
 0x3c7   :  { %v3379_v7 = vpop.f32.mrb[103].mxu0  ;;  %v3487_v26 = vpop.f32.mrb[100].mxu1 }
 0x3c8   :  { %v3380_v40 = vadd.f32 %v3379_v7, %v3378_v10  ;;  %v3488_v8 = vpop.f32.mrb[101].mxu1 }
 0x3c9   :  { %v3489_v43 = vadd.f32 %v3488_v8, %v3487_v26  ;;  %v3490_v57 = vpop.f32.mrb[102].mxu1 }
 0x3ca   :  { %v3491_v59 = vpop.f32.mrb[103].mxu1 }
 0x3cb   :  { %v2946_v22 = vadd.f32 %v3489_v43, %v3377_v51  ;;  %v3492_v60 = vadd.f32 %v3491_v59, %v3490_v57  ;;  %v3162_v59 = vld [vmem:[%s6988_s0 + $0xc0] sm:$0xff] }
 0x3cd   :  { %v3124_v0 = vadd.f32 %v6733_v49, %v2946_v22  ;;  %v2949_v56 = vadd.f32 %v3492_v60, %v3380_v40 }
 0x3cf   :  { %v3188_v62 = vadd.f32 %v3156_v14, %v3124_v0  ;;  %v3125_v44 = vadd.f32 %v6733_v49, %v2949_v56  ;;  %v3163_v14 = vld [vmem:[%s6988_s0 + $0xc8] sm:$0xff] }
 0x3d1   :  { %3220 = vst [vmem:[%s6995_s7 + $0x90] sm:$0xff] %v3188_v62  ;;  %v3189_v16 = vadd.f32 %v3157_v47, %v3125_v44 }
 0x3d3   :  { %3221 = vst [vmem:[%s6995_s7 + $0x98] sm:$0xff] %v3189_v16 }
 0x3f8   :  { %v3381_v23 = vpop.f32.mrb[104].mxu0 }
 0x3f9   :  { %v3382_v41 = vpop.f32.mrb[105].mxu0 }
 0x3fa   :  { %v3383_v55 = vadd.f32 %v3382_v41, %v3381_v23  ;;  %v3384_v3 = vpop.f32.mrb[106].mxu0 }
 0x3fb   :  { %v3385_v11 = vpop.f32.mrb[107].mxu0 }
 0x3fc   :  { %v3493_v52 = vpop.f32.mrb[104].mxu1  ;;  %v3386_v18 = vadd.f32 %v3385_v11, %v3384_v3 }
 0x3fd   :  { %v3494_v1 = vpop.f32.mrb[105].mxu1 }
 0x3fe   :  { %v3495_v39 = vadd.f32 %v3494_v1, %v3493_v52  ;;  %v3496_v35 = vpop.f32.mrb[106].mxu1 }
 0x3ff   :  { %v3497_v54 = vpop.f32.mrb[107].mxu1 }
 0x400   :  { %v2954_v45 = vadd.f32 %v3495_v39, %v3383_v55  ;;  %v3498_v48 = vadd.f32 %v3497_v54, %v3496_v35  ;;  %v3164_v54 = vld [vmem:[%s6988_s0 + $0xd0] sm:$0xff] }
 0x402   :  { %v3126_v2 = vadd.f32 %v6733_v49, %v2954_v45  ;;  %v2957_v20 = vadd.f32 %v3498_v48, %v3386_v18 }
 0x404   :  { %v3190_v38 = vadd.f32 %v3158_v32, %v3126_v2  ;;  %v3127_v17 = vadd.f32 %v6733_v49, %v2957_v20  ;;  %v3165_v32 = vld [vmem:[%s6988_s0 + $0xd8] sm:$0xff] }
 0x406   :  { %3222 = vst [vmem:[%s6995_s7 + $0xa0] sm:$0xff] %v3190_v38  ;;  %v3191_v30 = vadd.f32 %v3159_v24, %v3127_v17 }
 0x408   :  { %3223 = vst [vmem:[%s6995_s7 + $0xa8] sm:$0xff] %v3191_v30 }
 0x40e   :  { %v3387_v31 = vpop.f32.mrb[108].mxu0 }
 0x40f   :  { %v3388_v61 = vpop.f32.mrb[109].mxu0 }
 0x410   :  { %v3389_v5 = vadd.f32 %v3388_v61, %v3387_v31  ;;  %v3390_v21 = vpop.f32.mrb[110].mxu0 }
 0x411   :  { %v3499_v46 = vpop.f32.mrb[108].mxu1  ;;  %v3391_v50 = vpop.f32.mrb[111].mxu0 }
 0x412   :  { %v3500_v12 = vpop.f32.mrb[109].mxu1  ;;  %v3392_v29 = vadd.f32 %v3391_v50, %v3390_v21 }
 0x413   :  { %v3501_v63 = vadd.f32 %v3500_v12, %v3499_v46  ;;  %v3502_v25 = vpop.f32.mrb[110].mxu1 }
 0x414   :  { %v3503_v13 = vpop.f32.mrb[111].mxu1 }
 0x415   :  { %v2962_v36 = vadd.f32 %v3501_v63, %v3389_v5  ;;  %v3504_v6 = vadd.f32 %v3503_v13, %v3502_v25  ;;  %v3166_v13 = vld [vmem:[%s6988_s0 + $0xe0] sm:$0xff] }
 0x417   :  { %v3128_v37 = vadd.f32 %v6733_v49, %v2962_v36  ;;  %v2965_v4 = vadd.f32 %v3504_v6, %v3392_v29 }
 0x419   :  { %v3192_v34 = vadd.f32 %v3160_v19, %v3128_v37  ;;  %v3129_v53 = vadd.f32 %v6733_v49, %v2965_v4  ;;  %v3167_v19 = vld [vmem:[%s6988_s0 + $0xe8] sm:$0xff] }
 0x41b   :  { %3224 = vst [vmem:[%s6995_s7 + $0xb0] sm:$0xff] %v3192_v34  ;;  %v3193_v33 = vadd.f32 %v3161_v28, %v3129_v53 }
 0x41c   :  { %v3393_v15 = vpop.f32.mrb[112].mxu0 }
 0x41d   :  { %3225 = vst [vmem:[%s6995_s7 + $0xb8] sm:$0xff] %v3193_v33  ;;  %v3394_v42 = vpop.f32.mrb[113].mxu0 }
 0x41e   :  { %v3505_v9 = vpop.f32.mrb[112].mxu1  ;;  %v3395_v58 = vadd.f32 %v3394_v42, %v3393_v15  ;;  %v3396_v27 = vpop.f32.mrb[114].mxu0 }
 0x41f   :  { %v3506_v51 = vpop.f32.mrb[113].mxu1  ;;  %v3397_v10 = vpop.f32.mrb[115].mxu0 }
 0x420   :  { %v3507_v7 = vadd.f32 %v3506_v51, %v3505_v9  ;;  %v3508_v26 = vpop.f32.mrb[114].mxu1  ;;  %v3398_v40 = vadd.f32 %v3397_v10, %v3396_v27 }
 0x421   :  { %v3509_v8 = vpop.f32.mrb[115].mxu1 }
 0x422   :  { %v2970_v43 = vadd.f32 %v3507_v7, %v3395_v58  ;;  %v3510_v57 = vadd.f32 %v3509_v8, %v3508_v26  ;;  %v3168_v8 = vld [vmem:[%s6988_s0 + $0xf0] sm:$0xff] }
 0x424   :  { %v3130_v22 = vadd.f32 %v6733_v49, %v2970_v43  ;;  %v2973_v60 = vadd.f32 %v3510_v57, %v3398_v40 }
 0x426   :  { %v3194_v0 = vadd.f32 %v3162_v59, %v3130_v22  ;;  %v3131_v56 = vadd.f32 %v6733_v49, %v2973_v60  ;;  %v3169_v59 = vld [vmem:[%s6988_s0 + $0xf8] sm:$0xff] }
 0x427   :  { %v3399_v62 = vpop.f32.mrb[116].mxu0 }
 0x428   :  { %3226 = vst [vmem:[%s6995_s7 + $0xc0] sm:$0xff] %v3194_v0  ;;  %v3195_v47 = vadd.f32 %v3163_v14, %v3131_v56  ;;  %v3400_v44 = vpop.f32.mrb[117].mxu0 }
 0x429   :  { %v3401_v16 = vadd.f32 %v3400_v44, %v3399_v62  ;;  %v3402_v23 = vpop.f32.mrb[118].mxu0 }
 0x42a   :  { %3227 = vst [vmem:[%s6995_s7 + $0xc8] sm:$0xff] %v3195_v47  ;;  %v3403_v41 = vpop.f32.mrb[119].mxu0 }
 0x42b   :  { %v3511_v55 = vpop.f32.mrb[116].mxu1  ;;  %v3404_v3 = vadd.f32 %v3403_v41, %v3402_v23 }
 0x42c   :  { %v3512_v52 = vpop.f32.mrb[117].mxu1 }
 0x42d   :  { %v3513_v11 = vadd.f32 %v3512_v52, %v3511_v55  ;;  %v3514_v1 = vpop.f32.mrb[118].mxu1 }
 0x42e   :  { %v3515_v18 = vpop.f32.mrb[119].mxu1 }
 0x42f   :  { %v2978_v39 = vadd.f32 %v3513_v11, %v3401_v16  ;;  %v3516_v35 = vadd.f32 %v3515_v18, %v3514_v1 }
 0x431   :  { %v3132_v45 = vadd.f32 %v6733_v49, %v2978_v39  ;;  %v2981_v48 = vadd.f32 %v3516_v35, %v3404_v3 }
 0x433   :  { %v3196_v2 = vadd.f32 %v3164_v54, %v3132_v45  ;;  %v3133_v20 = vadd.f32 %v6733_v49, %v2981_v48 }
 0x435   :  { %v3405_v24 = vpop.f32.mrb[120].mxu0  ;;  %3228 = vst [vmem:[%s6995_s7 + $0xd0] sm:$0xff] %v3196_v2  ;;  %v3197_v38 = vadd.f32 %v3165_v32, %v3133_v20 }
 0x436   :  { %v3406_v17 = vpop.f32.mrb[121].mxu0 }
 0x437   :  { %v3407_v30 = vadd.f32 %v3406_v17, %v3405_v24  ;;  %v3408_v31 = vpop.f32.mrb[122].mxu0  ;;  %3229 = vst [vmem:[%s6995_s7 + $0xd8] sm:$0xff] %v3197_v38 }
 0x438   :  { %v3517_v61 = vpop.f32.mrb[120].mxu1  ;;  %v3409_v46 = vpop.f32.mrb[123].mxu0 }
 0x439   :  { %v3518_v5 = vpop.f32.mrb[121].mxu1  ;;  %v3410_v21 = vadd.f32 %v3409_v46, %v3408_v31 }
 0x43a   :  { %v3519_v12 = vadd.f32 %v3518_v5, %v3517_v61  ;;  %v3520_v50 = vpop.f32.mrb[122].mxu1 }
 0x43b   :  { %v3521_v63 = vpop.f32.mrb[123].mxu1 }
 0x43c   :  { %v2986_v25 = vadd.f32 %v3519_v12, %v3407_v30  ;;  %v3522_v29 = vadd.f32 %v3521_v63, %v3520_v50 }
 0x43e   :  { %v3134_v36 = vadd.f32 %v6733_v49, %v2986_v25  ;;  %v2989_v6 = vadd.f32 %v3522_v29, %v3410_v21 }
 0x440   :  { %v3198_v37 = vadd.f32 %v3166_v13, %v3134_v36  ;;  %v3135_v4 = vadd.f32 %v6733_v49, %v2989_v6 }
 0x442   :  { %3230 = vst [vmem:[%s6995_s7 + $0xe0] sm:$0xff] %v3198_v37  ;;  %v3199_v28 = vadd.f32 %v3167_v19, %v3135_v4  ;;  %v3411_v34 = vpop.f32.mrb[124].mxu0 }
 0x443   :  { %v3412_v53 = vpop.f32.mrb[125].mxu0 }
 0x444   :  { %3231 = vst [vmem:[%s6995_s7 + $0xe8] sm:$0xff] %v3199_v28  ;;  %v3413_v33 = vadd.f32 %v3412_v53, %v3411_v34  ;;  %v3414_v15 = vpop.f32.mrb[126].mxu0 }
 0x445   :  { %v3523_v42 = vpop.f32.mrb[124].mxu1  ;;  %v3415_v9 = vpop.f32.mrb[127].mxu0 }
 0x446   :  { %v3524_v58 = vpop.f32.mrb[125].mxu1  ;;  %v3416_v27 = vadd.f32 %v3415_v9, %v3414_v15 }
 0x447   :  { %v3525_v51 = vadd.f32 %v3524_v58, %v3523_v42  ;;  %v3526_v10 = vpop.f32.mrb[126].mxu1 }
 0x448   :  { %v3527_v7 = vpop.f32.mrb[127].mxu1 }
 0x449   :  { %v2994_v26 = vadd.f32 %v3525_v51, %v3413_v33  ;;  %v3528_v40 = vadd.f32 %v3527_v7, %v3526_v10 }
 0x44b   :  { %v3136_v43 = vadd.f32 %v6733_v49, %v2994_v26  ;;  %v2997_v57 = vadd.f32 %v3528_v40, %v3416_v27 }
 0x44d   :  { %v3200_v22 = vadd.f32 %v3168_v8, %v3136_v43  ;;  %v3137_v60 = vadd.f32 %v6733_v49, %v2997_v57 }
 0x44f   :  { %3232 = vst [vmem:[%s6995_s7 + $0xf0] sm:$0xff] %v3200_v22  ;;  %v3201_v14 = vadd.f32 %v3169_v59, %v3137_v60 }
 0x451   :  { %3233 = vst [vmem:[%s6995_s7 + $0xf8] sm:$0xff] %v3201_v14 }

// kernel: _lambda_.17
= control target key start
LH: loop header
LB: loop body
LE: loop exit
PB: predicated region body
PF: predicated region fallthrough
CT: control target
= control target key end

     0   :  { %7 = vsyncpa [#allocation3], 0  ;;  %s633_s0 = inlined_call_operand.vmem [shape: bf16[64,16], index: 0, kind: input, shape index: {}]   ;;  %s634_s1 = inlined_call_operand.vmem [shape: bf16[2,16,64], index: 1, kind: input, shape index: {}]   ;;  %s635_s2 = inlined_call_operand.hbm [shape: f32[2,64,64], index: 2, kind: output, shape index: {}]  }
   0x1   :  { %9 = vsyncpa [#allocation3 + $0x1], 0  ;;  %s510_s9 = smov 0   ;;  %s512_s10 = smov 0  }
   0x2   :  { %s514_s11 = smov 0   ;;  %s516_s12 = smov 0  }
   0x3 LB: > { %s531_s13 = sadd.s32 4294967295, %s490_s12   ;;  %s342_s14 = sadd.s32 4294967294, %s490_s12   ;;  %s490_s12 = sphi %s516_s12, %s641_s12   ;;  %s486_s11 = sphi %s514_s11, %s640_s11   ;;  %s482_s10 = sphi %s512_s10, %s639_s10   ;;  %s478_s9 = sphi %s510_s9, %s638_s9  }
   0x4   : > { %s535_s15 = sadd.s32 1, %s490_s12   ;;  %s69_s16 = sadd.s32 1, %s486_s11 }
   0x5   : > { %s66_s17 = ssub.s32 %s490_s12, %s535_s15  ;;  %p79_p0 = scmp.ne.s32.totalorder %s486_s11, %s482_s10 }
   0x6   : > { %p67_p1 = scmp.eq.s32.totalorder %s66_s17, 0  ;;  %p80_p2 = scmp.eq.s32.totalorder %s531_s13, 1 }
   0x7   : > { %p85_p3 = scmp.ne.s32.totalorder %s482_s10, %s478_s9  ;;  %p86_p4 = scmp.eq.s32.totalorder %s342_s14, 1 }
   0x8   : > { %s546_s18 = scalar_select %p67_p1, %s486_s11, %s69_s16  }
   0x9   : > { %p548_p5 = por %p80_p2, %p79_p0  ;;  %p552_p6 = por %p86_p4, %p85_p3 }
   0xa   : > { %p345_p7 = scmp.ge.s32.totalorder %s490_s12, 1  ;;  %p115_p8 = scmp.lt.s32.totalorder %s490_s12, 3 }
   0xc   : > { %p116_p9 = pnand %p345_p7, %p115_p8 }
   0xd   : > { %p137_p10 = scmp.lt.s32.totalorder (!%p116_p9), %s531_s13, 1  ;;  %v424_v0 = vld [vmem:[%s633_s0] sm:$0xff] (!%p116_p9)   ;;  %vm179_vm0 = vcmask (!%p116_p9), 130048   ;;  %v425_v1 = vld [vmem:[%s633_s0 + $0x10] sm:$0xff] (!%p116_p9)   ;;  %v426_v3 = vld [vmem:[%s633_s0 + $0x8] sm:$0xff] (!%p116_p9)   ;;  %s134_s6 = sand.u32 (!%p116_p9), 1, %s482_s10  }
   0xe   : > { %119 = sbr.rel (%p116_p9) target bundleno = 260 (0x104), region = 28  ;;  %372 = vmatprep.mubr.msk.bf16.mxu0 (!%p116_p9), %vm179_vm0, %v424_v0  ;;  %376 = vmatprep.mubr.msk.bf16.mxu1 (!%p116_p9), %vm179_vm0, %v425_v1  ;;  %v427_v4 = vld [vmem:[%s633_s0 + $0x18] sm:$0xff] (!%p116_p9)   ;;  %s346_s7 = sshll.u32 (!%p116_p9), %s134_s6, 6  ;;  %vm257_vm1 = vcmask (!%p116_p9), 523264  }
   0xf   : > { %s364_s8 = sshll.u32 (!%p116_p9), %s531_s13, 10  ;;  %s136_s14 = scalar_lea.vmem (!%p116_p9), [#allocation2], %s346_s7 }
  0x10   : > { %s280_s16 = sshll.u32 (!%p116_p9), %s136_s14, 4  ;;  %s582_s22 = scalar_lea.hbm (!%p116_p9), %s635_s2, %s364_s8  ;;  %s584_s16 = int_to_ptr.vmem [resolvable:$true] %s280_s16 }
  0x11   : > { %s428_s23 = scalar_lea.vmem (!%p116_p9), %s584_s16, 1024  ;;  %s492_s24 = smov (!%p116_p9), [#allocation2]  }
  0x12   : > { %p429_p11 = scmp.ne.s32.totalorder (!%p116_p9), %s584_s16, %s428_s23 }
  0x14   : > { %p430_p12 = pnand (!%p116_p9), %p429_p11, %p548_p5 }
  0x15   : > { %s138_s25 = scalar_select %p137_p10, %s531_s13, 1 }
  0x16   : > { %s592_s13 = scalar_lea.sflag [#allocation3], %s134_s6  ;;  %p431_p13 = pneg %p430_p12 }
  0x17   : > { %s363_s26 = sshll.u32 %s138_s25, 3  ;;  %s432_s25 = sshll.u32 %s492_s24, 4  ;;  %s433_s25 = int_to_ptr.vmem [resolvable:$false] %s432_s25 }
  0x18   : > { %s141_s29 = scalar_lea.vmem %s634_s1, %s363_s26  ;;  %s434_s26 = scalar_lea.vmem %s433_s25, 2048 }
  0x19   : > { %v423_v2 = vld [vmem:[%s141_s29] sm:$0xff]   ;;  %p435_p0 = scmp.lt.s32.totalorder %s584_s16, %s433_s25  ;;  %p436_p1 = scmp.lt.s32.totalorder %s434_s26, %s428_s23 }
  0x1a   : > { %370 = vmatprep.subr.bf16.mxu0 %v423_v2  ;;  %380 = vmatprep.subr.bf16.mxu1 %v423_v2 }
  0x1b   : > { %371 = vmatpush3.bf16.msra.mxu0 %v423_v2  ;;  %381 = vmatpush3.bf16.msra.mxu1 %v423_v2  ;;  %p437_p2 = por %p436_p1, %p435_p0 }
  0x1d   : > { %p438_p3 = pnand %p437_p2, %p431_p13 }
  0x1e   : > { %373 = vmatmul.mubr.msk.bf16.vlgmr.msra.gmra.mrb[0].mxu0 %vm179_vm0, %v426_v3  ;;  %377 = vmatmul.mubr.msk.bf16.vlgmr.msra.gmra.mrb[0].mxu1 %vm179_vm0, %v427_v4 }
  0xf1   : > { %v374_v5 = vpop.f32.mrb[0].mxu0  ;;  %v378_v6 = vpop.f32.mrb[0].mxu1 }
  0xf2   : > { %260 = vst.msk [vmem:[%s136_s14 + $0x10] sm:$0xff] %vm257_vm1, %v374_v5  ;;  %264 = vst.msk [vmem:[%s136_s14 + $0x30] sm:$0xff] %vm257_vm1, %v378_v6  ;;  %v226_v7 = vpop.f32.mrb[1].mxu0  ;;  %v242_v8 = vpop.f32.mrb[1].mxu1 }
  0xf3   : > { %258 = vst.msk [vmem:[%s136_s14] sm:$0xff] %vm257_vm1, %v226_v7  ;;  %262 = vst.msk [vmem:[%s136_s14 + $0x20] sm:$0xff] %vm257_vm1, %v242_v8  ;;  %v375_v9 = vpop.f32.mrb[2].mxu0  ;;  %v379_v10 = vpop.f32.mrb[2].mxu1 }
  0xf4   : > { %261 = vst.msk [vmem:[%s136_s14 + $0x18] sm:$0xff] %vm257_vm1, %v375_v9  ;;  %265 = vst.msk [vmem:[%s136_s14 + $0x38] sm:$0xff] %vm257_vm1, %v379_v10  ;;  %v229_v11 = vpop.f32.mrb[3].mxu0  ;;  %v245_v12 = vpop.f32.mrb[3].mxu1 }
  0xf5   : > { %259 = vst.msk [vmem:[%s136_s14 + $0x8] sm:$0xff] %vm257_vm1, %v229_v11  ;;  %263 = vst.msk [vmem:[%s136_s14 + $0x28] sm:$0xff] %vm257_vm1, %v245_v12 }
  0xf6   : > { %441 = shalt.err (!%p438_p3)
}
  0xf7   : > { %s442_s27 = scalar_lea.hbm %s582_s22, 1024  ;;  %s446_s30 = scalar_lea.hbm %s635_s2, 2048 }
  0xf8   : > { %p443_p4 = scmp.ne.s32.totalorder %s582_s22, %s442_s27  ;;  %p447_p9 = scmp.lt.u32.totalorder %s582_s22, %s635_s2 }
  0xf9   : > { %p448_p10 = scmp.lt.u32.totalorder %s446_s30, %s442_s27  ;;  %p450_p12 = scmp.lt.u32.totalorder %s442_s27, %s582_s22 }
  0xfa   : > { %p444_p7 = pnand %p443_p4, %p548_p5 }
  0xfb   : > { %p449_p11 = por %p448_p10, %p447_p9 }
  0xfc   : > { %p445_p8 = pneg %p444_p7 }
  0xfd   : > { %p451_p13 = por %p450_p12, %p449_p11 }
  0xff   : > { %p452_p0 = pnand %p451_p13, %p445_p8 }
 0x101   : > { %455 = shalt.err (!%p452_p0)
}
 0x102   : > { %s493_s5 = smov 128   ;;  %s494_s6 = smov 8  }
 0x103   : > { %382 = dma.vmem_to_hbm [thread:$0]  (%p548_p5), %s584_s16, 1024, %s582_s22, %s592_s13, %s493_s5, %s493_s5, %s494_s6  }
 0x104 PF: > { %p388_p1 = scmp.ge.s32.totalorder %s490_s12, 2  ;;  %s295_s7 = sand.u32 1, %s478_s9  }
 0x105   : > { %s296_s8 = scalar_lea.sflag [#allocation3], %s295_s7 }
 0x106   : > { %p385_p2 = pnand %p388_p1, %p552_p6 }
 0x108   : > { %473 = dma.done.wait (!%p385_p2), %s296_s8, 1024  }
 0x109   : > { %475 = vsyncadd (!%p385_p2), %s296_s8, 4294966272  ;;  %p12_p3 = scmp.ge.s32.totalorder %s535_s15, 4   ;;  %s638_s9 = smov %s482_s10 }
 0x10a   : > { %s639_s10 = smov %s486_s11  ;;  %s640_s11 = smov %s546_s18 }
 0x10b   : > { %s641_s12 = smov %s535_s15  ;;  %14 = sbr.rel (!%p12_p3) target bundleno = 3 (0x3), region = 63 }
 0x112   :  { %301 = vsyncpa [#allocation3], 1 }
 0x113   :  { %303 = vsyncpa [#allocation3 + $0x1], 1 }

</bundles_post_ra>
